<compile_context>
chip_gen: v6e
topology: v6e:2x2x1
jax: 0.10.0
libtpu: 0.0.40
codegen_flags: <defaults>
</compile_context>

<pallas_src>
import jax
import jax.numpy as jnp
from jax.experimental import pallas as pl
from jax.experimental.pallas import tpu as pltpu


def _round_up(x, m):
    return ((x + m - 1) // m) * m


# ---------------------------------------------------------------------------
# Pallas kernel: fused (A @ W + b) + ReLU, tiled over rows.
# A, W are bf16; accumulation / bias / ReLU in f32.
# ---------------------------------------------------------------------------
def _conv_matmul_kernel(a_ref, w_ref, b_ref, o_ref):
    acc = jnp.dot(a_ref[...], w_ref[...], preferred_element_type=jnp.float32)
    acc = jnp.maximum(acc + b_ref[...], 0.0)
    o_ref[...] = acc.astype(o_ref.dtype)


def _conv_pallas(patches, w, b2d, *, n_tiles):
    """patches: (M, K) bf16, w: (K, N) bf16, b2d: (1, N) f32 -> (M, N) bf16."""
    M, K = patches.shape
    N = w.shape[1]
    if n_tiles > 1:
        Mp = _round_up(M, 16 * n_tiles)
        if Mp != M:
            patches = jnp.pad(patches, ((0, Mp - M), (0, 0)))
    else:
        Mp = M
    tm = Mp // n_tiles
    out = pl.pallas_call(
        _conv_matmul_kernel,
        out_shape=jax.ShapeDtypeStruct((Mp, N), jnp.bfloat16),
        grid=(n_tiles,),
        in_specs=[
            pl.BlockSpec((tm, K), lambda i: (i, 0)),
            pl.BlockSpec((K, N), lambda i: (0, 0)),
            pl.BlockSpec((1, N), lambda i: (0, 0)),
        ],
        out_specs=pl.BlockSpec((tm, N), lambda i: (i, 0)),
        compiler_params=pltpu.CompilerParams(
            dimension_semantics=("parallel",)),
    )(patches, w, b2d)
    return out[:M] if Mp != M else out


# ---------------------------------------------------------------------------
# Pallas kernel: fused MLP tail  relu(x @ W1 + b1) @ W2 + b2  (one launch).
# ---------------------------------------------------------------------------
def _mlp_head_kernel(x_ref, w1_ref, b1_ref, w2_ref, b2_ref, o_ref):
    h = jnp.dot(x_ref[...], w1_ref[...], preferred_element_type=jnp.float32)
    h = jnp.maximum(h + b1_ref[...], 0.0)
    o = jnp.dot(h.astype(jnp.bfloat16), w2_ref[...],
                preferred_element_type=jnp.float32)
    o_ref[...] = o + b2_ref[...]


def _head_pallas(feat, w1, b1, w2, b2):
    """feat: (B, K1) bf16, w1: (K1, H) bf16, b1: (1, H) f32,
       w2: (H, N) bf16, b2: (1, N) f32 -> (B, N) f32."""
    B, K1 = feat.shape
    H = w1.shape[1]
    N = w2.shape[1]
    Bp = max(16, _round_up(B, 16))          # bf16 sublane quantum
    if Bp != B:
        feat = jnp.pad(feat, ((0, Bp - B), (0, 0)))
    out = pl.pallas_call(
        _mlp_head_kernel,
        out_shape=jax.ShapeDtypeStruct((Bp, N), jnp.float32),
        grid=(1,),
        in_specs=[
            pl.BlockSpec((Bp, K1), lambda i: (0, 0)),
            pl.BlockSpec((K1, H), lambda i: (0, 0)),
            pl.BlockSpec((1, H), lambda i: (0, 0)),
            pl.BlockSpec((H, N), lambda i: (0, 0)),
            pl.BlockSpec((1, N), lambda i: (0, 0)),
        ],
        out_specs=pl.BlockSpec((Bp, N), lambda i: (0, 0)),
        compiler_params=pltpu.CompilerParams(
            dimension_semantics=("arbitrary",)),
    )(feat, w1, b1, w2, b2)
    return out[:B]


# ---------------------------------------------------------------------------
# Conv(3x3, stride 2, pad 1) lowered to im2col + Pallas matmul.
# Patch flatten order is (kh, kw, cin); weights are pre-permuted to match.
# ---------------------------------------------------------------------------
def _im2col(x, ksize=3, stride=2, pad=1):
    B, H, W, C = x.shape
    xp = jnp.pad(x, ((0, 0), (pad, pad), (pad, pad), (0, 0)))
    Ho = (H + 2 * pad - ksize) // stride + 1
    Wo = (W + 2 * pad - ksize) // stride + 1
    taps = [xp[:, kh:kh + stride * Ho:stride, kw:kw + stride * Wo:stride, :]
            for kh in range(ksize) for kw in range(ksize)]
    patches = jnp.concatenate(taps, axis=-1)          # (B, Ho, Wo, 9*C)
    return patches.reshape(B * Ho * Wo, ksize * ksize * C), Ho, Wo


# ---------------------------------------------------------------------------
# Parameter init (xavier_uniform weights, zero biases) -- PyTorch layout.
# ---------------------------------------------------------------------------
def _xavier_uniform(key, shape, fan_in, fan_out):
    bound = (6.0 / (fan_in + fan_out)) ** 0.5
    return jax.random.uniform(key, shape, jnp.float32, -bound, bound)


def init_params(key, channels_in, num_actions):
    keys = jax.random.split(key, 7)
    params = {}
    convs = []
    cin = channels_in
    for i in range(4):
        cout = 32
        w = _xavier_uniform(keys[i], (cout, cin, 3, 3), cin * 9, cout * 9)
        convs.append((w, jnp.zeros((cout,), jnp.float32)))
        cin = cout
    params["convs"] = convs
    params["fc_w"] = _xavier_uniform(keys[4], (512, 32 * 6 * 6), 32 * 6 * 6, 512)
    params["fc_b"] = jnp.zeros((512,), jnp.float32)
    params["actor_w"] = _xavier_uniform(keys[5], (num_actions, 512), 512, num_actions)
    params["actor_b"] = jnp.zeros((num_actions,), jnp.float32)
    params["critic_w"] = _xavier_uniform(keys[6], (1, 512), 512, 1)
    params["critic_b"] = jnp.zeros((1,), jnp.float32)
    return params


# ---------------------------------------------------------------------------
# One-time weight preparation (runs OUTSIDE the jitted forward).
# ---------------------------------------------------------------------------
def prepare_params(params):
    prep = {"convs": []}
    for (w, b) in params["convs"]:
        cout, cin, ksh, ksw = w.shape
        # (kh, kw, cin) flatten order to match the im2col tap concatenation.
        wt = (jnp.transpose(w, (2, 3, 1, 0))
              .reshape(ksh * ksw * cin, cout).astype(jnp.bfloat16))   # (K, 32)
        prep["convs"].append((wt, b.reshape(1, cout).astype(jnp.float32)))

    hidden, feat = params["fc_w"].shape                               # (512, 1152)
    c, h, w = 32, 6, 6
    # PyTorch flattens (c, h, w); our activation flattens (h, w, c): permute
    # the fc weight columns once so no activation transpose is ever needed.
    prep["fc_w"] = (params["fc_w"].reshape(hidden, c, h, w)
                    .transpose(0, 2, 3, 1).reshape(hidden, feat).T
                    .astype(jnp.bfloat16))                            # (1152, 512)
    prep["fc_b"] = params["fc_b"].reshape(1, hidden).astype(jnp.float32)
    prep["actor_w"] = params["actor_w"].T.astype(jnp.bfloat16)        # (512, A)
    prep["actor_b"] = params["actor_b"].reshape(1, -1).astype(jnp.float32)
    prep["critic_w"] = params["critic_w"].T.astype(jnp.bfloat16)      # (512, 1)
    prep["critic_b"] = params["critic_b"].reshape(1, -1).astype(jnp.float32)
    # Concatenated head for single-pass actor+critic evaluation.
    prep["ac_w"] = jnp.concatenate([prep["actor_w"], prep["critic_w"]], axis=1)
    prep["ac_b"] = jnp.concatenate([prep["actor_b"], prep["critic_b"]], axis=1)
    return prep


# ---------------------------------------------------------------------------
# AC_NET.forward
# ---------------------------------------------------------------------------
def _backbone(prep, x_nchw):
    x = jnp.transpose(x_nchw, (0, 2, 3, 1)).astype(jnp.bfloat16)      # NHWC bf16
    B = x.shape[0]
    for (wt, bp) in prep["convs"]:
        patches, Ho, Wo = _im2col(x)
        n_tiles = 2 if patches.shape[0] >= 2048 else 1   # 2 balanced tiles only for conv1
        y = _conv_pallas(patches, wt, bp, n_tiles=n_tiles)            # (M, 32) bf16
        x = y.reshape(B, Ho, Wo, y.shape[-1])
    return x.reshape(B, -1)                                           # (B, 1152), (h,w,c)


def _forward_impl(prep, x_nchw, model):
    feat = _backbone(prep, x_nchw)
    if model == 1:
        return _head_pallas(feat, prep["fc_w"], prep["fc_b"],
                            prep["actor_w"], prep["actor_b"])
    return _head_pallas(feat, prep["fc_w"], prep["fc_b"],
                        prep["critic_w"], prep["critic_b"])


def _forward_both_impl(prep, x_nchw):
    feat = _backbone(prep, x_nchw)
    out = _head_pallas(feat, prep["fc_w"], prep["fc_b"],
                       prep["ac_w"], prep["ac_b"])
    num_actions = prep["actor_w"].shape[1]
    return out[:, :num_actions], out[:, num_actions:]


ac_net_forward = jax.jit(_forward_impl, static_argnames=("model",))
ac_net_forward_both = jax.jit(_forward_both_impl)


# ---------------------------------------------------------------------------
# Pure-JAX f32 reference (for correctness check only).
# ---------------------------------------------------------------------------
def _ref_forward(params, x, model):
    h = x
    for w, b in params["convs"]:
        h = jax.lax.conv_general_dilated(
            h, w, (2, 2), ((1, 1), (1, 1)),
            dimension_numbers=("NCHW", "OIHW", "NCHW"))
        h = jax.nn.relu(h + b.reshape(1, -1, 1, 1))
    h = h.reshape(h.shape[0], -1)
    h = jax.nn.relu(h @ params["fc_w"].T + params["fc_b"])
    if model == 1:
        return h @ params["actor_w"].T + params["actor_b"]
    return h @ params["critic_w"].T + params["critic_b"]


if __name__ == "__main__":
    channels_in, num_actions = 4, 6
    # Input spatial size 84x84 -> 42 -> 21 -> 11 -> 6, matching fc(32*6*6, 512).
    key = jax.random.PRNGKey(0)
    k_params, k_x = jax.random.split(key)
    params = init_params(k_params, channels_in, num_actions)
    prep = prepare_params(params)                      # one-time weight prep
    x = jax.random.normal(k_x, (2, channels_in, 84, 84), jnp.float32)

    actor_out = jax.block_until_ready(ac_net_forward(prep, x, model=1))
    critic_out = jax.block_until_ready(ac_net_forward(prep, x, model=0))
    both_a, both_c = jax.block_until_ready(ac_net_forward_both(prep, x))

    assert actor_out.shape == (2, num_actions)
    assert critic_out.shape == (2, 1)
    assert both_a.shape == (2, num_actions) and both_c.shape == (2, 1)

    ref_actor = _ref_forward(params, x, 1)
    ref_critic = _ref_forward(params, x, 0)
    # bf16 inputs / f32 MXU accumulation vs f32 reference.
    assert jnp.allclose(actor_out, ref_actor, rtol=2e-2, atol=2e-2), (
        float(jnp.max(jnp.abs(actor_out - ref_actor))))
    assert jnp.allclose(critic_out, ref_critic, rtol=2e-2, atol=2e-2), (
        float(jnp.max(jnp.abs(critic_out - ref_critic))))
    assert jnp.allclose(both_a, ref_actor, rtol=2e-2, atol=2e-2)
    assert jnp.allclose(both_c, ref_critic, rtol=2e-2, atol=2e-2)

    print("KERNEL_OK")
</pallas_src>

<mosaic_0001>
module attributes {stable_mosaic.version = 11 : i64} {
  func.func @_conv_matmul_kernel(%arg0: i32, %arg1: memref<1776x36xbf16, #tpu.memory_space<vmem>>, %arg2: memref<36x32xbf16, #tpu.memory_space<vmem>>, %arg3: memref<1x32xf32, #tpu.memory_space<vmem>>, %arg4: memref<1776x32xbf16, #tpu.memory_space<vmem>>) attributes {dimension_semantics = [#tpu.dimension_semantics<parallel>], iteration_bounds = array<i64: 2>, scalar_prefetch = 0 : i64, scratch_operands = 0 : i64, tpu.core_type = #tpu.core_type<tc>, window_params = [{transform_indices = @transform_0, window_bounds = array<i64: 1776, 36>}, {pipeline_mode = #tpu.pipeline_mode<synchronous>, transform_indices = @transform_1, window_bounds = array<i64: 36, 32>}, {pipeline_mode = #tpu.pipeline_mode<synchronous>, transform_indices = @transform_2, window_bounds = array<i64: 1, 32>}, {transform_indices = @transform_3, window_bounds = array<i64: 1776, 32>}]} {
    %c0 = arith.constant 0 : index
    %c0_0 = arith.constant 0 : index
    %0 = vector.load %arg1[%c0, %c0_0] : memref<1776x36xbf16, #tpu.memory_space<vmem>>, vector<1776x36xbf16>
    %c0_1 = arith.constant 0 : index
    %c0_2 = arith.constant 0 : index
    %1 = vector.load %arg2[%c0_1, %c0_2] : memref<36x32xbf16, #tpu.memory_space<vmem>>, vector<36x32xbf16>
    %cst = arith.constant dense<0.000000e+00> : vector<1776x32xf32>
    %2 = tpu.matmul %0, %1, %cst {dimension_numbers = #tpu.dot_dimension_numbers<[1], [0], [0], [1], [0, 0, 1, 1], [], []>} : vector<1776x36xbf16>, vector<36x32xbf16>, vector<1776x32xf32> -> vector<1776x32xf32>
    %c0_3 = arith.constant 0 : index
    %c0_4 = arith.constant 0 : index
    %3 = vector.load %arg3[%c0_3, %c0_4] : memref<1x32xf32, #tpu.memory_space<vmem>>, vector<1x32xf32>
    %4 = vector.broadcast %3 : vector<1x32xf32> to vector<1776x32xf32>
    %5 = arith.addf %2, %4 : vector<1776x32xf32>
    %cst_5 = arith.constant 0.000000e+00 : f32
    %6 = vector.broadcast %cst_5 : f32 to vector<1776x32xf32>
    %7 = arith.maximumf %5, %6 : vector<1776x32xf32>
    %8 = arith.truncf %7 : vector<1776x32xf32> to vector<1776x32xbf16>
    %c0_6 = arith.constant 0 : index
    %c0_7 = arith.constant 0 : index
    %9 = vector.load %arg4[%c0_6, %c0_7] : memref<1776x32xbf16, #tpu.memory_space<vmem>>, vector<1776x32xbf16>
    tpu.vector_store %arg4[%c0_6, %c0_7], %8 {strides = array<i32>} : memref<1776x32xbf16, #tpu.memory_space<vmem>>, vector<1776x32xbf16>,
    return
  }
  func.func @transform_0(%arg0: i32) -> (i32, i32) {
    %c0_i32 = arith.constant 0 : i32
    %c0_i32_0 = arith.constant 0 : i32
    return %arg0, %c0_i32 : i32, i32
  }
  func.func @transform_1(%arg0: i32) -> (i32, i32) {
    %c0_i32 = arith.constant 0 : i32
    %c0_i32_0 = arith.constant 0 : i32
    %c0_i32_1 = arith.constant 0 : i32
    return %c0_i32, %c0_i32_0 : i32, i32
  }
  func.func @transform_2(%arg0: i32) -> (i32, i32) {
    %c0_i32 = arith.constant 0 : i32
    %c0_i32_0 = arith.constant 0 : i32
    %c0_i32_1 = arith.constant 0 : i32
    return %c0_i32, %c0_i32_0 : i32, i32
  }
  func.func @transform_3(%arg0: i32) -> (i32, i32) {
    %c0_i32 = arith.constant 0 : i32
    %c0_i32_0 = arith.constant 0 : i32
    return %arg0, %c0_i32 : i32, i32
  }
}

module attributes {stable_mosaic.version = 11 : i64} {
  func.func @_conv_matmul_kernel(%arg0: i32, %arg1: memref<882x288xbf16, #tpu.memory_space<vmem>>, %arg2: memref<288x32xbf16, #tpu.memory_space<vmem>>, %arg3: memref<1x32xf32, #tpu.memory_space<vmem>>, %arg4: memref<882x32xbf16, #tpu.memory_space<vmem>>) attributes {dimension_semantics = [#tpu.dimension_semantics<parallel>], iteration_bounds = array<i64: 1>, scalar_prefetch = 0 : i64, scratch_operands = 0 : i64, tpu.core_type = #tpu.core_type<tc>, window_params = [{transform_indices = @transform_0, window_bounds = array<i64: 882, 288>}, {pipeline_mode = #tpu.pipeline_mode<synchronous>, transform_indices = @transform_1, window_bounds = array<i64: 288, 32>}, {pipeline_mode = #tpu.pipeline_mode<synchronous>, transform_indices = @transform_2, window_bounds = array<i64: 1, 32>}, {transform_indices = @transform_3, window_bounds = array<i64: 882, 32>}]} {
    %c0 = arith.constant 0 : index
    %c0_0 = arith.constant 0 : index
    %0 = vector.load %arg1[%c0, %c0_0] : memref<882x288xbf16, #tpu.memory_space<vmem>>, vector<882x288xbf16>
    %c0_1 = arith.constant 0 : index
    %c0_2 = arith.constant 0 : index
    %1 = vector.load %arg2[%c0_1, %c0_2] : memref<288x32xbf16, #tpu.memory_space<vmem>>, vector<288x32xbf16>
    %cst = arith.constant dense<0.000000e+00> : vector<882x32xf32>
    %2 = tpu.matmul %0, %1, %cst {dimension_numbers = #tpu.dot_dimension_numbers<[1], [0], [0], [1], [0, 0, 1, 1], [], []>} : vector<882x288xbf16>, vector<288x32xbf16>, vector<882x32xf32> -> vector<882x32xf32>
    %c0_3 = arith.constant 0 : index
    %c0_4 = arith.constant 0 : index
    %3 = vector.load %arg3[%c0_3, %c0_4] : memref<1x32xf32, #tpu.memory_space<vmem>>, vector<1x32xf32>
    %4 = vector.broadcast %3 : vector<1x32xf32> to vector<882x32xf32>
    %5 = arith.addf %2, %4 : vector<882x32xf32>
    %cst_5 = arith.constant 0.000000e+00 : f32
    %6 = vector.broadcast %cst_5 : f32 to vector<882x32xf32>
    %7 = arith.maximumf %5, %6 : vector<882x32xf32>
    %8 = arith.truncf %7 : vector<882x32xf32> to vector<882x32xbf16>
    %c0_6 = arith.constant 0 : index
    %c0_7 = arith.constant 0 : index
    %9 = vector.load %arg4[%c0_6, %c0_7] : memref<882x32xbf16, #tpu.memory_space<vmem>>, vector<882x32xbf16>
    tpu.vector_store %arg4[%c0_6, %c0_7], %8 {strides = array<i32>} : memref<882x32xbf16, #tpu.memory_space<vmem>>, vector<882x32xbf16>,
    return
  }
  func.func @transform_0(%arg0: i32) -> (i32, i32) {
    %c0_i32 = arith.constant 0 : i32
    %c0_i32_0 = arith.constant 0 : i32
    return %arg0, %c0_i32 : i32, i32
  }
  func.func @transform_1(%arg0: i32) -> (i32, i32) {
    %c0_i32 = arith.constant 0 : i32
    %c0_i32_0 = arith.constant 0 : i32
    %c0_i32_1 = arith.constant 0 : i32
    return %c0_i32, %c0_i32_0 : i32, i32
  }
  func.func @transform_2(%arg0: i32) -> (i32, i32) {
    %c0_i32 = arith.constant 0 : i32
    %c0_i32_0 = arith.constant 0 : i32
    %c0_i32_1 = arith.constant 0 : i32
    return %c0_i32, %c0_i32_0 : i32, i32
  }
  func.func @transform_3(%arg0: i32) -> (i32, i32) {
    %c0_i32 = arith.constant 0 : i32
    %c0_i32_0 = arith.constant 0 : i32
    return %arg0, %c0_i32 : i32, i32
  }
}

module attributes {stable_mosaic.version = 11 : i64} {
  func.func @_conv_matmul_kernel(%arg0: i32, %arg1: memref<242x288xbf16, #tpu.memory_space<vmem>>, %arg2: memref<288x32xbf16, #tpu.memory_space<vmem>>, %arg3: memref<1x32xf32, #tpu.memory_space<vmem>>, %arg4: memref<242x32xbf16, #tpu.memory_space<vmem>>) attributes {dimension_semantics = [#tpu.dimension_semantics<parallel>], iteration_bounds = array<i64: 1>, scalar_prefetch = 0 : i64, scratch_operands = 0 : i64, tpu.core_type = #tpu.core_type<tc>, window_params = [{transform_indices = @transform_0, window_bounds = array<i64: 242, 288>}, {pipeline_mode = #tpu.pipeline_mode<synchronous>, transform_indices = @transform_1, window_bounds = array<i64: 288, 32>}, {pipeline_mode = #tpu.pipeline_mode<synchronous>, transform_indices = @transform_2, window_bounds = array<i64: 1, 32>}, {transform_indices = @transform_3, window_bounds = array<i64: 242, 32>}]} {
    %c0 = arith.constant 0 : index
    %c0_0 = arith.constant 0 : index
    %0 = vector.load %arg1[%c0, %c0_0] : memref<242x288xbf16, #tpu.memory_space<vmem>>, vector<242x288xbf16>
    %c0_1 = arith.constant 0 : index
    %c0_2 = arith.constant 0 : index
    %1 = vector.load %arg2[%c0_1, %c0_2] : memref<288x32xbf16, #tpu.memory_space<vmem>>, vector<288x32xbf16>
    %cst = arith.constant dense<0.000000e+00> : vector<242x32xf32>
    %2 = tpu.matmul %0, %1, %cst {dimension_numbers = #tpu.dot_dimension_numbers<[1], [0], [0], [1], [0, 0, 1, 1], [], []>} : vector<242x288xbf16>, vector<288x32xbf16>, vector<242x32xf32> -> vector<242x32xf32>
    %c0_3 = arith.constant 0 : index
    %c0_4 = arith.constant 0 : index
    %3 = vector.load %arg3[%c0_3, %c0_4] : memref<1x32xf32, #tpu.memory_space<vmem>>, vector<1x32xf32>
    %4 = vector.broadcast %3 : vector<1x32xf32> to vector<242x32xf32>
    %5 = arith.addf %2, %4 : vector<242x32xf32>
    %cst_5 = arith.constant 0.000000e+00 : f32
    %6 = vector.broadcast %cst_5 : f32 to vector<242x32xf32>
    %7 = arith.maximumf %5, %6 : vector<242x32xf32>
    %8 = arith.truncf %7 : vector<242x32xf32> to vector<242x32xbf16>
    %c0_6 = arith.constant 0 : index
    %c0_7 = arith.constant 0 : index
    %9 = vector.load %arg4[%c0_6, %c0_7] : memref<242x32xbf16, #tpu.memory_space<vmem>>, vector<242x32xbf16>
    tpu.vector_store %arg4[%c0_6, %c0_7], %8 {strides = array<i32>} : memref<242x32xbf16, #tpu.memory_space<vmem>>, vector<242x32xbf16>,
    return
  }
  func.func @transform_0(%arg0: i32) -> (i32, i32) {
    %c0_i32 = arith.constant 0 : i32
    %c0_i32_0 = arith.constant 0 : i32
    return %arg0, %c0_i32 : i32, i32
  }
  func.func @transform_1(%arg0: i32) -> (i32, i32) {
    %c0_i32 = arith.constant 0 : i32
    %c0_i32_0 = arith.constant 0 : i32
    %c0_i32_1 = arith.constant 0 : i32
    return %c0_i32, %c0_i32_0 : i32, i32
  }
  func.func @transform_2(%arg0: i32) -> (i32, i32) {
    %c0_i32 = arith.constant 0 : i32
    %c0_i32_0 = arith.constant 0 : i32
    %c0_i32_1 = arith.constant 0 : i32
    return %c0_i32, %c0_i32_0 : i32, i32
  }
  func.func @transform_3(%arg0: i32) -> (i32, i32) {
    %c0_i32 = arith.constant 0 : i32
    %c0_i32_0 = arith.constant 0 : i32
    return %arg0, %c0_i32 : i32, i32
  }
}

module attributes {stable_mosaic.version = 11 : i64} {
  func.func @_conv_matmul_kernel(%arg0: i32, %arg1: memref<72x288xbf16, #tpu.memory_space<vmem>>, %arg2: memref<288x32xbf16, #tpu.memory_space<vmem>>, %arg3: memref<1x32xf32, #tpu.memory_space<vmem>>, %arg4: memref<72x32xbf16, #tpu.memory_space<vmem>>) attributes {dimension_semantics = [#tpu.dimension_semantics<parallel>], iteration_bounds = array<i64: 1>, scalar_prefetch = 0 : i64, scratch_operands = 0 : i64, tpu.core_type = #tpu.core_type<tc>, window_params = [{transform_indices = @transform_0, window_bounds = array<i64: 72, 288>}, {pipeline_mode = #tpu.pipeline_mode<synchronous>, transform_indices = @transform_1, window_bounds = array<i64: 288, 32>}, {pipeline_mode = #tpu.pipeline_mode<synchronous>, transform_indices = @transform_2, window_bounds = array<i64: 1, 32>}, {transform_indices = @transform_3, window_bounds = array<i64: 72, 32>}]} {
    %c0 = arith.constant 0 : index
    %c0_0 = arith.constant 0 : index
    %0 = vector.load %arg1[%c0, %c0_0] : memref<72x288xbf16, #tpu.memory_space<vmem>>, vector<72x288xbf16>
    %c0_1 = arith.constant 0 : index
    %c0_2 = arith.constant 0 : index
    %1 = vector.load %arg2[%c0_1, %c0_2] : memref<288x32xbf16, #tpu.memory_space<vmem>>, vector<288x32xbf16>
    %cst = arith.constant dense<0.000000e+00> : vector<72x32xf32>
    %2 = tpu.matmul %0, %1, %cst {dimension_numbers = #tpu.dot_dimension_numbers<[1], [0], [0], [1], [0, 0, 1, 1], [], []>} : vector<72x288xbf16>, vector<288x32xbf16>, vector<72x32xf32> -> vector<72x32xf32>
    %c0_3 = arith.constant 0 : index
    %c0_4 = arith.constant 0 : index
    %3 = vector.load %arg3[%c0_3, %c0_4] : memref<1x32xf32, #tpu.memory_space<vmem>>, vector<1x32xf32>
    %4 = vector.broadcast %3 : vector<1x32xf32> to vector<72x32xf32>
    %5 = arith.addf %2, %4 : vector<72x32xf32>
    %cst_5 = arith.constant 0.000000e+00 : f32
    %6 = vector.broadcast %cst_5 : f32 to vector<72x32xf32>
    %7 = arith.maximumf %5, %6 : vector<72x32xf32>
    %8 = arith.truncf %7 : vector<72x32xf32> to vector<72x32xbf16>
    %c0_6 = arith.constant 0 : index
    %c0_7 = arith.constant 0 : index
    %9 = vector.load %arg4[%c0_6, %c0_7] : memref<72x32xbf16, #tpu.memory_space<vmem>>, vector<72x32xbf16>
    tpu.vector_store %arg4[%c0_6, %c0_7], %8 {strides = array<i32>} : memref<72x32xbf16, #tpu.memory_space<vmem>>, vector<72x32xbf16>,
    return
  }
  func.func @transform_0(%arg0: i32) -> (i32, i32) {
    %c0_i32 = arith.constant 0 : i32
    %c0_i32_0 = arith.constant 0 : i32
    return %arg0, %c0_i32 : i32, i32
  }
  func.func @transform_1(%arg0: i32) -> (i32, i32) {
    %c0_i32 = arith.constant 0 : i32
    %c0_i32_0 = arith.constant 0 : i32
    %c0_i32_1 = arith.constant 0 : i32
    return %c0_i32, %c0_i32_0 : i32, i32
  }
  func.func @transform_2(%arg0: i32) -> (i32, i32) {
    %c0_i32 = arith.constant 0 : i32
    %c0_i32_0 = arith.constant 0 : i32
    %c0_i32_1 = arith.constant 0 : i32
    return %c0_i32, %c0_i32_0 : i32, i32
  }
  func.func @transform_3(%arg0: i32) -> (i32, i32) {
    %c0_i32 = arith.constant 0 : i32
    %c0_i32_0 = arith.constant 0 : i32
    return %arg0, %c0_i32 : i32, i32
  }
}

module attributes {stable_mosaic.version = 11 : i64} {
  func.func @_mlp_head_kernel(%arg0: i32, %arg1: memref<16x1152xbf16, #tpu.memory_space<vmem>>, %arg2: memref<1152x512xbf16, #tpu.memory_space<vmem>>, %arg3: memref<1x512xf32, #tpu.memory_space<vmem>>, %arg4: memref<512x6xbf16, #tpu.memory_space<vmem>>, %arg5: memref<1x6xf32, #tpu.memory_space<vmem>>, %arg6: memref<16x6xf32, #tpu.memory_space<vmem>>) attributes {dimension_semantics = [#tpu.dimension_semantics<arbitrary>], iteration_bounds = array<i64: 1>, scalar_prefetch = 0 : i64, scratch_operands = 0 : i64, tpu.core_type = #tpu.core_type<tc>, window_params = [{pipeline_mode = #tpu.pipeline_mode<synchronous>, transform_indices = @transform_0, window_bounds = array<i64: 16, 1152>}, {pipeline_mode = #tpu.pipeline_mode<synchronous>, transform_indices = @transform_1, window_bounds = array<i64: 1152, 512>}, {pipeline_mode = #tpu.pipeline_mode<synchronous>, transform_indices = @transform_2, window_bounds = array<i64: 1, 512>}, {pipeline_mode = #tpu.pipeline_mode<synchronous>, transform_indices = @transform_3, window_bounds = array<i64: 512, 6>}, {pipeline_mode = #tpu.pipeline_mode<synchronous>, transform_indices = @transform_4, window_bounds = array<i64: 1, 6>}, {pipeline_mode = #tpu.pipeline_mode<synchronous>, transform_indices = @transform_5, window_bounds = array<i64: 16, 6>}]} {
    %c0 = arith.constant 0 : index
    %c0_0 = arith.constant 0 : index
    %0 = vector.load %arg1[%c0, %c0_0] : memref<16x1152xbf16, #tpu.memory_space<vmem>>, vector<16x1152xbf16>
    %c0_1 = arith.constant 0 : index
    %c0_2 = arith.constant 0 : index
    %1 = vector.load %arg2[%c0_1, %c0_2] : memref<1152x512xbf16, #tpu.memory_space<vmem>>, vector<1152x512xbf16>
    %cst = arith.constant dense<0.000000e+00> : vector<16x512xf32>
    %2 = tpu.matmul %0, %1, %cst {dimension_numbers = #tpu.dot_dimension_numbers<[1], [0], [0], [1], [0, 0, 1, 1], [], []>} : vector<16x1152xbf16>, vector<1152x512xbf16>, vector<16x512xf32> -> vector<16x512xf32>
    %c0_3 = arith.constant 0 : index
    %c0_4 = arith.constant 0 : index
    %3 = vector.load %arg3[%c0_3, %c0_4] : memref<1x512xf32, #tpu.memory_space<vmem>>, vector<1x512xf32>
    %4 = vector.broadcast %3 : vector<1x512xf32> to vector<16x512xf32>
    %5 = arith.addf %2, %4 : vector<16x512xf32>
    %cst_5 = arith.constant 0.000000e+00 : f32
    %6 = vector.broadcast %cst_5 : f32 to vector<16x512xf32>
    %7 = arith.maximumf %5, %6 : vector<16x512xf32>
    %8 = arith.truncf %7 : vector<16x512xf32> to vector<16x512xbf16>
    %c0_6 = arith.constant 0 : index
    %c0_7 = arith.constant 0 : index
    %9 = vector.load %arg4[%c0_6, %c0_7] : memref<512x6xbf16, #tpu.memory_space<vmem>>, vector<512x6xbf16>
    %cst_8 = arith.constant dense<0.000000e+00> : vector<16x6xf32>
    %10 = tpu.matmul %8, %9, %cst_8 {dimension_numbers = #tpu.dot_dimension_numbers<[1], [0], [0], [1], [0, 0, 1, 1], [], []>} : vector<16x512xbf16>, vector<512x6xbf16>, vector<16x6xf32> -> vector<16x6xf32>
    %c0_9 = arith.constant 0 : index
    %c0_10 = arith.constant 0 : index
    %11 = vector.load %arg5[%c0_9, %c0_10] : memref<1x6xf32, #tpu.memory_space<vmem>>, vector<1x6xf32>
    %12 = vector.broadcast %11 : vector<1x6xf32> to vector<16x6xf32>
    %13 = arith.addf %10, %12 : vector<16x6xf32>
    %c0_11 = arith.constant 0 : index
    %c0_12 = arith.constant 0 : index
    %14 = vector.load %arg6[%c0_11, %c0_12] : memref<16x6xf32, #tpu.memory_space<vmem>>, vector<16x6xf32>
    tpu.vector_store %arg6[%c0_11, %c0_12], %13 {strides = array<i32>} : memref<16x6xf32, #tpu.memory_space<vmem>>, vector<16x6xf32>,
    return
  }
  func.func @transform_0(%arg0: i32) -> (i32, i32) {
    %c0_i32 = arith.constant 0 : i32
    %c0_i32_0 = arith.constant 0 : i32
    %c0_i32_1 = arith.constant 0 : i32
    return %c0_i32, %c0_i32_0 : i32, i32
  }
  func.func @transform_1(%arg0: i32) -> (i32, i32) {
    %c0_i32 = arith.constant 0 : i32
    %c0_i32_0 = arith.constant 0 : i32
    %c0_i32_1 = arith.constant 0 : i32
    return %c0_i32, %c0_i32_0 : i32, i32
  }
  func.func @transform_2(%arg0: i32) -> (i32, i32) {
    %c0_i32 = arith.constant 0 : i32
    %c0_i32_0 = arith.constant 0 : i32
    %c0_i32_1 = arith.constant 0 : i32
    return %c0_i32, %c0_i32_0 : i32, i32
  }
  func.func @transform_3(%arg0: i32) -> (i32, i32) {
    %c0_i32 = arith.constant 0 : i32
    %c0_i32_0 = arith.constant 0 : i32
    %c0_i32_1 = arith.constant 0 : i32
    return %c0_i32, %c0_i32_0 : i32, i32
  }
  func.func @transform_4(%arg0: i32) -> (i32, i32) {
    %c0_i32 = arith.constant 0 : i32
    %c0_i32_0 = arith.constant 0 : i32
    %c0_i32_1 = arith.constant 0 : i32
    return %c0_i32, %c0_i32_0 : i32, i32
  }
  func.func @transform_5(%arg0: i32) -> (i32, i32) {
    %c0_i32 = arith.constant 0 : i32
    %c0_i32_0 = arith.constant 0 : i32
    %c0_i32_1 = arith.constant 0 : i32
    return %c0_i32, %c0_i32_0 : i32, i32
  }
}

</mosaic_0001>

<bundles_post_ra>
// kernel: _forward_impl.5
= control target key start
LH: loop header
LB: loop body
LE: loop exit
PB: predicated region body
PF: predicated region fallthrough
CT: control target
= control target key end

     0   :  { %s5032_s12 = smov 0   ;;  %s6200_s0 = inlined_call_operand.vmem [shape: bf16[3552,36], index: 0, kind: input, shape index: {}]   ;;  %s6201_s1 = inlined_call_operand.vmem [shape: bf16[36,32], index: 1, kind: input, shape index: {}]   ;;  %s6202_s2 = inlined_call_operand.vmem [shape: f32[1,32], index: 2, kind: input, shape index: {}]   ;;  %s6203_s3 = inlined_call_operand.vmem [shape: bf16[3552,32], index: 3, kind: output, shape index: {}]  }
   0x1 LB: > { %s3627_s13 = sadd.s32 4294967295, %s5008_s12   ;;  %p3631_p0 = scmp.ge.s32.totalorder %s5008_s12, 1  ;;  %s5008_s12 = sphi %s5032_s12, %s13_s12  }
   0x2   : > { %p138_p1 = scmp.lt.s32.totalorder %s5008_s12, 3 }
   0x4   : > { %p139_p2 = pnand %p3631_p0, %p138_p1 }
   0x5   : > { %s162_s18 = smul.u32 (!%p139_p2), 222, %s3627_s13 }
   0x6   : > { %142 = sbr.rel (%p139_p2) target bundleno = 668 (0x29c), region = 32 }
   0x7   : > { %p163_p3 = scmp.lt.s32.totalorder (!%p139_p2), %s162_s18, 443 }
   0xb   : > { %v4886_v0 = vld [vmem:[%s6201_s1 + $0x10] ss:$0 sps:$4 sm:$0x33]   ;;  %v5010_v1 = vmov 0.0   ;;  %vm1313_vm0 = vcmask 1041408   ;;  %v4887_v3 = vld [vmem:[%s6201_s1 + $0x8] sm:$0xff]  }
   0xc   : > { %4420 = vmatprep.subr.bf16.mxu0 %v5010_v1  ;;  %4870 = vmatprep.subr.bf16.mxu1 %v5010_v1  ;;  %v1315_v2 = vsel %vm1313_vm0, %v4886_v0, 0  ;;  %vm5011_vm1 = vmmov 0   ;;  %v4888_v4 = vld [vmem:[%s6201_s1] sm:$0xff]   ;;  %s6205_s18 = smov (!%p163_p3, %s162_s18), 443  ;;  %vm979_vm2 = vcmask 293888   ;;  %vm3348_vm3 = vcmask 257024  }
   0xd   : > { %4421 = vmatpush3.bf16.msra.mxu0 %v1315_v2  ;;  %4873 = vmatpush3.bf16.msra.mxu1 %v1315_v2  ;;  %s3632_s21 = sshll.u32 %s6205_s18, 2  ;;  %v5266_v55 = vld [vmem:[%s6202_s2] ss:$0 sm:$0xff] }
   0xe   : > { %4422 = vmatprep.subr.bf16.mxu0 %v5010_v1  ;;  %4871 = vmatprep.subr.bf16.mxu1 %v5010_v1  ;;  %s5067_s24 = scalar_lea.vmem %s6200_s0, %s3632_s21  ;;  %s5281_s29 = scalar_lea.vmem %s6203_s3, %s3632_s21 }
   0xf   : > { %4426 = vmatprep.mubr.msk.bf16.mxu0 %vm5011_vm1, %v5010_v1  ;;  %4650 = vmatprep.mubr.msk.bf16.mxu1 %vm5011_vm1, %v5010_v1  ;;  %v4889_v5 = vld [vmem:[%s5067_s24] sm:$0xff]   ;;  %v4891_v7 = vld [vmem:[%s5067_s24 + $0x8] sm:$0xff]   ;;  %v4893_v9 = vld [vmem:[%s5067_s24 + $0x10] sm:$0xff]  }
  0x10   : > { %v4890_v6 = vld [vmem:[%s5067_s24 + $0x1c0] sm:$0xff]   ;;  %v4892_v8 = vld [vmem:[%s5067_s24 + $0x1c8] sm:$0xff]   ;;  %v4894_v10 = vld [vmem:[%s5067_s24 + $0x1d0] sm:$0xff]  }
  0x11   : > { %4423 = vmatpush3.bf16.msra.mxu0 %v4887_v3  ;;  %4874 = vmatpush3.bf16.msra.mxu1 %v4887_v3  ;;  %v4895_v11 = vld [vmem:[%s5067_s24 + $0x18] sm:$0xff]   ;;  %v4897_v13 = vld [vmem:[%s5067_s24 + $0x20] sm:$0xff]   ;;  %v4899_v15 = vld [vmem:[%s5067_s24 + $0x28] sm:$0xff]  }
  0x12   : > { %4424 = vmatprep.subr.bf16.mxu0 %v5010_v1  ;;  %4872 = vmatprep.subr.bf16.mxu1 %v5010_v1  ;;  %v4896_v12 = vld [vmem:[%s5067_s24 + $0x1d8] sm:$0xff]   ;;  %v4898_v14 = vld [vmem:[%s5067_s24 + $0x1e0] sm:$0xff]   ;;  %v4900_v16 = vld [vmem:[%s5067_s24 + $0x1e8] sm:$0xff]  }
  0x13   : > { %v4901_v17 = vld [vmem:[%s5067_s24 + $0x30] sm:$0xff]   ;;  %v4903_v19 = vld [vmem:[%s5067_s24 + $0x38] sm:$0xff]   ;;  %v4905_v21 = vld [vmem:[%s5067_s24 + $0x40] sm:$0xff]  }
  0x14   : > { %v4902_v18 = vld [vmem:[%s5067_s24 + $0x1f0] sm:$0xff]   ;;  %v4904_v20 = vld [vmem:[%s5067_s24 + $0x1f8] sm:$0xff]   ;;  %v4906_v22 = vld [vmem:[%s5067_s24 + $0x200] sm:$0xff]  }
  0x15   : > { %4425 = vmatpush3.bf16.msra.mxu0 %v4888_v4  ;;  %4875 = vmatpush3.bf16.msra.mxu1 %v4888_v4  ;;  %v4907_v23 = vld [vmem:[%s5067_s24 + $0x48] sm:$0xff]   ;;  %v4909_v25 = vld [vmem:[%s5067_s24 + $0x50] sm:$0xff]   ;;  %v4911_v27 = vld [vmem:[%s5067_s24 + $0x58] sm:$0xff]  }
  0x16   : > { %v4908_v24 = vld [vmem:[%s5067_s24 + $0x208] sm:$0xff]   ;;  %v4910_v26 = vld [vmem:[%s5067_s24 + $0x210] sm:$0xff]   ;;  %v4912_v28 = vld [vmem:[%s5067_s24 + $0x218] sm:$0xff]  }
  0x17   : > { %v4913_v29 = vld [vmem:[%s5067_s24 + $0x60] sm:$0xff]   ;;  %v4915_v31 = vld [vmem:[%s5067_s24 + $0x68] sm:$0xff]   ;;  %v4917_v33 = vld [vmem:[%s5067_s24 + $0x70] sm:$0xff]  }
  0x18   : > { %4427 = vmatmul.mubr.msk.bf16.vlgmr.msra.gmra.mxu0 %vm979_vm2, %v4889_v5  ;;  %4651 = vmatmul.mubr.msk.bf16.vlgmr.msra.gmra.mxu1 %vm979_vm2, %v4890_v6  ;;  %v4914_v30 = vld [vmem:[%s5067_s24 + $0x220] sm:$0xff]   ;;  %v4916_v32 = vld [vmem:[%s5067_s24 + $0x228] sm:$0xff]   ;;  %v4918_v34 = vld [vmem:[%s5067_s24 + $0x230] sm:$0xff]  }
  0x19   : > { %4430 = vmatprep.mubr.msk.bf16.mxu0 %vm5011_vm1, %v5010_v1  ;;  %4654 = vmatprep.mubr.msk.bf16.mxu1 %vm5011_vm1, %v5010_v1  ;;  %v4919_v35 = vld [vmem:[%s5067_s24 + $0x78] sm:$0xff]   ;;  %v4921_v37 = vld [vmem:[%s5067_s24 + $0x80] sm:$0xff]   ;;  %v4923_v39 = vld [vmem:[%s5067_s24 + $0x88] sm:$0xff]  }
  0x1a   : > { %v4920_v36 = vld [vmem:[%s5067_s24 + $0x238] sm:$0xff]   ;;  %v4922_v38 = vld [vmem:[%s5067_s24 + $0x240] sm:$0xff]   ;;  %v4924_v40 = vld [vmem:[%s5067_s24 + $0x248] sm:$0xff]  }
  0x1b   : > { %v4925_v41 = vld [vmem:[%s5067_s24 + $0x90] sm:$0xff]   ;;  %v4927_v43 = vld [vmem:[%s5067_s24 + $0x98] sm:$0xff]   ;;  %v4929_v45 = vld [vmem:[%s5067_s24 + $0xa0] sm:$0xff]  }
  0x1c   : > { %v4926_v42 = vld [vmem:[%s5067_s24 + $0x250] sm:$0xff]   ;;  %v4928_v44 = vld [vmem:[%s5067_s24 + $0x258] sm:$0xff]   ;;  %v4930_v46 = vld [vmem:[%s5067_s24 + $0x260] sm:$0xff]  }
  0x1d   : > { %v4931_v47 = vld [vmem:[%s5067_s24 + $0xa8] sm:$0xff]   ;;  %v4933_v49 = vld [vmem:[%s5067_s24 + $0xb0] sm:$0xff]   ;;  %v4935_v51 = vld [vmem:[%s5067_s24 + $0xb8] sm:$0xff]  }
  0x1e   : > { %v4932_v48 = vld [vmem:[%s5067_s24 + $0x268] sm:$0xff]   ;;  %v4934_v50 = vld [vmem:[%s5067_s24 + $0x270] sm:$0xff]   ;;  %v4936_v52 = vld [vmem:[%s5067_s24 + $0x278] sm:$0xff]  }
  0x1f   : > { %v4937_v53 = vld [vmem:[%s5067_s24 + $0xc0] sm:$0xff]   ;;  %v4939_v3 = vld [vmem:[%s5067_s24 + $0xc8] sm:$0xff]  }
  0x20   : > { %4431 = vmatmul.mubr.msk.bf16.gmra.mxu0 %vm979_vm2, %v4891_v7  ;;  %4655 = vmatmul.mubr.msk.bf16.gmra.mxu1 %vm979_vm2, %v4892_v8  ;;  %v4938_v54 = vld [vmem:[%s5067_s24 + $0x280] sm:$0xff]   ;;  %v4940_v4 = vld [vmem:[%s5067_s24 + $0x288] sm:$0xff]  }
  0x21   : > { %4434 = vmatprep.mubr.msk.bf16.mxu0 %vm5011_vm1, %v5010_v1  ;;  %4658 = vmatprep.mubr.msk.bf16.mxu1 %vm5011_vm1, %v5010_v1 }
  0x28   : > { %4435 = vmatmul.mubr.msk.bf16.gmra.mxu0 %vm979_vm2, %v4893_v9  ;;  %4659 = vmatmul.mubr.msk.bf16.gmra.mxu1 %vm979_vm2, %v4894_v10 }
  0x29   : > { %4438 = vmatprep.mubr.msk.bf16.mxu0 %vm5011_vm1, %v5010_v1  ;;  %4662 = vmatprep.mubr.msk.bf16.mxu1 %vm5011_vm1, %v5010_v1 }
  0x30   : > { %4439 = vmatmul.mubr.msk.bf16.gmra.mxu0 %vm979_vm2, %v4895_v11  ;;  %4663 = vmatmul.mubr.msk.bf16.gmra.mxu1 %vm979_vm2, %v4896_v12 }
  0x31   : > { %4442 = vmatprep.mubr.msk.bf16.mxu0 %vm5011_vm1, %v5010_v1  ;;  %4666 = vmatprep.mubr.msk.bf16.mxu1 %vm5011_vm1, %v5010_v1 }
  0x38   : > { %4443 = vmatmul.mubr.msk.bf16.gmra.mxu0 %vm979_vm2, %v4897_v13  ;;  %4667 = vmatmul.mubr.msk.bf16.gmra.mxu1 %vm979_vm2, %v4898_v14 }
  0x39   : > { %4446 = vmatprep.mubr.msk.bf16.mxu0 %vm5011_vm1, %v5010_v1  ;;  %4670 = vmatprep.mubr.msk.bf16.mxu1 %vm5011_vm1, %v5010_v1 }
  0x40   : > { %4447 = vmatmul.mubr.msk.bf16.gmra.mxu0 %vm979_vm2, %v4899_v15  ;;  %4671 = vmatmul.mubr.msk.bf16.gmra.mxu1 %vm979_vm2, %v4900_v16 }
  0x41   : > { %4450 = vmatprep.mubr.msk.bf16.mxu0 %vm5011_vm1, %v5010_v1  ;;  %4674 = vmatprep.mubr.msk.bf16.mxu1 %vm5011_vm1, %v5010_v1 }
  0x48   : > { %4451 = vmatmul.mubr.msk.bf16.gmra.mxu0 %vm979_vm2, %v4901_v17  ;;  %4675 = vmatmul.mubr.msk.bf16.gmra.mxu1 %vm979_vm2, %v4902_v18 }
  0x49   : > { %4454 = vmatprep.mubr.msk.bf16.mxu0 %vm5011_vm1, %v5010_v1  ;;  %4678 = vmatprep.mubr.msk.bf16.mxu1 %vm5011_vm1, %v5010_v1 }
  0x50   : > { %4455 = vmatmul.mubr.msk.bf16.gmra.mxu0 %vm979_vm2, %v4903_v19  ;;  %4679 = vmatmul.mubr.msk.bf16.gmra.mxu1 %vm979_vm2, %v4904_v20 }
  0x51   : > { %4458 = vmatprep.mubr.msk.bf16.mxu0 %vm5011_vm1, %v5010_v1  ;;  %4682 = vmatprep.mubr.msk.bf16.mxu1 %vm5011_vm1, %v5010_v1 }
  0x58   : > { %4459 = vmatmul.mubr.msk.bf16.gmra.mxu0 %vm979_vm2, %v4905_v21  ;;  %4683 = vmatmul.mubr.msk.bf16.gmra.mxu1 %vm979_vm2, %v4906_v22 }
  0x59   : > { %4462 = vmatprep.mubr.msk.bf16.mxu0 %vm5011_vm1, %v5010_v1  ;;  %4686 = vmatprep.mubr.msk.bf16.mxu1 %vm5011_vm1, %v5010_v1 }
  0x60   : > { %4463 = vmatmul.mubr.msk.bf16.gmra.mxu0 %vm979_vm2, %v4907_v23  ;;  %4687 = vmatmul.mubr.msk.bf16.gmra.mxu1 %vm979_vm2, %v4908_v24 }
  0x61   : > { %4466 = vmatprep.mubr.msk.bf16.mxu0 %vm5011_vm1, %v5010_v1  ;;  %4690 = vmatprep.mubr.msk.bf16.mxu1 %vm5011_vm1, %v5010_v1 }
  0x68   : > { %4467 = vmatmul.mubr.msk.bf16.gmra.mxu0 %vm979_vm2, %v4909_v25  ;;  %4691 = vmatmul.mubr.msk.bf16.gmra.mxu1 %vm979_vm2, %v4910_v26  ;;  %v4941_v25 = vld [vmem:[%s5067_s24 + $0xd0] sm:$0xff]  }
  0x69   : > { %4470 = vmatprep.mubr.msk.bf16.mxu0 %vm5011_vm1, %v5010_v1  ;;  %4694 = vmatprep.mubr.msk.bf16.mxu1 %vm5011_vm1, %v5010_v1  ;;  %v4942_v26 = vld [vmem:[%s5067_s24 + $0x290] sm:$0xff]  }
  0x70   : > { %4471 = vmatmul.mubr.msk.bf16.gmra.mxu0 %vm979_vm2, %v4911_v27  ;;  %4695 = vmatmul.mubr.msk.bf16.gmra.mxu1 %vm979_vm2, %v4912_v28 }
  0x71   : > { %4474 = vmatprep.mubr.msk.bf16.mxu0 %vm5011_vm1, %v5010_v1  ;;  %4698 = vmatprep.mubr.msk.bf16.mxu1 %vm5011_vm1, %v5010_v1 }
  0x78   : > { %4475 = vmatmul.mubr.msk.bf16.gmra.mxu0 %vm979_vm2, %v4913_v29  ;;  %4699 = vmatmul.mubr.msk.bf16.gmra.mxu1 %vm979_vm2, %v4914_v30 }
  0x79   : > { %4478 = vmatprep.mubr.msk.bf16.mxu0 %vm5011_vm1, %v5010_v1  ;;  %4702 = vmatprep.mubr.msk.bf16.mxu1 %vm5011_vm1, %v5010_v1 }
  0x80   : > { %4479 = vmatmul.mubr.msk.bf16.gmra.mxu0 %vm979_vm2, %v4915_v31  ;;  %4703 = vmatmul.mubr.msk.bf16.gmra.mxu1 %vm979_vm2, %v4916_v32 }
  0x81   : > { %4482 = vmatprep.mubr.msk.bf16.mxu0 %vm5011_vm1, %v5010_v1  ;;  %4706 = vmatprep.mubr.msk.bf16.mxu1 %vm5011_vm1, %v5010_v1 }
  0x88   : > { %4483 = vmatmul.mubr.msk.bf16.gmra.mxu0 %vm979_vm2, %v4917_v33  ;;  %4707 = vmatmul.mubr.msk.bf16.gmra.mxu1 %vm979_vm2, %v4918_v34 }
  0x89   : > { %4486 = vmatprep.mubr.msk.bf16.mxu0 %vm5011_vm1, %v5010_v1  ;;  %4710 = vmatprep.mubr.msk.bf16.mxu1 %vm5011_vm1, %v5010_v1 }
  0x90   : > { %4487 = vmatmul.mubr.msk.bf16.gmra.mxu0 %vm979_vm2, %v4919_v35  ;;  %4711 = vmatmul.mubr.msk.bf16.gmra.mxu1 %vm979_vm2, %v4920_v36 }
  0x91   : > { %4490 = vmatprep.mubr.msk.bf16.mxu0 %vm5011_vm1, %v5010_v1  ;;  %4714 = vmatprep.mubr.msk.bf16.mxu1 %vm5011_vm1, %v5010_v1 }
  0x98   : > { %4491 = vmatmul.mubr.msk.bf16.gmra.mxu0 %vm979_vm2, %v4921_v37  ;;  %4715 = vmatmul.mubr.msk.bf16.gmra.mxu1 %vm979_vm2, %v4922_v38 }
  0x99   : > { %4494 = vmatprep.mubr.msk.bf16.mxu0 %vm5011_vm1, %v5010_v1  ;;  %4718 = vmatprep.mubr.msk.bf16.mxu1 %vm5011_vm1, %v5010_v1 }
  0xa0   : > { %4495 = vmatmul.mubr.msk.bf16.gmra.mxu0 %vm979_vm2, %v4923_v39  ;;  %4719 = vmatmul.mubr.msk.bf16.gmra.mxu1 %vm979_vm2, %v4924_v40 }
  0xa1   : > { %4498 = vmatprep.mubr.msk.bf16.mxu0 %vm5011_vm1, %v5010_v1  ;;  %4722 = vmatprep.mubr.msk.bf16.mxu1 %vm5011_vm1, %v5010_v1 }
  0xa8   : > { %4499 = vmatmul.mubr.msk.bf16.gmra.mxu0 %vm979_vm2, %v4925_v41  ;;  %4723 = vmatmul.mubr.msk.bf16.gmra.mxu1 %vm979_vm2, %v4926_v42 }
  0xa9   : > { %4502 = vmatprep.mubr.msk.bf16.mxu0 %vm5011_vm1, %v5010_v1  ;;  %4726 = vmatprep.mubr.msk.bf16.mxu1 %vm5011_vm1, %v5010_v1 }
  0xb0   : > { %4503 = vmatmul.mubr.msk.bf16.gmra.mxu0 %vm979_vm2, %v4927_v43  ;;  %4727 = vmatmul.mubr.msk.bf16.gmra.mxu1 %vm979_vm2, %v4928_v44 }
  0xb1   : > { %4506 = vmatprep.mubr.msk.bf16.mxu0 %vm5011_vm1, %v5010_v1  ;;  %4730 = vmatprep.mubr.msk.bf16.mxu1 %vm5011_vm1, %v5010_v1 }
  0xb8   : > { %4507 = vmatmul.mubr.msk.bf16.gmra.mxu0 %vm979_vm2, %v4929_v45  ;;  %4731 = vmatmul.mubr.msk.bf16.gmra.mxu1 %vm979_vm2, %v4930_v46 }
  0xb9   : > { %4510 = vmatprep.mubr.msk.bf16.mxu0 %vm5011_vm1, %v5010_v1  ;;  %4734 = vmatprep.mubr.msk.bf16.mxu1 %vm5011_vm1, %v5010_v1 }
  0xc0   : > { %4511 = vmatmul.mubr.msk.bf16.gmra.mxu0 %vm979_vm2, %v4931_v47  ;;  %4735 = vmatmul.mubr.msk.bf16.gmra.mxu1 %vm979_vm2, %v4932_v48  ;;  %v4943_v47 = vld [vmem:[%s5067_s24 + $0xd8] sm:$0xff]  }
  0xc1   : > { %4514 = vmatprep.mubr.msk.bf16.mxu0 %vm5011_vm1, %v5010_v1  ;;  %4738 = vmatprep.mubr.msk.bf16.mxu1 %vm5011_vm1, %v5010_v1  ;;  %v4944_v48 = vld [vmem:[%s5067_s24 + $0x298] sm:$0xff]  }
  0xc8   : > { %4515 = vmatmul.mubr.msk.bf16.gmra.mxu0 %vm979_vm2, %v4933_v49  ;;  %4739 = vmatmul.mubr.msk.bf16.gmra.mxu1 %vm979_vm2, %v4934_v50 }
  0xc9   : > { %4518 = vmatprep.mubr.msk.bf16.mxu0 %vm5011_vm1, %v5010_v1  ;;  %4742 = vmatprep.mubr.msk.bf16.mxu1 %vm5011_vm1, %v5010_v1 }
  0xd0   : > { %4519 = vmatmul.mubr.msk.bf16.gmra.mxu0 %vm979_vm2, %v4935_v51  ;;  %4743 = vmatmul.mubr.msk.bf16.gmra.mxu1 %vm979_vm2, %v4936_v52 }
  0xd1   : > { %4522 = vmatprep.mubr.msk.bf16.mxu0 %vm5011_vm1, %v5010_v1  ;;  %4746 = vmatprep.mubr.msk.bf16.mxu1 %vm5011_vm1, %v5010_v1 }
  0xd8   : > { %v1351_v56 = vpop.f32.mrf.mxu0  ;;  %4523 = vmatmul.mubr.msk.bf16.gmra.mxu0 %vm979_vm2, %v4937_v53  ;;  %v1799_v57 = vpop.f32.mrf.mxu1  ;;  %4747 = vmatmul.mubr.msk.bf16.gmra.mxu1 %vm979_vm2, %v4938_v54 }
  0xd9   : > { %v1352_v58 = vadd.f32 %v5266_v55, %v1351_v56  ;;  %v1800_v59 = vadd.f32 %v5266_v55, %v1799_v57  ;;  %4526 = vmatprep.mubr.msk.bf16.mxu0 %vm5011_vm1, %v5010_v1  ;;  %4750 = vmatprep.mubr.msk.bf16.mxu1 %vm5011_vm1, %v5010_v1 }
  0xda   : > { %v4428_v60 = vpop.f32.mrf.mxu0  ;;  %v4652_v61 = vpop.f32.mrf.mxu1 }
  0xdb   : > { %v2238_v62 = vmax.f32 %v1352_v58, 0.0  ;;  %v2350_v63 = vmax.f32 %v1800_v59, 0.0 }
  0xdc   : > { %v1354_v0 = vpop.f32.mrf.mxu0  ;;  %v1802_v2 = vpop.f32.mrf.mxu1 }
  0xdd   : > { %v4084_v5 = vpack.c.bf16 %v2238_v62, %v2238_v62  ;;  %v4196_v6 = vpack.c.bf16 %v2350_v63, %v2350_v63  ;;  %v1355_v7 = vadd.f32 %v5266_v55, %v1354_v0  ;;  %v1803_v8 = vadd.f32 %v5266_v55, %v1802_v2 }
  0xde   : > { %v4429_v9 = vpop.f32.mrf.mxu0  ;;  %v4653_v10 = vpop.f32.mrf.mxu1 }
  0xdf   : > { %3349 = vst.msk [vmem:[%s5281_s29] sm:$0xf] %vm3348_vm3, %v4084_v5  ;;  %3461 = vst.msk [vmem:[%s5281_s29 + $0x1c0] sm:$0xf] %vm3348_vm3, %v4196_v6  ;;  %v2239_v11 = vmax.f32 %v1355_v7, 0.0  ;;  %v2351_v12 = vmax.f32 %v1803_v8, 0.0 }
  0xe0   : > { %v1359_v13 = vpop.f32.mrf.mxu0  ;;  %4527 = vmatmul.mubr.msk.bf16.gmra.mxu0 %vm979_vm2, %v4939_v3  ;;  %v1807_v14 = vpop.f32.mrf.mxu1  ;;  %4751 = vmatmul.mubr.msk.bf16.gmra.mxu1 %vm979_vm2, %v4940_v4  ;;  %v4945_v7 = vld [vmem:[%s5067_s24 + $0xe0] sm:$0xff]  }
  0xe1   : > { %v4085_v15 = vpack.c.bf16 %v2239_v11, %v2239_v11  ;;  %v4197_v16 = vpack.c.bf16 %v2351_v12, %v2351_v12  ;;  %v1360_v17 = vadd.f32 %v5266_v55, %v1359_v13  ;;  %v1808_v18 = vadd.f32 %v5266_v55, %v1807_v14  ;;  %4530 = vmatprep.mubr.msk.bf16.mxu0 %vm5011_vm1, %v5010_v1  ;;  %v4946_v8 = vld [vmem:[%s5067_s24 + $0x2a0] sm:$0xff]  }
  0xe2   : > { %v4432_v19 = vpop.f32.mrf.mxu0  ;;  %v4656_v20 = vpop.f32.mrf.mxu1  ;;  %4754 = vmatprep.mubr.msk.bf16.mxu1 %vm5011_vm1, %v5010_v1 }
  0xe3   : > { %3350 = vst.msk [vmem:[%s5281_s29 + $0x4] sm:$0xf] %vm3348_vm3, %v4085_v15  ;;  %3462 = vst.msk [vmem:[%s5281_s29 + $0x1c4] sm:$0xf] %vm3348_vm3, %v4197_v16  ;;  %v2240_v21 = vmax.f32 %v1360_v17, 0.0  ;;  %v2352_v22 = vmax.f32 %v1808_v18, 0.0 }
  0xe4   : > { %v1362_v23 = vpop.f32.mrf.mxu0  ;;  %v1810_v24 = vpop.f32.mrf.mxu1 }
  0xe5   : > { %v4086_v27 = vpack.c.bf16 %v2240_v21, %v2240_v21  ;;  %v4198_v28 = vpack.c.bf16 %v2352_v22, %v2352_v22  ;;  %v1363_v29 = vadd.f32 %v5266_v55, %v1362_v23  ;;  %v1811_v30 = vadd.f32 %v5266_v55, %v1810_v24 }
  0xe6   : > { %v4433_v31 = vpop.f32.mrf.mxu0  ;;  %v4657_v32 = vpop.f32.mrf.mxu1 }
  0xe7   : > { %3351 = vst.msk [vmem:[%s5281_s29 + $0x8] sm:$0xf] %vm3348_vm3, %v4086_v27  ;;  %3463 = vst.msk [vmem:[%s5281_s29 + $0x1c8] sm:$0xf] %vm3348_vm3, %v4198_v28  ;;  %v2241_v33 = vmax.f32 %v1363_v29, 0.0  ;;  %v2353_v34 = vmax.f32 %v1811_v30, 0.0 }
  0xe8   : > { %v1367_v35 = vpop.f32.mrf.mxu0  ;;  %4531 = vmatmul.mubr.msk.bf16.gmra.mxu0 %vm979_vm2, %v4941_v25  ;;  %v1815_v36 = vpop.f32.mrf.mxu1  ;;  %4755 = vmatmul.mubr.msk.bf16.gmra.mxu1 %vm979_vm2, %v4942_v26  ;;  %v4947_v29 = vld [vmem:[%s5067_s24 + $0xe8] sm:$0xff]  }
  0xe9   : > { %v4087_v37 = vpack.c.bf16 %v2241_v33, %v2241_v33  ;;  %v4199_v38 = vpack.c.bf16 %v2353_v34, %v2353_v34  ;;  %v1368_v39 = vadd.f32 %v5266_v55, %v1367_v35  ;;  %v1816_v40 = vadd.f32 %v5266_v55, %v1815_v36  ;;  %4534 = vmatprep.mubr.msk.bf16.mxu0 %vm5011_vm1, %v5010_v1  ;;  %v4948_v30 = vld [vmem:[%s5067_s24 + $0x2a8] sm:$0xff]  }
  0xea   : > { %v4436_v41 = vpop.f32.mrf.mxu0  ;;  %v4660_v42 = vpop.f32.mrf.mxu1  ;;  %4758 = vmatprep.mubr.msk.bf16.mxu1 %vm5011_vm1, %v5010_v1 }
  0xeb   : > { %3352 = vst.msk [vmem:[%s5281_s29 + $0xc] sm:$0xf] %vm3348_vm3, %v4087_v37  ;;  %3464 = vst.msk [vmem:[%s5281_s29 + $0x1cc] sm:$0xf] %vm3348_vm3, %v4199_v38  ;;  %v2242_v43 = vmax.f32 %v1368_v39, 0.0  ;;  %v2354_v44 = vmax.f32 %v1816_v40, 0.0 }
  0xec   : > { %v1370_v45 = vpop.f32.mrf.mxu0  ;;  %v1818_v46 = vpop.f32.mrf.mxu1 }
  0xed   : > { %v4088_v49 = vpack.c.bf16 %v2242_v43, %v2242_v43  ;;  %v4200_v50 = vpack.c.bf16 %v2354_v44, %v2354_v44  ;;  %v1371_v51 = vadd.f32 %v5266_v55, %v1370_v45  ;;  %v1819_v52 = vadd.f32 %v5266_v55, %v1818_v46 }
  0xee   : > { %v4437_v53 = vpop.f32.mrf.mxu0  ;;  %v4661_v54 = vpop.f32.mrf.mxu1 }
  0xef   : > { %3353 = vst.msk [vmem:[%s5281_s29 + $0x10] sm:$0xf] %vm3348_vm3, %v4088_v49  ;;  %3465 = vst.msk [vmem:[%s5281_s29 + $0x1d0] sm:$0xf] %vm3348_vm3, %v4200_v50  ;;  %v2243_v56 = vmax.f32 %v1371_v51, 0.0  ;;  %v2355_v57 = vmax.f32 %v1819_v52, 0.0 }
  0xf0   : > { %v1375_v58 = vpop.f32.mrf.mxu0  ;;  %4535 = vmatmul.mubr.msk.bf16.gmra.mxu0 %vm979_vm2, %v4943_v47  ;;  %v1823_v59 = vpop.f32.mrf.mxu1  ;;  %4759 = vmatmul.mubr.msk.bf16.gmra.mxu1 %vm979_vm2, %v4944_v48  ;;  %v4949_v51 = vld [vmem:[%s5067_s24 + $0xf0] sm:$0xff]  }
  0xf1   : > { %v4089_v60 = vpack.c.bf16 %v2243_v56, %v2243_v56  ;;  %v4201_v61 = vpack.c.bf16 %v2355_v57, %v2355_v57  ;;  %v1376_v62 = vadd.f32 %v5266_v55, %v1375_v58  ;;  %v1824_v63 = vadd.f32 %v5266_v55, %v1823_v59  ;;  %4538 = vmatprep.mubr.msk.bf16.mxu0 %vm5011_vm1, %v5010_v1  ;;  %v4950_v52 = vld [vmem:[%s5067_s24 + $0x2b0] sm:$0xff]  }
  0xf2   : > { %v4440_v0 = vpop.f32.mrf.mxu0  ;;  %v4664_v2 = vpop.f32.mrf.mxu1  ;;  %4762 = vmatprep.mubr.msk.bf16.mxu1 %vm5011_vm1, %v5010_v1 }
  0xf3   : > { %3354 = vst.msk [vmem:[%s5281_s29 + $0x14] sm:$0xf] %vm3348_vm3, %v4089_v60  ;;  %3466 = vst.msk [vmem:[%s5281_s29 + $0x1d4] sm:$0xf] %vm3348_vm3, %v4201_v61  ;;  %v2244_v3 = vmax.f32 %v1376_v62, 0.0  ;;  %v2356_v4 = vmax.f32 %v1824_v63, 0.0 }
  0xf4   : > { %v1378_v5 = vpop.f32.mrf.mxu0  ;;  %v1826_v6 = vpop.f32.mrf.mxu1 }
  0xf5   : > { %v4090_v9 = vpack.c.bf16 %v2244_v3, %v2244_v3  ;;  %v4202_v10 = vpack.c.bf16 %v2356_v4, %v2356_v4  ;;  %v1379_v11 = vadd.f32 %v5266_v55, %v1378_v5  ;;  %v1827_v12 = vadd.f32 %v5266_v55, %v1826_v6 }
  0xf6   : > { %v4441_v13 = vpop.f32.mrf.mxu0  ;;  %v4665_v14 = vpop.f32.mrf.mxu1 }
  0xf7   : > { %3355 = vst.msk [vmem:[%s5281_s29 + $0x18] sm:$0xf] %vm3348_vm3, %v4090_v9  ;;  %3467 = vst.msk [vmem:[%s5281_s29 + $0x1d8] sm:$0xf] %vm3348_vm3, %v4202_v10  ;;  %v2245_v15 = vmax.f32 %v1379_v11, 0.0  ;;  %v2357_v16 = vmax.f32 %v1827_v12, 0.0 }
  0xf8   : > { %v1383_v17 = vpop.f32.mrf.mxu0  ;;  %4539 = vmatmul.mubr.msk.bf16.gmra.mxu0 %vm979_vm2, %v4945_v7  ;;  %v1831_v18 = vpop.f32.mrf.mxu1  ;;  %4763 = vmatmul.mubr.msk.bf16.gmra.mxu1 %vm979_vm2, %v4946_v8  ;;  %v4951_v11 = vld [vmem:[%s5067_s24 + $0xf8] sm:$0xff]  }
  0xf9   : > { %v4091_v19 = vpack.c.bf16 %v2245_v15, %v2245_v15  ;;  %v4203_v20 = vpack.c.bf16 %v2357_v16, %v2357_v16  ;;  %v1384_v21 = vadd.f32 %v5266_v55, %v1383_v17  ;;  %v1832_v22 = vadd.f32 %v5266_v55, %v1831_v18  ;;  %4542 = vmatprep.mubr.msk.bf16.mxu0 %vm5011_vm1, %v5010_v1  ;;  %v4952_v12 = vld [vmem:[%s5067_s24 + $0x2b8] sm:$0xff]  }
  0xfa   : > { %v4444_v23 = vpop.f32.mrf.mxu0  ;;  %v4668_v24 = vpop.f32.mrf.mxu1  ;;  %4766 = vmatprep.mubr.msk.bf16.mxu1 %vm5011_vm1, %v5010_v1 }
  0xfb   : > { %3356 = vst.msk [vmem:[%s5281_s29 + $0x1c] sm:$0xf] %vm3348_vm3, %v4091_v19  ;;  %3468 = vst.msk [vmem:[%s5281_s29 + $0x1dc] sm:$0xf] %vm3348_vm3, %v4203_v20  ;;  %v2246_v25 = vmax.f32 %v1384_v21, 0.0  ;;  %v2358_v26 = vmax.f32 %v1832_v22, 0.0 }
  0xfc   : > { %v1386_v27 = vpop.f32.mrf.mxu0  ;;  %v1834_v28 = vpop.f32.mrf.mxu1 }
  0xfd   : > { %v4092_v31 = vpack.c.bf16 %v2246_v25, %v2246_v25  ;;  %v4204_v32 = vpack.c.bf16 %v2358_v26, %v2358_v26  ;;  %v1387_v33 = vadd.f32 %v5266_v55, %v1386_v27  ;;  %v1835_v34 = vadd.f32 %v5266_v55, %v1834_v28 }
  0xfe   : > { %v4445_v35 = vpop.f32.mrf.mxu0  ;;  %v4669_v36 = vpop.f32.mrf.mxu1 }
  0xff   : > { %3357 = vst.msk [vmem:[%s5281_s29 + $0x20] sm:$0xf] %vm3348_vm3, %v4092_v31  ;;  %3469 = vst.msk [vmem:[%s5281_s29 + $0x1e0] sm:$0xf] %vm3348_vm3, %v4204_v32  ;;  %v2247_v37 = vmax.f32 %v1387_v33, 0.0  ;;  %v2359_v38 = vmax.f32 %v1835_v34, 0.0 }
 0x100   : > { %v1391_v39 = vpop.f32.mrf.mxu0  ;;  %4543 = vmatmul.mubr.msk.bf16.gmra.mxu0 %vm979_vm2, %v4947_v29  ;;  %v1839_v40 = vpop.f32.mrf.mxu1  ;;  %4767 = vmatmul.mubr.msk.bf16.gmra.mxu1 %vm979_vm2, %v4948_v30  ;;  %v4953_v33 = vld [vmem:[%s5067_s24 + $0x100] sm:$0xff]  }
 0x101   : > { %v4093_v41 = vpack.c.bf16 %v2247_v37, %v2247_v37  ;;  %v4205_v42 = vpack.c.bf16 %v2359_v38, %v2359_v38  ;;  %v1392_v43 = vadd.f32 %v5266_v55, %v1391_v39  ;;  %v1840_v44 = vadd.f32 %v5266_v55, %v1839_v40  ;;  %4546 = vmatprep.mubr.msk.bf16.mxu0 %vm5011_vm1, %v5010_v1  ;;  %v4954_v34 = vld [vmem:[%s5067_s24 + $0x2c0] sm:$0xff]  }
 0x102   : > { %v4448_v45 = vpop.f32.mrf.mxu0  ;;  %v4672_v46 = vpop.f32.mrf.mxu1  ;;  %4770 = vmatprep.mubr.msk.bf16.mxu1 %vm5011_vm1, %v5010_v1 }
 0x103   : > { %3358 = vst.msk [vmem:[%s5281_s29 + $0x24] sm:$0xf] %vm3348_vm3, %v4093_v41  ;;  %3470 = vst.msk [vmem:[%s5281_s29 + $0x1e4] sm:$0xf] %vm3348_vm3, %v4205_v42  ;;  %v2248_v47 = vmax.f32 %v1392_v43, 0.0  ;;  %v2360_v48 = vmax.f32 %v1840_v44, 0.0 }
 0x104   : > { %v1394_v49 = vpop.f32.mrf.mxu0  ;;  %v1842_v50 = vpop.f32.mrf.mxu1 }
 0x105   : > { %v4094_v53 = vpack.c.bf16 %v2248_v47, %v2248_v47  ;;  %v4206_v54 = vpack.c.bf16 %v2360_v48, %v2360_v48  ;;  %v1395_v56 = vadd.f32 %v5266_v55, %v1394_v49  ;;  %v1843_v57 = vadd.f32 %v5266_v55, %v1842_v50 }
 0x106   : > { %v4449_v58 = vpop.f32.mrf.mxu0  ;;  %v4673_v59 = vpop.f32.mrf.mxu1 }
 0x107   : > { %3359 = vst.msk [vmem:[%s5281_s29 + $0x28] sm:$0xf] %vm3348_vm3, %v4094_v53  ;;  %3471 = vst.msk [vmem:[%s5281_s29 + $0x1e8] sm:$0xf] %vm3348_vm3, %v4206_v54  ;;  %v2249_v60 = vmax.f32 %v1395_v56, 0.0  ;;  %v2361_v61 = vmax.f32 %v1843_v57, 0.0 }
 0x108   : > { %v1399_v62 = vpop.f32.mrf.mxu0  ;;  %4547 = vmatmul.mubr.msk.bf16.gmra.mxu0 %vm979_vm2, %v4949_v51  ;;  %v1847_v63 = vpop.f32.mrf.mxu1  ;;  %4771 = vmatmul.mubr.msk.bf16.gmra.mxu1 %vm979_vm2, %v4950_v52  ;;  %v4955_v56 = vld [vmem:[%s5067_s24 + $0x108] sm:$0xff]  }
 0x109   : > { %v4095_v0 = vpack.c.bf16 %v2249_v60, %v2249_v60  ;;  %v4207_v2 = vpack.c.bf16 %v2361_v61, %v2361_v61  ;;  %v1400_v3 = vadd.f32 %v5266_v55, %v1399_v62  ;;  %v1848_v4 = vadd.f32 %v5266_v55, %v1847_v63  ;;  %4550 = vmatprep.mubr.msk.bf16.mxu0 %vm5011_vm1, %v5010_v1  ;;  %v4956_v57 = vld [vmem:[%s5067_s24 + $0x2c8] sm:$0xff]  }
 0x10a   : > { %v4452_v5 = vpop.f32.mrf.mxu0  ;;  %v4676_v6 = vpop.f32.mrf.mxu1  ;;  %4774 = vmatprep.mubr.msk.bf16.mxu1 %vm5011_vm1, %v5010_v1 }
 0x10b   : > { %3360 = vst.msk [vmem:[%s5281_s29 + $0x2c] sm:$0xf] %vm3348_vm3, %v4095_v0  ;;  %3472 = vst.msk [vmem:[%s5281_s29 + $0x1ec] sm:$0xf] %vm3348_vm3, %v4207_v2  ;;  %v2250_v7 = vmax.f32 %v1400_v3, 0.0  ;;  %v2362_v8 = vmax.f32 %v1848_v4, 0.0 }
 0x10c   : > { %v1402_v9 = vpop.f32.mrf.mxu0  ;;  %v1850_v10 = vpop.f32.mrf.mxu1 }
 0x10d   : > { %v4096_v13 = vpack.c.bf16 %v2250_v7, %v2250_v7  ;;  %v4208_v14 = vpack.c.bf16 %v2362_v8, %v2362_v8  ;;  %v1403_v15 = vadd.f32 %v5266_v55, %v1402_v9  ;;  %v1851_v16 = vadd.f32 %v5266_v55, %v1850_v10 }
 0x10e   : > { %v4453_v17 = vpop.f32.mrf.mxu0  ;;  %v4677_v18 = vpop.f32.mrf.mxu1 }
 0x10f   : > { %3361 = vst.msk [vmem:[%s5281_s29 + $0x30] sm:$0xf] %vm3348_vm3, %v4096_v13  ;;  %3473 = vst.msk [vmem:[%s5281_s29 + $0x1f0] sm:$0xf] %vm3348_vm3, %v4208_v14  ;;  %v2251_v19 = vmax.f32 %v1403_v15, 0.0  ;;  %v2363_v20 = vmax.f32 %v1851_v16, 0.0 }
 0x110   : > { %v1407_v21 = vpop.f32.mrf.mxu0  ;;  %4551 = vmatmul.mubr.msk.bf16.gmra.mxu0 %vm979_vm2, %v4951_v11  ;;  %v1855_v22 = vpop.f32.mrf.mxu1  ;;  %4775 = vmatmul.mubr.msk.bf16.gmra.mxu1 %vm979_vm2, %v4952_v12  ;;  %v4957_v15 = vld [vmem:[%s5067_s24 + $0x110] sm:$0xff]  }
 0x111   : > { %v4097_v23 = vpack.c.bf16 %v2251_v19, %v2251_v19  ;;  %v4209_v24 = vpack.c.bf16 %v2363_v20, %v2363_v20  ;;  %v1408_v25 = vadd.f32 %v5266_v55, %v1407_v21  ;;  %v1856_v26 = vadd.f32 %v5266_v55, %v1855_v22  ;;  %4554 = vmatprep.mubr.msk.bf16.mxu0 %vm5011_vm1, %v5010_v1  ;;  %v4958_v16 = vld [vmem:[%s5067_s24 + $0x2d0] sm:$0xff]  }
 0x112   : > { %v4456_v27 = vpop.f32.mrf.mxu0  ;;  %v4680_v28 = vpop.f32.mrf.mxu1  ;;  %4778 = vmatprep.mubr.msk.bf16.mxu1 %vm5011_vm1, %v5010_v1 }
 0x113   : > { %3362 = vst.msk [vmem:[%s5281_s29 + $0x34] sm:$0xf] %vm3348_vm3, %v4097_v23  ;;  %3474 = vst.msk [vmem:[%s5281_s29 + $0x1f4] sm:$0xf] %vm3348_vm3, %v4209_v24  ;;  %v2252_v29 = vmax.f32 %v1408_v25, 0.0  ;;  %v2364_v30 = vmax.f32 %v1856_v26, 0.0 }
 0x114   : > { %v1410_v31 = vpop.f32.mrf.mxu0  ;;  %v1858_v32 = vpop.f32.mrf.mxu1 }
 0x115   : > { %v4098_v35 = vpack.c.bf16 %v2252_v29, %v2252_v29  ;;  %v4210_v36 = vpack.c.bf16 %v2364_v30, %v2364_v30  ;;  %v1411_v37 = vadd.f32 %v5266_v55, %v1410_v31  ;;  %v1859_v38 = vadd.f32 %v5266_v55, %v1858_v32 }
 0x116   : > { %v4457_v39 = vpop.f32.mrf.mxu0  ;;  %v4681_v40 = vpop.f32.mrf.mxu1 }
 0x117   : > { %3363 = vst.msk [vmem:[%s5281_s29 + $0x38] sm:$0xf] %vm3348_vm3, %v4098_v35  ;;  %3475 = vst.msk [vmem:[%s5281_s29 + $0x1f8] sm:$0xf] %vm3348_vm3, %v4210_v36  ;;  %v2253_v41 = vmax.f32 %v1411_v37, 0.0  ;;  %v2365_v42 = vmax.f32 %v1859_v38, 0.0 }
 0x118   : > { %v1415_v43 = vpop.f32.mrf.mxu0  ;;  %4555 = vmatmul.mubr.msk.bf16.gmra.mxu0 %vm979_vm2, %v4953_v33  ;;  %v1863_v44 = vpop.f32.mrf.mxu1  ;;  %4779 = vmatmul.mubr.msk.bf16.gmra.mxu1 %vm979_vm2, %v4954_v34  ;;  %v4959_v37 = vld [vmem:[%s5067_s24 + $0x118] sm:$0xff]  }
 0x119   : > { %v4099_v45 = vpack.c.bf16 %v2253_v41, %v2253_v41  ;;  %v4211_v46 = vpack.c.bf16 %v2365_v42, %v2365_v42  ;;  %v1416_v47 = vadd.f32 %v5266_v55, %v1415_v43  ;;  %v1864_v48 = vadd.f32 %v5266_v55, %v1863_v44  ;;  %4558 = vmatprep.mubr.msk.bf16.mxu0 %vm5011_vm1, %v5010_v1  ;;  %v4960_v38 = vld [vmem:[%s5067_s24 + $0x2d8] sm:$0xff]  }
 0x11a   : > { %v4460_v49 = vpop.f32.mrf.mxu0  ;;  %v4684_v50 = vpop.f32.mrf.mxu1  ;;  %4782 = vmatprep.mubr.msk.bf16.mxu1 %vm5011_vm1, %v5010_v1 }
 0x11b   : > { %3364 = vst.msk [vmem:[%s5281_s29 + $0x3c] sm:$0xf] %vm3348_vm3, %v4099_v45  ;;  %3476 = vst.msk [vmem:[%s5281_s29 + $0x1fc] sm:$0xf] %vm3348_vm3, %v4211_v46  ;;  %v2254_v51 = vmax.f32 %v1416_v47, 0.0  ;;  %v2366_v52 = vmax.f32 %v1864_v48, 0.0 }
 0x11c   : > { %v1418_v53 = vpop.f32.mrf.mxu0  ;;  %v1866_v54 = vpop.f32.mrf.mxu1 }
 0x11d   : > { %v4100_v58 = vpack.c.bf16 %v2254_v51, %v2254_v51  ;;  %v4212_v59 = vpack.c.bf16 %v2366_v52, %v2366_v52  ;;  %v1419_v60 = vadd.f32 %v5266_v55, %v1418_v53  ;;  %v1867_v61 = vadd.f32 %v5266_v55, %v1866_v54 }
 0x11e   : > { %v4461_v62 = vpop.f32.mrf.mxu0  ;;  %v4685_v63 = vpop.f32.mrf.mxu1 }
 0x11f   : > { %3365 = vst.msk [vmem:[%s5281_s29 + $0x40] sm:$0xf] %vm3348_vm3, %v4100_v58  ;;  %3477 = vst.msk [vmem:[%s5281_s29 + $0x200] sm:$0xf] %vm3348_vm3, %v4212_v59  ;;  %v2255_v0 = vmax.f32 %v1419_v60, 0.0  ;;  %v2367_v2 = vmax.f32 %v1867_v61, 0.0 }
 0x120   : > { %v1423_v3 = vpop.f32.mrf.mxu0  ;;  %4559 = vmatmul.mubr.msk.bf16.gmra.mxu0 %vm979_vm2, %v4955_v56  ;;  %v1871_v4 = vpop.f32.mrf.mxu1  ;;  %4783 = vmatmul.mubr.msk.bf16.gmra.mxu1 %vm979_vm2, %v4956_v57  ;;  %v4961_v60 = vld [vmem:[%s5067_s24 + $0x120] sm:$0xff]  }
 0x121   : > { %v4101_v5 = vpack.c.bf16 %v2255_v0, %v2255_v0  ;;  %v4213_v6 = vpack.c.bf16 %v2367_v2, %v2367_v2  ;;  %v1424_v7 = vadd.f32 %v5266_v55, %v1423_v3  ;;  %v1872_v8 = vadd.f32 %v5266_v55, %v1871_v4  ;;  %4562 = vmatprep.mubr.msk.bf16.mxu0 %vm5011_vm1, %v5010_v1  ;;  %v4962_v61 = vld [vmem:[%s5067_s24 + $0x2e0] sm:$0xff]  }
 0x122   : > { %v4464_v9 = vpop.f32.mrf.mxu0  ;;  %v4688_v10 = vpop.f32.mrf.mxu1  ;;  %4786 = vmatprep.mubr.msk.bf16.mxu1 %vm5011_vm1, %v5010_v1 }
 0x123   : > { %3366 = vst.msk [vmem:[%s5281_s29 + $0x44] sm:$0xf] %vm3348_vm3, %v4101_v5  ;;  %3478 = vst.msk [vmem:[%s5281_s29 + $0x204] sm:$0xf] %vm3348_vm3, %v4213_v6  ;;  %v2256_v11 = vmax.f32 %v1424_v7, 0.0  ;;  %v2368_v12 = vmax.f32 %v1872_v8, 0.0 }
 0x124   : > { %v1426_v13 = vpop.f32.mrf.mxu0  ;;  %v1874_v14 = vpop.f32.mrf.mxu1 }
 0x125   : > { %v4102_v17 = vpack.c.bf16 %v2256_v11, %v2256_v11  ;;  %v4214_v18 = vpack.c.bf16 %v2368_v12, %v2368_v12  ;;  %v1427_v19 = vadd.f32 %v5266_v55, %v1426_v13  ;;  %v1875_v20 = vadd.f32 %v5266_v55, %v1874_v14 }
 0x126   : > { %v4465_v21 = vpop.f32.mrf.mxu0  ;;  %v4689_v22 = vpop.f32.mrf.mxu1 }
 0x127   : > { %3367 = vst.msk [vmem:[%s5281_s29 + $0x48] sm:$0xf] %vm3348_vm3, %v4102_v17  ;;  %3479 = vst.msk [vmem:[%s5281_s29 + $0x208] sm:$0xf] %vm3348_vm3, %v4214_v18  ;;  %v2257_v23 = vmax.f32 %v1427_v19, 0.0  ;;  %v2369_v24 = vmax.f32 %v1875_v20, 0.0 }
 0x128   : > { %v1431_v25 = vpop.f32.mrf.mxu0  ;;  %4563 = vmatmul.mubr.msk.bf16.gmra.mxu0 %vm979_vm2, %v4957_v15  ;;  %v1879_v26 = vpop.f32.mrf.mxu1  ;;  %4787 = vmatmul.mubr.msk.bf16.gmra.mxu1 %vm979_vm2, %v4958_v16  ;;  %v4963_v19 = vld [vmem:[%s5067_s24 + $0x128] sm:$0xff]  }
 0x129   : > { %v4103_v27 = vpack.c.bf16 %v2257_v23, %v2257_v23  ;;  %v4215_v28 = vpack.c.bf16 %v2369_v24, %v2369_v24  ;;  %v1432_v29 = vadd.f32 %v5266_v55, %v1431_v25  ;;  %v1880_v30 = vadd.f32 %v5266_v55, %v1879_v26  ;;  %4566 = vmatprep.mubr.msk.bf16.mxu0 %vm5011_vm1, %v5010_v1  ;;  %v4964_v20 = vld [vmem:[%s5067_s24 + $0x2e8] sm:$0xff]  }
 0x12a   : > { %v4468_v31 = vpop.f32.mrf.mxu0  ;;  %v4692_v32 = vpop.f32.mrf.mxu1  ;;  %4790 = vmatprep.mubr.msk.bf16.mxu1 %vm5011_vm1, %v5010_v1 }
 0x12b   : > { %3368 = vst.msk [vmem:[%s5281_s29 + $0x4c] sm:$0xf] %vm3348_vm3, %v4103_v27  ;;  %3480 = vst.msk [vmem:[%s5281_s29 + $0x20c] sm:$0xf] %vm3348_vm3, %v4215_v28  ;;  %v2258_v33 = vmax.f32 %v1432_v29, 0.0  ;;  %v2370_v34 = vmax.f32 %v1880_v30, 0.0 }
 0x12c   : > { %v1434_v35 = vpop.f32.mrf.mxu0  ;;  %v1882_v36 = vpop.f32.mrf.mxu1 }
 0x12d   : > { %v4104_v39 = vpack.c.bf16 %v2258_v33, %v2258_v33  ;;  %v4216_v40 = vpack.c.bf16 %v2370_v34, %v2370_v34  ;;  %v1435_v41 = vadd.f32 %v5266_v55, %v1434_v35  ;;  %v1883_v42 = vadd.f32 %v5266_v55, %v1882_v36 }
 0x12e   : > { %v4469_v43 = vpop.f32.mrf.mxu0  ;;  %v4693_v44 = vpop.f32.mrf.mxu1 }
 0x12f   : > { %3369 = vst.msk [vmem:[%s5281_s29 + $0x50] sm:$0xf] %vm3348_vm3, %v4104_v39  ;;  %3481 = vst.msk [vmem:[%s5281_s29 + $0x210] sm:$0xf] %vm3348_vm3, %v4216_v40  ;;  %v2259_v45 = vmax.f32 %v1435_v41, 0.0  ;;  %v2371_v46 = vmax.f32 %v1883_v42, 0.0 }
 0x130   : > { %v1439_v47 = vpop.f32.mrf.mxu0  ;;  %4567 = vmatmul.mubr.msk.bf16.gmra.mxu0 %vm979_vm2, %v4959_v37  ;;  %v1887_v48 = vpop.f32.mrf.mxu1  ;;  %4791 = vmatmul.mubr.msk.bf16.gmra.mxu1 %vm979_vm2, %v4960_v38  ;;  %v4965_v41 = vld [vmem:[%s5067_s24 + $0x130] sm:$0xff]  }
 0x131   : > { %v4105_v49 = vpack.c.bf16 %v2259_v45, %v2259_v45  ;;  %v4217_v50 = vpack.c.bf16 %v2371_v46, %v2371_v46  ;;  %v1440_v51 = vadd.f32 %v5266_v55, %v1439_v47  ;;  %v1888_v52 = vadd.f32 %v5266_v55, %v1887_v48  ;;  %4570 = vmatprep.mubr.msk.bf16.mxu0 %vm5011_vm1, %v5010_v1  ;;  %v4966_v42 = vld [vmem:[%s5067_s24 + $0x2f0] sm:$0xff]  }
 0x132   : > { %v4472_v53 = vpop.f32.mrf.mxu0  ;;  %v4696_v54 = vpop.f32.mrf.mxu1  ;;  %4794 = vmatprep.mubr.msk.bf16.mxu1 %vm5011_vm1, %v5010_v1 }
 0x133   : > { %3370 = vst.msk [vmem:[%s5281_s29 + $0x54] sm:$0xf] %vm3348_vm3, %v4105_v49  ;;  %3482 = vst.msk [vmem:[%s5281_s29 + $0x214] sm:$0xf] %vm3348_vm3, %v4217_v50  ;;  %v2260_v56 = vmax.f32 %v1440_v51, 0.0  ;;  %v2372_v57 = vmax.f32 %v1888_v52, 0.0 }
 0x134   : > { %v1442_v58 = vpop.f32.mrf.mxu0  ;;  %v1890_v59 = vpop.f32.mrf.mxu1 }
 0x135   : > { %v4106_v62 = vpack.c.bf16 %v2260_v56, %v2260_v56  ;;  %v4218_v63 = vpack.c.bf16 %v2372_v57, %v2372_v57  ;;  %v1443_v0 = vadd.f32 %v5266_v55, %v1442_v58  ;;  %v1891_v2 = vadd.f32 %v5266_v55, %v1890_v59 }
 0x136   : > { %v4473_v3 = vpop.f32.mrf.mxu0  ;;  %v4697_v4 = vpop.f32.mrf.mxu1 }
 0x137   : > { %3371 = vst.msk [vmem:[%s5281_s29 + $0x58] sm:$0xf] %vm3348_vm3, %v4106_v62  ;;  %3483 = vst.msk [vmem:[%s5281_s29 + $0x218] sm:$0xf] %vm3348_vm3, %v4218_v63  ;;  %v2261_v5 = vmax.f32 %v1443_v0, 0.0  ;;  %v2373_v6 = vmax.f32 %v1891_v2, 0.0 }
 0x138   : > { %v1447_v7 = vpop.f32.mrf.mxu0  ;;  %4571 = vmatmul.mubr.msk.bf16.gmra.mxu0 %vm979_vm2, %v4961_v60  ;;  %v1895_v8 = vpop.f32.mrf.mxu1  ;;  %4795 = vmatmul.mubr.msk.bf16.gmra.mxu1 %vm979_vm2, %v4962_v61  ;;  %v4967_v0 = vld [vmem:[%s5067_s24 + $0x138] sm:$0xff]  }
 0x139   : > { %v4107_v9 = vpack.c.bf16 %v2261_v5, %v2261_v5  ;;  %v4219_v10 = vpack.c.bf16 %v2373_v6, %v2373_v6  ;;  %v1448_v11 = vadd.f32 %v5266_v55, %v1447_v7  ;;  %v1896_v12 = vadd.f32 %v5266_v55, %v1895_v8  ;;  %4574 = vmatprep.mubr.msk.bf16.mxu0 %vm5011_vm1, %v5010_v1  ;;  %v4968_v2 = vld [vmem:[%s5067_s24 + $0x2f8] sm:$0xff]  }
 0x13a   : > { %v4476_v13 = vpop.f32.mrf.mxu0  ;;  %v4700_v14 = vpop.f32.mrf.mxu1  ;;  %4798 = vmatprep.mubr.msk.bf16.mxu1 %vm5011_vm1, %v5010_v1 }
 0x13b   : > { %3372 = vst.msk [vmem:[%s5281_s29 + $0x5c] sm:$0xf] %vm3348_vm3, %v4107_v9  ;;  %3484 = vst.msk [vmem:[%s5281_s29 + $0x21c] sm:$0xf] %vm3348_vm3, %v4219_v10  ;;  %v2262_v15 = vmax.f32 %v1448_v11, 0.0  ;;  %v2374_v16 = vmax.f32 %v1896_v12, 0.0 }
 0x13c   : > { %v1450_v17 = vpop.f32.mrf.mxu0  ;;  %v1898_v18 = vpop.f32.mrf.mxu1 }
 0x13d   : > { %v4108_v21 = vpack.c.bf16 %v2262_v15, %v2262_v15  ;;  %v4220_v22 = vpack.c.bf16 %v2374_v16, %v2374_v16  ;;  %v1451_v23 = vadd.f32 %v5266_v55, %v1450_v17  ;;  %v1899_v24 = vadd.f32 %v5266_v55, %v1898_v18 }
 0x13e   : > { %v4477_v25 = vpop.f32.mrf.mxu0  ;;  %v4701_v26 = vpop.f32.mrf.mxu1 }
 0x13f   : > { %3373 = vst.msk [vmem:[%s5281_s29 + $0x60] sm:$0xf] %vm3348_vm3, %v4108_v21  ;;  %3485 = vst.msk [vmem:[%s5281_s29 + $0x220] sm:$0xf] %vm3348_vm3, %v4220_v22  ;;  %v2263_v27 = vmax.f32 %v1451_v23, 0.0  ;;  %v2375_v28 = vmax.f32 %v1899_v24, 0.0 }
 0x140   : > { %v1455_v29 = vpop.f32.mrf.mxu0  ;;  %4575 = vmatmul.mubr.msk.bf16.gmra.mxu0 %vm979_vm2, %v4963_v19  ;;  %v1903_v30 = vpop.f32.mrf.mxu1  ;;  %4799 = vmatmul.mubr.msk.bf16.gmra.mxu1 %vm979_vm2, %v4964_v20  ;;  %v4969_v23 = vld [vmem:[%s5067_s24 + $0x140] sm:$0xff]  }
 0x141   : > { %v4109_v31 = vpack.c.bf16 %v2263_v27, %v2263_v27  ;;  %v4221_v32 = vpack.c.bf16 %v2375_v28, %v2375_v28  ;;  %v1456_v33 = vadd.f32 %v5266_v55, %v1455_v29  ;;  %v1904_v34 = vadd.f32 %v5266_v55, %v1903_v30  ;;  %4578 = vmatprep.mubr.msk.bf16.mxu0 %vm5011_vm1, %v5010_v1  ;;  %v4970_v24 = vld [vmem:[%s5067_s24 + $0x300] sm:$0xff]  }
 0x142   : > { %v4480_v35 = vpop.f32.mrf.mxu0  ;;  %v4704_v36 = vpop.f32.mrf.mxu1  ;;  %4802 = vmatprep.mubr.msk.bf16.mxu1 %vm5011_vm1, %v5010_v1 }
 0x143   : > { %3374 = vst.msk [vmem:[%s5281_s29 + $0x64] sm:$0xf] %vm3348_vm3, %v4109_v31  ;;  %3486 = vst.msk [vmem:[%s5281_s29 + $0x224] sm:$0xf] %vm3348_vm3, %v4221_v32  ;;  %v2264_v37 = vmax.f32 %v1456_v33, 0.0  ;;  %v2376_v38 = vmax.f32 %v1904_v34, 0.0 }
 0x144   : > { %v1458_v39 = vpop.f32.mrf.mxu0  ;;  %v1906_v40 = vpop.f32.mrf.mxu1 }
 0x145   : > { %v4110_v43 = vpack.c.bf16 %v2264_v37, %v2264_v37  ;;  %v4222_v44 = vpack.c.bf16 %v2376_v38, %v2376_v38  ;;  %v1459_v45 = vadd.f32 %v5266_v55, %v1458_v39  ;;  %v1907_v46 = vadd.f32 %v5266_v55, %v1906_v40 }
 0x146   : > { %v4481_v47 = vpop.f32.mrf.mxu0  ;;  %v4705_v48 = vpop.f32.mrf.mxu1 }
 0x147   : > { %3375 = vst.msk [vmem:[%s5281_s29 + $0x68] sm:$0xf] %vm3348_vm3, %v4110_v43  ;;  %3487 = vst.msk [vmem:[%s5281_s29 + $0x228] sm:$0xf] %vm3348_vm3, %v4222_v44  ;;  %v2265_v49 = vmax.f32 %v1459_v45, 0.0  ;;  %v2377_v50 = vmax.f32 %v1907_v46, 0.0 }
 0x148   : > { %v1463_v51 = vpop.f32.mrf.mxu0  ;;  %4579 = vmatmul.mubr.msk.bf16.gmra.mxu0 %vm979_vm2, %v4965_v41  ;;  %v1911_v52 = vpop.f32.mrf.mxu1  ;;  %4803 = vmatmul.mubr.msk.bf16.gmra.mxu1 %vm979_vm2, %v4966_v42  ;;  %v4971_v45 = vld [vmem:[%s5067_s24 + $0x148] sm:$0xff]  }
 0x149   : > { %v4111_v53 = vpack.c.bf16 %v2265_v49, %v2265_v49  ;;  %v4223_v54 = vpack.c.bf16 %v2377_v50, %v2377_v50  ;;  %v1464_v56 = vadd.f32 %v5266_v55, %v1463_v51  ;;  %v1912_v57 = vadd.f32 %v5266_v55, %v1911_v52  ;;  %4582 = vmatprep.mubr.msk.bf16.mxu0 %vm5011_vm1, %v5010_v1  ;;  %v4972_v46 = vld [vmem:[%s5067_s24 + $0x308] sm:$0xff]  }
 0x14a   : > { %v4484_v58 = vpop.f32.mrf.mxu0  ;;  %v4708_v59 = vpop.f32.mrf.mxu1  ;;  %4806 = vmatprep.mubr.msk.bf16.mxu1 %vm5011_vm1, %v5010_v1 }
 0x14b   : > { %3376 = vst.msk [vmem:[%s5281_s29 + $0x6c] sm:$0xf] %vm3348_vm3, %v4111_v53  ;;  %3488 = vst.msk [vmem:[%s5281_s29 + $0x22c] sm:$0xf] %vm3348_vm3, %v4223_v54  ;;  %v2266_v60 = vmax.f32 %v1464_v56, 0.0  ;;  %v2378_v61 = vmax.f32 %v1912_v57, 0.0 }
 0x14c   : > { %v1466_v62 = vpop.f32.mrf.mxu0  ;;  %v1914_v63 = vpop.f32.mrf.mxu1  ;;  %v5616_v59 = vld [vmem:[%s6202_s2] ss:$0 sm:$0xff] }
 0x14d   : > { %v4112_v3 = vpack.c.bf16 %v2266_v60, %v2266_v60  ;;  %v4224_v4 = vpack.c.bf16 %v2378_v61, %v2378_v61  ;;  %v1467_v5 = vadd.f32 %v5266_v55, %v1466_v62  ;;  %v1915_v6 = vadd.f32 %v5266_v55, %v1914_v63 }
 0x14e   : > { %v4485_v7 = vpop.f32.mrf.mxu0  ;;  %v4709_v8 = vpop.f32.mrf.mxu1 }
 0x14f   : > { %3377 = vst.msk [vmem:[%s5281_s29 + $0x70] sm:$0xf] %vm3348_vm3, %v4112_v3  ;;  %3489 = vst.msk [vmem:[%s5281_s29 + $0x230] sm:$0xf] %vm3348_vm3, %v4224_v4  ;;  %v2267_v9 = vmax.f32 %v1467_v5, 0.0  ;;  %v2379_v10 = vmax.f32 %v1915_v6, 0.0 }
 0x150   : > { %v1471_v11 = vpop.f32.mrf.mxu0  ;;  %4583 = vmatmul.mubr.msk.bf16.gmra.mxu0 %vm979_vm2, %v4967_v0  ;;  %v1919_v12 = vpop.f32.mrf.mxu1  ;;  %4807 = vmatmul.mubr.msk.bf16.gmra.mxu1 %vm979_vm2, %v4968_v2  ;;  %v4973_v5 = vld [vmem:[%s5067_s24 + $0x150] sm:$0xff]  }
 0x151   : > { %v4113_v13 = vpack.c.bf16 %v2267_v9, %v2267_v9  ;;  %v4225_v14 = vpack.c.bf16 %v2379_v10, %v2379_v10  ;;  %v1472_v15 = vadd.f32 %v5266_v55, %v1471_v11  ;;  %v1920_v16 = vadd.f32 %v5266_v55, %v1919_v12  ;;  %4586 = vmatprep.mubr.msk.bf16.mxu0 %vm5011_vm1, %v5010_v1  ;;  %v4974_v6 = vld [vmem:[%s5067_s24 + $0x310] sm:$0xff]  }
 0x152   : > { %v4488_v17 = vpop.f32.mrf.mxu0  ;;  %v4712_v18 = vpop.f32.mrf.mxu1  ;;  %4810 = vmatprep.mubr.msk.bf16.mxu1 %vm5011_vm1, %v5010_v1 }
 0x153   : > { %3378 = vst.msk [vmem:[%s5281_s29 + $0x74] sm:$0xf] %vm3348_vm3, %v4113_v13  ;;  %3490 = vst.msk [vmem:[%s5281_s29 + $0x234] sm:$0xf] %vm3348_vm3, %v4225_v14  ;;  %v2268_v19 = vmax.f32 %v1472_v15, 0.0  ;;  %v2380_v20 = vmax.f32 %v1920_v16, 0.0 }
 0x154   : > { %v1474_v21 = vpop.f32.mrf.mxu0  ;;  %v1922_v22 = vpop.f32.mrf.mxu1 }
 0x155   : > { %v4114_v25 = vpack.c.bf16 %v2268_v19, %v2268_v19  ;;  %v4226_v26 = vpack.c.bf16 %v2380_v20, %v2380_v20  ;;  %v1475_v27 = vadd.f32 %v5266_v55, %v1474_v21  ;;  %v1923_v28 = vadd.f32 %v5266_v55, %v1922_v22 }
 0x156   : > { %v4489_v29 = vpop.f32.mrf.mxu0  ;;  %v4713_v30 = vpop.f32.mrf.mxu1 }
 0x157   : > { %3379 = vst.msk [vmem:[%s5281_s29 + $0x78] sm:$0xf] %vm3348_vm3, %v4114_v25  ;;  %3491 = vst.msk [vmem:[%s5281_s29 + $0x238] sm:$0xf] %vm3348_vm3, %v4226_v26  ;;  %v2269_v31 = vmax.f32 %v1475_v27, 0.0  ;;  %v2381_v32 = vmax.f32 %v1923_v28, 0.0 }
 0x158   : > { %v1479_v33 = vpop.f32.mrf.mxu0  ;;  %4587 = vmatmul.mubr.msk.bf16.gmra.mxu0 %vm979_vm2, %v4969_v23  ;;  %v1927_v34 = vpop.f32.mrf.mxu1  ;;  %4811 = vmatmul.mubr.msk.bf16.gmra.mxu1 %vm979_vm2, %v4970_v24  ;;  %v4975_v27 = vld [vmem:[%s5067_s24 + $0x158] sm:$0xff]  }
 0x159   : > { %v4115_v35 = vpack.c.bf16 %v2269_v31, %v2269_v31  ;;  %v4227_v36 = vpack.c.bf16 %v2381_v32, %v2381_v32  ;;  %v1480_v37 = vadd.f32 %v5266_v55, %v1479_v33  ;;  %v1928_v38 = vadd.f32 %v5266_v55, %v1927_v34  ;;  %4590 = vmatprep.mubr.msk.bf16.mxu0 %vm5011_vm1, %v5010_v1  ;;  %v4976_v28 = vld [vmem:[%s5067_s24 + $0x318] sm:$0xff]  }
 0x15a   : > { %v4492_v39 = vpop.f32.mrf.mxu0  ;;  %v4716_v40 = vpop.f32.mrf.mxu1  ;;  %4814 = vmatprep.mubr.msk.bf16.mxu1 %vm5011_vm1, %v5010_v1 }
 0x15b   : > { %3380 = vst.msk [vmem:[%s5281_s29 + $0x7c] sm:$0xf] %vm3348_vm3, %v4115_v35  ;;  %3492 = vst.msk [vmem:[%s5281_s29 + $0x23c] sm:$0xf] %vm3348_vm3, %v4227_v36  ;;  %v2270_v41 = vmax.f32 %v1480_v37, 0.0  ;;  %v2382_v42 = vmax.f32 %v1928_v38, 0.0 }
 0x15c   : > { %v1482_v43 = vpop.f32.mrf.mxu0  ;;  %v1930_v44 = vpop.f32.mrf.mxu1 }
 0x15d   : > { %v4116_v47 = vpack.c.bf16 %v2270_v41, %v2270_v41  ;;  %v4228_v48 = vpack.c.bf16 %v2382_v42, %v2382_v42  ;;  %v1483_v49 = vadd.f32 %v5266_v55, %v1482_v43  ;;  %v1931_v50 = vadd.f32 %v5266_v55, %v1930_v44 }
 0x15e   : > { %v4493_v51 = vpop.f32.mrf.mxu0  ;;  %v4717_v52 = vpop.f32.mrf.mxu1 }
 0x15f   : > { %3381 = vst.msk [vmem:[%s5281_s29 + $0x80] sm:$0xf] %vm3348_vm3, %v4116_v47  ;;  %3493 = vst.msk [vmem:[%s5281_s29 + $0x240] sm:$0xf] %vm3348_vm3, %v4228_v48  ;;  %v2271_v53 = vmax.f32 %v1483_v49, 0.0  ;;  %v2383_v54 = vmax.f32 %v1931_v50, 0.0 }
 0x160   : > { %v1487_v56 = vpop.f32.mrf.mxu0  ;;  %4591 = vmatmul.mubr.msk.bf16.gmra.mxu0 %vm979_vm2, %v4971_v45  ;;  %v1935_v57 = vpop.f32.mrf.mxu1  ;;  %4815 = vmatmul.mubr.msk.bf16.gmra.mxu1 %vm979_vm2, %v4972_v46  ;;  %v4977_v49 = vld [vmem:[%s5067_s24 + $0x160] sm:$0xff]  }
 0x161   : > { %v4117_v58 = vpack.c.bf16 %v2271_v53, %v2271_v53  ;;  %v4229_v55 = vpack.c.bf16 %v2383_v54, %v2383_v54  ;;  %v1488_v60 = vadd.f32 %v5616_v59, %v1487_v56  ;;  %v1936_v61 = vadd.f32 %v5616_v59, %v1935_v57  ;;  %4594 = vmatprep.mubr.msk.bf16.mxu0 %vm5011_vm1, %v5010_v1  ;;  %v4978_v50 = vld [vmem:[%s5067_s24 + $0x320] sm:$0xff]  }
 0x162   : > { %v4496_v62 = vpop.f32.mrf.mxu0  ;;  %v4720_v63 = vpop.f32.mrf.mxu1  ;;  %4818 = vmatprep.mubr.msk.bf16.mxu1 %vm5011_vm1, %v5010_v1 }
 0x163   : > { %3382 = vst.msk [vmem:[%s5281_s29 + $0x84] sm:$0xf] %vm3348_vm3, %v4117_v58  ;;  %3494 = vst.msk [vmem:[%s5281_s29 + $0x244] sm:$0xf] %vm3348_vm3, %v4229_v55  ;;  %v2272_v0 = vmax.f32 %v1488_v60, 0.0  ;;  %v2384_v2 = vmax.f32 %v1936_v61, 0.0 }
 0x164   : > { %v1490_v3 = vpop.f32.mrf.mxu0  ;;  %v1938_v4 = vpop.f32.mrf.mxu1 }
 0x165   : > { %v4118_v7 = vpack.c.bf16 %v2272_v0, %v2272_v0  ;;  %v4230_v8 = vpack.c.bf16 %v2384_v2, %v2384_v2  ;;  %v1491_v9 = vadd.f32 %v5616_v59, %v1490_v3  ;;  %v1939_v10 = vadd.f32 %v5616_v59, %v1938_v4 }
 0x166   : > { %v4497_v11 = vpop.f32.mrf.mxu0  ;;  %v4721_v12 = vpop.f32.mrf.mxu1 }
 0x167   : > { %3383 = vst.msk [vmem:[%s5281_s29 + $0x88] sm:$0xf] %vm3348_vm3, %v4118_v7  ;;  %3495 = vst.msk [vmem:[%s5281_s29 + $0x248] sm:$0xf] %vm3348_vm3, %v4230_v8  ;;  %v2273_v13 = vmax.f32 %v1491_v9, 0.0  ;;  %v2385_v14 = vmax.f32 %v1939_v10, 0.0 }
 0x168   : > { %v1495_v15 = vpop.f32.mrf.mxu0  ;;  %4595 = vmatmul.mubr.msk.bf16.gmra.mxu0 %vm979_vm2, %v4973_v5  ;;  %v1943_v16 = vpop.f32.mrf.mxu1  ;;  %4819 = vmatmul.mubr.msk.bf16.gmra.mxu1 %vm979_vm2, %v4974_v6  ;;  %v4979_v9 = vld [vmem:[%s5067_s24 + $0x168] sm:$0xff]  }
 0x169   : > { %v4119_v17 = vpack.c.bf16 %v2273_v13, %v2273_v13  ;;  %v4231_v18 = vpack.c.bf16 %v2385_v14, %v2385_v14  ;;  %v1496_v19 = vadd.f32 %v5616_v59, %v1495_v15  ;;  %v1944_v20 = vadd.f32 %v5616_v59, %v1943_v16  ;;  %4598 = vmatprep.mubr.msk.bf16.mxu0 %vm5011_vm1, %v5010_v1  ;;  %v4980_v10 = vld [vmem:[%s5067_s24 + $0x328] sm:$0xff]  }
 0x16a   : > { %v4500_v21 = vpop.f32.mrf.mxu0  ;;  %v4724_v22 = vpop.f32.mrf.mxu1  ;;  %4822 = vmatprep.mubr.msk.bf16.mxu1 %vm5011_vm1, %v5010_v1 }
 0x16b   : > { %3384 = vst.msk [vmem:[%s5281_s29 + $0x8c] sm:$0xf] %vm3348_vm3, %v4119_v17  ;;  %3496 = vst.msk [vmem:[%s5281_s29 + $0x24c] sm:$0xf] %vm3348_vm3, %v4231_v18  ;;  %v2274_v23 = vmax.f32 %v1496_v19, 0.0  ;;  %v2386_v24 = vmax.f32 %v1944_v20, 0.0 }
 0x16c   : > { %v1498_v25 = vpop.f32.mrf.mxu0  ;;  %v1946_v26 = vpop.f32.mrf.mxu1 }
 0x16d   : > { %v4120_v29 = vpack.c.bf16 %v2274_v23, %v2274_v23  ;;  %v4232_v30 = vpack.c.bf16 %v2386_v24, %v2386_v24  ;;  %v1499_v31 = vadd.f32 %v5616_v59, %v1498_v25  ;;  %v1947_v32 = vadd.f32 %v5616_v59, %v1946_v26 }
 0x16e   : > { %v4501_v33 = vpop.f32.mrf.mxu0  ;;  %v4725_v34 = vpop.f32.mrf.mxu1 }
 0x16f   : > { %3385 = vst.msk [vmem:[%s5281_s29 + $0x90] sm:$0xf] %vm3348_vm3, %v4120_v29  ;;  %3497 = vst.msk [vmem:[%s5281_s29 + $0x250] sm:$0xf] %vm3348_vm3, %v4232_v30  ;;  %v2275_v35 = vmax.f32 %v1499_v31, 0.0  ;;  %v2387_v36 = vmax.f32 %v1947_v32, 0.0 }
 0x170   : > { %v1503_v37 = vpop.f32.mrf.mxu0  ;;  %4599 = vmatmul.mubr.msk.bf16.gmra.mxu0 %vm979_vm2, %v4975_v27  ;;  %v1951_v38 = vpop.f32.mrf.mxu1  ;;  %4823 = vmatmul.mubr.msk.bf16.gmra.mxu1 %vm979_vm2, %v4976_v28  ;;  %v4981_v31 = vld [vmem:[%s5067_s24 + $0x170] sm:$0xff]  }
 0x171   : > { %v4121_v39 = vpack.c.bf16 %v2275_v35, %v2275_v35  ;;  %v4233_v40 = vpack.c.bf16 %v2387_v36, %v2387_v36  ;;  %v1504_v41 = vadd.f32 %v5616_v59, %v1503_v37  ;;  %v1952_v42 = vadd.f32 %v5616_v59, %v1951_v38  ;;  %4602 = vmatprep.mubr.msk.bf16.mxu0 %vm5011_vm1, %v5010_v1  ;;  %v4982_v32 = vld [vmem:[%s5067_s24 + $0x330] sm:$0xff]  }
 0x172   : > { %v4504_v43 = vpop.f32.mrf.mxu0  ;;  %v4728_v44 = vpop.f32.mrf.mxu1  ;;  %4826 = vmatprep.mubr.msk.bf16.mxu1 %vm5011_vm1, %v5010_v1 }
 0x173   : > { %3386 = vst.msk [vmem:[%s5281_s29 + $0x94] sm:$0xf] %vm3348_vm3, %v4121_v39  ;;  %3498 = vst.msk [vmem:[%s5281_s29 + $0x254] sm:$0xf] %vm3348_vm3, %v4233_v40  ;;  %v2276_v45 = vmax.f32 %v1504_v41, 0.0  ;;  %v2388_v46 = vmax.f32 %v1952_v42, 0.0 }
 0x174   : > { %v1506_v47 = vpop.f32.mrf.mxu0  ;;  %v1954_v48 = vpop.f32.mrf.mxu1 }
 0x175   : > { %v4122_v51 = vpack.c.bf16 %v2276_v45, %v2276_v45  ;;  %v4234_v52 = vpack.c.bf16 %v2388_v46, %v2388_v46  ;;  %v1507_v53 = vadd.f32 %v5616_v59, %v1506_v47  ;;  %v1955_v54 = vadd.f32 %v5616_v59, %v1954_v48 }
 0x176   : > { %v4505_v56 = vpop.f32.mrf.mxu0  ;;  %v4729_v57 = vpop.f32.mrf.mxu1 }
 0x177   : > { %3387 = vst.msk [vmem:[%s5281_s29 + $0x98] sm:$0xf] %vm3348_vm3, %v4122_v51  ;;  %3499 = vst.msk [vmem:[%s5281_s29 + $0x258] sm:$0xf] %vm3348_vm3, %v4234_v52  ;;  %v2277_v58 = vmax.f32 %v1507_v53, 0.0  ;;  %v2389_v55 = vmax.f32 %v1955_v54, 0.0 }
 0x178   : > { %v1511_v60 = vpop.f32.mrf.mxu0  ;;  %4603 = vmatmul.mubr.msk.bf16.gmra.mxu0 %vm979_vm2, %v4977_v49  ;;  %v1959_v61 = vpop.f32.mrf.mxu1  ;;  %4827 = vmatmul.mubr.msk.bf16.gmra.mxu1 %vm979_vm2, %v4978_v50  ;;  %v4983_v53 = vld [vmem:[%s5067_s24 + $0x178] sm:$0xff]  }
 0x179   : > { %v4123_v62 = vpack.c.bf16 %v2277_v58, %v2277_v58  ;;  %v4235_v63 = vpack.c.bf16 %v2389_v55, %v2389_v55  ;;  %v1512_v0 = vadd.f32 %v5616_v59, %v1511_v60  ;;  %v1960_v2 = vadd.f32 %v5616_v59, %v1959_v61  ;;  %4606 = vmatprep.mubr.msk.bf16.mxu0 %vm5011_vm1, %v5010_v1  ;;  %v4984_v54 = vld [vmem:[%s5067_s24 + $0x338] sm:$0xff]  }
 0x17a   : > { %v4508_v3 = vpop.f32.mrf.mxu0  ;;  %v4732_v4 = vpop.f32.mrf.mxu1  ;;  %4830 = vmatprep.mubr.msk.bf16.mxu1 %vm5011_vm1, %v5010_v1 }
 0x17b   : > { %3388 = vst.msk [vmem:[%s5281_s29 + $0x9c] sm:$0xf] %vm3348_vm3, %v4123_v62  ;;  %3500 = vst.msk [vmem:[%s5281_s29 + $0x25c] sm:$0xf] %vm3348_vm3, %v4235_v63  ;;  %v2278_v5 = vmax.f32 %v1512_v0, 0.0  ;;  %v2390_v6 = vmax.f32 %v1960_v2, 0.0 }
 0x17c   : > { %v1514_v7 = vpop.f32.mrf.mxu0  ;;  %v1962_v8 = vpop.f32.mrf.mxu1 }
 0x17d   : > { %v4124_v11 = vpack.c.bf16 %v2278_v5, %v2278_v5  ;;  %v4236_v12 = vpack.c.bf16 %v2390_v6, %v2390_v6  ;;  %v1515_v13 = vadd.f32 %v5616_v59, %v1514_v7  ;;  %v1963_v14 = vadd.f32 %v5616_v59, %v1962_v8 }
 0x17e   : > { %v4509_v15 = vpop.f32.mrf.mxu0  ;;  %v4733_v16 = vpop.f32.mrf.mxu1 }
 0x17f   : > { %3389 = vst.msk [vmem:[%s5281_s29 + $0xa0] sm:$0xf] %vm3348_vm3, %v4124_v11  ;;  %3501 = vst.msk [vmem:[%s5281_s29 + $0x260] sm:$0xf] %vm3348_vm3, %v4236_v12  ;;  %v2279_v17 = vmax.f32 %v1515_v13, 0.0  ;;  %v2391_v18 = vmax.f32 %v1963_v14, 0.0 }
 0x180   : > { %v1519_v19 = vpop.f32.mrf.mxu0  ;;  %4607 = vmatmul.mubr.msk.bf16.gmra.mxu0 %vm979_vm2, %v4979_v9  ;;  %v1967_v20 = vpop.f32.mrf.mxu1  ;;  %4831 = vmatmul.mubr.msk.bf16.gmra.mxu1 %vm979_vm2, %v4980_v10  ;;  %v4985_v13 = vld [vmem:[%s5067_s24 + $0x180] sm:$0xff]  }
 0x181   : > { %v4125_v21 = vpack.c.bf16 %v2279_v17, %v2279_v17  ;;  %v4237_v22 = vpack.c.bf16 %v2391_v18, %v2391_v18  ;;  %v1520_v23 = vadd.f32 %v5616_v59, %v1519_v19  ;;  %v1968_v24 = vadd.f32 %v5616_v59, %v1967_v20  ;;  %4610 = vmatprep.mubr.msk.bf16.mxu0 %vm5011_vm1, %v5010_v1  ;;  %v4986_v14 = vld [vmem:[%s5067_s24 + $0x340] sm:$0xff]  }
 0x182   : > { %v4512_v25 = vpop.f32.mrf.mxu0  ;;  %v4736_v26 = vpop.f32.mrf.mxu1  ;;  %4834 = vmatprep.mubr.msk.bf16.mxu1 %vm5011_vm1, %v5010_v1 }
 0x183   : > { %3390 = vst.msk [vmem:[%s5281_s29 + $0xa4] sm:$0xf] %vm3348_vm3, %v4125_v21  ;;  %3502 = vst.msk [vmem:[%s5281_s29 + $0x264] sm:$0xf] %vm3348_vm3, %v4237_v22  ;;  %v2280_v27 = vmax.f32 %v1520_v23, 0.0  ;;  %v2392_v28 = vmax.f32 %v1968_v24, 0.0 }
 0x184   : > { %v1522_v29 = vpop.f32.mrf.mxu0  ;;  %v1970_v30 = vpop.f32.mrf.mxu1 }
 0x185   : > { %v4126_v33 = vpack.c.bf16 %v2280_v27, %v2280_v27  ;;  %v4238_v34 = vpack.c.bf16 %v2392_v28, %v2392_v28  ;;  %v1523_v35 = vadd.f32 %v5616_v59, %v1522_v29  ;;  %v1971_v36 = vadd.f32 %v5616_v59, %v1970_v30 }
 0x186   : > { %v4513_v37 = vpop.f32.mrf.mxu0  ;;  %v4737_v38 = vpop.f32.mrf.mxu1 }
 0x187   : > { %3391 = vst.msk [vmem:[%s5281_s29 + $0xa8] sm:$0xf] %vm3348_vm3, %v4126_v33  ;;  %3503 = vst.msk [vmem:[%s5281_s29 + $0x268] sm:$0xf] %vm3348_vm3, %v4238_v34  ;;  %v2281_v39 = vmax.f32 %v1523_v35, 0.0  ;;  %v2393_v40 = vmax.f32 %v1971_v36, 0.0 }
 0x188   : > { %v1527_v41 = vpop.f32.mrf.mxu0  ;;  %4611 = vmatmul.mubr.msk.bf16.gmra.mxu0 %vm979_vm2, %v4981_v31  ;;  %v1975_v42 = vpop.f32.mrf.mxu1  ;;  %4835 = vmatmul.mubr.msk.bf16.gmra.mxu1 %vm979_vm2, %v4982_v32  ;;  %v4987_v35 = vld [vmem:[%s5067_s24 + $0x188] sm:$0xff]  }
 0x189   : > { %v4127_v43 = vpack.c.bf16 %v2281_v39, %v2281_v39  ;;  %v4239_v44 = vpack.c.bf16 %v2393_v40, %v2393_v40  ;;  %v1528_v45 = vadd.f32 %v5616_v59, %v1527_v41  ;;  %v1976_v46 = vadd.f32 %v5616_v59, %v1975_v42  ;;  %4614 = vmatprep.mubr.msk.bf16.mxu0 %vm5011_vm1, %v5010_v1  ;;  %v4988_v36 = vld [vmem:[%s5067_s24 + $0x348] sm:$0xff]  }
 0x18a   : > { %v4516_v47 = vpop.f32.mrf.mxu0  ;;  %v4740_v48 = vpop.f32.mrf.mxu1  ;;  %4838 = vmatprep.mubr.msk.bf16.mxu1 %vm5011_vm1, %v5010_v1 }
 0x18b   : > { %3392 = vst.msk [vmem:[%s5281_s29 + $0xac] sm:$0xf] %vm3348_vm3, %v4127_v43  ;;  %3504 = vst.msk [vmem:[%s5281_s29 + $0x26c] sm:$0xf] %vm3348_vm3, %v4239_v44  ;;  %v2282_v49 = vmax.f32 %v1528_v45, 0.0  ;;  %v2394_v50 = vmax.f32 %v1976_v46, 0.0 }
 0x18c   : > { %v1530_v51 = vpop.f32.mrf.mxu0  ;;  %v1978_v52 = vpop.f32.mrf.mxu1 }
 0x18d   : > { %v4128_v56 = vpack.c.bf16 %v2282_v49, %v2282_v49  ;;  %v4240_v57 = vpack.c.bf16 %v2394_v50, %v2394_v50  ;;  %v1531_v58 = vadd.f32 %v5616_v59, %v1530_v51  ;;  %v1979_v55 = vadd.f32 %v5616_v59, %v1978_v52 }
 0x18e   : > { %v4517_v60 = vpop.f32.mrf.mxu0  ;;  %v4741_v61 = vpop.f32.mrf.mxu1 }
 0x18f   : > { %3393 = vst.msk [vmem:[%s5281_s29 + $0xb0] sm:$0xf] %vm3348_vm3, %v4128_v56  ;;  %3505 = vst.msk [vmem:[%s5281_s29 + $0x270] sm:$0xf] %vm3348_vm3, %v4240_v57  ;;  %v2283_v62 = vmax.f32 %v1531_v58, 0.0  ;;  %v2395_v63 = vmax.f32 %v1979_v55, 0.0 }
 0x190   : > { %v1535_v0 = vpop.f32.mrf.mxu0  ;;  %4615 = vmatmul.mubr.msk.bf16.gmra.mxu0 %vm979_vm2, %v4983_v53  ;;  %v1983_v2 = vpop.f32.mrf.mxu1  ;;  %4839 = vmatmul.mubr.msk.bf16.gmra.mxu1 %vm979_vm2, %v4984_v54  ;;  %v4989_v58 = vld [vmem:[%s5067_s24 + $0x190] sm:$0xff]  }
 0x191   : > { %v4129_v3 = vpack.c.bf16 %v2283_v62, %v2283_v62  ;;  %v4241_v4 = vpack.c.bf16 %v2395_v63, %v2395_v63  ;;  %v1536_v5 = vadd.f32 %v5616_v59, %v1535_v0  ;;  %v1984_v6 = vadd.f32 %v5616_v59, %v1983_v2  ;;  %4618 = vmatprep.mubr.msk.bf16.mxu0 %vm5011_vm1, %v5010_v1  ;;  %v4990_v55 = vld [vmem:[%s5067_s24 + $0x350] sm:$0xff]  }
 0x192   : > { %v4520_v7 = vpop.f32.mrf.mxu0  ;;  %v4744_v8 = vpop.f32.mrf.mxu1  ;;  %4842 = vmatprep.mubr.msk.bf16.mxu1 %vm5011_vm1, %v5010_v1 }
 0x193   : > { %3394 = vst.msk [vmem:[%s5281_s29 + $0xb4] sm:$0xf] %vm3348_vm3, %v4129_v3  ;;  %3506 = vst.msk [vmem:[%s5281_s29 + $0x274] sm:$0xf] %vm3348_vm3, %v4241_v4  ;;  %v2284_v9 = vmax.f32 %v1536_v5, 0.0  ;;  %v2396_v10 = vmax.f32 %v1984_v6, 0.0 }
 0x194   : > { %v1538_v11 = vpop.f32.mrf.mxu0  ;;  %v1986_v12 = vpop.f32.mrf.mxu1 }
 0x195   : > { %v4130_v15 = vpack.c.bf16 %v2284_v9, %v2284_v9  ;;  %v4242_v16 = vpack.c.bf16 %v2396_v10, %v2396_v10  ;;  %v1539_v17 = vadd.f32 %v5616_v59, %v1538_v11  ;;  %v1987_v18 = vadd.f32 %v5616_v59, %v1986_v12 }
 0x196   : > { %v4521_v19 = vpop.f32.mrf.mxu0  ;;  %v4745_v20 = vpop.f32.mrf.mxu1 }
 0x197   : > { %3395 = vst.msk [vmem:[%s5281_s29 + $0xb8] sm:$0xf] %vm3348_vm3, %v4130_v15  ;;  %3507 = vst.msk [vmem:[%s5281_s29 + $0x278] sm:$0xf] %vm3348_vm3, %v4242_v16  ;;  %v2285_v21 = vmax.f32 %v1539_v17, 0.0  ;;  %v2397_v22 = vmax.f32 %v1987_v18, 0.0 }
 0x198   : > { %v1543_v23 = vpop.f32.mrf.mxu0  ;;  %4619 = vmatmul.mubr.msk.bf16.gmra.mxu0 %vm979_vm2, %v4985_v13  ;;  %v1991_v24 = vpop.f32.mrf.mxu1  ;;  %4843 = vmatmul.mubr.msk.bf16.gmra.mxu1 %vm979_vm2, %v4986_v14  ;;  %v4991_v17 = vld [vmem:[%s5067_s24 + $0x198] sm:$0xff]  }
 0x199   : > { %v4131_v25 = vpack.c.bf16 %v2285_v21, %v2285_v21  ;;  %v4243_v26 = vpack.c.bf16 %v2397_v22, %v2397_v22  ;;  %v1544_v27 = vadd.f32 %v5616_v59, %v1543_v23  ;;  %v1992_v28 = vadd.f32 %v5616_v59, %v1991_v24  ;;  %4622 = vmatprep.mubr.msk.bf16.mxu0 %vm5011_vm1, %v5010_v1  ;;  %v4992_v18 = vld [vmem:[%s5067_s24 + $0x358] sm:$0xff]  }
 0x19a   : > { %v4524_v29 = vpop.f32.mrf.mxu0  ;;  %v4748_v30 = vpop.f32.mrf.mxu1  ;;  %4846 = vmatprep.mubr.msk.bf16.mxu1 %vm5011_vm1, %v5010_v1 }
 0x19b   : > { %3396 = vst.msk [vmem:[%s5281_s29 + $0xbc] sm:$0xf] %vm3348_vm3, %v4131_v25  ;;  %3508 = vst.msk [vmem:[%s5281_s29 + $0x27c] sm:$0xf] %vm3348_vm3, %v4243_v26  ;;  %v2286_v31 = vmax.f32 %v1544_v27, 0.0  ;;  %v2398_v32 = vmax.f32 %v1992_v28, 0.0 }
 0x19c   : > { %v1546_v33 = vpop.f32.mrf.mxu0  ;;  %v1994_v34 = vpop.f32.mrf.mxu1 }
 0x19d   : > { %v4132_v37 = vpack.c.bf16 %v2286_v31, %v2286_v31  ;;  %v4244_v38 = vpack.c.bf16 %v2398_v32, %v2398_v32  ;;  %v1547_v39 = vadd.f32 %v5616_v59, %v1546_v33  ;;  %v1995_v40 = vadd.f32 %v5616_v59, %v1994_v34 }
 0x19e   : > { %v4525_v41 = vpop.f32.mrf.mxu0  ;;  %v4749_v42 = vpop.f32.mrf.mxu1 }
 0x19f   : > { %3397 = vst.msk [vmem:[%s5281_s29 + $0xc0] sm:$0xf] %vm3348_vm3, %v4132_v37  ;;  %3509 = vst.msk [vmem:[%s5281_s29 + $0x280] sm:$0xf] %vm3348_vm3, %v4244_v38  ;;  %v2287_v43 = vmax.f32 %v1547_v39, 0.0  ;;  %v2399_v44 = vmax.f32 %v1995_v40, 0.0 }
 0x1a0   : > { %v1551_v45 = vpop.f32.mrf.mxu0  ;;  %4623 = vmatmul.mubr.msk.bf16.gmra.mxu0 %vm979_vm2, %v4987_v35  ;;  %v1999_v46 = vpop.f32.mrf.mxu1  ;;  %4847 = vmatmul.mubr.msk.bf16.gmra.mxu1 %vm979_vm2, %v4988_v36  ;;  %v4993_v39 = vld [vmem:[%s5067_s24 + $0x1a0] sm:$0xff]  }
 0x1a1   : > { %v4133_v47 = vpack.c.bf16 %v2287_v43, %v2287_v43  ;;  %v4245_v48 = vpack.c.bf16 %v2399_v44, %v2399_v44  ;;  %v1552_v49 = vadd.f32 %v5616_v59, %v1551_v45  ;;  %v2000_v50 = vadd.f32 %v5616_v59, %v1999_v46  ;;  %4626 = vmatprep.mubr.msk.bf16.mxu0 %vm5011_vm1, %v5010_v1  ;;  %v4994_v40 = vld [vmem:[%s5067_s24 + $0x360] sm:$0xff]  }
 0x1a2   : > { %v4528_v51 = vpop.f32.mrf.mxu0  ;;  %v4752_v52 = vpop.f32.mrf.mxu1  ;;  %4850 = vmatprep.mubr.msk.bf16.mxu1 %vm5011_vm1, %v5010_v1 }
 0x1a3   : > { %3398 = vst.msk [vmem:[%s5281_s29 + $0xc4] sm:$0xf] %vm3348_vm3, %v4133_v47  ;;  %3510 = vst.msk [vmem:[%s5281_s29 + $0x284] sm:$0xf] %vm3348_vm3, %v4245_v48  ;;  %v2288_v53 = vmax.f32 %v1552_v49, 0.0  ;;  %v2400_v54 = vmax.f32 %v2000_v50, 0.0 }
 0x1a4   : > { %v1554_v56 = vpop.f32.mrf.mxu0  ;;  %v2002_v57 = vpop.f32.mrf.mxu1 }
 0x1a5   : > { %v4134_v60 = vpack.c.bf16 %v2288_v53, %v2288_v53  ;;  %v4246_v61 = vpack.c.bf16 %v2400_v54, %v2400_v54  ;;  %v1555_v62 = vadd.f32 %v5616_v59, %v1554_v56  ;;  %v2003_v63 = vadd.f32 %v5616_v59, %v2002_v57 }
 0x1a6   : > { %v4529_v0 = vpop.f32.mrf.mxu0  ;;  %v4753_v2 = vpop.f32.mrf.mxu1 }
 0x1a7   : > { %3399 = vst.msk [vmem:[%s5281_s29 + $0xc8] sm:$0xf] %vm3348_vm3, %v4134_v60  ;;  %3511 = vst.msk [vmem:[%s5281_s29 + $0x288] sm:$0xf] %vm3348_vm3, %v4246_v61  ;;  %v2289_v3 = vmax.f32 %v1555_v62, 0.0  ;;  %v2401_v4 = vmax.f32 %v2003_v63, 0.0 }
 0x1a8   : > { %v1559_v5 = vpop.f32.mrf.mxu0  ;;  %4627 = vmatmul.mubr.msk.bf16.gmra.mxu0 %vm979_vm2, %v4989_v58  ;;  %v2007_v6 = vpop.f32.mrf.mxu1  ;;  %4851 = vmatmul.mubr.msk.bf16.gmra.mxu1 %vm979_vm2, %v4990_v55  ;;  %v4995_v62 = vld [vmem:[%s5067_s24 + $0x1a8] sm:$0xff]  }
 0x1a9   : > { %v4135_v7 = vpack.c.bf16 %v2289_v3, %v2289_v3  ;;  %v4247_v8 = vpack.c.bf16 %v2401_v4, %v2401_v4  ;;  %v1560_v9 = vadd.f32 %v5616_v59, %v1559_v5  ;;  %v2008_v10 = vadd.f32 %v5616_v59, %v2007_v6  ;;  %4630 = vmatprep.mubr.msk.bf16.mxu0 %vm5011_vm1, %v5010_v1  ;;  %v4996_v63 = vld [vmem:[%s5067_s24 + $0x368] sm:$0xff]  }
 0x1aa   : > { %v4532_v11 = vpop.f32.mrf.mxu0  ;;  %v4756_v12 = vpop.f32.mrf.mxu1  ;;  %4854 = vmatprep.mubr.msk.bf16.mxu1 %vm5011_vm1, %v5010_v1 }
 0x1ab   : > { %3400 = vst.msk [vmem:[%s5281_s29 + $0xcc] sm:$0xf] %vm3348_vm3, %v4135_v7  ;;  %3512 = vst.msk [vmem:[%s5281_s29 + $0x28c] sm:$0xf] %vm3348_vm3, %v4247_v8  ;;  %v2290_v13 = vmax.f32 %v1560_v9, 0.0  ;;  %v2402_v14 = vmax.f32 %v2008_v10, 0.0 }
 0x1ac   : > { %v1562_v15 = vpop.f32.mrf.mxu0  ;;  %v2010_v16 = vpop.f32.mrf.mxu1 }
 0x1ad   : > { %v4136_v19 = vpack.c.bf16 %v2290_v13, %v2290_v13  ;;  %v4248_v20 = vpack.c.bf16 %v2402_v14, %v2402_v14  ;;  %v1563_v21 = vadd.f32 %v5616_v59, %v1562_v15  ;;  %v2011_v22 = vadd.f32 %v5616_v59, %v2010_v16 }
 0x1ae   : > { %v4533_v23 = vpop.f32.mrf.mxu0  ;;  %v4757_v24 = vpop.f32.mrf.mxu1 }
 0x1af   : > { %3401 = vst.msk [vmem:[%s5281_s29 + $0xd0] sm:$0xf] %vm3348_vm3, %v4136_v19  ;;  %3513 = vst.msk [vmem:[%s5281_s29 + $0x290] sm:$0xf] %vm3348_vm3, %v4248_v20  ;;  %v2291_v25 = vmax.f32 %v1563_v21, 0.0  ;;  %v2403_v26 = vmax.f32 %v2011_v22, 0.0 }
 0x1b0   : > { %v1567_v27 = vpop.f32.mrf.mxu0  ;;  %4631 = vmatmul.mubr.msk.bf16.gmra.mxu0 %vm979_vm2, %v4991_v17  ;;  %v2015_v28 = vpop.f32.mrf.mxu1  ;;  %4855 = vmatmul.mubr.msk.bf16.gmra.mxu1 %vm979_vm2, %v4992_v18  ;;  %v4997_v21 = vld [vmem:[%s5067_s24 + $0x1b0] sm:$0xff]  }
 0x1b1   : > { %v4137_v29 = vpack.c.bf16 %v2291_v25, %v2291_v25  ;;  %v4249_v30 = vpack.c.bf16 %v2403_v26, %v2403_v26  ;;  %v1568_v31 = vadd.f32 %v5616_v59, %v1567_v27  ;;  %v2016_v32 = vadd.f32 %v5616_v59, %v2015_v28  ;;  %4634 = vmatprep.mubr.msk.bf16.mxu0 %vm5011_vm1, %v5010_v1  ;;  %v4998_v22 = vld [vmem:[%s5067_s24 + $0x370] sm:$0xff]  }
 0x1b2   : > { %v4536_v33 = vpop.f32.mrf.mxu0  ;;  %v4760_v34 = vpop.f32.mrf.mxu1  ;;  %4858 = vmatprep.mubr.msk.bf16.mxu1 %vm5011_vm1, %v5010_v1 }
 0x1b3   : > { %3402 = vst.msk [vmem:[%s5281_s29 + $0xd4] sm:$0xf] %vm3348_vm3, %v4137_v29  ;;  %3514 = vst.msk [vmem:[%s5281_s29 + $0x294] sm:$0xf] %vm3348_vm3, %v4249_v30  ;;  %v2292_v35 = vmax.f32 %v1568_v31, 0.0  ;;  %v2404_v36 = vmax.f32 %v2016_v32, 0.0 }
 0x1b4   : > { %v1570_v37 = vpop.f32.mrf.mxu0  ;;  %v2018_v38 = vpop.f32.mrf.mxu1 }
 0x1b5   : > { %v4138_v41 = vpack.c.bf16 %v2292_v35, %v2292_v35  ;;  %v4250_v42 = vpack.c.bf16 %v2404_v36, %v2404_v36  ;;  %v1571_v43 = vadd.f32 %v5616_v59, %v1570_v37  ;;  %v2019_v44 = vadd.f32 %v5616_v59, %v2018_v38 }
 0x1b6   : > { %v4537_v45 = vpop.f32.mrf.mxu0  ;;  %v4761_v46 = vpop.f32.mrf.mxu1 }
 0x1b7   : > { %3403 = vst.msk [vmem:[%s5281_s29 + $0xd8] sm:$0xf] %vm3348_vm3, %v4138_v41  ;;  %3515 = vst.msk [vmem:[%s5281_s29 + $0x298] sm:$0xf] %vm3348_vm3, %v4250_v42  ;;  %v2293_v47 = vmax.f32 %v1571_v43, 0.0  ;;  %v2405_v48 = vmax.f32 %v2019_v44, 0.0 }
 0x1b8   : > { %v1575_v49 = vpop.f32.mrf.mxu0  ;;  %4635 = vmatmul.mubr.msk.bf16.gmra.mxu0 %vm979_vm2, %v4993_v39  ;;  %v2023_v50 = vpop.f32.mrf.mxu1  ;;  %4859 = vmatmul.mubr.msk.bf16.gmra.mxu1 %vm979_vm2, %v4994_v40  ;;  %v4999_v43 = vld [vmem:[%s5067_s24 + $0x1b8] sm:$0xff]  }
 0x1b9   : > { %v4139_v51 = vpack.c.bf16 %v2293_v47, %v2293_v47  ;;  %v4251_v52 = vpack.c.bf16 %v2405_v48, %v2405_v48  ;;  %v1576_v53 = vadd.f32 %v5616_v59, %v1575_v49  ;;  %v2024_v54 = vadd.f32 %v5616_v59, %v2023_v50  ;;  %4638 = vmatprep.mubr.msk.bf16.mxu0 %vm5011_vm1, %v5010_v1 }
 0x1ba   : > { %v4540_v56 = vpop.f32.mrf.mxu0  ;;  %v4764_v57 = vpop.f32.mrf.mxu1  ;;  %4862 = vmatprep.mubr.msk.bf16.mxu1 %vm5011_vm1, %v5010_v1 }
 0x1bb   : > { %3404 = vst.msk [vmem:[%s5281_s29 + $0xdc] sm:$0xf] %vm3348_vm3, %v4139_v51  ;;  %3516 = vst.msk [vmem:[%s5281_s29 + $0x29c] sm:$0xf] %vm3348_vm3, %v4251_v52  ;;  %v2294_v58 = vmax.f32 %v1576_v53, 0.0  ;;  %v2406_v55 = vmax.f32 %v2024_v54, 0.0 }
 0x1bc   : > { %v1578_v60 = vpop.f32.mrf.mxu0  ;;  %v2026_v61 = vpop.f32.mrf.mxu1 }
 0x1bd   : > { %v4140_v0 = vpack.c.bf16 %v2294_v58, %v2294_v58  ;;  %v4252_v2 = vpack.c.bf16 %v2406_v55, %v2406_v55  ;;  %v1579_v3 = vadd.f32 %v5616_v59, %v1578_v60  ;;  %v2027_v4 = vadd.f32 %v5616_v59, %v2026_v61 }
 0x1be   : > { %v4541_v5 = vpop.f32.mrf.mxu0  ;;  %v4765_v6 = vpop.f32.mrf.mxu1 }
 0x1bf   : > { %3405 = vst.msk [vmem:[%s5281_s29 + $0xe0] sm:$0xf] %vm3348_vm3, %v4140_v0  ;;  %3517 = vst.msk [vmem:[%s5281_s29 + $0x2a0] sm:$0xf] %vm3348_vm3, %v4252_v2  ;;  %v2295_v7 = vmax.f32 %v1579_v3, 0.0  ;;  %v2407_v8 = vmax.f32 %v2027_v4, 0.0 }
 0x1c0   : > { %v1583_v9 = vpop.f32.mrf.mxu0  ;;  %4639 = vmatmul.mubr.msk.bf16.gmra.mxu0 %vm979_vm2, %v4995_v62  ;;  %v2031_v10 = vpop.f32.mrf.mxu1  ;;  %4863 = vmatmul.mubr.msk.bf16.gmra.mxu1 %vm979_vm2, %v4996_v63 }
 0x1c1   : > { %v4141_v11 = vpack.c.bf16 %v2295_v7, %v2295_v7  ;;  %v4253_v12 = vpack.c.bf16 %v2407_v8, %v2407_v8  ;;  %v1584_v13 = vadd.f32 %v5616_v59, %v1583_v9  ;;  %v2032_v14 = vadd.f32 %v5616_v59, %v2031_v10  ;;  %4642 = vmatprep.mubr.msk.bf16.mxu0 %vm5011_vm1, %v5010_v1 }
 0x1c2   : > { %v4544_v15 = vpop.f32.mrf.mxu0  ;;  %v4768_v16 = vpop.f32.mrf.mxu1  ;;  %4866 = vmatprep.mubr.msk.bf16.mxu1 %vm5011_vm1, %v5010_v1 }
 0x1c3   : > { %3406 = vst.msk [vmem:[%s5281_s29 + $0xe4] sm:$0xf] %vm3348_vm3, %v4141_v11  ;;  %3518 = vst.msk [vmem:[%s5281_s29 + $0x2a4] sm:$0xf] %vm3348_vm3, %v4253_v12  ;;  %v2296_v17 = vmax.f32 %v1584_v13, 0.0  ;;  %v2408_v18 = vmax.f32 %v2032_v14, 0.0 }
 0x1c4   : > { %v1586_v19 = vpop.f32.mrf.mxu0  ;;  %v2034_v20 = vpop.f32.mrf.mxu1 }
 0x1c5   : > { %v4142_v23 = vpack.c.bf16 %v2296_v17, %v2296_v17  ;;  %v4254_v24 = vpack.c.bf16 %v2408_v18, %v2408_v18  ;;  %v1587_v25 = vadd.f32 %v5616_v59, %v1586_v19  ;;  %v2035_v26 = vadd.f32 %v5616_v59, %v2034_v20 }
 0x1c6   : > { %v4545_v27 = vpop.f32.mrf.mxu0  ;;  %v4769_v28 = vpop.f32.mrf.mxu1 }
 0x1c7   : > { %3407 = vst.msk [vmem:[%s5281_s29 + $0xe8] sm:$0xf] %vm3348_vm3, %v4142_v23  ;;  %3519 = vst.msk [vmem:[%s5281_s29 + $0x2a8] sm:$0xf] %vm3348_vm3, %v4254_v24  ;;  %v2297_v29 = vmax.f32 %v1587_v25, 0.0  ;;  %v2409_v30 = vmax.f32 %v2035_v26, 0.0 }
 0x1c8   : > { %v1591_v31 = vpop.f32.mrf.mxu0  ;;  %4643 = vmatmul.mubr.msk.bf16.gmra.mxu0 %vm979_vm2, %v4997_v21  ;;  %v2039_v32 = vpop.f32.mrf.mxu1  ;;  %4867 = vmatmul.mubr.msk.bf16.gmra.mxu1 %vm979_vm2, %v4998_v22 }
 0x1c9   : > { %v4143_v33 = vpack.c.bf16 %v2297_v29, %v2297_v29  ;;  %v4255_v34 = vpack.c.bf16 %v2409_v30, %v2409_v30  ;;  %v1592_v35 = vadd.f32 %v5616_v59, %v1591_v31  ;;  %v2040_v36 = vadd.f32 %v5616_v59, %v2039_v32  ;;  %4646 = vmatprep.mubr.msk.bf16.mxu0 %vm5011_vm1, %v5010_v1 }
 0x1ca   : > { %v4548_v37 = vpop.f32.mrf.mxu0  ;;  %v4772_v38 = vpop.f32.mrf.mxu1 }
 0x1cb   : > { %3408 = vst.msk [vmem:[%s5281_s29 + $0xec] sm:$0xf] %vm3348_vm3, %v4143_v33  ;;  %3520 = vst.msk [vmem:[%s5281_s29 + $0x2ac] sm:$0xf] %vm3348_vm3, %v4255_v34  ;;  %v2298_v39 = vmax.f32 %v1592_v35, 0.0  ;;  %v2410_v40 = vmax.f32 %v2040_v36, 0.0 }
 0x1cc   : > { %v1594_v41 = vpop.f32.mrf.mxu0  ;;  %v2042_v42 = vpop.f32.mrf.mxu1 }
 0x1cd   : > { %v4144_v44 = vpack.c.bf16 %v2298_v39, %v2298_v39  ;;  %v4256_v45 = vpack.c.bf16 %v2410_v40, %v2410_v40  ;;  %v1595_v46 = vadd.f32 %v5616_v59, %v1594_v41  ;;  %v2043_v47 = vadd.f32 %v5616_v59, %v2042_v42 }
 0x1ce   : > { %v4549_v1 = vpop.f32.mrf.mxu0  ;;  %v4773_v48 = vpop.f32.mrf.mxu1 }
 0x1cf   : > { %3409 = vst.msk [vmem:[%s5281_s29 + $0xf0] sm:$0xf] %vm3348_vm3, %v4144_v44  ;;  %3521 = vst.msk [vmem:[%s5281_s29 + $0x2b0] sm:$0xf] %vm3348_vm3, %v4256_v45  ;;  %v2299_v49 = vmax.f32 %v1595_v46, 0.0  ;;  %v2411_v50 = vmax.f32 %v2043_v47, 0.0 }
 0x1d0   : > { %v1599_v51 = vpop.f32.mrf.mxu0  ;;  %4647 = vmatmul.mubr.msk.bf16.gmra.mxu0 %vm979_vm2, %v4999_v43  ;;  %v2047_v52 = vpop.f32.mrf.mxu1 }
 0x1d1   : > { %v4145_v53 = vpack.c.bf16 %v2299_v49, %v2299_v49  ;;  %v4257_v54 = vpack.c.bf16 %v2411_v50, %v2411_v50  ;;  %v1600_v56 = vadd.f32 %v5616_v59, %v1599_v51  ;;  %v2048_v57 = vadd.f32 %v5616_v59, %v2047_v52 }
 0x1d2   : > { %v4552_v58 = vpop.f32.mrf.mxu0  ;;  %v4776_v55 = vpop.f32.mrf.mxu1 }
 0x1d3   : > { %3410 = vst.msk [vmem:[%s5281_s29 + $0xf4] sm:$0xf] %vm3348_vm3, %v4145_v53  ;;  %3522 = vst.msk [vmem:[%s5281_s29 + $0x2b4] sm:$0xf] %vm3348_vm3, %v4257_v54  ;;  %v2300_v60 = vmax.f32 %v1600_v56, 0.0  ;;  %v2412_v61 = vmax.f32 %v2048_v57, 0.0 }
 0x1d4   : > { %v1602_v62 = vpop.f32.mrf.mxu0  ;;  %v2050_v63 = vpop.f32.mrf.mxu1 }
 0x1d5   : > { %v4146_v0 = vpack.c.bf16 %v2300_v60, %v2300_v60  ;;  %v4258_v2 = vpack.c.bf16 %v2412_v61, %v2412_v61  ;;  %v1603_v3 = vadd.f32 %v5616_v59, %v1602_v62  ;;  %v2051_v4 = vadd.f32 %v5616_v59, %v2050_v63 }
 0x1d6   : > { %v4553_v5 = vpop.f32.mrf.mxu0  ;;  %v4777_v6 = vpop.f32.mrf.mxu1 }
 0x1d7   : > { %3411 = vst.msk [vmem:[%s5281_s29 + $0xf8] sm:$0xf] %vm3348_vm3, %v4146_v0  ;;  %3523 = vst.msk [vmem:[%s5281_s29 + $0x2b8] sm:$0xf] %vm3348_vm3, %v4258_v2  ;;  %v2301_v7 = vmax.f32 %v1603_v3, 0.0  ;;  %v2413_v8 = vmax.f32 %v2051_v4, 0.0 }
 0x1d8   : > { %v1607_v9 = vpop.f32.mrf.mxu0  ;;  %v2055_v10 = vpop.f32.mrf.mxu1 }
 0x1d9   : > { %v4147_v11 = vpack.c.bf16 %v2301_v7, %v2301_v7  ;;  %v4259_v12 = vpack.c.bf16 %v2413_v8, %v2413_v8  ;;  %v1608_v13 = vadd.f32 %v5616_v59, %v1607_v9  ;;  %v2056_v14 = vadd.f32 %v5616_v59, %v2055_v10  ;;  %v5945_v10 = vld [vmem:[%s6202_s2] ss:$0 sm:$0xff] }
 0x1da   : > { %v4556_v15 = vpop.f32.mrf.mxu0  ;;  %v4780_v16 = vpop.f32.mrf.mxu1 }
 0x1db   : > { %3412 = vst.msk [vmem:[%s5281_s29 + $0xfc] sm:$0xf] %vm3348_vm3, %v4147_v11  ;;  %3524 = vst.msk [vmem:[%s5281_s29 + $0x2bc] sm:$0xf] %vm3348_vm3, %v4259_v12  ;;  %v2302_v17 = vmax.f32 %v1608_v13, 0.0  ;;  %v2414_v18 = vmax.f32 %v2056_v14, 0.0 }
 0x1dc   : > { %v1610_v19 = vpop.f32.mrf.mxu0  ;;  %v2058_v20 = vpop.f32.mrf.mxu1 }
 0x1dd   : > { %v4148_v21 = vpack.c.bf16 %v2302_v17, %v2302_v17  ;;  %v4260_v22 = vpack.c.bf16 %v2414_v18, %v2414_v18  ;;  %v1611_v23 = vadd.f32 %v5616_v59, %v1610_v19  ;;  %v2059_v24 = vadd.f32 %v5616_v59, %v2058_v20 }
 0x1de   : > { %v4557_v25 = vpop.f32.mrf.mxu0  ;;  %v4781_v26 = vpop.f32.mrf.mxu1 }
 0x1df   : > { %3413 = vst.msk [vmem:[%s5281_s29 + $0x100] sm:$0xf] %vm3348_vm3, %v4148_v21  ;;  %3525 = vst.msk [vmem:[%s5281_s29 + $0x2c0] sm:$0xf] %vm3348_vm3, %v4260_v22  ;;  %v2303_v27 = vmax.f32 %v1611_v23, 0.0  ;;  %v2415_v28 = vmax.f32 %v2059_v24, 0.0 }
 0x1e0   : > { %v1615_v29 = vpop.f32.mrf.mxu0  ;;  %v2063_v30 = vpop.f32.mrf.mxu1 }
 0x1e1   : > { %v4149_v31 = vpack.c.bf16 %v2303_v27, %v2303_v27  ;;  %v4261_v32 = vpack.c.bf16 %v2415_v28, %v2415_v28  ;;  %v1616_v33 = vadd.f32 %v5616_v59, %v1615_v29  ;;  %v2064_v34 = vadd.f32 %v5616_v59, %v2063_v30 }
 0x1e2   : > { %v4560_v35 = vpop.f32.mrf.mxu0  ;;  %v4784_v36 = vpop.f32.mrf.mxu1 }
 0x1e3   : > { %3414 = vst.msk [vmem:[%s5281_s29 + $0x104] sm:$0xf] %vm3348_vm3, %v4149_v31  ;;  %3526 = vst.msk [vmem:[%s5281_s29 + $0x2c4] sm:$0xf] %vm3348_vm3, %v4261_v32  ;;  %v2304_v37 = vmax.f32 %v1616_v33, 0.0  ;;  %v2416_v38 = vmax.f32 %v2064_v34, 0.0 }
 0x1e4   : > { %v1618_v39 = vpop.f32.mrf.mxu0  ;;  %v2066_v40 = vpop.f32.mrf.mxu1 }
 0x1e5   : > { %v4150_v41 = vpack.c.bf16 %v2304_v37, %v2304_v37  ;;  %v4262_v42 = vpack.c.bf16 %v2416_v38, %v2416_v38  ;;  %v1619_v43 = vadd.f32 %v5616_v59, %v1618_v39  ;;  %v2067_v44 = vadd.f32 %v5616_v59, %v2066_v40 }
 0x1e6   : > { %v4561_v45 = vpop.f32.mrf.mxu0  ;;  %v4785_v46 = vpop.f32.mrf.mxu1 }
 0x1e7   : > { %3415 = vst.msk [vmem:[%s5281_s29 + $0x108] sm:$0xf] %vm3348_vm3, %v4150_v41  ;;  %3527 = vst.msk [vmem:[%s5281_s29 + $0x2c8] sm:$0xf] %vm3348_vm3, %v4262_v42  ;;  %v2305_v47 = vmax.f32 %v1619_v43, 0.0  ;;  %v2417_v1 = vmax.f32 %v2067_v44, 0.0 }
 0x1e8   : > { %v1623_v48 = vpop.f32.mrf.mxu0  ;;  %v2071_v49 = vpop.f32.mrf.mxu1 }
 0x1e9   : > { %v4151_v50 = vpack.c.bf16 %v2305_v47, %v2305_v47  ;;  %v4263_v51 = vpack.c.bf16 %v2417_v1, %v2417_v1  ;;  %v1624_v52 = vadd.f32 %v5616_v59, %v1623_v48  ;;  %v2072_v53 = vadd.f32 %v5616_v59, %v2071_v49 }
 0x1ea   : > { %v4564_v54 = vpop.f32.mrf.mxu0  ;;  %v4788_v56 = vpop.f32.mrf.mxu1 }
 0x1eb   : > { %3416 = vst.msk [vmem:[%s5281_s29 + $0x10c] sm:$0xf] %vm3348_vm3, %v4151_v50  ;;  %3528 = vst.msk [vmem:[%s5281_s29 + $0x2cc] sm:$0xf] %vm3348_vm3, %v4263_v51  ;;  %v2306_v57 = vmax.f32 %v1624_v52, 0.0  ;;  %v2418_v58 = vmax.f32 %v2072_v53, 0.0 }
 0x1ec   : > { %v1626_v55 = vpop.f32.mrf.mxu0  ;;  %v2074_v60 = vpop.f32.mrf.mxu1 }
 0x1ed   : > { %v4152_v61 = vpack.c.bf16 %v2306_v57, %v2306_v57  ;;  %v4264_v62 = vpack.c.bf16 %v2418_v58, %v2418_v58  ;;  %v1627_v63 = vadd.f32 %v5616_v59, %v1626_v55  ;;  %v2075_v0 = vadd.f32 %v5616_v59, %v2074_v60 }
 0x1ee   : > { %v4565_v2 = vpop.f32.mrf.mxu0  ;;  %v4789_v3 = vpop.f32.mrf.mxu1 }
 0x1ef   : > { %3417 = vst.msk [vmem:[%s5281_s29 + $0x110] sm:$0xf] %vm3348_vm3, %v4152_v61  ;;  %3529 = vst.msk [vmem:[%s5281_s29 + $0x2d0] sm:$0xf] %vm3348_vm3, %v4264_v62  ;;  %v2307_v4 = vmax.f32 %v1627_v63, 0.0  ;;  %v2419_v5 = vmax.f32 %v2075_v0, 0.0 }
 0x1f0   : > { %v1631_v6 = vpop.f32.mrf.mxu0  ;;  %v2079_v7 = vpop.f32.mrf.mxu1 }
 0x1f1   : > { %v4153_v8 = vpack.c.bf16 %v2307_v4, %v2307_v4  ;;  %v4265_v9 = vpack.c.bf16 %v2419_v5, %v2419_v5  ;;  %v1632_v59 = vadd.f32 %v5945_v10, %v1631_v6  ;;  %v2080_v11 = vadd.f32 %v5945_v10, %v2079_v7 }
 0x1f2   : > { %v4568_v12 = vpop.f32.mrf.mxu0  ;;  %v4792_v13 = vpop.f32.mrf.mxu1 }
 0x1f3   : > { %3418 = vst.msk [vmem:[%s5281_s29 + $0x114] sm:$0xf] %vm3348_vm3, %v4153_v8  ;;  %3530 = vst.msk [vmem:[%s5281_s29 + $0x2d4] sm:$0xf] %vm3348_vm3, %v4265_v9  ;;  %v2308_v14 = vmax.f32 %v1632_v59, 0.0  ;;  %v2420_v15 = vmax.f32 %v2080_v11, 0.0 }
 0x1f4   : > { %v1634_v16 = vpop.f32.mrf.mxu0  ;;  %v2082_v17 = vpop.f32.mrf.mxu1 }
 0x1f5   : > { %v4154_v18 = vpack.c.bf16 %v2308_v14, %v2308_v14  ;;  %v4266_v19 = vpack.c.bf16 %v2420_v15, %v2420_v15  ;;  %v1635_v20 = vadd.f32 %v5945_v10, %v1634_v16  ;;  %v2083_v21 = vadd.f32 %v5945_v10, %v2082_v17 }
 0x1f6   : > { %v4569_v22 = vpop.f32.mrf.mxu0  ;;  %v4793_v23 = vpop.f32.mrf.mxu1 }
 0x1f7   : > { %3419 = vst.msk [vmem:[%s5281_s29 + $0x118] sm:$0xf] %vm3348_vm3, %v4154_v18  ;;  %3531 = vst.msk [vmem:[%s5281_s29 + $0x2d8] sm:$0xf] %vm3348_vm3, %v4266_v19  ;;  %v2309_v24 = vmax.f32 %v1635_v20, 0.0  ;;  %v2421_v25 = vmax.f32 %v2083_v21, 0.0 }
 0x1f8   : > { %v1639_v26 = vpop.f32.mrf.mxu0  ;;  %v2087_v27 = vpop.f32.mrf.mxu1 }
 0x1f9   : > { %v4155_v28 = vpack.c.bf16 %v2309_v24, %v2309_v24  ;;  %v4267_v29 = vpack.c.bf16 %v2421_v25, %v2421_v25  ;;  %v1640_v30 = vadd.f32 %v5945_v10, %v1639_v26  ;;  %v2088_v31 = vadd.f32 %v5945_v10, %v2087_v27 }
 0x1fa   : > { %v4572_v32 = vpop.f32.mrf.mxu0  ;;  %v4796_v33 = vpop.f32.mrf.mxu1 }
 0x1fb   : > { %3420 = vst.msk [vmem:[%s5281_s29 + $0x11c] sm:$0xf] %vm3348_vm3, %v4155_v28  ;;  %3532 = vst.msk [vmem:[%s5281_s29 + $0x2dc] sm:$0xf] %vm3348_vm3, %v4267_v29  ;;  %v2310_v34 = vmax.f32 %v1640_v30, 0.0  ;;  %v2422_v35 = vmax.f32 %v2088_v31, 0.0 }
 0x1fc   : > { %v1642_v36 = vpop.f32.mrf.mxu0  ;;  %v2090_v37 = vpop.f32.mrf.mxu1 }
 0x1fd   : > { %v4156_v38 = vpack.c.bf16 %v2310_v34, %v2310_v34  ;;  %v4268_v39 = vpack.c.bf16 %v2422_v35, %v2422_v35  ;;  %v1643_v40 = vadd.f32 %v5945_v10, %v1642_v36  ;;  %v2091_v41 = vadd.f32 %v5945_v10, %v2090_v37 }
 0x1fe   : > { %v4573_v42 = vpop.f32.mrf.mxu0  ;;  %v4797_v43 = vpop.f32.mrf.mxu1 }
 0x1ff   : > { %3421 = vst.msk [vmem:[%s5281_s29 + $0x120] sm:$0xf] %vm3348_vm3, %v4156_v38  ;;  %3533 = vst.msk [vmem:[%s5281_s29 + $0x2e0] sm:$0xf] %vm3348_vm3, %v4268_v39  ;;  %v2311_v44 = vmax.f32 %v1643_v40, 0.0  ;;  %v2423_v45 = vmax.f32 %v2091_v41, 0.0 }
 0x200   : > { %v1647_v46 = vpop.f32.mrf.mxu0  ;;  %v2095_v47 = vpop.f32.mrf.mxu1 }
 0x201   : > { %v4157_v1 = vpack.c.bf16 %v2311_v44, %v2311_v44  ;;  %v4269_v48 = vpack.c.bf16 %v2423_v45, %v2423_v45  ;;  %v1648_v49 = vadd.f32 %v5945_v10, %v1647_v46  ;;  %v2096_v50 = vadd.f32 %v5945_v10, %v2095_v47 }
 0x202   : > { %v4576_v51 = vpop.f32.mrf.mxu0  ;;  %v4800_v52 = vpop.f32.mrf.mxu1 }
 0x203   : > { %3422 = vst.msk [vmem:[%s5281_s29 + $0x124] sm:$0xf] %vm3348_vm3, %v4157_v1  ;;  %3534 = vst.msk [vmem:[%s5281_s29 + $0x2e4] sm:$0xf] %vm3348_vm3, %v4269_v48  ;;  %v2312_v53 = vmax.f32 %v1648_v49, 0.0  ;;  %v2424_v54 = vmax.f32 %v2096_v50, 0.0 }
 0x204   : > { %v1650_v56 = vpop.f32.mrf.mxu0  ;;  %v2098_v57 = vpop.f32.mrf.mxu1 }
 0x205   : > { %v4158_v58 = vpack.c.bf16 %v2312_v53, %v2312_v53  ;;  %v4270_v55 = vpack.c.bf16 %v2424_v54, %v2424_v54  ;;  %v1651_v60 = vadd.f32 %v5945_v10, %v1650_v56  ;;  %v2099_v61 = vadd.f32 %v5945_v10, %v2098_v57 }
 0x206   : > { %v4577_v62 = vpop.f32.mrf.mxu0  ;;  %v4801_v63 = vpop.f32.mrf.mxu1 }
 0x207   : > { %3423 = vst.msk [vmem:[%s5281_s29 + $0x128] sm:$0xf] %vm3348_vm3, %v4158_v58  ;;  %3535 = vst.msk [vmem:[%s5281_s29 + $0x2e8] sm:$0xf] %vm3348_vm3, %v4270_v55  ;;  %v2313_v0 = vmax.f32 %v1651_v60, 0.0  ;;  %v2425_v2 = vmax.f32 %v2099_v61, 0.0 }
 0x208   : > { %v1655_v3 = vpop.f32.mrf.mxu0  ;;  %v2103_v4 = vpop.f32.mrf.mxu1 }
 0x209   : > { %v4159_v5 = vpack.c.bf16 %v2313_v0, %v2313_v0  ;;  %v4271_v6 = vpack.c.bf16 %v2425_v2, %v2425_v2  ;;  %v1656_v7 = vadd.f32 %v5945_v10, %v1655_v3  ;;  %v2104_v8 = vadd.f32 %v5945_v10, %v2103_v4 }
 0x20a   : > { %v4580_v9 = vpop.f32.mrf.mxu0  ;;  %v4804_v59 = vpop.f32.mrf.mxu1 }
 0x20b   : > { %3424 = vst.msk [vmem:[%s5281_s29 + $0x12c] sm:$0xf] %vm3348_vm3, %v4159_v5  ;;  %3536 = vst.msk [vmem:[%s5281_s29 + $0x2ec] sm:$0xf] %vm3348_vm3, %v4271_v6  ;;  %v2314_v11 = vmax.f32 %v1656_v7, 0.0  ;;  %v2426_v12 = vmax.f32 %v2104_v8, 0.0 }
 0x20c   : > { %v1658_v13 = vpop.f32.mrf.mxu0  ;;  %v2106_v14 = vpop.f32.mrf.mxu1 }
 0x20d   : > { %v4160_v15 = vpack.c.bf16 %v2314_v11, %v2314_v11  ;;  %v4272_v16 = vpack.c.bf16 %v2426_v12, %v2426_v12  ;;  %v1659_v17 = vadd.f32 %v5945_v10, %v1658_v13  ;;  %v2107_v18 = vadd.f32 %v5945_v10, %v2106_v14 }
 0x20e   : > { %v4581_v19 = vpop.f32.mrf.mxu0  ;;  %v4805_v20 = vpop.f32.mrf.mxu1 }
 0x20f   : > { %3425 = vst.msk [vmem:[%s5281_s29 + $0x130] sm:$0xf] %vm3348_vm3, %v4160_v15  ;;  %3537 = vst.msk [vmem:[%s5281_s29 + $0x2f0] sm:$0xf] %vm3348_vm3, %v4272_v16  ;;  %v2315_v21 = vmax.f32 %v1659_v17, 0.0  ;;  %v2427_v22 = vmax.f32 %v2107_v18, 0.0 }
 0x210   : > { %v1663_v23 = vpop.f32.mrf.mxu0  ;;  %v2111_v24 = vpop.f32.mrf.mxu1 }
 0x211   : > { %v4161_v25 = vpack.c.bf16 %v2315_v21, %v2315_v21  ;;  %v4273_v26 = vpack.c.bf16 %v2427_v22, %v2427_v22  ;;  %v1664_v27 = vadd.f32 %v5945_v10, %v1663_v23  ;;  %v2112_v28 = vadd.f32 %v5945_v10, %v2111_v24 }
 0x212   : > { %v4584_v29 = vpop.f32.mrf.mxu0  ;;  %v4808_v30 = vpop.f32.mrf.mxu1 }
 0x213   : > { %3426 = vst.msk [vmem:[%s5281_s29 + $0x134] sm:$0xf] %vm3348_vm3, %v4161_v25  ;;  %3538 = vst.msk [vmem:[%s5281_s29 + $0x2f4] sm:$0xf] %vm3348_vm3, %v4273_v26  ;;  %v2316_v31 = vmax.f32 %v1664_v27, 0.0  ;;  %v2428_v32 = vmax.f32 %v2112_v28, 0.0 }
 0x214   : > { %v1666_v33 = vpop.f32.mrf.mxu0  ;;  %v2114_v34 = vpop.f32.mrf.mxu1 }
 0x215   : > { %v4162_v35 = vpack.c.bf16 %v2316_v31, %v2316_v31  ;;  %v4274_v36 = vpack.c.bf16 %v2428_v32, %v2428_v32  ;;  %v1667_v37 = vadd.f32 %v5945_v10, %v1666_v33  ;;  %v2115_v38 = vadd.f32 %v5945_v10, %v2114_v34 }
 0x216   : > { %v4585_v39 = vpop.f32.mrf.mxu0  ;;  %v4809_v40 = vpop.f32.mrf.mxu1 }
 0x217   : > { %3427 = vst.msk [vmem:[%s5281_s29 + $0x138] sm:$0xf] %vm3348_vm3, %v4162_v35  ;;  %3539 = vst.msk [vmem:[%s5281_s29 + $0x2f8] sm:$0xf] %vm3348_vm3, %v4274_v36  ;;  %v2317_v41 = vmax.f32 %v1667_v37, 0.0  ;;  %v2429_v42 = vmax.f32 %v2115_v38, 0.0 }
 0x218   : > { %v1671_v43 = vpop.f32.mrf.mxu0  ;;  %v2119_v44 = vpop.f32.mrf.mxu1 }
 0x219   : > { %v4163_v45 = vpack.c.bf16 %v2317_v41, %v2317_v41  ;;  %v4275_v46 = vpack.c.bf16 %v2429_v42, %v2429_v42  ;;  %v1672_v47 = vadd.f32 %v5945_v10, %v1671_v43  ;;  %v2120_v1 = vadd.f32 %v5945_v10, %v2119_v44 }
 0x21a   : > { %v4588_v48 = vpop.f32.mrf.mxu0  ;;  %v4812_v49 = vpop.f32.mrf.mxu1 }
 0x21b   : > { %3428 = vst.msk [vmem:[%s5281_s29 + $0x13c] sm:$0xf] %vm3348_vm3, %v4163_v45  ;;  %3540 = vst.msk [vmem:[%s5281_s29 + $0x2fc] sm:$0xf] %vm3348_vm3, %v4275_v46  ;;  %v2318_v50 = vmax.f32 %v1672_v47, 0.0  ;;  %v2430_v51 = vmax.f32 %v2120_v1, 0.0 }
 0x21c   : > { %v1674_v52 = vpop.f32.mrf.mxu0  ;;  %v2122_v53 = vpop.f32.mrf.mxu1 }
 0x21d   : > { %v4164_v54 = vpack.c.bf16 %v2318_v50, %v2318_v50  ;;  %v4276_v56 = vpack.c.bf16 %v2430_v51, %v2430_v51  ;;  %v1675_v57 = vadd.f32 %v5945_v10, %v1674_v52  ;;  %v2123_v58 = vadd.f32 %v5945_v10, %v2122_v53 }
 0x21e   : > { %v4589_v55 = vpop.f32.mrf.mxu0  ;;  %v4813_v60 = vpop.f32.mrf.mxu1 }
 0x21f   : > { %3429 = vst.msk [vmem:[%s5281_s29 + $0x140] sm:$0xf] %vm3348_vm3, %v4164_v54  ;;  %3541 = vst.msk [vmem:[%s5281_s29 + $0x300] sm:$0xf] %vm3348_vm3, %v4276_v56  ;;  %v2319_v61 = vmax.f32 %v1675_v57, 0.0  ;;  %v2431_v62 = vmax.f32 %v2123_v58, 0.0 }
 0x220   : > { %v1679_v63 = vpop.f32.mrf.mxu0  ;;  %v2127_v0 = vpop.f32.mrf.mxu1 }
 0x221   : > { %v4165_v2 = vpack.c.bf16 %v2319_v61, %v2319_v61  ;;  %v4277_v3 = vpack.c.bf16 %v2431_v62, %v2431_v62  ;;  %v1680_v4 = vadd.f32 %v5945_v10, %v1679_v63  ;;  %v2128_v5 = vadd.f32 %v5945_v10, %v2127_v0 }
 0x222   : > { %v4592_v6 = vpop.f32.mrf.mxu0  ;;  %v4816_v7 = vpop.f32.mrf.mxu1 }
 0x223   : > { %3430 = vst.msk [vmem:[%s5281_s29 + $0x144] sm:$0xf] %vm3348_vm3, %v4165_v2  ;;  %3542 = vst.msk [vmem:[%s5281_s29 + $0x304] sm:$0xf] %vm3348_vm3, %v4277_v3  ;;  %v2320_v8 = vmax.f32 %v1680_v4, 0.0  ;;  %v2432_v9 = vmax.f32 %v2128_v5, 0.0 }
 0x224   : > { %v1682_v59 = vpop.f32.mrf.mxu0  ;;  %v2130_v11 = vpop.f32.mrf.mxu1 }
 0x225   : > { %v4166_v12 = vpack.c.bf16 %v2320_v8, %v2320_v8  ;;  %v4278_v13 = vpack.c.bf16 %v2432_v9, %v2432_v9  ;;  %v1683_v14 = vadd.f32 %v5945_v10, %v1682_v59  ;;  %v2131_v15 = vadd.f32 %v5945_v10, %v2130_v11 }
 0x226   : > { %v4593_v16 = vpop.f32.mrf.mxu0  ;;  %v4817_v17 = vpop.f32.mrf.mxu1 }
 0x227   : > { %3431 = vst.msk [vmem:[%s5281_s29 + $0x148] sm:$0xf] %vm3348_vm3, %v4166_v12  ;;  %3543 = vst.msk [vmem:[%s5281_s29 + $0x308] sm:$0xf] %vm3348_vm3, %v4278_v13  ;;  %v2321_v18 = vmax.f32 %v1683_v14, 0.0  ;;  %v2433_v19 = vmax.f32 %v2131_v15, 0.0 }
 0x228   : > { %v1687_v20 = vpop.f32.mrf.mxu0  ;;  %v2135_v21 = vpop.f32.mrf.mxu1 }
 0x229   : > { %v4167_v22 = vpack.c.bf16 %v2321_v18, %v2321_v18  ;;  %v4279_v23 = vpack.c.bf16 %v2433_v19, %v2433_v19  ;;  %v1688_v24 = vadd.f32 %v5945_v10, %v1687_v20  ;;  %v2136_v25 = vadd.f32 %v5945_v10, %v2135_v21 }
 0x22a   : > { %v4596_v26 = vpop.f32.mrf.mxu0  ;;  %v4820_v27 = vpop.f32.mrf.mxu1 }
 0x22b   : > { %3432 = vst.msk [vmem:[%s5281_s29 + $0x14c] sm:$0xf] %vm3348_vm3, %v4167_v22  ;;  %3544 = vst.msk [vmem:[%s5281_s29 + $0x30c] sm:$0xf] %vm3348_vm3, %v4279_v23  ;;  %v2322_v28 = vmax.f32 %v1688_v24, 0.0  ;;  %v2434_v29 = vmax.f32 %v2136_v25, 0.0 }
 0x22c   : > { %v1690_v30 = vpop.f32.mrf.mxu0  ;;  %v2138_v31 = vpop.f32.mrf.mxu1 }
 0x22d   : > { %v4168_v32 = vpack.c.bf16 %v2322_v28, %v2322_v28  ;;  %v4280_v33 = vpack.c.bf16 %v2434_v29, %v2434_v29  ;;  %v1691_v34 = vadd.f32 %v5945_v10, %v1690_v30  ;;  %v2139_v35 = vadd.f32 %v5945_v10, %v2138_v31 }
 0x22e   : > { %v4597_v36 = vpop.f32.mrf.mxu0  ;;  %v4821_v37 = vpop.f32.mrf.mxu1 }
 0x22f   : > { %3433 = vst.msk [vmem:[%s5281_s29 + $0x150] sm:$0xf] %vm3348_vm3, %v4168_v32  ;;  %3545 = vst.msk [vmem:[%s5281_s29 + $0x310] sm:$0xf] %vm3348_vm3, %v4280_v33  ;;  %v2323_v38 = vmax.f32 %v1691_v34, 0.0  ;;  %v2435_v39 = vmax.f32 %v2139_v35, 0.0 }
 0x230   : > { %v1695_v40 = vpop.f32.mrf.mxu0  ;;  %v2143_v41 = vpop.f32.mrf.mxu1 }
 0x231   : > { %v4169_v42 = vpack.c.bf16 %v2323_v38, %v2323_v38  ;;  %v4281_v43 = vpack.c.bf16 %v2435_v39, %v2435_v39  ;;  %v1696_v44 = vadd.f32 %v5945_v10, %v1695_v40  ;;  %v2144_v45 = vadd.f32 %v5945_v10, %v2143_v41 }
 0x232   : > { %v4600_v46 = vpop.f32.mrf.mxu0  ;;  %v4824_v47 = vpop.f32.mrf.mxu1 }
 0x233   : > { %3434 = vst.msk [vmem:[%s5281_s29 + $0x154] sm:$0xf] %vm3348_vm3, %v4169_v42  ;;  %3546 = vst.msk [vmem:[%s5281_s29 + $0x314] sm:$0xf] %vm3348_vm3, %v4281_v43  ;;  %v2324_v1 = vmax.f32 %v1696_v44, 0.0  ;;  %v2436_v48 = vmax.f32 %v2144_v45, 0.0 }
 0x234   : > { %v1698_v49 = vpop.f32.mrf.mxu0  ;;  %v2146_v50 = vpop.f32.mrf.mxu1 }
 0x235   : > { %v4170_v51 = vpack.c.bf16 %v2324_v1, %v2324_v1  ;;  %v4282_v52 = vpack.c.bf16 %v2436_v48, %v2436_v48  ;;  %v1699_v53 = vadd.f32 %v5945_v10, %v1698_v49  ;;  %v2147_v54 = vadd.f32 %v5945_v10, %v2146_v50 }
 0x236   : > { %v4601_v56 = vpop.f32.mrf.mxu0  ;;  %v4825_v57 = vpop.f32.mrf.mxu1 }
 0x237   : > { %3435 = vst.msk [vmem:[%s5281_s29 + $0x158] sm:$0xf] %vm3348_vm3, %v4170_v51  ;;  %3547 = vst.msk [vmem:[%s5281_s29 + $0x318] sm:$0xf] %vm3348_vm3, %v4282_v52  ;;  %v2325_v58 = vmax.f32 %v1699_v53, 0.0  ;;  %v2437_v55 = vmax.f32 %v2147_v54, 0.0 }
 0x238   : > { %v1703_v60 = vpop.f32.mrf.mxu0  ;;  %v2151_v61 = vpop.f32.mrf.mxu1 }
 0x239   : > { %v4171_v62 = vpack.c.bf16 %v2325_v58, %v2325_v58  ;;  %v4283_v63 = vpack.c.bf16 %v2437_v55, %v2437_v55  ;;  %v1704_v0 = vadd.f32 %v5945_v10, %v1703_v60  ;;  %v2152_v2 = vadd.f32 %v5945_v10, %v2151_v61 }
 0x23a   : > { %v4604_v3 = vpop.f32.mrf.mxu0  ;;  %v4828_v4 = vpop.f32.mrf.mxu1 }
 0x23b   : > { %3436 = vst.msk [vmem:[%s5281_s29 + $0x15c] sm:$0xf] %vm3348_vm3, %v4171_v62  ;;  %3548 = vst.msk [vmem:[%s5281_s29 + $0x31c] sm:$0xf] %vm3348_vm3, %v4283_v63  ;;  %v2326_v5 = vmax.f32 %v1704_v0, 0.0  ;;  %v2438_v6 = vmax.f32 %v2152_v2, 0.0 }
 0x23c   : > { %v1706_v7 = vpop.f32.mrf.mxu0  ;;  %v2154_v8 = vpop.f32.mrf.mxu1 }
 0x23d   : > { %v4172_v9 = vpack.c.bf16 %v2326_v5, %v2326_v5  ;;  %v4284_v59 = vpack.c.bf16 %v2438_v6, %v2438_v6  ;;  %v1707_v11 = vadd.f32 %v5945_v10, %v1706_v7  ;;  %v2155_v12 = vadd.f32 %v5945_v10, %v2154_v8 }
 0x23e   : > { %v4605_v13 = vpop.f32.mrf.mxu0  ;;  %v4829_v14 = vpop.f32.mrf.mxu1 }
 0x23f   : > { %3437 = vst.msk [vmem:[%s5281_s29 + $0x160] sm:$0xf] %vm3348_vm3, %v4172_v9  ;;  %3549 = vst.msk [vmem:[%s5281_s29 + $0x320] sm:$0xf] %vm3348_vm3, %v4284_v59  ;;  %v2327_v15 = vmax.f32 %v1707_v11, 0.0  ;;  %v2439_v16 = vmax.f32 %v2155_v12, 0.0 }
 0x240   : > { %v1711_v17 = vpop.f32.mrf.mxu0  ;;  %v2159_v18 = vpop.f32.mrf.mxu1 }
 0x241   : > { %v4173_v19 = vpack.c.bf16 %v2327_v15, %v2327_v15  ;;  %v4285_v20 = vpack.c.bf16 %v2439_v16, %v2439_v16  ;;  %v1712_v21 = vadd.f32 %v5945_v10, %v1711_v17  ;;  %v2160_v22 = vadd.f32 %v5945_v10, %v2159_v18 }
 0x242   : > { %v4608_v23 = vpop.f32.mrf.mxu0  ;;  %v4832_v24 = vpop.f32.mrf.mxu1 }
 0x243   : > { %3438 = vst.msk [vmem:[%s5281_s29 + $0x164] sm:$0xf] %vm3348_vm3, %v4173_v19  ;;  %3550 = vst.msk [vmem:[%s5281_s29 + $0x324] sm:$0xf] %vm3348_vm3, %v4285_v20  ;;  %v2328_v25 = vmax.f32 %v1712_v21, 0.0  ;;  %v2440_v26 = vmax.f32 %v2160_v22, 0.0 }
 0x244   : > { %v1714_v27 = vpop.f32.mrf.mxu0  ;;  %v2162_v28 = vpop.f32.mrf.mxu1 }
 0x245   : > { %v4174_v29 = vpack.c.bf16 %v2328_v25, %v2328_v25  ;;  %v4286_v30 = vpack.c.bf16 %v2440_v26, %v2440_v26  ;;  %v1715_v31 = vadd.f32 %v5945_v10, %v1714_v27  ;;  %v2163_v32 = vadd.f32 %v5945_v10, %v2162_v28 }
 0x246   : > { %v4609_v33 = vpop.f32.mrf.mxu0  ;;  %v4833_v34 = vpop.f32.mrf.mxu1 }
 0x247   : > { %3439 = vst.msk [vmem:[%s5281_s29 + $0x168] sm:$0xf] %vm3348_vm3, %v4174_v29  ;;  %3551 = vst.msk [vmem:[%s5281_s29 + $0x328] sm:$0xf] %vm3348_vm3, %v4286_v30  ;;  %v2329_v35 = vmax.f32 %v1715_v31, 0.0  ;;  %v2441_v36 = vmax.f32 %v2163_v32, 0.0 }
 0x248   : > { %v1719_v37 = vpop.f32.mrf.mxu0  ;;  %v2167_v38 = vpop.f32.mrf.mxu1 }
 0x249   : > { %v4175_v39 = vpack.c.bf16 %v2329_v35, %v2329_v35  ;;  %v4287_v40 = vpack.c.bf16 %v2441_v36, %v2441_v36  ;;  %v1720_v41 = vadd.f32 %v5945_v10, %v1719_v37  ;;  %v2168_v42 = vadd.f32 %v5945_v10, %v2167_v38 }
 0x24a   : > { %v4612_v43 = vpop.f32.mrf.mxu0  ;;  %v4836_v44 = vpop.f32.mrf.mxu1 }
 0x24b   : > { %3440 = vst.msk [vmem:[%s5281_s29 + $0x16c] sm:$0xf] %vm3348_vm3, %v4175_v39  ;;  %3552 = vst.msk [vmem:[%s5281_s29 + $0x32c] sm:$0xf] %vm3348_vm3, %v4287_v40  ;;  %v2330_v45 = vmax.f32 %v1720_v41, 0.0  ;;  %v2442_v46 = vmax.f32 %v2168_v42, 0.0 }
 0x24c   : > { %v1722_v47 = vpop.f32.mrf.mxu0  ;;  %v2170_v1 = vpop.f32.mrf.mxu1 }
 0x24d   : > { %v4176_v48 = vpack.c.bf16 %v2330_v45, %v2330_v45  ;;  %v4288_v49 = vpack.c.bf16 %v2442_v46, %v2442_v46  ;;  %v1723_v50 = vadd.f32 %v5945_v10, %v1722_v47  ;;  %v2171_v51 = vadd.f32 %v5945_v10, %v2170_v1 }
 0x24e   : > { %v4613_v52 = vpop.f32.mrf.mxu0  ;;  %v4837_v53 = vpop.f32.mrf.mxu1 }
 0x24f   : > { %3441 = vst.msk [vmem:[%s5281_s29 + $0x170] sm:$0xf] %vm3348_vm3, %v4176_v48  ;;  %3553 = vst.msk [vmem:[%s5281_s29 + $0x330] sm:$0xf] %vm3348_vm3, %v4288_v49  ;;  %v2331_v54 = vmax.f32 %v1723_v50, 0.0  ;;  %v2443_v56 = vmax.f32 %v2171_v51, 0.0 }
 0x250   : > { %v1727_v57 = vpop.f32.mrf.mxu0  ;;  %v2175_v58 = vpop.f32.mrf.mxu1 }
 0x251   : > { %v4177_v55 = vpack.c.bf16 %v2331_v54, %v2331_v54  ;;  %v4289_v60 = vpack.c.bf16 %v2443_v56, %v2443_v56  ;;  %v1728_v61 = vadd.f32 %v5945_v10, %v1727_v57  ;;  %v2176_v62 = vadd.f32 %v5945_v10, %v2175_v58 }
 0x252   : > { %v4616_v63 = vpop.f32.mrf.mxu0  ;;  %v4840_v0 = vpop.f32.mrf.mxu1 }
 0x253   : > { %3442 = vst.msk [vmem:[%s5281_s29 + $0x174] sm:$0xf] %vm3348_vm3, %v4177_v55  ;;  %3554 = vst.msk [vmem:[%s5281_s29 + $0x334] sm:$0xf] %vm3348_vm3, %v4289_v60  ;;  %v2332_v2 = vmax.f32 %v1728_v61, 0.0  ;;  %v2444_v3 = vmax.f32 %v2176_v62, 0.0 }
 0x254   : > { %v1730_v4 = vpop.f32.mrf.mxu0  ;;  %v2178_v5 = vpop.f32.mrf.mxu1 }
 0x255   : > { %v4178_v6 = vpack.c.bf16 %v2332_v2, %v2332_v2  ;;  %v4290_v7 = vpack.c.bf16 %v2444_v3, %v2444_v3  ;;  %v1731_v8 = vadd.f32 %v5945_v10, %v1730_v4  ;;  %v2179_v9 = vadd.f32 %v5945_v10, %v2178_v5 }
 0x256   : > { %v4617_v59 = vpop.f32.mrf.mxu0  ;;  %v4841_v11 = vpop.f32.mrf.mxu1 }
 0x257   : > { %3443 = vst.msk [vmem:[%s5281_s29 + $0x178] sm:$0xf] %vm3348_vm3, %v4178_v6  ;;  %3555 = vst.msk [vmem:[%s5281_s29 + $0x338] sm:$0xf] %vm3348_vm3, %v4290_v7  ;;  %v2333_v12 = vmax.f32 %v1731_v8, 0.0  ;;  %v2445_v13 = vmax.f32 %v2179_v9, 0.0 }
 0x258   : > { %v1735_v14 = vpop.f32.mrf.mxu0  ;;  %v2183_v15 = vpop.f32.mrf.mxu1 }
 0x259   : > { %v4179_v16 = vpack.c.bf16 %v2333_v12, %v2333_v12  ;;  %v4291_v17 = vpack.c.bf16 %v2445_v13, %v2445_v13  ;;  %v1736_v18 = vadd.f32 %v5945_v10, %v1735_v14  ;;  %v2184_v19 = vadd.f32 %v5945_v10, %v2183_v15 }
 0x25a   : > { %v4620_v20 = vpop.f32.mrf.mxu0  ;;  %v4844_v21 = vpop.f32.mrf.mxu1 }
 0x25b   : > { %3444 = vst.msk [vmem:[%s5281_s29 + $0x17c] sm:$0xf] %vm3348_vm3, %v4179_v16  ;;  %3556 = vst.msk [vmem:[%s5281_s29 + $0x33c] sm:$0xf] %vm3348_vm3, %v4291_v17  ;;  %v2334_v22 = vmax.f32 %v1736_v18, 0.0  ;;  %v2446_v23 = vmax.f32 %v2184_v19, 0.0 }
 0x25c   : > { %v1738_v24 = vpop.f32.mrf.mxu0  ;;  %v2186_v25 = vpop.f32.mrf.mxu1 }
 0x25d   : > { %v4180_v26 = vpack.c.bf16 %v2334_v22, %v2334_v22  ;;  %v4292_v27 = vpack.c.bf16 %v2446_v23, %v2446_v23  ;;  %v1739_v28 = vadd.f32 %v5945_v10, %v1738_v24  ;;  %v2187_v29 = vadd.f32 %v5945_v10, %v2186_v25 }
 0x25e   : > { %v4621_v30 = vpop.f32.mrf.mxu0  ;;  %v4845_v31 = vpop.f32.mrf.mxu1 }
 0x25f   : > { %3445 = vst.msk [vmem:[%s5281_s29 + $0x180] sm:$0xf] %vm3348_vm3, %v4180_v26  ;;  %3557 = vst.msk [vmem:[%s5281_s29 + $0x340] sm:$0xf] %vm3348_vm3, %v4292_v27  ;;  %v2335_v32 = vmax.f32 %v1739_v28, 0.0  ;;  %v2447_v33 = vmax.f32 %v2187_v29, 0.0 }
 0x260   : > { %v1743_v34 = vpop.f32.mrf.mxu0  ;;  %v2191_v35 = vpop.f32.mrf.mxu1 }
 0x261   : > { %v4181_v36 = vpack.c.bf16 %v2335_v32, %v2335_v32  ;;  %v4293_v37 = vpack.c.bf16 %v2447_v33, %v2447_v33  ;;  %v1744_v38 = vadd.f32 %v5945_v10, %v1743_v34  ;;  %v2192_v39 = vadd.f32 %v5945_v10, %v2191_v35 }
 0x262   : > { %v4624_v40 = vpop.f32.mrf.mxu0  ;;  %v4848_v41 = vpop.f32.mrf.mxu1 }
 0x263   : > { %3446 = vst.msk [vmem:[%s5281_s29 + $0x184] sm:$0xf] %vm3348_vm3, %v4181_v36  ;;  %3558 = vst.msk [vmem:[%s5281_s29 + $0x344] sm:$0xf] %vm3348_vm3, %v4293_v37  ;;  %v2336_v42 = vmax.f32 %v1744_v38, 0.0  ;;  %v2448_v43 = vmax.f32 %v2192_v39, 0.0 }
 0x264   : > { %v1746_v44 = vpop.f32.mrf.mxu0  ;;  %v2194_v45 = vpop.f32.mrf.mxu1 }
 0x265   : > { %v4182_v46 = vpack.c.bf16 %v2336_v42, %v2336_v42  ;;  %v4294_v47 = vpack.c.bf16 %v2448_v43, %v2448_v43  ;;  %v1747_v1 = vadd.f32 %v5945_v10, %v1746_v44  ;;  %v2195_v48 = vadd.f32 %v5945_v10, %v2194_v45 }
 0x266   : > { %v4625_v49 = vpop.f32.mrf.mxu0  ;;  %v4849_v50 = vpop.f32.mrf.mxu1 }
 0x267   : > { %3447 = vst.msk [vmem:[%s5281_s29 + $0x188] sm:$0xf] %vm3348_vm3, %v4182_v46  ;;  %3559 = vst.msk [vmem:[%s5281_s29 + $0x348] sm:$0xf] %vm3348_vm3, %v4294_v47  ;;  %v2337_v51 = vmax.f32 %v1747_v1, 0.0  ;;  %v2449_v52 = vmax.f32 %v2195_v48, 0.0 }
 0x268   : > { %v1751_v53 = vpop.f32.mrf.mxu0  ;;  %v2199_v54 = vpop.f32.mrf.mxu1 }
 0x269   : > { %v4183_v56 = vpack.c.bf16 %v2337_v51, %v2337_v51  ;;  %v4295_v57 = vpack.c.bf16 %v2449_v52, %v2449_v52  ;;  %v1752_v58 = vadd.f32 %v5945_v10, %v1751_v53  ;;  %v2200_v55 = vadd.f32 %v5945_v10, %v2199_v54 }
 0x26a   : > { %v4628_v60 = vpop.f32.mrf.mxu0  ;;  %v4852_v61 = vpop.f32.mrf.mxu1 }
 0x26b   : > { %3448 = vst.msk [vmem:[%s5281_s29 + $0x18c] sm:$0xf] %vm3348_vm3, %v4183_v56  ;;  %3560 = vst.msk [vmem:[%s5281_s29 + $0x34c] sm:$0xf] %vm3348_vm3, %v4295_v57  ;;  %v2338_v62 = vmax.f32 %v1752_v58, 0.0  ;;  %v2450_v63 = vmax.f32 %v2200_v55, 0.0 }
 0x26c   : > { %v1754_v0 = vpop.f32.mrf.mxu0  ;;  %v2202_v2 = vpop.f32.mrf.mxu1 }
 0x26d   : > { %v4184_v3 = vpack.c.bf16 %v2338_v62, %v2338_v62  ;;  %v4296_v4 = vpack.c.bf16 %v2450_v63, %v2450_v63  ;;  %v1755_v5 = vadd.f32 %v5945_v10, %v1754_v0  ;;  %v2203_v6 = vadd.f32 %v5945_v10, %v2202_v2 }
 0x26e   : > { %v4629_v7 = vpop.f32.mrf.mxu0  ;;  %v4853_v8 = vpop.f32.mrf.mxu1 }
 0x26f   : > { %3449 = vst.msk [vmem:[%s5281_s29 + $0x190] sm:$0xf] %vm3348_vm3, %v4184_v3  ;;  %3561 = vst.msk [vmem:[%s5281_s29 + $0x350] sm:$0xf] %vm3348_vm3, %v4296_v4  ;;  %v2339_v9 = vmax.f32 %v1755_v5, 0.0  ;;  %v2451_v59 = vmax.f32 %v2203_v6, 0.0 }
 0x270   : > { %v1759_v11 = vpop.f32.mrf.mxu0  ;;  %v2207_v12 = vpop.f32.mrf.mxu1 }
 0x271   : > { %v4185_v13 = vpack.c.bf16 %v2339_v9, %v2339_v9  ;;  %v4297_v14 = vpack.c.bf16 %v2451_v59, %v2451_v59  ;;  %v1760_v15 = vadd.f32 %v5945_v10, %v1759_v11  ;;  %v2208_v16 = vadd.f32 %v5945_v10, %v2207_v12 }
 0x272   : > { %v4632_v17 = vpop.f32.mrf.mxu0  ;;  %v4856_v18 = vpop.f32.mrf.mxu1 }
 0x273   : > { %3450 = vst.msk [vmem:[%s5281_s29 + $0x194] sm:$0xf] %vm3348_vm3, %v4185_v13  ;;  %3562 = vst.msk [vmem:[%s5281_s29 + $0x354] sm:$0xf] %vm3348_vm3, %v4297_v14  ;;  %v2340_v19 = vmax.f32 %v1760_v15, 0.0  ;;  %v2452_v20 = vmax.f32 %v2208_v16, 0.0 }
 0x274   : > { %v1762_v21 = vpop.f32.mrf.mxu0  ;;  %v2210_v22 = vpop.f32.mrf.mxu1 }
 0x275   : > { %v4186_v23 = vpack.c.bf16 %v2340_v19, %v2340_v19  ;;  %v4298_v24 = vpack.c.bf16 %v2452_v20, %v2452_v20  ;;  %v1763_v25 = vadd.f32 %v5945_v10, %v1762_v21  ;;  %v2211_v26 = vadd.f32 %v5945_v10, %v2210_v22 }
 0x276   : > { %v4633_v27 = vpop.f32.mrf.mxu0  ;;  %v4857_v28 = vpop.f32.mrf.mxu1 }
 0x277   : > { %3451 = vst.msk [vmem:[%s5281_s29 + $0x198] sm:$0xf] %vm3348_vm3, %v4186_v23  ;;  %3563 = vst.msk [vmem:[%s5281_s29 + $0x358] sm:$0xf] %vm3348_vm3, %v4298_v24  ;;  %v2341_v29 = vmax.f32 %v1763_v25, 0.0  ;;  %v2453_v30 = vmax.f32 %v2211_v26, 0.0 }
 0x278   : > { %v1767_v31 = vpop.f32.mrf.mxu0  ;;  %v2215_v32 = vpop.f32.mrf.mxu1 }
 0x279   : > { %v4187_v33 = vpack.c.bf16 %v2341_v29, %v2341_v29  ;;  %v4299_v34 = vpack.c.bf16 %v2453_v30, %v2453_v30  ;;  %v1768_v35 = vadd.f32 %v5945_v10, %v1767_v31  ;;  %v2216_v36 = vadd.f32 %v5945_v10, %v2215_v32 }
 0x27a   : > { %v4636_v37 = vpop.f32.mrf.mxu0  ;;  %v4860_v38 = vpop.f32.mrf.mxu1 }
 0x27b   : > { %3452 = vst.msk [vmem:[%s5281_s29 + $0x19c] sm:$0xf] %vm3348_vm3, %v4187_v33  ;;  %3564 = vst.msk [vmem:[%s5281_s29 + $0x35c] sm:$0xf] %vm3348_vm3, %v4299_v34  ;;  %v2342_v39 = vmax.f32 %v1768_v35, 0.0  ;;  %v2454_v40 = vmax.f32 %v2216_v36, 0.0 }
 0x27c   : > { %v1770_v41 = vpop.f32.mrf.mxu0  ;;  %v2218_v42 = vpop.f32.mrf.mxu1 }
 0x27d   : > { %v4188_v43 = vpack.c.bf16 %v2342_v39, %v2342_v39  ;;  %v4300_v44 = vpack.c.bf16 %v2454_v40, %v2454_v40  ;;  %v1771_v45 = vadd.f32 %v5945_v10, %v1770_v41  ;;  %v2219_v46 = vadd.f32 %v5945_v10, %v2218_v42 }
 0x27e   : > { %v4637_v47 = vpop.f32.mrf.mxu0  ;;  %v4861_v1 = vpop.f32.mrf.mxu1 }
 0x27f   : > { %3453 = vst.msk [vmem:[%s5281_s29 + $0x1a0] sm:$0xf] %vm3348_vm3, %v4188_v43  ;;  %3565 = vst.msk [vmem:[%s5281_s29 + $0x360] sm:$0xf] %vm3348_vm3, %v4300_v44  ;;  %v2343_v48 = vmax.f32 %v1771_v45, 0.0  ;;  %v2455_v49 = vmax.f32 %v2219_v46, 0.0 }
 0x280   : > { %v1775_v50 = vpop.f32.mrf.mxu0  ;;  %v2223_v51 = vpop.f32.mrf.mxu1 }
 0x281   : > { %v4189_v52 = vpack.c.bf16 %v2343_v48, %v2343_v48  ;;  %v4301_v53 = vpack.c.bf16 %v2455_v49, %v2455_v49  ;;  %v1776_v54 = vadd.f32 %v5945_v10, %v1775_v50  ;;  %v2224_v56 = vadd.f32 %v5945_v10, %v2223_v51 }
 0x282   : > { %v4640_v57 = vpop.f32.mrf.mxu0  ;;  %v4864_v58 = vpop.f32.mrf.mxu1 }
 0x283   : > { %3454 = vst.msk [vmem:[%s5281_s29 + $0x1a4] sm:$0xf] %vm3348_vm3, %v4189_v52  ;;  %3566 = vst.msk [vmem:[%s5281_s29 + $0x364] sm:$0xf] %vm3348_vm3, %v4301_v53  ;;  %v2344_v55 = vmax.f32 %v1776_v54, 0.0  ;;  %v2456_v60 = vmax.f32 %v2224_v56, 0.0 }
 0x284   : > { %v1778_v61 = vpop.f32.mrf.mxu0  ;;  %v2226_v62 = vpop.f32.mrf.mxu1 }
 0x285   : > { %v4190_v63 = vpack.c.bf16 %v2344_v55, %v2344_v55  ;;  %v4302_v0 = vpack.c.bf16 %v2456_v60, %v2456_v60  ;;  %v1779_v2 = vadd.f32 %v5945_v10, %v1778_v61  ;;  %v2227_v3 = vadd.f32 %v5945_v10, %v2226_v62 }
 0x286   : > { %v4641_v4 = vpop.f32.mrf.mxu0  ;;  %v4865_v5 = vpop.f32.mrf.mxu1 }
 0x287   : > { %3455 = vst.msk [vmem:[%s5281_s29 + $0x1a8] sm:$0xf] %vm3348_vm3, %v4190_v63  ;;  %3567 = vst.msk [vmem:[%s5281_s29 + $0x368] sm:$0xf] %vm3348_vm3, %v4302_v0  ;;  %v2345_v6 = vmax.f32 %v1779_v2, 0.0  ;;  %v2457_v7 = vmax.f32 %v2227_v3, 0.0 }
 0x288   : > { %v1783_v8 = vpop.f32.mrf.mxu0  ;;  %v2231_v9 = vpop.f32.mrf.mxu1 }
 0x289   : > { %v4191_v59 = vpack.c.bf16 %v2345_v6, %v2345_v6  ;;  %v4303_v11 = vpack.c.bf16 %v2457_v7, %v2457_v7  ;;  %v1784_v12 = vadd.f32 %v5945_v10, %v1783_v8  ;;  %v2232_v13 = vadd.f32 %v5945_v10, %v2231_v9 }
 0x28a   : > { %v4644_v14 = vpop.f32.mrf.mxu0  ;;  %v4868_v15 = vpop.f32.mrf.mxu1 }
 0x28b   : > { %3456 = vst.msk [vmem:[%s5281_s29 + $0x1ac] sm:$0xf] %vm3348_vm3, %v4191_v59  ;;  %3568 = vst.msk [vmem:[%s5281_s29 + $0x36c] sm:$0xf] %vm3348_vm3, %v4303_v11  ;;  %v2346_v16 = vmax.f32 %v1784_v12, 0.0  ;;  %v2458_v17 = vmax.f32 %v2232_v13, 0.0 }
 0x28c   : > { %v1786_v18 = vpop.f32.mrf.mxu0  ;;  %v2234_v19 = vpop.f32.mrf.mxu1 }
 0x28d   : > { %v4192_v20 = vpack.c.bf16 %v2346_v16, %v2346_v16  ;;  %v4304_v21 = vpack.c.bf16 %v2458_v17, %v2458_v17  ;;  %v1787_v22 = vadd.f32 %v5945_v10, %v1786_v18  ;;  %v2235_v23 = vadd.f32 %v5945_v10, %v2234_v19 }
 0x28e   : > { %v4645_v24 = vpop.f32.mrf.mxu0  ;;  %v4869_v25 = vpop.f32.mrf.mxu1 }
 0x28f   : > { %3457 = vst.msk [vmem:[%s5281_s29 + $0x1b0] sm:$0xf] %vm3348_vm3, %v4192_v20  ;;  %3569 = vst.msk [vmem:[%s5281_s29 + $0x370] sm:$0xf] %vm3348_vm3, %v4304_v21  ;;  %v2347_v26 = vmax.f32 %v1787_v22, 0.0  ;;  %v2459_v27 = vmax.f32 %v2235_v23, 0.0 }
 0x290   : > { %v1791_v28 = vpop.f32.mrf.mxu0 }
 0x291   : > { %v4193_v29 = vpack.c.bf16 %v2347_v26, %v2347_v26  ;;  %v4305_v30 = vpack.c.bf16 %v2459_v27, %v2459_v27  ;;  %v1792_v31 = vadd.f32 %v5945_v10, %v1791_v28 }
 0x292   : > { %v4648_v32 = vpop.f32.mrf.mxu0 }
 0x293   : > { %3458 = vst.msk [vmem:[%s5281_s29 + $0x1b4] sm:$0xf] %vm3348_vm3, %v4193_v29  ;;  %3570 = vst.msk [vmem:[%s5281_s29 + $0x374] sm:$0xf] %vm3348_vm3, %v4305_v30  ;;  %v2348_v33 = vmax.f32 %v1792_v31, 0.0 }
 0x294   : > { %v1794_v34 = vpop.f32.mrf.mxu0 }
 0x295   : > { %v4194_v35 = vpack.c.bf16 %v2348_v33, %v2348_v33  ;;  %v1795_v36 = vadd.f32 %v5945_v10, %v1794_v34 }
 0x296   : > { %v4649_v37 = vpop.f32.mrf.mxu0 }
 0x297   : > { %3459 = vst.msk [vmem:[%s5281_s29 + $0x1b8] sm:$0xf] %vm3348_vm3, %v4194_v35  ;;  %v2349_v38 = vmax.f32 %v1795_v36, 0.0 }
 0x299   : > { %v4195_v39 = vpack.c.bf16 %v2349_v38, %v2349_v38 }
 0x29b   : > { %3460 = vst.msk [vmem:[%s5281_s29 + $0x1bc] sm:$0xf] %vm3348_vm3, %v4195_v39 }
 0x29c PF: > { %s13_s12 = sadd.s32 1, %s5008_s12  }
 0x29d   : > { %p10_p4 = scmp.ge.s32.totalorder %s13_s12, 4  }
 0x29f   :  { %12 = sbr.rel (!%p10_p4) target bundleno = 1 (0x1), region = 62 }

// kernel: _forward_impl.6
= control target key start
LH: loop header
LB: loop body
LE: loop exit
PB: predicated region body
PF: predicated region fallthrough
CT: control target
= control target key end

     0   :  { %v3939_v0 = vmov 0   ;;  %vm1223_vm0 = vcmask 261120   ;;  %vm2908_vm1 = vcmask 257024   ;;  %vm3019_vm2 = vcmask 253952   ;;  %s5428_s1 = inlined_call_operand.vmem [shape: bf16[288,32], index: 1, kind: input, shape index: {}]   ;;  %s5429_s0 = inlined_call_operand.vmem [shape: bf16[882,288], index: 0, kind: input, shape index: {}]   ;;  %s5430_s2 = inlined_call_operand.vmem [shape: f32[1,32], index: 2, kind: input, shape index: {}]   ;;  %s5431_s3 = inlined_call_operand.vmem [shape: bf16[882,32], index: 3, kind: output, shape index: {}]  }
   0x1   :  { %1392 = vmatprep.subr.bf16.mxu0 %v3939_v0  ;;  %3664 = vmatprep.subr.bf16.mxu1 %v3939_v0  ;;  %v3697_v1 = vld [vmem:[%s5428_s1 + $0x38] sm:$0xff]   ;;  %v3698_v2 = vld [vmem:[%s5428_s1 + $0x30] sm:$0xff]   ;;  %v3699_v3 = vld [vmem:[%s5428_s1 + $0x28] sm:$0xff]  }
   0x2   :  { %1393 = vmatpush1.bf16.msra.mxu0 %v3697_v1  ;;  %3680 = vmatpush1.bf16.msra.mxu1 %v3697_v1  ;;  %v3700_v4 = vld [vmem:[%s5428_s1 + $0x20] sm:$0xff]   ;;  %v3701_v5 = vld [vmem:[%s5428_s1 + $0x18] sm:$0xff]   ;;  %v3702_v7 = vld [vmem:[%s5428_s1 + $0x10] sm:$0xff]  }
   0x3   :  { %1394 = vmatprep.subr.bf16.mxu0 %v3939_v0  ;;  %3665 = vmatprep.subr.bf16.mxu1 %v3939_v0  ;;  %v3715_v6 = vld [vmem:[%s5429_s0 + $0x4] ss:$12 sps:$4 sm:$0xff]   ;;  %v3718_v8 = vld [vmem:[%s5429_s0 + $0x3f4] ss:$12 sps:$4 sm:$0xff]   ;;  %v3703_v9 = vld [vmem:[%s5428_s1 + $0x8] sm:$0xff]  }
   0x4   :  { %1424 = vmatprep.mubr.bf16.mxu0 %v3715_v6  ;;  %1760 = vmatprep.mubr.bf16.mxu1 %v3718_v8  ;;  %v3704_v10 = vld [vmem:[%s5428_s1] sm:$0xff]   ;;  %v3705_v11 = vld [vmem:[%s5428_s1 + $0x78] sm:$0xff]   ;;  %v3706_v12 = vld [vmem:[%s5428_s1 + $0x70] sm:$0xff]  }
   0x5   :  { %v3707_v13 = vld [vmem:[%s5428_s1 + $0x68] sm:$0xff]   ;;  %v3708_v14 = vld [vmem:[%s5428_s1 + $0x60] sm:$0xff]   ;;  %v3709_v15 = vld [vmem:[%s5428_s1 + $0x58] sm:$0xff]  }
   0x6   :  { %1395 = vmatpush1.bf16.msra.mxu0 %v3698_v2  ;;  %3681 = vmatpush1.bf16.msra.mxu1 %v3698_v2  ;;  %v3710_v16 = vld [vmem:[%s5428_s1 + $0x50] sm:$0xff]   ;;  %v3711_v17 = vld [vmem:[%s5428_s1 + $0x48] sm:$0xff]   ;;  %v3712_v18 = vld [vmem:[%s5428_s1 + $0x40] sm:$0xff]  }
   0x7   :  { %1396 = vmatprep.subr.bf16.mxu0 %v3939_v0  ;;  %3666 = vmatprep.subr.bf16.mxu1 %v3939_v0  ;;  %v3713_v19 = vld [vmem:[%s5429_s0] ss:$12 sps:$4 sm:$0xff]   ;;  %v3716_v21 = vld [vmem:[%s5429_s0 + $0x3f0] ss:$12 sps:$4 sm:$0xff]   ;;  %v3724_v25 = vld [vmem:[%s5429_s0 + $0x18] ss:$12 sps:$4 sm:$0xff]  }
   0x8   :  { %v3719_v20 = vld [vmem:[%s5428_s1 + $0x88] sm:$0xff]   ;;  %v3762_v24 = vld [vmem:[%s5428_s1 + $0x80] sm:$0xff]   ;;  %v3730_v29 = vld [vmem:[%s5429_s0 + $0x30] ss:$12 sps:$4 sm:$0xff]  }
   0x9   :  { %v3720_v22 = vld [vmem:[%s5429_s0 + $0x1c] ss:$12 sps:$4 sm:$0xff]   ;;  %v3722_v23 = vld [vmem:[%s5429_s0 + $0x40c] ss:$12 sps:$4 sm:$0xff]   ;;  %v3726_v27 = vld [vmem:[%s5429_s0 + $0x34] ss:$12 sps:$4 sm:$0xff]  }
   0xa   :  { %1397 = vmatpush1.bf16.msra.mxu0 %v3699_v3  ;;  %3682 = vmatpush1.bf16.msra.mxu1 %v3699_v3  ;;  %v3725_v26 = vld [vmem:[%s5429_s0 + $0x408] ss:$12 sps:$4 sm:$0xff]   ;;  %v3728_v28 = vld [vmem:[%s5429_s0 + $0x424] ss:$12 sps:$4 sm:$0xff]   ;;  %v3731_v30 = vld [vmem:[%s5429_s0 + $0x420] ss:$12 sps:$4 sm:$0xff]  }
   0xb   :  { %1398 = vmatprep.subr.bf16.mxu0 %v3939_v0  ;;  %3667 = vmatprep.subr.bf16.mxu1 %v3939_v0  ;;  %v3732_v31 = vld [vmem:[%s5429_s0 + $0x4c] ss:$12 sps:$4 sm:$0xff]   ;;  %v3734_v32 = vld [vmem:[%s5429_s0 + $0x43c] ss:$12 sps:$4 sm:$0xff]   ;;  %v3738_v35 = vld [vmem:[%s5429_s0 + $0x64] ss:$12 sps:$4 sm:$0xff]  }
   0xc   :  { %v3736_v33 = vld [vmem:[%s5429_s0 + $0x48] ss:$12 sps:$4 sm:$0xff]   ;;  %v3737_v34 = vld [vmem:[%s5429_s0 + $0x438] ss:$12 sps:$4 sm:$0xff]   ;;  %v3742_v37 = vld [vmem:[%s5429_s0 + $0x60] ss:$12 sps:$4 sm:$0xff]  }
   0xd   :  { %v3740_v36 = vld [vmem:[%s5429_s0 + $0x454] ss:$12 sps:$4 sm:$0xff]   ;;  %v3743_v38 = vld [vmem:[%s5429_s0 + $0x450] ss:$12 sps:$4 sm:$0xff]   ;;  %v3746_v40 = vld [vmem:[%s5429_s0 + $0x46c] ss:$12 sps:$4 sm:$0xff]  }
   0xe   :  { %1399 = vmatpush1.bf16.msra.mxu0 %v3700_v4  ;;  %3683 = vmatpush1.bf16.msra.mxu1 %v3700_v4  ;;  %v3744_v39 = vld [vmem:[%s5429_s0 + $0x7c] ss:$12 sps:$4 sm:$0xff]   ;;  %v3748_v41 = vld [vmem:[%s5429_s0 + $0x78] ss:$12 sps:$4 sm:$0xff]   ;;  %v3750_v43 = vld [vmem:[%s5429_s0 + $0x94] ss:$12 sps:$4 sm:$0xff]  }
   0xf   :  { %1400 = vmatprep.subr.bf16.mxu0 %v3939_v0  ;;  %3668 = vmatprep.subr.bf16.mxu1 %v3939_v0  ;;  %v3749_v42 = vld [vmem:[%s5429_s0 + $0x468] ss:$12 sps:$4 sm:$0xff]   ;;  %v3752_v44 = vld [vmem:[%s5429_s0 + $0x484] ss:$12 sps:$4 sm:$0xff]   ;;  %v3755_v46 = vld [vmem:[%s5429_s0 + $0x480] ss:$12 sps:$4 sm:$0xff]  }
  0x10   :  { %v3754_v45 = vld [vmem:[%s5429_s0 + $0x90] ss:$12 sps:$4 sm:$0xff]   ;;  %v3756_v47 = vld [vmem:[%s5429_s0 + $0xac] ss:$12 sps:$4 sm:$0xff]   ;;  %v3760_v49 = vld [vmem:[%s5429_s0 + $0xa8] ss:$12 sps:$4 sm:$0xff]  }
  0x11   :  { %v3758_v48 = vld [vmem:[%s5429_s0 + $0x49c] ss:$12 sps:$4 sm:$0xff]   ;;  %v3761_v50 = vld [vmem:[%s5429_s0 + $0x498] ss:$12 sps:$4 sm:$0xff]   ;;  %v3765_v52 = vld [vmem:[%s5429_s0 + $0x4b4] ss:$12 sps:$4 sm:$0xff]  }
  0x12   :  { %1401 = vmatpush1.bf16.msra.mxu0 %v3701_v5  ;;  %3684 = vmatpush1.bf16.msra.mxu1 %v3701_v5  ;;  %v3763_v51 = vld [vmem:[%s5429_s0 + $0xc4] ss:$12 sps:$4 sm:$0xff]   ;;  %v3767_v53 = vld [vmem:[%s5429_s0 + $0xc0] ss:$12 sps:$4 sm:$0xff]   ;;  %v3769_v55 = vld [vmem:[%s5429_s0 + $0xdc] ss:$12 sps:$4 sm:$0xff]  }
  0x13   :  { %1402 = vmatprep.subr.bf16.mxu0 %v3939_v0  ;;  %3669 = vmatprep.subr.bf16.mxu1 %v3939_v0  ;;  %v3768_v54 = vld [vmem:[%s5429_s0 + $0x4b0] ss:$12 sps:$4 sm:$0xff]   ;;  %v3771_v56 = vld [vmem:[%s5429_s0 + $0x4cc] ss:$12 sps:$4 sm:$0xff]   ;;  %v3774_v58 = vld [vmem:[%s5429_s0 + $0x4c8] ss:$12 sps:$4 sm:$0xff]  }
  0x14   :  { %v3773_v57 = vld [vmem:[%s5429_s0 + $0xd8] ss:$12 sps:$4 sm:$0xff]   ;;  %v3775_v59 = vld [vmem:[%s5429_s0 + $0xf4] ss:$12 sps:$4 sm:$0xff]   ;;  %v3779_v61 = vld [vmem:[%s5429_s0 + $0xf0] ss:$12 sps:$4 sm:$0xff]  }
  0x15   :  { %v3777_v60 = vld [vmem:[%s5429_s0 + $0x4e4] ss:$12 sps:$4 sm:$0xff]   ;;  %v3780_v62 = vld [vmem:[%s5429_s0 + $0x4e0] ss:$12 sps:$4 sm:$0xff]   ;;  %v3785_v1 = vld [vmem:[%s5429_s0 + $0x108] ss:$12 sps:$4 sm:$0xff]  }
  0x16   :  { %1403 = vmatpush1.bf16.msra.mxu0 %v3702_v7  ;;  %3685 = vmatpush1.bf16.msra.mxu1 %v3702_v7  ;;  %v3781_v63 = vld [vmem:[%s5429_s0 + $0x10c] ss:$12 sps:$4 sm:$0xff]   ;;  %v3787_v3 = vld [vmem:[%s5429_s0 + $0x124] ss:$12 sps:$4 sm:$0xff]   ;;  %v3789_v4 = vld [vmem:[%s5429_s0 + $0x514] ss:$12 sps:$4 sm:$0xff]  }
  0x17   :  { %1404 = vmatprep.subr.bf16.mxu0 %v3939_v0  ;;  %3670 = vmatprep.subr.bf16.mxu1 %v3939_v0  ;;  %v3786_v2 = vld [vmem:[%s5429_s0 + $0x4f8] ss:$12 sps:$4 sm:$0xff]   ;;  %v235_v5 = vld [vmem:[%s5429_s0 + $0x528] sm:$0x11]  ;;  %v3792_v7 = vld [vmem:[%s5429_s0 + $0x510] ss:$12 sps:$4 sm:$0xff]  }
  0x18   :  { %v3791_v6 = vld [vmem:[%s5429_s0 + $0x120] ss:$12 sps:$4 sm:$0xff]   ;;  %v3793_v8 = vld [vmem:[%s5429_s0 + $0x13c] ss:$12 sps:$4 sm:$0xff]  }
  0x1a   :  { %1405 = vmatpush1.bf16.msra.mxu0 %v3703_v9  ;;  %3686 = vmatpush1.bf16.msra.mxu1 %v3703_v9  ;;  %v3192_v9 = vcombine.high %v235_v5, %v235_v5 }
  0x1b   :  { %1406 = vmatprep.subr.bf16.mxu0 %v3939_v0  ;;  %3671 = vmatprep.subr.bf16.mxu1 %v3939_v0 }
  0x1e   :  { %1407 = vmatpush1.bf16.msra.mxu0 %v3704_v10  ;;  %3687 = vmatpush1.bf16.msra.mxu1 %v3704_v10  ;;  %v3796_v10 = vld [vmem:[%s5429_s0 + $0x138] ss:$12 sps:$4 sm:$0xff]  }
  0x1f   :  { %1408 = vmatprep.subr.bf16.mxu0 %v3939_v0  ;;  %3672 = vmatprep.subr.bf16.mxu1 %v3939_v0 }
  0x22   :  { %1409 = vmatpush2.bf16.msra.mxu0 %v3705_v11  ;;  %3688 = vmatpush2.bf16.msra.mxu1 %v3705_v11  ;;  %v3191_v11 = vcombine.low %v235_v5, %v235_v5 }
  0x23   :  { %1410 = vmatprep.subr.bf16.mxu0 %v3939_v0  ;;  %3673 = vmatprep.subr.bf16.mxu1 %v3939_v0 }
  0x26   :  { %1411 = vmatpush2.bf16.msra.mxu0 %v3706_v12  ;;  %3689 = vmatpush2.bf16.msra.mxu1 %v3706_v12  ;;  %v3798_v12 = vld [vmem:[%s5429_s0 + $0x154] ss:$12 sps:$4 sm:$0xff]  }
  0x27   :  { %1412 = vmatprep.subr.bf16.mxu0 %v3939_v0  ;;  %3674 = vmatprep.subr.bf16.mxu1 %v3939_v0 }
  0x2a   :  { %1413 = vmatpush2.bf16.msra.mxu0 %v3707_v13  ;;  %3690 = vmatpush2.bf16.msra.mxu1 %v3707_v13  ;;  %v3800_v13 = vld [vmem:[%s5429_s0 + $0x8] ss:$12 sps:$4 sm:$0xff]  }
  0x2b   :  { %1414 = vmatprep.subr.bf16.mxu0 %v3939_v0  ;;  %3675 = vmatprep.subr.bf16.mxu1 %v3939_v0 }
  0x2e   :  { %1415 = vmatpush2.bf16.msra.mxu0 %v3708_v14  ;;  %3691 = vmatpush2.bf16.msra.mxu1 %v3708_v14  ;;  %v3801_v14 = vld [vmem:[%s5429_s0 + $0x150] ss:$12 sps:$4 sm:$0xff]  }
  0x2f   :  { %1416 = vmatprep.subr.bf16.mxu0 %v3939_v0  ;;  %3676 = vmatprep.subr.bf16.mxu1 %v3939_v0 }
  0x32   :  { %1417 = vmatpush2.bf16.msra.mxu0 %v3709_v15  ;;  %3692 = vmatpush2.bf16.msra.mxu1 %v3709_v15  ;;  %v3802_v15 = vld [vmem:[%s5429_s0 + $0x20] ss:$12 sps:$4 sm:$0xff]  }
  0x33   :  { %1418 = vmatprep.subr.bf16.mxu0 %v3939_v0  ;;  %3677 = vmatprep.subr.bf16.mxu1 %v3939_v0 }
  0x36   :  { %1419 = vmatpush2.bf16.msra.mxu0 %v3710_v16  ;;  %3693 = vmatpush2.bf16.msra.mxu1 %v3710_v16  ;;  %v3803_v16 = vld [vmem:[%s5429_s0 + $0x16c] ss:$12 sps:$4 sm:$0xff]  }
  0x37   :  { %1420 = vmatprep.subr.bf16.mxu0 %v3939_v0  ;;  %3678 = vmatprep.subr.bf16.mxu1 %v3939_v0 }
  0x3a   :  { %1421 = vmatpush2.bf16.msra.mxu0 %v3711_v17  ;;  %3694 = vmatpush2.bf16.msra.mxu1 %v3711_v17  ;;  %v3805_v17 = vld [vmem:[%s5429_s0 + $0x38] ss:$12 sps:$4 sm:$0xff]  }
  0x3b   :  { %1422 = vmatprep.subr.bf16.mxu0 %v3939_v0  ;;  %3679 = vmatprep.subr.bf16.mxu1 %v3939_v0  ;;  %v3783_v0 = vld [vmem:[%s5429_s0 + $0x4fc] ss:$12 sps:$4 sm:$0xff]  }
  0x3e   :  { %1423 = vmatpush2.bf16.msra.mxu0 %v3712_v18  ;;  %3695 = vmatpush2.bf16.msra.mxu1 %v3712_v18  ;;  %v3806_v18 = vld [vmem:[%s5429_s0 + $0x168] ss:$12 sps:$4 sm:$0xff]  }
  0x3f   :  { %3548 = vmatprep.subr.bf16.mxu1 %v3719_v20 }
  0x41   :  { %1425 = vmatmul.mubr.bf16.vlgmr.msra.gmra.mxu0 %v3713_v19  ;;  %1761 = vmatmul.mubr.bf16.vlgmr.msra.gmra.mxu1 %v3716_v21  ;;  %v3807_v19 = vld [vmem:[%s5429_s0 + $0x50] ss:$12 sps:$4 sm:$0xff]   ;;  %v3810_v21 = vld [vmem:[%s5429_s0 + $0x68] ss:$12 sps:$4 sm:$0xff]  }
  0x42   :  { %3549 = vmatpush3.bf16.msra.mxu1 %v3719_v20  ;;  %1432 = vmatprep.mubr.bf16.mxu0 %v3720_v22  ;;  %v3808_v20 = vld [vmem:[%s5429_s0 + $0x184] ss:$12 sps:$4 sm:$0xff]   ;;  %v3811_v22 = vld [vmem:[%s5429_s0 + $0x180] ss:$12 sps:$4 sm:$0xff]  }
  0x43   :  { %1768 = vmatprep.mubr.bf16.mxu1 %v3722_v23  ;;  %3550 = vmatprep.subr.bf16.mxu1 %v3762_v24  ;;  %v3812_v23 = vld [vmem:[%s5429_s0 + $0x80] ss:$12 sps:$4 sm:$0xff]  }
  0x46   :  { %3551 = vmatpush3.bf16.msra.mxu1 %v3762_v24  ;;  %v3813_v24 = vld [vmem:[%s5429_s0 + $0x19c] ss:$12 sps:$4 sm:$0xff]  }
  0x49   :  { %1433 = vmatmul.mubr.bf16.gmra.mxu0 %v3724_v25  ;;  %1769 = vmatmul.mubr.bf16.gmra.mxu1 %v3725_v26  ;;  %v3815_v25 = vld [vmem:[%s5429_s0 + $0x98] ss:$12 sps:$4 sm:$0xff]  }
  0x4a   :  { %1440 = vmatprep.mubr.bf16.mxu0 %v3726_v27  ;;  %1776 = vmatprep.mubr.bf16.mxu1 %v3728_v28  ;;  %v3816_v26 = vld [vmem:[%s5429_s0 + $0x198] ss:$12 sps:$4 sm:$0xff]   ;;  %v3817_v27 = vld [vmem:[%s5429_s0 + $0xb0] ss:$12 sps:$4 sm:$0xff]   ;;  %v3818_v28 = vld [vmem:[%s5429_s0 + $0x1b4] ss:$12 sps:$4 sm:$0xff]  }
  0x51   :  { %1441 = vmatmul.mubr.bf16.gmra.mxu0 %v3730_v29  ;;  %1777 = vmatmul.mubr.bf16.gmra.mxu1 %v3731_v30  ;;  %v3820_v29 = vld [vmem:[%s5429_s0 + $0xc8] ss:$12 sps:$4 sm:$0xff]   ;;  %v3821_v30 = vld [vmem:[%s5429_s0 + $0x1b0] ss:$12 sps:$4 sm:$0xff]  }
  0x52   :  { %1448 = vmatprep.mubr.bf16.mxu0 %v3732_v31  ;;  %1784 = vmatprep.mubr.bf16.mxu1 %v3734_v32  ;;  %v3822_v31 = vld [vmem:[%s5429_s0 + $0xe0] ss:$12 sps:$4 sm:$0xff]  }
  0x53   :  { %v3823_v32 = vld [vmem:[%s5429_s0 + $0x1cc] ss:$12 sps:$4 sm:$0xff]  }
  0x59   :  { %1449 = vmatmul.mubr.bf16.gmra.mxu0 %v3736_v33  ;;  %1785 = vmatmul.mubr.bf16.gmra.mxu1 %v3737_v34  ;;  %v3825_v33 = vld [vmem:[%s5429_s0 + $0xf8] ss:$12 sps:$4 sm:$0xff]   ;;  %v3826_v34 = vld [vmem:[%s5429_s0 + $0x1c8] ss:$12 sps:$4 sm:$0xff]  }
  0x5a   :  { %1456 = vmatprep.mubr.bf16.mxu0 %v3738_v35  ;;  %1792 = vmatprep.mubr.bf16.mxu1 %v3740_v36  ;;  %v3827_v35 = vld [vmem:[%s5429_s0 + $0x110] ss:$12 sps:$4 sm:$0xff]  }
  0x5b   :  { %v3828_v36 = vld [vmem:[%s5429_s0 + $0x1e4] ss:$12 sps:$4 sm:$0xff]  }
  0x61   :  { %1457 = vmatmul.mubr.bf16.gmra.mxu0 %v3742_v37  ;;  %1793 = vmatmul.mubr.bf16.gmra.mxu1 %v3743_v38  ;;  %v3830_v37 = vld [vmem:[%s5429_s0 + $0x128] ss:$12 sps:$4 sm:$0xff]   ;;  %v3831_v38 = vld [vmem:[%s5429_s0 + $0x1e0] ss:$12 sps:$4 sm:$0xff]  }
  0x62   :  { %1464 = vmatprep.mubr.bf16.mxu0 %v3744_v39  ;;  %1800 = vmatprep.mubr.bf16.mxu1 %v3746_v40  ;;  %v3832_v39 = vld [vmem:[%s5429_s0 + $0x140] ss:$12 sps:$4 sm:$0xff]   ;;  %v3833_v40 = vld [vmem:[%s5429_s0 + $0x1fc] ss:$12 sps:$4 sm:$0xff]  }
  0x69   :  { %1465 = vmatmul.mubr.bf16.gmra.mxu0 %v3748_v41  ;;  %1801 = vmatmul.mubr.bf16.gmra.mxu1 %v3749_v42  ;;  %v3835_v41 = vld [vmem:[%s5429_s0 + $0x158] ss:$12 sps:$4 sm:$0xff]  }
  0x6a   :  { %1472 = vmatprep.mubr.bf16.mxu0 %v3750_v43  ;;  %1808 = vmatprep.mubr.bf16.mxu1 %v3752_v44  ;;  %v3836_v42 = vld [vmem:[%s5429_s0 + $0x1f8] ss:$12 sps:$4 sm:$0xff]   ;;  %v3837_v43 = vld [vmem:[%s5429_s0 + $0x170] ss:$12 sps:$4 sm:$0xff]   ;;  %v3838_v44 = vld [vmem:[%s5429_s0 + $0x214] ss:$12 sps:$4 sm:$0xff]  }
  0x71   :  { %1473 = vmatmul.mubr.bf16.gmra.mxu0 %v3754_v45  ;;  %1809 = vmatmul.mubr.bf16.gmra.mxu1 %v3755_v46  ;;  %v3840_v45 = vld [vmem:[%s5429_s0 + $0x188] ss:$12 sps:$4 sm:$0xff]   ;;  %v3841_v46 = vld [vmem:[%s5429_s0 + $0x210] ss:$12 sps:$4 sm:$0xff]  }
  0x72   :  { %1480 = vmatprep.mubr.bf16.mxu0 %v3756_v47  ;;  %1816 = vmatprep.mubr.bf16.mxu1 %v3758_v48  ;;  %v3842_v47 = vld [vmem:[%s5429_s0 + $0x1a0] ss:$12 sps:$4 sm:$0xff]  }
  0x73   :  { %v3843_v48 = vld [vmem:[%s5429_s0 + $0x22c] ss:$12 sps:$4 sm:$0xff]  }
  0x79   :  { %1481 = vmatmul.mubr.bf16.gmra.mxu0 %v3760_v49  ;;  %1817 = vmatmul.mubr.bf16.gmra.mxu1 %v3761_v50  ;;  %v3845_v49 = vld [vmem:[%s5429_s0 + $0x1b8] ss:$12 sps:$4 sm:$0xff]   ;;  %v3846_v50 = vld [vmem:[%s5429_s0 + $0x228] ss:$12 sps:$4 sm:$0xff]  }
  0x7a   :  { %1488 = vmatprep.mubr.bf16.mxu0 %v3763_v51  ;;  %1824 = vmatprep.mubr.bf16.mxu1 %v3765_v52  ;;  %v3847_v51 = vld [vmem:[%s5429_s0 + $0x1d0] ss:$12 sps:$4 sm:$0xff]  }
  0x7b   :  { %v3848_v52 = vld [vmem:[%s5429_s0 + $0x244] ss:$12 sps:$4 sm:$0xff]  }
  0x81   :  { %1489 = vmatmul.mubr.bf16.gmra.mxu0 %v3767_v53  ;;  %1825 = vmatmul.mubr.bf16.gmra.mxu1 %v3768_v54  ;;  %v3850_v53 = vld [vmem:[%s5429_s0 + $0x1e8] ss:$12 sps:$4 sm:$0xff]   ;;  %v3851_v54 = vld [vmem:[%s5429_s0 + $0x240] ss:$12 sps:$4 sm:$0xff]  }
  0x82   :  { %1496 = vmatprep.mubr.bf16.mxu0 %v3769_v55  ;;  %1832 = vmatprep.mubr.bf16.mxu1 %v3771_v56  ;;  %v3852_v55 = vld [vmem:[%s5429_s0 + $0x200] ss:$12 sps:$4 sm:$0xff]   ;;  %v3853_v56 = vld [vmem:[%s5429_s0 + $0x25c] ss:$12 sps:$4 sm:$0xff]  }
  0x89   :  { %1497 = vmatmul.mubr.bf16.gmra.mxu0 %v3773_v57  ;;  %1833 = vmatmul.mubr.bf16.gmra.mxu1 %v3774_v58  ;;  %v3855_v57 = vld [vmem:[%s5429_s0 + $0x218] ss:$12 sps:$4 sm:$0xff]  }
  0x8a   :  { %1504 = vmatprep.mubr.bf16.mxu0 %v3775_v59  ;;  %1840 = vmatprep.mubr.bf16.mxu1 %v3777_v60 }
  0x91   :  { %1505 = vmatmul.mubr.bf16.gmra.mxu0 %v3779_v61  ;;  %1841 = vmatmul.mubr.bf16.gmra.mxu1 %v3780_v62 }
  0x92   :  { %1512 = vmatprep.mubr.bf16.mxu0 %v3781_v63  ;;  %1848 = vmatprep.mubr.bf16.mxu1 %v3783_v0  ;;  %v3856_v0 = vld [vmem:[%s5429_s0 + $0x258] ss:$12 sps:$4 sm:$0xff]  }
  0x99   :  { %1513 = vmatmul.mubr.bf16.gmra.mxu0 %v3785_v1  ;;  %1849 = vmatmul.mubr.bf16.gmra.mxu1 %v3786_v2  ;;  %v3857_v1 = vld [vmem:[%s5429_s0 + $0x230] ss:$12 sps:$4 sm:$0xff]   ;;  %v3858_v2 = vld [vmem:[%s5429_s0 + $0x274] ss:$12 sps:$4 sm:$0xff]  }
  0x9a   :  { %1520 = vmatprep.mubr.bf16.mxu0 %v3787_v3  ;;  %1856 = vmatprep.mubr.bf16.mxu1 %v3789_v4  ;;  %v3860_v3 = vld [vmem:[%s5429_s0 + $0x248] ss:$12 sps:$4 sm:$0xff]  }
  0xa1   :  { %1521 = vmatmul.mubr.bf16.gmra.mxu0 %v3791_v6  ;;  %1857 = vmatmul.mubr.bf16.gmra.mxu1 %v3792_v7 }
  0xa2   :  { %1528 = vmatprep.mubr.bf16.mxu0 %v3793_v8  ;;  %1864 = vmatprep.mubr.bf16.mxu1 %v3192_v9 }
  0xa9   :  { %1529 = vmatmul.mubr.bf16.gmra.mxu0 %v3796_v10  ;;  %1865 = vmatmul.mubr.bf16.gmra.mxu1 %v3191_v11 }
  0xaa   :  { %1536 = vmatprep.mubr.bf16.mxu0 %v3798_v12  ;;  %3552 = vmatprep.mubr.msk.bf16.mxu1 %vm1223_vm0, %v3800_v13  ;;  %v3861_v12 = vld [vmem:[%s5429_s0 + $0x270] ss:$12 sps:$4 sm:$0xff]   ;;  %v3862_v13 = vld [vmem:[%s5429_s0 + $0x260] ss:$12 sps:$4 sm:$0xff]  }
  0xb1   :  { %1537 = vmatmul.mubr.bf16.gmra.mxu0 %v3801_v14  ;;  %3553 = vmatmul.mubr.msk.bf16.vlgmr.msra.gmra.mxu1 %vm1223_vm0, %v3802_v15  ;;  %v3863_v14 = vld [vmem:[%s5429_s0 + $0x28c] ss:$12 sps:$4 sm:$0xff]  }
  0xb2   :  { %1544 = vmatprep.mubr.bf16.mxu0 %v3803_v16  ;;  %3556 = vmatprep.mubr.msk.bf16.mxu1 %vm1223_vm0, %v3805_v17  ;;  %v3865_v15 = vld [vmem:[%s5429_s0 + $0x278] ss:$12 sps:$4 sm:$0xff]  }
  0xb9   :  { %1545 = vmatmul.mubr.bf16.gmra.mxu0 %v3806_v18  ;;  %3557 = vmatmul.mubr.msk.bf16.gmra.mxu1 %vm1223_vm0, %v3807_v19 }
  0xba   :  { %1552 = vmatprep.mubr.bf16.mxu0 %v3808_v20  ;;  %3560 = vmatprep.mubr.msk.bf16.mxu1 %vm1223_vm0, %v3810_v21 }
  0xc1   :  { %1553 = vmatmul.mubr.bf16.gmra.mxu0 %v3811_v22  ;;  %3561 = vmatmul.mubr.msk.bf16.gmra.mxu1 %vm1223_vm0, %v3812_v23 }
  0xc2   :  { %1560 = vmatprep.mubr.bf16.mxu0 %v3813_v24  ;;  %3564 = vmatprep.mubr.msk.bf16.mxu1 %vm1223_vm0, %v3815_v25  ;;  %v3866_v24 = vld [vmem:[%s5429_s0 + $0x288] ss:$12 sps:$4 sm:$0xff]   ;;  %v3867_v25 = vld [vmem:[%s5429_s0 + $0x290] ss:$12 sps:$4 sm:$0xff]  }
  0xc9   :  { %1561 = vmatmul.mubr.bf16.gmra.mxu0 %v3816_v26  ;;  %3565 = vmatmul.mubr.msk.bf16.gmra.mxu1 %vm1223_vm0, %v3817_v27  ;;  %v3870_v26 = vld [vmem:[%s5429_s0 + $0x2a4] ss:$12 sps:$4 sm:$0xff]   ;;  %v3871_v27 = vld [vmem:[%s5429_s0 + $0x2a8] ss:$12 sps:$4 sm:$0xff]  }
  0xca   :  { %1568 = vmatprep.mubr.bf16.mxu0 %v3818_v28  ;;  %3568 = vmatprep.mubr.msk.bf16.mxu1 %vm1223_vm0, %v3820_v29 }
  0xd1   :  { %1569 = vmatmul.mubr.bf16.gmra.mxu0 %v3821_v30  ;;  %3569 = vmatmul.mubr.msk.bf16.gmra.mxu1 %vm1223_vm0, %v3822_v31 }
  0xd2   :  { %1576 = vmatprep.mubr.bf16.mxu0 %v3823_v32  ;;  %3572 = vmatprep.mubr.msk.bf16.mxu1 %vm1223_vm0, %v3825_v33 }
  0xd9   :  { %1577 = vmatmul.mubr.bf16.gmra.mxu0 %v3826_v34  ;;  %3573 = vmatmul.mubr.msk.bf16.gmra.mxu1 %vm1223_vm0, %v3827_v35 }
  0xda   :  { %1584 = vmatprep.mubr.bf16.mxu0 %v3828_v36  ;;  %3576 = vmatprep.mubr.msk.bf16.mxu1 %vm1223_vm0, %v3830_v37  ;;  %v3868_v36 = vld [vmem:[%s5429_s0 + $0x2a0] ss:$12 sps:$4 sm:$0xff]  }
  0xdb   :  { %v3872_v37 = vld [vmem:[%s5429_s0 + $0x2c0] ss:$12 sps:$4 sm:$0xff]  }
  0xe1   :  { %1585 = vmatmul.mubr.bf16.gmra.mxu0 %v3831_v38  ;;  %3577 = vmatmul.mubr.msk.bf16.gmra.mxu1 %vm1223_vm0, %v3832_v39  ;;  %v3875_v38 = vld [vmem:[%s5429_s0 + $0x2bc] ss:$12 sps:$4 sm:$0xff]   ;;  %v3876_v39 = vld [vmem:[%s5429_s0 + $0x2d8] ss:$12 sps:$4 sm:$0xff]  }
  0xe2   :  { %1592 = vmatprep.mubr.bf16.mxu0 %v3833_v40  ;;  %3580 = vmatprep.mubr.msk.bf16.mxu1 %vm1223_vm0, %v3835_v41 }
  0xe9   :  { %1593 = vmatmul.mubr.bf16.gmra.mxu0 %v3836_v42  ;;  %3581 = vmatmul.mubr.msk.bf16.gmra.mxu1 %vm1223_vm0, %v3837_v43 }
  0xea   :  { %1600 = vmatprep.mubr.bf16.mxu0 %v3838_v44  ;;  %3584 = vmatprep.mubr.msk.bf16.mxu1 %vm1223_vm0, %v3840_v45 }
  0xf1   :  { %1601 = vmatmul.mubr.bf16.gmra.mxu0 %v3841_v46  ;;  %3585 = vmatmul.mubr.msk.bf16.gmra.mxu1 %vm1223_vm0, %v3842_v47 }
  0xf2   :  { %1608 = vmatprep.mubr.bf16.mxu0 %v3843_v48  ;;  %3588 = vmatprep.mubr.msk.bf16.mxu1 %vm1223_vm0, %v3845_v49  ;;  %v3873_v48 = vld [vmem:[%s5429_s0 + $0x2b8] ss:$12 sps:$4 sm:$0xff]   ;;  %v3877_v49 = vld [vmem:[%s5429_s0 + $0x2f0] ss:$12 sps:$4 sm:$0xff]  }
  0xf9   :  { %1609 = vmatmul.mubr.bf16.gmra.mxu0 %v3846_v50  ;;  %3589 = vmatmul.mubr.msk.bf16.gmra.mxu1 %vm1223_vm0, %v3847_v51  ;;  %v3880_v50 = vld [vmem:[%s5429_s0 + $0x2d4] ss:$12 sps:$4 sm:$0xff]  }
  0xfa   :  { %1616 = vmatprep.mubr.bf16.mxu0 %v3848_v52  ;;  %3592 = vmatprep.mubr.msk.bf16.mxu1 %vm1223_vm0, %v3850_v53  ;;  %v3881_v51 = vld [vmem:[%s5429_s0 + $0x308] ss:$12 sps:$4 sm:$0xff]  }
 0x101   :  { %v4370_v58 = vpop.f32.mrf.mxu0  ;;  %1617 = vmatmul.mubr.bf16.gmra.mxu0 %v3851_v54  ;;  %v4372_v59 = vpop.f32.mrf.mxu1  ;;  %3593 = vmatmul.mubr.msk.bf16.gmra.mxu1 %vm1223_vm0, %v3852_v55 }
 0x102   :  { %1624 = vmatprep.mubr.bf16.mxu0 %v3853_v56  ;;  %3596 = vmatprep.mubr.msk.bf16.mxu1 %vm1223_vm0, %v3855_v57 }
 0x103   :  { %v1428_v60 = vpop.f32.mrf.mxu0  ;;  %v1764_v61 = vpop.f32.mrf.mxu1 }
 0x105   :  { %v4376_v62 = vpop.f32.mrf.mxu0  ;;  %v4378_v63 = vpop.f32.mrf.mxu1 }
 0x107   :  { %v1431_v4 = vpop.f32.mrf.mxu0  ;;  %v1767_v5 = vpop.f32.mrf.mxu1 }
 0x109   :  { %v4392_v6 = vpop.f32.mrf.mxu0  ;;  %1625 = vmatmul.mubr.bf16.gmra.mxu0 %v3856_v0  ;;  %v4394_v7 = vpop.f32.mrf.mxu1  ;;  %3597 = vmatmul.mubr.msk.bf16.gmra.mxu1 %vm1223_vm0, %v3857_v1  ;;  %v3878_v0 = vld [vmem:[%s5429_s0 + $0x2d0] ss:$12 sps:$4 sm:$0xff]   ;;  %v3882_v1 = vld [vmem:[%s5429_s0 + $0x320] ss:$12 sps:$4 sm:$0xff]  }
 0x10a   :  { %1632 = vmatprep.mubr.bf16.mxu0 %v3858_v2  ;;  %3600 = vmatprep.mubr.msk.bf16.mxu1 %vm1223_vm0, %v3860_v3  ;;  %v3885_v2 = vld [vmem:[%s5429_s0 + $0x2ec] ss:$12 sps:$4 sm:$0xff]  }
 0x10b   :  { %v1436_v8 = vpop.f32.mrf.mxu0  ;;  %v1772_v9 = vpop.f32.mrf.mxu1  ;;  %v3886_v3 = vld [vmem:[%s5429_s0 + $0x338] ss:$12 sps:$4 sm:$0xff]  }
 0x10d   :  { %v4398_v10 = vpop.f32.mrf.mxu0  ;;  %v4400_v11 = vpop.f32.mrf.mxu1 }
 0x10f   :  { %v1439_v16 = vpop.f32.mrf.mxu0  ;;  %v1775_v17 = vpop.f32.mrf.mxu1 }
 0x110   :  { %v3883_v16 = vld [vmem:[%s5429_s0 + $0x2e8] ss:$12 sps:$4 sm:$0xff]   ;;  %v3887_v17 = vld [vmem:[%s5429_s0 + $0x350] ss:$12 sps:$4 sm:$0xff]  }
 0x111   :  { %v4414_v18 = vpop.f32.mrf.mxu0  ;;  %1633 = vmatmul.mubr.bf16.gmra.mxu0 %v3861_v12  ;;  %v4416_v19 = vpop.f32.mrf.mxu1  ;;  %3601 = vmatmul.mubr.msk.bf16.gmra.mxu1 %vm1223_vm0, %v3862_v13 }
 0x112   :  { %1640 = vmatprep.mubr.bf16.mxu0 %v3863_v14  ;;  %3604 = vmatprep.mubr.msk.bf16.mxu1 %vm1223_vm0, %v3865_v15 }
 0x113   :  { %v1444_v20 = vpop.f32.mrf.mxu0  ;;  %v1780_v21 = vpop.f32.mrf.mxu1 }
 0x114   :  { %v3890_v20 = vld [vmem:[%s5429_s0 + $0x304] ss:$12 sps:$4 sm:$0xff]   ;;  %v3891_v21 = vld [vmem:[%s5429_s0 + $0x368] ss:$12 sps:$4 sm:$0xff]  }
 0x115   :  { %v4420_v22 = vpop.f32.mrf.mxu0  ;;  %v4422_v23 = vpop.f32.mrf.mxu1 }
 0x117   :  { %v1447_v28 = vpop.f32.mrf.mxu0  ;;  %v1783_v29 = vpop.f32.mrf.mxu1 }
 0x119   :  { %v4436_v30 = vpop.f32.mrf.mxu0  ;;  %1641 = vmatmul.mubr.bf16.gmra.mxu0 %v3866_v24  ;;  %v4438_v31 = vpop.f32.mrf.mxu1  ;;  %3605 = vmatmul.mubr.msk.bf16.gmra.mxu1 %vm1223_vm0, %v3867_v25 }
 0x11a   :  { %1648 = vmatprep.mubr.bf16.mxu0 %v3870_v26  ;;  %3608 = vmatprep.mubr.msk.bf16.mxu1 %vm1223_vm0, %v3871_v27 }
 0x11b   :  { %v1452_v32 = vpop.f32.mrf.mxu0  ;;  %v1788_v33 = vpop.f32.mrf.mxu1 }
 0x11d   :  { %v4442_v34 = vpop.f32.mrf.mxu0  ;;  %v4444_v35 = vpop.f32.mrf.mxu1 }
 0x11f   :  { %v1455_v40 = vpop.f32.mrf.mxu0  ;;  %v1791_v41 = vpop.f32.mrf.mxu1 }
 0x121   :  { %v4458_v42 = vpop.f32.mrf.mxu0  ;;  %1649 = vmatmul.mubr.bf16.gmra.mxu0 %v3868_v36  ;;  %v4460_v43 = vpop.f32.mrf.mxu1  ;;  %3609 = vmatmul.mubr.msk.bf16.gmra.mxu1 %vm1223_vm0, %v3872_v37  ;;  %v3888_v36 = vld [vmem:[%s5429_s0 + $0x300] ss:$12 sps:$4 sm:$0xff]  }
 0x122   :  { %1656 = vmatprep.mubr.bf16.mxu0 %v3875_v38  ;;  %3612 = vmatprep.mubr.msk.bf16.mxu1 %vm1223_vm0, %v3876_v39  ;;  %v3892_v37 = vld [vmem:[%s5429_s0 + $0x380] ss:$12 sps:$4 sm:$0xff]   ;;  %v3895_v38 = vld [vmem:[%s5429_s0 + $0x31c] ss:$12 sps:$4 sm:$0xff]   ;;  %v3896_v39 = vld [vmem:[%s5429_s0 + $0x398] ss:$12 sps:$4 sm:$0xff]  }
 0x123   :  { %v1460_v44 = vpop.f32.mrf.mxu0  ;;  %v1796_v45 = vpop.f32.mrf.mxu1 }
 0x125   :  { %v4464_v46 = vpop.f32.mrf.mxu0  ;;  %v4466_v47 = vpop.f32.mrf.mxu1 }
 0x127   :  { %v1463_v52 = vpop.f32.mrf.mxu0  ;;  %v1799_v53 = vpop.f32.mrf.mxu1 }
 0x128   :  { %v3893_v52 = vld [vmem:[%s5429_s0 + $0x318] ss:$12 sps:$4 sm:$0xff]   ;;  %v3897_v53 = vld [vmem:[%s5429_s0 + $0x3b0] ss:$12 sps:$4 sm:$0xff]  }
 0x129   :  { %v4480_v54 = vpop.f32.mrf.mxu0  ;;  %1657 = vmatmul.mubr.bf16.gmra.mxu0 %v3873_v48  ;;  %v4482_v55 = vpop.f32.mrf.mxu1  ;;  %3613 = vmatmul.mubr.msk.bf16.gmra.mxu1 %vm1223_vm0, %v3877_v49 }
 0x12a   :  { %1664 = vmatprep.mubr.bf16.mxu0 %v3880_v50  ;;  %3616 = vmatprep.mubr.msk.bf16.mxu1 %vm1223_vm0, %v3881_v51 }
 0x12b   :  { %v1468_v56 = vpop.f32.mrf.mxu0  ;;  %v1804_v57 = vpop.f32.mrf.mxu1 }
 0x12c   :  { %v3900_v56 = vld [vmem:[%s5429_s0 + $0x334] ss:$12 sps:$4 sm:$0xff]  }
 0x12d   :  { %v4486_v60 = vpop.f32.mrf.mxu0  ;;  %v4488_v61 = vpop.f32.mrf.mxu1  ;;  %v3901_v57 = vld [vmem:[%s5429_s0 + $0x3c8] ss:$12 sps:$4 sm:$0xff]  }
 0x12f   :  { %v1471_v4 = vpop.f32.mrf.mxu0  ;;  %v1807_v5 = vpop.f32.mrf.mxu1 }
 0x131   :  { %v4502_v8 = vpop.f32.mrf.mxu0  ;;  %1665 = vmatmul.mubr.bf16.gmra.mxu0 %v3878_v0  ;;  %v4504_v9 = vpop.f32.mrf.mxu1  ;;  %3617 = vmatmul.mubr.msk.bf16.gmra.mxu1 %vm1223_vm0, %v3882_v1 }
 0x132   :  { %1672 = vmatprep.mubr.bf16.mxu0 %v3885_v2  ;;  %3620 = vmatprep.mubr.msk.bf16.mxu1 %vm1223_vm0, %v3886_v3 }
 0x133   :  { %v1476_v12 = vpop.f32.mrf.mxu0  ;;  %v1812_v13 = vpop.f32.mrf.mxu1 }
 0x135   :  { %v4508_v14 = vpop.f32.mrf.mxu0  ;;  %v4510_v15 = vpop.f32.mrf.mxu1 }
 0x137   :  { %v1479_v24 = vpop.f32.mrf.mxu0  ;;  %v1815_v25 = vpop.f32.mrf.mxu1 }
 0x139   :  { %v4524_v26 = vpop.f32.mrf.mxu0  ;;  %1673 = vmatmul.mubr.bf16.gmra.mxu0 %v3883_v16  ;;  %v4526_v27 = vpop.f32.mrf.mxu1  ;;  %3621 = vmatmul.mubr.msk.bf16.gmra.mxu1 %vm1223_vm0, %v3887_v17  ;;  %v3898_v16 = vld [vmem:[%s5429_s0 + $0x330] ss:$12 sps:$4 sm:$0xff]   ;;  %v3902_v17 = vld [vmem:[%s5429_s0 + $0x3e0] ss:$12 sps:$4 sm:$0xff]  }
 0x13a   :  { %1680 = vmatprep.mubr.bf16.mxu0 %v3890_v20  ;;  %3624 = vmatprep.mubr.msk.bf16.mxu1 %vm1223_vm0, %v3891_v21  ;;  %v3905_v20 = vld [vmem:[%s5429_s0 + $0x34c] ss:$12 sps:$4 sm:$0xff]  }
 0x13b   :  { %v1484_v28 = vpop.f32.mrf.mxu0  ;;  %v1820_v29 = vpop.f32.mrf.mxu1  ;;  %v3906_v21 = vld [vmem:[%s5429_s0 + $0x3f8] ss:$12 sps:$4 sm:$0xff]  }
 0x13d   :  { %v4530_v32 = vpop.f32.mrf.mxu0  ;;  %v4532_v33 = vpop.f32.mrf.mxu1 }
 0x13f   :  { %v1487_v40 = vpop.f32.mrf.mxu0  ;;  %v1823_v41 = vpop.f32.mrf.mxu1 }
 0x140   :  { %v3903_v40 = vld [vmem:[%s5429_s0 + $0x348] ss:$12 sps:$4 sm:$0xff]   ;;  %v3907_v41 = vld [vmem:[%s5429_s0 + $0x410] ss:$12 sps:$4 sm:$0xff]  }
 0x141   :  { %v4546_v44 = vpop.f32.mrf.mxu0  ;;  %1681 = vmatmul.mubr.bf16.gmra.mxu0 %v3888_v36  ;;  %v4548_v45 = vpop.f32.mrf.mxu1  ;;  %3625 = vmatmul.mubr.msk.bf16.gmra.mxu1 %vm1223_vm0, %v3892_v37 }
 0x142   :  { %1688 = vmatprep.mubr.bf16.mxu0 %v3895_v38  ;;  %3628 = vmatprep.mubr.msk.bf16.mxu1 %vm1223_vm0, %v3896_v39 }
 0x143   :  { %v1492_v48 = vpop.f32.mrf.mxu0  ;;  %v1828_v49 = vpop.f32.mrf.mxu1 }
 0x144   :  { %v3910_v48 = vld [vmem:[%s5429_s0 + $0x364] ss:$12 sps:$4 sm:$0xff]   ;;  %v3911_v49 = vld [vmem:[%s5429_s0 + $0x428] ss:$12 sps:$4 sm:$0xff]  }
 0x145   :  { %v4552_v50 = vpop.f32.mrf.mxu0  ;;  %v4554_v51 = vpop.f32.mrf.mxu1 }
 0x147   :  { %v1495_v0 = vpop.f32.mrf.mxu0  ;;  %v1831_v1 = vpop.f32.mrf.mxu1 }
 0x149   :  { %v4568_v2 = vpop.f32.mrf.mxu0  ;;  %1689 = vmatmul.mubr.bf16.gmra.mxu0 %v3893_v52  ;;  %v4570_v3 = vpop.f32.mrf.mxu1  ;;  %3629 = vmatmul.mubr.msk.bf16.gmra.mxu1 %vm1223_vm0, %v3897_v53 }
 0x14a   :  { %1696 = vmatprep.mubr.bf16.mxu0 %v3900_v56  ;;  %3632 = vmatprep.mubr.msk.bf16.mxu1 %vm1223_vm0, %v3901_v57 }
 0x14b   :  { %v1500_v4 = vpop.f32.mrf.mxu0  ;;  %v1836_v5 = vpop.f32.mrf.mxu1 }
 0x14d   :  { %v4574_v12 = vpop.f32.mrf.mxu0  ;;  %v4576_v13 = vpop.f32.mrf.mxu1 }
 0x14f   :  { %v1503_v24 = vpop.f32.mrf.mxu0  ;;  %v1839_v25 = vpop.f32.mrf.mxu1 }
 0x151   :  { %v4590_v28 = vpop.f32.mrf.mxu0  ;;  %1697 = vmatmul.mubr.bf16.gmra.mxu0 %v3898_v16  ;;  %v4592_v29 = vpop.f32.mrf.mxu1  ;;  %3633 = vmatmul.mubr.msk.bf16.gmra.mxu1 %vm1223_vm0, %v3902_v17  ;;  %v3908_v16 = vld [vmem:[%s5429_s0 + $0x360] ss:$12 sps:$4 sm:$0xff]  }
 0x152   :  { %5432 = vst [vmem:[#allocation2_spill] sm:$0xff] %v4592_v29  ;;  %1704 = vmatprep.mubr.bf16.mxu0 %v3905_v20  ;;  %3636 = vmatprep.mubr.msk.bf16.mxu1 %vm1223_vm0, %v3906_v21  ;;  %v3912_v17 = vld [vmem:[%s5429_s0 + $0x440] ss:$12 sps:$4 sm:$0xff]   ;;  %v3915_v20 = vld [vmem:[%s5429_s0 + $0x37c] ss:$12 sps:$4 sm:$0xff]  }
 0x153   :  { %v1508_v36 = vpop.f32.mrf.mxu0  ;;  %v1844_v37 = vpop.f32.mrf.mxu1  ;;  %v3916_v21 = vld [vmem:[%s5429_s0 + $0x458] ss:$12 sps:$4 sm:$0xff]  }
 0x155   :  { %v4596_v38 = vpop.f32.mrf.mxu0  ;;  %v4598_v39 = vpop.f32.mrf.mxu1 }
 0x156   :  { %5433 = vst [vmem:[#allocation3_spill] sm:$0xff] %v4598_v39 }
 0x157   :  { %v1511_v52 = vpop.f32.mrf.mxu0  ;;  %v1847_v53 = vpop.f32.mrf.mxu1 }
 0x158   :  { %v3913_v52 = vld [vmem:[%s5429_s0 + $0x378] ss:$12 sps:$4 sm:$0xff]   ;;  %v3917_v53 = vld [vmem:[%s5429_s0 + $0x470] ss:$12 sps:$4 sm:$0xff]  }
 0x159   :  { %v4612_v56 = vpop.f32.mrf.mxu0  ;;  %1705 = vmatmul.mubr.bf16.gmra.mxu0 %v3903_v40  ;;  %v4614_v57 = vpop.f32.mrf.mxu1  ;;  %3637 = vmatmul.mubr.msk.bf16.gmra.mxu1 %vm1223_vm0, %v3907_v41 }
 0x15a   :  { %5434 = vst [vmem:[#allocation4_spill] sm:$0xff] %v4614_v57  ;;  %1712 = vmatprep.mubr.bf16.mxu0 %v3910_v48  ;;  %3640 = vmatprep.mubr.msk.bf16.mxu1 %vm1223_vm0, %v3911_v49 }
 0x15b   :  { %v1516_v0 = vpop.f32.mrf.mxu0  ;;  %v1852_v1 = vpop.f32.mrf.mxu1 }
 0x15c   :  { %v3920_v0 = vld [vmem:[%s5429_s0 + $0x394] ss:$12 sps:$4 sm:$0xff]  }
 0x15d   :  { %v4618_v4 = vpop.f32.mrf.mxu0  ;;  %v4620_v5 = vpop.f32.mrf.mxu1  ;;  %v3921_v1 = vld [vmem:[%s5429_s0 + $0x488] ss:$12 sps:$4 sm:$0xff]  }
 0x15e   :  { %5435 = vst [vmem:[#allocation5_spill] sm:$0xff] %v4620_v5 }
 0x15f   :  { %v1519_v24 = vpop.f32.mrf.mxu0  ;;  %v1855_v25 = vpop.f32.mrf.mxu1 }
 0x161   :  { %v4634_v36 = vpop.f32.mrf.mxu0  ;;  %1713 = vmatmul.mubr.bf16.gmra.mxu0 %v3908_v16  ;;  %v4636_v37 = vpop.f32.mrf.mxu1  ;;  %3641 = vmatmul.mubr.msk.bf16.gmra.mxu1 %vm1223_vm0, %v3912_v17 }
 0x162   :  { %5436 = vst [vmem:[#allocation6_spill] sm:$0xff] %v4636_v37  ;;  %1720 = vmatprep.mubr.bf16.mxu0 %v3915_v20  ;;  %3644 = vmatprep.mubr.msk.bf16.mxu1 %vm1223_vm0, %v3916_v21 }
 0x163   :  { %v1524_v40 = vpop.f32.mrf.mxu0  ;;  %v1860_v41 = vpop.f32.mrf.mxu1 }
 0x165   :  { %v4640_v48 = vpop.f32.mrf.mxu0  ;;  %v4642_v49 = vpop.f32.mrf.mxu1 }
 0x166   :  { %5437 = vst [vmem:[#allocation7_spill] sm:$0xff] %v4642_v49 }
 0x167   :  { %v1527_v16 = vpop.f32.mrf.mxu0  ;;  %v1863_v17 = vpop.f32.mrf.mxu1 }
 0x168   :  { %v3918_v16 = vld [vmem:[%s5429_s0 + $0x390] ss:$12 sps:$4 sm:$0xff]  }
 0x169   :  { %v4656_v20 = vpop.f32.mrf.mxu0  ;;  %1721 = vmatmul.mubr.bf16.gmra.mxu0 %v3913_v52  ;;  %v4658_v21 = vpop.f32.mrf.mxu1  ;;  %3645 = vmatmul.mubr.msk.bf16.gmra.mxu1 %vm1223_vm0, %v3917_v53  ;;  %v3922_v52 = vld [vmem:[%s5429_s0 + $0x4a0] ss:$12 sps:$4 sm:$0xff]  }
 0x16a   :  { %5438 = vst [vmem:[#allocation8_spill] sm:$0xff] %v4658_v21  ;;  %1728 = vmatprep.mubr.bf16.mxu0 %v3920_v0  ;;  %3648 = vmatprep.mubr.msk.bf16.mxu1 %vm1223_vm0, %v3921_v1  ;;  %v3925_v53 = vld [vmem:[%s5429_s0 + $0x3ac] ss:$12 sps:$4 sm:$0xff]   ;;  %v4679_v1 = vld [vmem:[%s5430_s2] ss:$0 sm:$0xff] }
 0x16b   :  { %v1532_v24 = vpop.f32.mrf.mxu0  ;;  %v1868_v25 = vpop.f32.mrf.mxu1  ;;  %v3926_v0 = vld [vmem:[%s5429_s0 + $0x4b8] ss:$12 sps:$4 sm:$0xff]   ;;  %v1427_v37 = vadd.f32 %v4679_v1, %v4370_v58  ;;  %v3927_v58 = vld [vmem:[%s5429_s0 + $0x4d0] ss:$12 sps:$4 sm:$0xff]  }
 0x16c   :  { %v1435_v25 = vadd.f32 %v4679_v1, %v4392_v6 }
 0x16d   :  { %v4662_v40 = vpop.f32.mrf.mxu0  ;;  %v1869_v41 = vpop.f32.mrf.mxu1 }
 0x16f   :  { %v1535_v17 = vpop.f32.mrf.mxu0  ;;  %v1870_v24 = vpop.f32.mrf.mxu1 }
 0x170   :  { %v1438_v17 = vadd.f32 %v4679_v1, %v4398_v10 }
 0x171   :  { %v4683_v41 = vpop.f32.mrf.mxu0  ;;  %1729 = vmatmul.mubr.bf16.gmra.mxu0 %v3918_v16  ;;  %v3554_v49 = vpop.f32.mrf.mxu1  ;;  %3649 = vmatmul.mubr.msk.bf16.gmra.mxu1 %vm1223_vm0, %v3922_v52  ;;  %v3923_v52 = vld [vmem:[%s5429_s0 + $0x3a8] ss:$12 sps:$4 sm:$0xff]  }
 0x172   :  { %v1915_v21 = vadd.f32 %v3554_v49, %v1435_v25  ;;  %1736 = vmatprep.mubr.bf16.mxu0 %v3925_v53  ;;  %3652 = vmatprep.mubr.msk.bf16.mxu1 %vm1223_vm0, %v3926_v0  ;;  %v1451_v25 = vadd.f32 %v4679_v1, %v4436_v30 }
 0x173   :  { %v1540_v39 = vpop.f32.mrf.mxu0  ;;  %v1906_v5 = vpop.f32.mrf.mxu1 }
 0x174   :  { %v2354_v24 = vmax.f32 %v1915_v21, 0.0  ;;  %v1907_v6 = vadd.f32 %v1906_v5, %v1427_v37  ;;  %v1430_v39 = vadd.f32 %v4679_v1, %v4376_v62  ;;  %v3930_v5 = vld [vmem:[%s5429_s0 + $0x3c4] ss:$12 sps:$4 sm:$0xff]   ;;  %v3931_v37 = vld [vmem:[%s5429_s0 + $0x4e8] ss:$12 sps:$4 sm:$0xff]  }
 0x175   :  { %v4691_v57 = vpop.f32.mrf.mxu0  ;;  %v3555_v16 = vpop.f32.mrf.mxu1 }
 0x176   :  { %v3381_v49 = vpack.c.bf16 %v2354_v24, %v2354_v24  ;;  %v2352_v53 = vmax.f32 %v1907_v6, 0.0  ;;  %v1918_v10 = vadd.f32 %v3555_v16, %v1438_v17 }
 0x177   :  { %v1543_v21 = vpop.f32.mrf.mxu0  ;;  %v1909_v0 = vpop.f32.mrf.mxu1 }
 0x178   :  { %2911 = vst.msk [vmem:[%s5431_s3 + $0x8] sm:$0xf] %vm2908_vm1, %v3381_v49  ;;  %v3379_v62 = vpack.c.bf16 %v2352_v53, %v2352_v53  ;;  %v2355_v17 = vmax.f32 %v1918_v10, 0.0  ;;  %v1910_v24 = vadd.f32 %v1909_v0, %v1430_v39  ;;  %v1443_v21 = vadd.f32 %v4679_v1, %v4414_v18 }
 0x179   :  { %v4713_v6 = vpop.f32.mrf.mxu0  ;;  %1737 = vmatmul.mubr.bf16.gmra.mxu0 %v3923_v52  ;;  %v3558_v16 = vpop.f32.mrf.mxu1  ;;  %3653 = vmatmul.mubr.msk.bf16.gmra.mxu1 %vm1223_vm0, %v3927_v58  ;;  %v1454_v52 = vadd.f32 %v4679_v1, %v4442_v34  ;;  %v1446_v34 = vadd.f32 %v4679_v1, %v4420_v22  ;;  %v1467_v22 = vadd.f32 %v4679_v1, %v4480_v54 }
 0x17a   :  { %2909 = vst.msk [vmem:[%s5431_s3] sm:$0xf] %vm2908_vm1, %v3379_v62  ;;  %v3382_v30 = vpack.c.bf16 %v2355_v17, %v2355_v17  ;;  %v2353_v29 = vmax.f32 %v1910_v24, 0.0  ;;  %v1931_v49 = vadd.f32 %v3558_v16, %v1451_v25  ;;  %1744 = vmatprep.mubr.bf16.mxu0 %v3930_v5  ;;  %3656 = vmatprep.mubr.msk.bf16.mxu1 %vm1223_vm0, %v3931_v37  ;;  %v3928_v5 = vld [vmem:[%s5429_s0 + $0x3c0] ss:$12 sps:$4 sm:$0xff]  }
 0x17b   :  { %v1548_v39 = vpop.f32.mrf.mxu0  ;;  %v1922_v53 = vpop.f32.mrf.mxu1  ;;  %v3932_v37 = vld [vmem:[%s5429_s0 + $0x500] ss:$12 sps:$4 sm:$0xff]   ;;  %v3935_v24 = vld [vmem:[%s5429_s0 + $0x3dc] ss:$12 sps:$4 sm:$0xff]   ;;  %v3936_v16 = vld [vmem:[%s5429_s0 + $0x518] ss:$12 sps:$4 sm:$0xff]  }
 0x17c   :  { %2912 = vst.msk [vmem:[%s5431_s3 + $0xc] sm:$0xf] %vm2908_vm1, %v3382_v30  ;;  %v3380_v18 = vpack.c.bf16 %v2353_v29, %v2353_v29  ;;  %v2358_v58 = vmax.f32 %v1931_v49, 0.0  ;;  %v1923_v10 = vadd.f32 %v1922_v53, %v1443_v21 }
 0x17d   :  { %v4729_v0 = vpop.f32.mrf.mxu0  ;;  %v3559_v62 = vpop.f32.mrf.mxu1 }
 0x17e   :  { %2910 = vst.msk [vmem:[%s5431_s3 + $0x4] sm:$0xf] %vm2908_vm1, %v3380_v18  ;;  %v3385_v29 = vpack.c.bf16 %v2358_v58, %v2358_v58  ;;  %v2356_v25 = vmax.f32 %v1923_v10, 0.0  ;;  %v1934_v17 = vadd.f32 %v3559_v62, %v1454_v52  ;;  %v1459_v58 = vadd.f32 %v4679_v1, %v4458_v42 }
 0x17f   :  { %v1551_v21 = vpop.f32.mrf.mxu0  ;;  %v1925_v30 = vpop.f32.mrf.mxu1 }
 0x180   :  { %2915 = vst.msk [vmem:[%s5431_s3 + $0x18] sm:$0xf] %vm2908_vm1, %v3385_v29  ;;  %v3383_v49 = vpack.c.bf16 %v2356_v25, %v2356_v25  ;;  %v2359_v39 = vmax.f32 %v1934_v17, 0.0  ;;  %v1926_v53 = vadd.f32 %v1925_v30, %v1446_v34 }
 0x181   :  { %v4755_v52 = vpop.f32.mrf.mxu0  ;;  %1745 = vmatmul.mubr.bf16.gmra.mxu0 %v3928_v5  ;;  %v3562_v18 = vpop.f32.mrf.mxu1  ;;  %3657 = vmatmul.mubr.msk.bf16.gmra.mxu1 %vm1223_vm0, %v3932_v37  ;;  %v1470_v5 = vadd.f32 %v4679_v1, %v4486_v60  ;;  %v1462_v60 = vadd.f32 %v4679_v1, %v4464_v46 }
 0x182   :  { %2913 = vst.msk [vmem:[%s5431_s3 + $0x10] sm:$0xf] %vm2908_vm1, %v3383_v49  ;;  %v3386_v54 = vpack.c.bf16 %v2359_v39, %v2359_v39  ;;  %v2357_v10 = vmax.f32 %v1926_v53, 0.0  ;;  %v1947_v62 = vadd.f32 %v3562_v18, %v1467_v22  ;;  %1752 = vmatprep.mubr.bf16.mxu0 %v3935_v24  ;;  %3660 = vmatprep.mubr.msk.bf16.mxu1 %vm1223_vm0, %v3936_v16  ;;  %v3933_v24 = vld [vmem:[%s5429_s0 + $0x3d8] ss:$12 sps:$4 sm:$0xff]  }
 0x183   :  { %v1556_v34 = vpop.f32.mrf.mxu0  ;;  %v1938_v29 = vpop.f32.mrf.mxu1  ;;  %v3937_v16 = vld [vmem:[%s5429_s0 + $0x530] ss:$0 sps:$4 sm:$0x11]   ;;  %v1483_v18 = vadd.f32 %v4679_v1, %v4524_v26 }
 0x184   :  { %2916 = vst.msk [vmem:[%s5431_s3 + $0x1c] sm:$0xf] %vm2908_vm1, %v3386_v54  ;;  %v3384_v42 = vpack.c.bf16 %v2357_v10, %v2357_v10  ;;  %v2362_v37 = vmax.f32 %v1947_v62, 0.0  ;;  %v1939_v25 = vadd.f32 %v1938_v29, %v1459_v58  ;;  %v1475_v34 = vadd.f32 %v4679_v1, %v4502_v8 }
 0x185   :  { %v4771_v17 = vpop.f32.mrf.mxu0  ;;  %v3563_v21 = vpop.f32.mrf.mxu1 }
 0x186   :  { %2914 = vst.msk [vmem:[%s5431_s3 + $0x14] sm:$0xf] %vm2908_vm1, %v3384_v42  ;;  %v3389_v30 = vpack.c.bf16 %v2362_v37, %v2362_v37  ;;  %v2360_v22 = vmax.f32 %v1939_v25, 0.0  ;;  %v1950_v49 = vadd.f32 %v3563_v21, %v1470_v5  ;;  %v1486_v25 = vadd.f32 %v4679_v1, %v4530_v32 }
 0x187   :  { %v1559_v39 = vpop.f32.mrf.mxu0  ;;  %v1941_v53 = vpop.f32.mrf.mxu1 }
 0x188   :  { %2919 = vst.msk [vmem:[%s5431_s3 + $0x28] sm:$0xf] %vm2908_vm1, %v3389_v30  ;;  %v3387_v58 = vpack.c.bf16 %v2360_v22, %v2360_v22  ;;  %v2363_v46 = vmax.f32 %v1950_v49, 0.0  ;;  %v1942_v54 = vadd.f32 %v1941_v53, %v1462_v60  ;;  %v1478_v30 = vadd.f32 %v4679_v1, %v4508_v14 }
 0x189   :  { %v4791_v10 = vpop.f32.mrf.mxu0  ;;  %1753 = vmatmul.mubr.bf16.gmra.mxu0 %v3933_v24  ;;  %v3566_v62 = vpop.f32.mrf.mxu1  ;;  %3661 = vmatmul.mubr.msk.bf16.gmra.mxu1 %vm1223_vm0, %v3937_v16 }
 0x18a   :  { %2917 = vst.msk [vmem:[%s5431_s3 + $0x20] sm:$0xf] %vm2908_vm1, %v3387_v58  ;;  %v3390_v26 = vpack.c.bf16 %v2363_v46, %v2363_v46  ;;  %v2361_v29 = vmax.f32 %v1942_v54, 0.0  ;;  %v1963_v5 = vadd.f32 %v3566_v62, %v1483_v18  ;;  %v1499_v18 = vadd.f32 %v4679_v1, %v4568_v2 }
 0x18b   :  { %v1564_v42 = vpop.f32.mrf.mxu0  ;;  %v1954_v37 = vpop.f32.mrf.mxu1 }
 0x18c   :  { %2920 = vst.msk [vmem:[%s5431_s3 + $0x2c] sm:$0xf] %vm2908_vm1, %v3390_v26  ;;  %v3388_v21 = vpack.c.bf16 %v2361_v29, %v2361_v29  ;;  %v2366_v8 = vmax.f32 %v1963_v5, 0.0  ;;  %v1955_v24 = vadd.f32 %v1954_v37, %v1475_v34  ;;  %v1491_v34 = vadd.f32 %v4679_v1, %v4546_v44 }
 0x18d   :  { %v4806_v16 = vpop.f32.mrf.mxu0  ;;  %v3567_v60 = vpop.f32.mrf.mxu1  ;;  %v1502_v37 = vadd.f32 %v4679_v1, %v4574_v12 }
 0x18e   :  { %2918 = vst.msk [vmem:[%s5431_s3 + $0x24] sm:$0xf] %vm2908_vm1, %v3388_v21  ;;  %v3393_v32 = vpack.c.bf16 %v2366_v8, %v2366_v8  ;;  %v2364_v22 = vmax.f32 %v1955_v24, 0.0  ;;  %v1966_v49 = vadd.f32 %v3567_v60, %v1486_v25  ;;  %v1494_v60 = vadd.f32 %v4679_v1, %v4552_v50 }
 0x18f   :  { %v1567_v39 = vpop.f32.mrf.mxu0  ;;  %v1957_v53 = vpop.f32.mrf.mxu1 }
 0x190   :  { %2923 = vst.msk [vmem:[%s5431_s3 + $0x38] sm:$0xf] %vm2908_vm1, %v3393_v32  ;;  %v3391_v58 = vpack.c.bf16 %v2364_v22, %v2364_v22  ;;  %v2367_v14 = vmax.f32 %v1966_v49, 0.0  ;;  %v1958_v46 = vadd.f32 %v1957_v53, %v1478_v30  ;;  %v1515_v39 = vadd.f32 %v4679_v1, %v4612_v56 }
 0x191   :  { %v4820_v54 = vpop.f32.mrf.mxu0  ;;  %v3570_v62 = vpop.f32.mrf.mxu1 }
 0x192   :  { %2921 = vst.msk [vmem:[%s5431_s3 + $0x30] sm:$0xf] %vm2908_vm1, %v3391_v58  ;;  %v3394_v2 = vpack.c.bf16 %v2367_v14, %v2367_v14  ;;  %v2365_v26 = vmax.f32 %v1958_v46, 0.0  ;;  %v1979_v29 = vadd.f32 %v3570_v62, %v1499_v18  ;;  %v1507_v46 = vadd.f32 %v4679_v1, %v4590_v28 }
 0x193   :  { %v1572_v5 = vpop.f32.mrf.mxu0  ;;  %v1970_v42 = vpop.f32.mrf.mxu1 }
 0x194   :  { %2924 = vst.msk [vmem:[%s5431_s3 + $0x3c] sm:$0xf] %vm2908_vm1, %v3394_v2  ;;  %v3392_v25 = vpack.c.bf16 %v2365_v26, %v2365_v26  ;;  %v2370_v44 = vmax.f32 %v1979_v29, 0.0  ;;  %v1971_v21 = vadd.f32 %v1970_v42, %v1491_v34  ;;  %v1518_v29 = vadd.f32 %v4679_v1, %v4618_v4 }
 0x195   :  { %v4834_v8 = vpop.f32.mrf.mxu0  ;;  %v3571_v24 = vpop.f32.mrf.mxu1 }
 0x196   :  { %2922 = vst.msk [vmem:[%s5431_s3 + $0x34] sm:$0xf] %vm2908_vm1, %v3392_v25  ;;  %v3397_v12 = vpack.c.bf16 %v2370_v44, %v2370_v44  ;;  %v2368_v30 = vmax.f32 %v1971_v21, 0.0  ;;  %v1982_v32 = vadd.f32 %v3571_v24, %v1502_v37  ;;  %v1510_v44 = vadd.f32 %v4679_v1, %v4596_v38 }
 0x197   :  { %v1575_v22 = vpop.f32.mrf.mxu0  ;;  %v1973_v49 = vpop.f32.mrf.mxu1 }
 0x198   :  { %2927 = vst.msk [vmem:[%s5431_s3 + $0x48] sm:$0xf] %vm2908_vm1, %v3397_v12  ;;  %v3395_v53 = vpack.c.bf16 %v2368_v30, %v2368_v30  ;;  %v2371_v50 = vmax.f32 %v1982_v32, 0.0  ;;  %v1974_v18 = vadd.f32 %v1973_v49, %v1494_v60  ;;  %v1531_v30 = vadd.f32 %v4679_v1, %v4656_v20 }
 0x199   :  { %v4848_v58 = vpop.f32.mrf.mxu0  ;;  %v3574_v14 = vpop.f32.mrf.mxu1 }
 0x19a   :  { %2925 = vst.msk [vmem:[%s5431_s3 + $0x40] sm:$0xf] %vm2908_vm1, %v3395_v53  ;;  %v3398_v56 = vpack.c.bf16 %v2371_v50, %v2371_v50  ;;  %v2369_v62 = vmax.f32 %v1974_v18, 0.0  ;;  %v1995_v34 = vadd.f32 %v3574_v14, %v1515_v39  ;;  %v1523_v53 = vadd.f32 %v4679_v1, %v4634_v36 }
 0x19b   :  { %v1580_v2 = vpop.f32.mrf.mxu0  ;;  %v1986_v26 = vpop.f32.mrf.mxu1 }
 0x19c   :  { %2928 = vst.msk [vmem:[%s5431_s3 + $0x4c] sm:$0xf] %vm2908_vm1, %v3398_v56  ;;  %v3396_v5 = vpack.c.bf16 %v2369_v62, %v2369_v62  ;;  %v2374_v28 = vmax.f32 %v1995_v34, 0.0  ;;  %v1987_v42 = vadd.f32 %v1986_v26, %v1507_v46  ;;  %v1534_v56 = vadd.f32 %v4679_v1, %v4662_v40 }
 0x19d   :  { %v4862_v37 = vpop.f32.mrf.mxu0  ;;  %v3575_v25 = vpop.f32.mrf.mxu1 }
 0x19e   :  { %2926 = vst.msk [vmem:[%s5431_s3 + $0x44] sm:$0xf] %vm2908_vm1, %v3396_v5  ;;  %v3401_v4 = vpack.c.bf16 %v2374_v28, %v2374_v28  ;;  %v2372_v21 = vmax.f32 %v1987_v42, 0.0  ;;  %v1998_v24 = vadd.f32 %v3575_v25, %v1518_v29  ;;  %v1526_v29 = vadd.f32 %v4679_v1, %v4640_v48 }
 0x19f   :  { %v1583_v60 = vpop.f32.mrf.mxu0  ;;  %v1989_v12 = vpop.f32.mrf.mxu1 }
 0x1a0   :  { %2931 = vst.msk [vmem:[%s5431_s3 + $0x58] sm:$0xf] %vm2908_vm1, %v3401_v4  ;;  %v3399_v32 = vpack.c.bf16 %v2372_v21, %v2372_v21  ;;  %v2375_v38 = vmax.f32 %v1998_v24, 0.0  ;;  %v1990_v22 = vadd.f32 %v1989_v12, %v1510_v44  ;;  %v1547_v44 = vadd.f32 %v4679_v1, %v4713_v6 }
 0x1a1   :  { %v4876_v49 = vpop.f32.mrf.mxu0  ;;  %v3578_v39 = vpop.f32.mrf.mxu1  ;;  %v1539_v12 = vadd.f32 %v4679_v1, %v4683_v41 }
 0x1a2   :  { %2929 = vst.msk [vmem:[%s5431_s3 + $0x50] sm:$0xf] %vm2908_vm1, %v3399_v32  ;;  %v3402_v20 = vpack.c.bf16 %v2375_v38, %v2375_v38  ;;  %v2373_v50 = vmax.f32 %v1990_v22, 0.0  ;;  %v2011_v18 = vadd.f32 %v3578_v39, %v1531_v30  ;;  %v1550_v39 = vadd.f32 %v4679_v1, %v4729_v0 }
 0x1a3   :  { %v1588_v14 = vpop.f32.mrf.mxu0  ;;  %v2002_v46 = vpop.f32.mrf.mxu1 }
 0x1a4   :  { %2932 = vst.msk [vmem:[%s5431_s3 + $0x5c] sm:$0xf] %vm2908_vm1, %v3402_v20  ;;  %v3400_v62 = vpack.c.bf16 %v2373_v50, %v2373_v50  ;;  %v2378_v36 = vmax.f32 %v2011_v18, 0.0  ;;  %v2003_v34 = vadd.f32 %v2002_v46, %v1523_v53  ;;  %v1542_v14 = vadd.f32 %v4679_v1, %v4691_v57 }
 0x1a5   :  { %v4890_v2 = vpop.f32.mrf.mxu0  ;;  %v3579_v26 = vpop.f32.mrf.mxu1 }
 0x1a6   :  { %2930 = vst.msk [vmem:[%s5431_s3 + $0x54] sm:$0xf] %vm2908_vm1, %v3400_v62  ;;  %v3405_v40 = vpack.c.bf16 %v2378_v36, %v2378_v36  ;;  %v2376_v5 = vmax.f32 %v2003_v34, 0.0  ;;  %v2014_v28 = vadd.f32 %v3579_v26, %v1534_v56  ;;  %v1563_v34 = vadd.f32 %v4679_v1, %v4791_v10 }
 0x1a7   :  { %v1591_v42 = vpop.f32.mrf.mxu0  ;;  %v2005_v25 = vpop.f32.mrf.mxu1 }
 0x1a8   :  { %2935 = vst.msk [vmem:[%s5431_s3 + $0x68] sm:$0xf] %vm2908_vm1, %v3405_v40  ;;  %v3403_v4 = vpack.c.bf16 %v2376_v5, %v2376_v5  ;;  %v2379_v48 = vmax.f32 %v2014_v28, 0.0  ;;  %v2006_v21 = vadd.f32 %v2005_v25, %v1526_v29  ;;  %v1555_v28 = vadd.f32 %v4679_v1, %v4755_v52 }
 0x1a9   :  { %v4904_v24 = vpop.f32.mrf.mxu0  ;;  %v3582_v60 = vpop.f32.mrf.mxu1 }
 0x1aa   :  { %2933 = vst.msk [vmem:[%s5431_s3 + $0x60] sm:$0xf] %vm2908_vm1, %v3403_v4  ;;  %v3406_v6 = vpack.c.bf16 %v2379_v48, %v2379_v48  ;;  %v2377_v30 = vmax.f32 %v2006_v21, 0.0  ;;  %v2027_v32 = vadd.f32 %v3582_v60, %v1547_v44  ;;  %v1566_v48 = vadd.f32 %v4679_v1, %v4806_v16 }
 0x1ab   :  { %v1596_v38 = vpop.f32.mrf.mxu0  ;;  %v2018_v22 = vpop.f32.mrf.mxu1 }
 0x1ac   :  { %2936 = vst.msk [vmem:[%s5431_s3 + $0x6c] sm:$0xf] %vm2908_vm1, %v3406_v6  ;;  %v3404_v53 = vpack.c.bf16 %v2377_v30, %v2377_v30  ;;  %v2382_v41 = vmax.f32 %v2027_v32, 0.0  ;;  %v2019_v20 = vadd.f32 %v2018_v22, %v1539_v12  ;;  %v1558_v30 = vadd.f32 %v4679_v1, %v4771_v17 }
 0x1ad   :  { %v4918_v50 = vpop.f32.mrf.mxu0  ;;  %v3583_v18 = vpop.f32.mrf.mxu1 }
 0x1ae   :  { %2934 = vst.msk [vmem:[%s5431_s3 + $0x64] sm:$0xf] %vm2908_vm1, %v3404_v53  ;;  %v3409_v0 = vpack.c.bf16 %v2382_v41, %v2382_v41  ;;  %v2380_v46 = vmax.f32 %v2019_v20, 0.0  ;;  %v2030_v56 = vadd.f32 %v3583_v18, %v1550_v39  ;;  %v1579_v53 = vadd.f32 %v4679_v1, %v4848_v58 }
 0x1af   :  { %v1599_v62 = vpop.f32.mrf.mxu0  ;;  %v2021_v36 = vpop.f32.mrf.mxu1 }
 0x1b0   :  { %2939 = vst.msk [vmem:[%s5431_s3 + $0x78] sm:$0xf] %vm2908_vm1, %v3409_v0  ;;  %v3407_v26 = vpack.c.bf16 %v2380_v46, %v2380_v46  ;;  %v2383_v57 = vmax.f32 %v2030_v56, 0.0  ;;  %v2022_v29 = vadd.f32 %v2021_v36, %v1542_v14  ;;  %v1571_v0 = vadd.f32 %v4679_v1, %v4820_v54 }
 0x1b1   :  { %v4932_v40 = vpop.f32.mrf.mxu0  ;;  %v3586_v5 = vpop.f32.mrf.mxu1 }
 0x1b2   :  { %2937 = vst.msk [vmem:[%s5431_s3 + $0x70] sm:$0xf] %vm2908_vm1, %v3407_v26  ;;  %v3410_v10 = vpack.c.bf16 %v2383_v57, %v2383_v57  ;;  %v2381_v42 = vmax.f32 %v2022_v29, 0.0  ;;  %v2043_v25 = vadd.f32 %v3586_v5, %v1563_v34  ;;  %v1582_v34 = vadd.f32 %v4679_v1, %v4862_v37 }
 0x1b3   :  { %v1604_v44 = vpop.f32.mrf.mxu0  ;;  %v2034_v4 = vpop.f32.mrf.mxu1 }
 0x1b4   :  { %2940 = vst.msk [vmem:[%s5431_s3 + $0x7c] sm:$0xf] %vm2908_vm1, %v3410_v10  ;;  %v3408_v21 = vpack.c.bf16 %v2381_v42, %v2381_v42  ;;  %v2386_v52 = vmax.f32 %v2043_v25, 0.0  ;;  %v2035_v60 = vadd.f32 %v2034_v4, %v1555_v28  ;;  %v1574_v28 = vadd.f32 %v4679_v1, %v4834_v8 }
 0x1b5   :  { %v4946_v12 = vpop.f32.mrf.mxu0  ;;  %v3587_v6 = vpop.f32.mrf.mxu1  ;;  %v1595_v4 = vadd.f32 %v4679_v1, %v4904_v24 }
 0x1b6   :  { %2938 = vst.msk [vmem:[%s5431_s3 + $0x74] sm:$0xf] %vm2908_vm1, %v3408_v21  ;;  %v3413_v16 = vpack.c.bf16 %v2386_v52, %v2386_v52  ;;  %v2384_v32 = vmax.f32 %v2035_v60, 0.0  ;;  %v2046_v38 = vadd.f32 %v3587_v6, %v1566_v48  ;;  %v1587_v6 = vadd.f32 %v4679_v1, %v4876_v49 }
 0x1b7   :  { %v1607_v22 = vpop.f32.mrf.mxu0  ;;  %v2037_v39 = vpop.f32.mrf.mxu1 }
 0x1b8   :  { %2943 = vst.msk [vmem:[%s5431_s3 + $0x88] sm:$0xf] %vm2908_vm1, %v3413_v16  ;;  %v3411_v41 = vpack.c.bf16 %v2384_v32, %v2384_v32  ;;  %v2387_v17 = vmax.f32 %v2046_v38, 0.0  ;;  %v2038_v20 = vadd.f32 %v2037_v39, %v1558_v30  ;;  %v1598_v22 = vadd.f32 %v4679_v1, %v4918_v50 }
 0x1b9   :  { %v1610_v18 = vpop.f32.mrf.mxu0  ;;  %v3590_v14 = vpop.f32.mrf.mxu1 }
 0x1ba   :  { %2941 = vst.msk [vmem:[%s5431_s3 + $0x80] sm:$0xf] %vm2908_vm1, %v3411_v41  ;;  %v3414_v46 = vpack.c.bf16 %v2387_v17, %v2387_v17  ;;  %v2385_v58 = vmax.f32 %v2038_v20, 0.0  ;;  %v2059_v56 = vadd.f32 %v3590_v14, %v1579_v53  ;;  %v1590_v20 = vadd.f32 %v4679_v1, %v4890_v2 }
 0x1bb   :  { %v1612_v62 = vpop.f32.mrf.mxu0  ;;  %v2050_v36 = vpop.f32.mrf.mxu1 }
 0x1bc   :  { %2944 = vst.msk [vmem:[%s5431_s3 + $0x8c] sm:$0xf] %vm2908_vm1, %v3414_v46  ;;  %v3412_v26 = vpack.c.bf16 %v2385_v58, %v2385_v58  ;;  %v2390_v54 = vmax.f32 %v2059_v56, 0.0  ;;  %v2051_v57 = vadd.f32 %v2050_v36, %v1571_v0  ;;  %v1611_v56 = vadd.f32 %v4679_v1, %v1610_v18 }
 0x1bd   :  { %v1613_v29 = vpop.f32.mrf.mxu0  ;;  %v3591_v5 = vpop.f32.mrf.mxu1 }
 0x1be   :  { %2942 = vst.msk [vmem:[%s5431_s3 + $0x84] sm:$0xf] %vm2908_vm1, %v3412_v26  ;;  %v3417_v10 = vpack.c.bf16 %v2390_v54, %v2390_v54  ;;  %v2388_v37 = vmax.f32 %v2051_v57, 0.0  ;;  %v2062_v42 = vadd.f32 %v3591_v5, %v1582_v34  ;;  %v1603_v54 = vadd.f32 %v4679_v1, %v4932_v40 }
 0x1bf   :  { %v1615_v25 = vpop.f32.mrf.mxu0  ;;  %v2053_v44 = vpop.f32.mrf.mxu1 }
 0x1c0   :  { %2947 = vst.msk [vmem:[%s5431_s3 + $0x98] sm:$0xf] %vm2908_vm1, %v3417_v10  ;;  %v3415_v48 = vpack.c.bf16 %v2388_v37, %v2388_v37  ;;  %v2391_v8 = vmax.f32 %v2062_v42, 0.0  ;;  %v2054_v21 = vadd.f32 %v2053_v44, %v1574_v28  ;;  %v1614_v37 = vadd.f32 %v4679_v1, %v1613_v29 }
 0x1c1   :  { %v1618_v52 = vpop.f32.mrf.mxu0  ;;  %v3594_v60 = vpop.f32.mrf.mxu1 }
 0x1c2   :  { %2945 = vst.msk [vmem:[%s5431_s3 + $0x90] sm:$0xf] %vm2908_vm1, %v3415_v48  ;;  %v3418_v30 = vpack.c.bf16 %v2391_v8, %v2391_v8  ;;  %v2389_v24 = vmax.f32 %v2054_v21, 0.0  ;;  %v2075_v16 = vadd.f32 %v3594_v60, %v1595_v4  ;;  %v1606_v48 = vadd.f32 %v4679_v1, %v4946_v12 }
 0x1c3   :  { %v1620_v32 = vpop.f32.mrf.mxu0  ;;  %v2066_v38 = vpop.f32.mrf.mxu1 }
 0x1c4   :  { %2948 = vst.msk [vmem:[%s5431_s3 + $0x9c] sm:$0xf] %vm2908_vm1, %v3418_v30  ;;  %v3416_v39 = vpack.c.bf16 %v2389_v24, %v2389_v24  ;;  %v2394_v49 = vmax.f32 %v2075_v16, 0.0  ;;  %v2067_v53 = vadd.f32 %v2066_v38, %v1587_v6 }
 0x1c5   :  { %v1621_v41 = vpop.f32.mrf.mxu0  ;;  %v3595_v17 = vpop.f32.mrf.mxu1 }
 0x1c6   :  { %2946 = vst.msk [vmem:[%s5431_s3 + $0x94] sm:$0xf] %vm2908_vm1, %v3416_v39  ;;  %v3421_v14 = vpack.c.bf16 %v2394_v49, %v2394_v49  ;;  %v2392_v50 = vmax.f32 %v2067_v53, 0.0  ;;  %v2078_v0 = vadd.f32 %v3595_v17, %v1598_v22  ;;  %v1619_v22 = vadd.f32 %v4679_v1, %v1618_v52 }
 0x1c7   :  { %v1623_v46 = vpop.f32.mrf.mxu0  ;;  %v2069_v58 = vpop.f32.mrf.mxu1 }
 0x1c8   :  { %2951 = vst.msk [vmem:[%s5431_s3 + $0xa8] sm:$0xf] %vm2908_vm1, %v3421_v14  ;;  %v3419_v62 = vpack.c.bf16 %v2392_v50, %v2392_v50  ;;  %v2395_v36 = vmax.f32 %v2078_v0, 0.0  ;;  %v2070_v2 = vadd.f32 %v2069_v58, %v1590_v20 }
 0x1c9   :  { %v1626_v34 = vpop.f32.mrf.mxu0  ;;  %v3598_v26 = vpop.f32.mrf.mxu1 }
 0x1ca   :  { %2949 = vst.msk [vmem:[%s5431_s3 + $0xa0] sm:$0xf] %vm2908_vm1, %v3419_v62  ;;  %v3422_v57 = vpack.c.bf16 %v2395_v36, %v2395_v36  ;;  %v2393_v18 = vmax.f32 %v2070_v2, 0.0  ;;  %v2091_v5 = vadd.f32 %v3598_v26, %v1611_v56  ;;  %v1627_v30 = vadd.f32 %v4679_v1, %v1626_v34 }
 0x1cb   :  { %v1628_v28 = vpop.f32.mrf.mxu0  ;;  %v2082_v10 = vpop.f32.mrf.mxu1  ;;  %v1622_v56 = vadd.f32 %v4679_v1, %v1621_v41 }
 0x1cc   :  { %2952 = vst.msk [vmem:[%s5431_s3 + $0xac] sm:$0xf] %vm2908_vm1, %v3422_v57  ;;  %v3420_v42 = vpack.c.bf16 %v2393_v18, %v2393_v18  ;;  %v2398_v25 = vmax.f32 %v2091_v5, 0.0  ;;  %v2083_v40 = vadd.f32 %v2082_v10, %v1603_v54 }
 0x1cd   :  { %v1629_v44 = vpop.f32.mrf.mxu0  ;;  %v3599_v4 = vpop.f32.mrf.mxu1 }
 0x1ce   :  { %2950 = vst.msk [vmem:[%s5431_s3 + $0xa4] sm:$0xf] %vm2908_vm1, %v3420_v42  ;;  %v3425_v8 = vpack.c.bf16 %v2398_v25, %v2398_v25  ;;  %v2396_v29 = vmax.f32 %v2083_v40, 0.0  ;;  %v2094_v21 = vadd.f32 %v3599_v4, %v1614_v37  ;;  %v1630_v14 = vadd.f32 %v4679_v1, %v1629_v44 }
 0x1cf   :  { %v1631_v60 = vpop.f32.mrf.mxu0  ;;  %v2085_v6 = vpop.f32.mrf.mxu1 }
 0x1d0   :  { %2955 = vst.msk [vmem:[%s5431_s3 + $0xb8] sm:$0xf] %vm2908_vm1, %v3425_v8  ;;  %v3423_v24 = vpack.c.bf16 %v2396_v29, %v2396_v29  ;;  %v2399_v16 = vmax.f32 %v2094_v21, 0.0  ;;  %v2086_v12 = vadd.f32 %v2085_v6, %v1606_v48 }
 0x1d1   :  { %v1634_v32 = vpop.f32.mrf.mxu0  ;;  %v3602_v38 = vpop.f32.mrf.mxu1 }
 0x1d2   :  { %2953 = vst.msk [vmem:[%s5431_s3 + $0xb0] sm:$0xf] %vm2908_vm1, %v3423_v24  ;;  %v3426_v39 = vpack.c.bf16 %v2399_v16, %v2399_v16  ;;  %v2397_v49 = vmax.f32 %v2086_v12, 0.0  ;;  %v2107_v53 = vadd.f32 %v3602_v38, %v1627_v30  ;;  %v1635_v28 = vadd.f32 %v4679_v1, %v1634_v32 }
 0x1d3   :  { %v1636_v17 = vpop.f32.mrf.mxu0  ;;  %v2098_v20 = vpop.f32.mrf.mxu1 }
 0x1d4   :  { %2956 = vst.msk [vmem:[%s5431_s3 + $0xbc] sm:$0xf] %vm2908_vm1, %v3426_v39  ;;  %v3424_v50 = vpack.c.bf16 %v2397_v49, %v2397_v49  ;;  %v2402_v0 = vmax.f32 %v2107_v53, 0.0  ;;  %v2099_v52 = vadd.f32 %v2098_v20, %v1619_v22 }
 0x1d5   :  { %v1637_v46 = vpop.f32.mrf.mxu0  ;;  %v3603_v58 = vpop.f32.mrf.mxu1 }
 0x1d6   :  { %2954 = vst.msk [vmem:[%s5431_s3 + $0xb4] sm:$0xf] %vm2908_vm1, %v3424_v50  ;;  %v3429_v62 = vpack.c.bf16 %v2402_v0, %v2402_v0  ;;  %v2400_v36 = vmax.f32 %v2099_v52, 0.0  ;;  %v2110_v2 = vadd.f32 %v3603_v58, %v1630_v14  ;;  %v1638_v21 = vadd.f32 %v4679_v1, %v1637_v46 }
 0x1d7   :  { %v1639_v34 = vpop.f32.mrf.mxu0  ;;  %v2101_v26 = vpop.f32.mrf.mxu1 }
 0x1d8   :  { %2959 = vst.msk [vmem:[%s5431_s3 + $0xc8] sm:$0xf] %vm2908_vm1, %v3429_v62  ;;  %v3427_v54 = vpack.c.bf16 %v2400_v36, %v2400_v36  ;;  %v2403_v57 = vmax.f32 %v2110_v2, 0.0  ;;  %v2102_v18 = vadd.f32 %v2101_v26, %v1622_v56 }
 0x1d9   :  { %v1642_v5 = vpop.f32.mrf.mxu0  ;;  %v3606_v41 = vpop.f32.mrf.mxu1 }
 0x1da   :  { %2957 = vst.msk [vmem:[%s5431_s3 + $0xc0] sm:$0xf] %vm2908_vm1, %v3427_v54  ;;  %v3430_v10 = vpack.c.bf16 %v2403_v57, %v2403_v57  ;;  %v2401_v37 = vmax.f32 %v2102_v18, 0.0  ;;  %v1643_v42 = vadd.f32 %v4679_v1, %v1642_v5 }
 0x1db   :  { %v1644_v25 = vpop.f32.mrf.mxu0  ;;  %v2114_v40 = vpop.f32.mrf.mxu1 }
 0x1dc   :  { %2960 = vst.msk [vmem:[%s5431_s3 + $0xcc] sm:$0xf] %vm2908_vm1, %v3430_v10  ;;  %v3428_v44 = vpack.c.bf16 %v2401_v37, %v2401_v37  ;;  %v2123_v4 = vadd.f32 %v3606_v41, %v1643_v42  ;;  %v2115_v48 = vadd.f32 %v2114_v40, %v1635_v28 }
 0x1dd   :  { %v1645_v8 = vpop.f32.mrf.mxu0  ;;  %v3607_v29 = vpop.f32.mrf.mxu1 }
 0x1de   :  { %2958 = vst.msk [vmem:[%s5431_s3 + $0xc4] sm:$0xf] %vm2908_vm1, %v3428_v44  ;;  %v2406_v60 = vmax.f32 %v2123_v4, 0.0  ;;  %v2404_v6 = vmax.f32 %v2115_v48, 0.0  ;;  %v1646_v30 = vadd.f32 %v4679_v1, %v1645_v8 }
 0x1df   :  { %v1647_v24 = vpop.f32.mrf.mxu0  ;;  %v2117_v16 = vpop.f32.mrf.mxu1 }
 0x1e0   :  { %v3433_v12 = vpack.c.bf16 %v2406_v60, %v2406_v60  ;;  %v3431_v32 = vpack.c.bf16 %v2404_v6, %v2404_v6  ;;  %v2126_v38 = vadd.f32 %v3607_v29, %v1646_v30  ;;  %v2118_v22 = vadd.f32 %v2117_v16, %v1638_v21 }
 0x1e1   :  { %v1650_v39 = vpop.f32.mrf.mxu0  ;;  %v3610_v49 = vpop.f32.mrf.mxu1 }
 0x1e2   :  { %2963 = vst.msk [vmem:[%s5431_s3 + $0xd8] sm:$0xf] %vm2908_vm1, %v3433_v12  ;;  %2961 = vst.msk [vmem:[%s5431_s3 + $0xd0] sm:$0xf] %vm2908_vm1, %v3431_v32  ;;  %v2407_v53 = vmax.f32 %v2126_v38, 0.0  ;;  %v2405_v17 = vmax.f32 %v2118_v22, 0.0  ;;  %v1651_v20 = vadd.f32 %v4679_v1, %v1650_v39 }
 0x1e3   :  { %v1652_v14 = vpop.f32.mrf.mxu0  ;;  %v2130_v50 = vpop.f32.mrf.mxu1 }
 0x1e4   :  { %v3434_v0 = vpack.c.bf16 %v2407_v53, %v2407_v53  ;;  %v3432_v52 = vpack.c.bf16 %v2405_v17, %v2405_v17  ;;  %v2131_v46 = vadd.f32 %v2130_v50, %v1651_v20 }
 0x1e5   :  { %v1653_v58 = vpop.f32.mrf.mxu0  ;;  %v3611_v56 = vpop.f32.mrf.mxu1 }
 0x1e6   :  { %2964 = vst.msk [vmem:[%s5431_s3 + $0xdc] sm:$0xf] %vm2908_vm1, %v3434_v0  ;;  %2962 = vst.msk [vmem:[%s5431_s3 + $0xd4] sm:$0xf] %vm2908_vm1, %v3432_v52  ;;  %v2408_v62 = vmax.f32 %v2131_v46, 0.0  ;;  %v1654_v36 = vadd.f32 %v4679_v1, %v1653_v58 }
 0x1e7   :  { %v1655_v2 = vpop.f32.mrf.mxu0  ;;  %v2133_v34 = vpop.f32.mrf.mxu1 }
 0x1e8   :  { %v3435_v26 = vpack.c.bf16 %v2408_v62, %v2408_v62  ;;  %v2134_v54 = vadd.f32 %v2133_v34, %v1654_v36 }
 0x1e9   :  { %v1658_v57 = vpop.f32.mrf.mxu0  ;;  %v3614_v18 = vpop.f32.mrf.mxu1 }
 0x1ea   :  { %2965 = vst.msk [vmem:[%s5431_s3 + $0xe0] sm:$0xf] %vm2908_vm1, %v3435_v26  ;;  %v2409_v5 = vmax.f32 %v2134_v54, 0.0  ;;  %v1659_v41 = vadd.f32 %v4679_v1, %v1658_v57 }
 0x1eb   :  { %v1660_v28 = vpop.f32.mrf.mxu0  ;;  %v2146_v10 = vpop.f32.mrf.mxu1 }
 0x1ec   :  { %v3436_v37 = vpack.c.bf16 %v2409_v5, %v2409_v5  ;;  %v2139_v42 = vadd.f32 %v3610_v49, %v1659_v41 }
 0x1ed   :  { %v1661_v25 = vpop.f32.mrf.mxu0  ;;  %v3615_v40 = vpop.f32.mrf.mxu1 }
 0x1ee   :  { %2966 = vst.msk [vmem:[%s5431_s3 + $0xe4] sm:$0xf] %vm2908_vm1, %v3436_v37  ;;  %v2410_v44 = vmax.f32 %v2139_v42, 0.0  ;;  %v1662_v4 = vadd.f32 %v4679_v1, %v1661_v25 }
 0x1ef   :  { %v1663_v48 = vpop.f32.mrf.mxu0  ;;  %v2149_v8 = vpop.f32.mrf.mxu1 }
 0x1f0   :  { %v3437_v29 = vpack.c.bf16 %v2410_v44, %v2410_v44  ;;  %v2142_v21 = vadd.f32 %v3611_v56, %v1662_v4 }
 0x1f1   :  { %v1666_v60 = vpop.f32.mrf.mxu0  ;;  %v3618_v6 = vpop.f32.mrf.mxu1 }
 0x1f2   :  { %2967 = vst.msk [vmem:[%s5431_s3 + $0xe8] sm:$0xf] %vm2908_vm1, %v3437_v29  ;;  %v2411_v30 = vmax.f32 %v2142_v21, 0.0  ;;  %v1667_v24 = vadd.f32 %v4679_v1, %v1666_v60 }
 0x1f3   :  { %v1668_v16 = vpop.f32.mrf.mxu0  ;;  %v2162_v12 = vpop.f32.mrf.mxu1 }
 0x1f4   :  { %v3438_v32 = vpack.c.bf16 %v2411_v30, %v2411_v30  ;;  %v2147_v38 = vadd.f32 %v2146_v10, %v1667_v24 }
 0x1f5   :  { %v1669_v22 = vpop.f32.mrf.mxu0  ;;  %v3619_v39 = vpop.f32.mrf.mxu1 }
 0x1f6   :  { %2968 = vst.msk [vmem:[%s5431_s3 + $0xec] sm:$0xf] %vm2908_vm1, %v3438_v32  ;;  %v2412_v49 = vmax.f32 %v2147_v38, 0.0  ;;  %v1670_v53 = vadd.f32 %v4679_v1, %v1669_v22 }
 0x1f7   :  { %v1671_v17 = vpop.f32.mrf.mxu0  ;;  %v2165_v20 = vpop.f32.mrf.mxu1 }
 0x1f8   :  { %v3439_v14 = vpack.c.bf16 %v2412_v49, %v2412_v49  ;;  %v2150_v50 = vadd.f32 %v2149_v8, %v1670_v53 }
 0x1f9   :  { %v1674_v0 = vpop.f32.mrf.mxu0  ;;  %v5102_v52 = vpop.f32.mrf.mxu1 }
 0x1fa   :  { %2969 = vst.msk [vmem:[%s5431_s3 + $0xf0] sm:$0xf] %vm2908_vm1, %v3439_v14  ;;  %v2413_v46 = vmax.f32 %v2150_v50, 0.0  ;;  %v1675_v58 = vadd.f32 %v4679_v1, %v1674_v0 }
 0x1fb   :  { %v1676_v56 = vpop.f32.mrf.mxu0  ;;  %v2178_v62 = vpop.f32.mrf.mxu1 }
 0x1fc   :  { %v3440_v36 = vpack.c.bf16 %v2413_v46, %v2413_v46  ;;  %v2155_v2 = vadd.f32 %v3614_v18, %v1675_v58  ;;  %v5152_v58 = vld [vmem:[%s5430_s2] ss:$0 sm:$0xff] }
 0x1fd   :  { %v1677_v34 = vpop.f32.mrf.mxu0  ;;  %v5109_v26 = vpop.f32.mrf.mxu1 }
 0x1fe   :  { %2970 = vst.msk [vmem:[%s5431_s3 + $0xf4] sm:$0xf] %vm2908_vm1, %v3440_v36  ;;  %v2414_v54 = vmax.f32 %v2155_v2, 0.0  ;;  %v1678_v57 = vadd.f32 %v4679_v1, %v1677_v34 }
 0x1ff   :  { %v1679_v5 = vpop.f32.mrf.mxu0  ;;  %v2181_v41 = vpop.f32.mrf.mxu1 }
 0x200   :  { %v3441_v28 = vpack.c.bf16 %v2414_v54, %v2414_v54  ;;  %v2158_v10 = vadd.f32 %v3615_v40, %v1678_v57 }
 0x201   :  { %v1682_v37 = vpop.f32.mrf.mxu0  ;;  %v5116_v42 = vpop.f32.mrf.mxu1 }
 0x202   :  { %2971 = vst.msk [vmem:[%s5431_s3 + $0xf8] sm:$0xf] %vm2908_vm1, %v3441_v28  ;;  %v2415_v18 = vmax.f32 %v2158_v10, 0.0  ;;  %v1683_v25 = vadd.f32 %v4679_v1, %v1682_v37 }
 0x203   :  { %v1684_v44 = vpop.f32.mrf.mxu0  ;;  %v5123_v4 = vpop.f32.mrf.mxu1 }
 0x204   :  { %v3442_v48 = vpack.c.bf16 %v2415_v18, %v2415_v18  ;;  %v2163_v8 = vadd.f32 %v2162_v12, %v1683_v25 }
 0x205   :  { %v1685_v29 = vpop.f32.mrf.mxu0  ;;  %v5125_v21 = vpop.f32.mrf.mxu1 }
 0x206   :  { %2972 = vst.msk [vmem:[%s5431_s3 + $0xfc] sm:$0xf] %vm2908_vm1, %v3442_v48  ;;  %v2416_v40 = vmax.f32 %v2163_v8, 0.0  ;;  %v1686_v60 = vadd.f32 %v4679_v1, %v1685_v29 }
 0x207   :  { %v1687_v30 = vpop.f32.mrf.mxu0  ;;  %v5132_v24 = vpop.f32.mrf.mxu1 }
 0x208   :  { %v3443_v16 = vpack.c.bf16 %v2416_v40, %v2416_v40  ;;  %v2166_v32 = vadd.f32 %v2165_v20, %v1686_v60  ;;  %v1771_v40 = vadd.f32 %v5152_v58, %v4394_v7 }
 0x209   :  { %v1690_v38 = vpop.f32.mrf.mxu0  ;;  %v5134_v22 = vpop.f32.mrf.mxu1 }
 0x20a   :  { %2973 = vst.msk [vmem:[%s5431_s3 + $0x100] sm:$0xf] %vm2908_vm1, %v3443_v16  ;;  %v2417_v12 = vmax.f32 %v2166_v32, 0.0  ;;  %v1691_v49 = vadd.f32 %v4679_v1, %v1690_v38  ;;  %v1763_v32 = vadd.f32 %v5152_v58, %v4372_v59  ;;  %v1774_v59 = vadd.f32 %v5152_v58, %v4400_v11 }
 0x20b   :  { %v1692_v53 = vpop.f32.mrf.mxu0  ;;  %v5141_v17 = vpop.f32.mrf.mxu1 }
 0x20c   :  { %v3444_v14 = vpack.c.bf16 %v2417_v12, %v2417_v12  ;;  %v2171_v50 = vadd.f32 %v3618_v6, %v1691_v49 }
 0x20d   :  { %v1693_v0 = vpop.f32.mrf.mxu0  ;;  %v5143_v46 = vpop.f32.mrf.mxu1 }
 0x20e   :  { %2974 = vst.msk [vmem:[%s5431_s3 + $0x104] sm:$0xf] %vm2908_vm1, %v3444_v14  ;;  %v2418_v20 = vmax.f32 %v2171_v50, 0.0  ;;  %v1694_v1 = vadd.f32 %v5152_v58, %v1693_v0 }
 0x20f   :  { %v1695_v56 = vpop.f32.mrf.mxu0  ;;  %v5155_v36 = vpop.f32.mrf.mxu1 }
 0x210   :  { %v3445_v6 = vpack.c.bf16 %v2418_v20, %v2418_v20  ;;  %v2174_v2 = vadd.f32 %v3619_v39, %v1694_v1  ;;  %v1766_v20 = vadd.f32 %v5152_v58, %v4378_v63 }
 0x211   :  { %v1698_v34 = vpop.f32.mrf.mxu0  ;;  %v5157_v54 = vpop.f32.mrf.mxu1 }
 0x212   :  { %2975 = vst.msk [vmem:[%s5431_s3 + $0x108] sm:$0xf] %vm2908_vm1, %v3445_v6  ;;  %v2419_v57 = vmax.f32 %v2174_v2, 0.0  ;;  %v1699_v5 = vadd.f32 %v5152_v58, %v1698_v34 }
 0x213   :  { %v1700_v28 = vpop.f32.mrf.mxu0  ;;  %v5164_v10 = vpop.f32.mrf.mxu1 }
 0x214   :  { %v3446_v37 = vpack.c.bf16 %v2419_v57, %v2419_v57  ;;  %v2179_v18 = vadd.f32 %v2178_v62, %v1699_v5  ;;  %v1787_v57 = vadd.f32 %v5152_v58, %v4438_v31 }
 0x215   :  { %v1701_v25 = vpop.f32.mrf.mxu0  ;;  %v5166_v44 = vpop.f32.mrf.mxu1 }
 0x216   :  { %2976 = vst.msk [vmem:[%s5431_s3 + $0x10c] sm:$0xf] %vm2908_vm1, %v3446_v37  ;;  %v2420_v39 = vmax.f32 %v2179_v18, 0.0  ;;  %v1702_v48 = vadd.f32 %v5152_v58, %v1701_v25 }
 0x217   :  { %v1703_v8 = vpop.f32.mrf.mxu0  ;;  %v5173_v29 = vpop.f32.mrf.mxu1 }
 0x218   :  { %v3447_v60 = vpack.c.bf16 %v2420_v39, %v2420_v39  ;;  %v2182_v30 = vadd.f32 %v2181_v41, %v1702_v48 }
 0x219   :  { %v1706_v62 = vpop.f32.mrf.mxu0  ;;  %v3638_v16 = vpop.f32.mrf.mxu1 }
 0x21a   :  { %2977 = vst.msk [vmem:[%s5431_s3 + $0x110] sm:$0xf] %vm2908_vm1, %v3447_v60  ;;  %v2421_v38 = vmax.f32 %v2182_v30, 0.0  ;;  %v1707_v12 = vadd.f32 %v5152_v58, %v1706_v62  ;;  %v2251_v49 = vadd.f32 %v3638_v16, %v1771_v40  ;;  %v1790_v62 = vadd.f32 %v5152_v58, %v4444_v35 }
 0x21b   :  { %v1708_v53 = vpop.f32.mrf.mxu0  ;;  %v2242_v14 = vpop.f32.mrf.mxu1 }
 0x21c   :  { %v3448_v50 = vpack.c.bf16 %v2421_v38, %v2421_v38  ;;  %v2187_v7 = vadd.f32 %v5102_v52, %v1707_v12  ;;  %v2438_v41 = vmax.f32 %v2251_v49, 0.0  ;;  %v2243_v0 = vadd.f32 %v2242_v14, %v1763_v32 }
 0x21d   :  { %v1709_v1 = vpop.f32.mrf.mxu0  ;;  %v3639_v56 = vpop.f32.mrf.mxu1 }
 0x21e   :  { %2978 = vst.msk [vmem:[%s5431_s3 + $0x114] sm:$0xf] %vm2908_vm1, %v3448_v50  ;;  %v2422_v6 = vmax.f32 %v2187_v7, 0.0  ;;  %v3465_v2 = vpack.c.bf16 %v2438_v41, %v2438_v41  ;;  %v2436_v34 = vmax.f32 %v2243_v0, 0.0  ;;  %v1710_v52 = vadd.f32 %v5152_v58, %v1709_v1 }
 0x21f   :  { %v2254_v5 = vadd.f32 %v3639_v56, %v1774_v59  ;;  %v1711_v63 = vpop.f32.mrf.mxu0  ;;  %v2245_v28 = vpop.f32.mrf.mxu1  ;;  %v1782_v50 = vadd.f32 %v5152_v58, %v4422_v23 }
 0x220   :  { %v3449_v37 = vpack.c.bf16 %v2422_v6, %v2422_v6  ;;  %2995 = vst.msk [vmem:[%s5431_s3 + $0x158] sm:$0xf] %vm2908_vm1, %v3465_v2  ;;  %v3463_v11 = vpack.c.bf16 %v2436_v34, %v2436_v34  ;;  %v2190_v18 = vadd.f32 %v5109_v26, %v1710_v52  ;;  %v2246_v25 = vadd.f32 %v2245_v28, %v1766_v20 }
 0x221   :  { %v2439_v39 = vmax.f32 %v2254_v5, 0.0  ;;  %v1714_v48 = vpop.f32.mrf.mxu0  ;;  %v3642_v8 = vpop.f32.mrf.mxu1  ;;  %v1779_v26 = vadd.f32 %v5152_v58, %v4416_v19  ;;  %v1795_v52 = vadd.f32 %v5152_v58, %v4460_v43 }
 0x222   :  { %2979 = vst.msk [vmem:[%s5431_s3 + $0x118] sm:$0xf] %vm2908_vm1, %v3449_v37  ;;  %2993 = vst.msk [vmem:[%s5431_s3 + $0x150] sm:$0xf] %vm2908_vm1, %v3463_v11  ;;  %v2423_v31 = vmax.f32 %v2190_v18, 0.0  ;;  %v2437_v40 = vmax.f32 %v2246_v25, 0.0  ;;  %v1715_v60 = vadd.f32 %v5152_v58, %v1714_v48  ;;  %v2267_v30 = vadd.f32 %v3642_v8, %v1787_v57 }
 0x223   :  { %v3466_v16 = vpack.c.bf16 %v2439_v39, %v2439_v39  ;;  %v1716_v32 = vpop.f32.mrf.mxu0  ;;  %v2258_v38 = vpop.f32.mrf.mxu1  ;;  %v1803_v57 = vadd.f32 %v5152_v58, %v4482_v55  ;;  %v1806_v25 = vadd.f32 %v5152_v58, %v4488_v61 }
 0x224   :  { %v3450_v12 = vpack.c.bf16 %v2423_v31, %v2423_v31  ;;  %v3464_v49 = vpack.c.bf16 %v2437_v40, %v2437_v40  ;;  %v2195_v53 = vadd.f32 %v5123_v4, %v1715_v60  ;;  %v2442_v14 = vmax.f32 %v2267_v30, 0.0 }
 0x225   :  { %2996 = vst.msk [vmem:[%s5431_s3 + $0x15c] sm:$0xf] %vm2908_vm1, %v3466_v16  ;;  %v2259_v19 = vadd.f32 %v2258_v38, %v1779_v26  ;;  %v1717_v7 = vpop.f32.mrf.mxu0  ;;  %v3643_v41 = vpop.f32.mrf.mxu1  ;;  %v1819_v38 = vadd.f32 %v5152_v58, %v4526_v27 }
 0x226   :  { %2980 = vst.msk [vmem:[%s5431_s3 + $0x11c] sm:$0xf] %vm2908_vm1, %v3450_v12  ;;  %2994 = vst.msk [vmem:[%s5431_s3 + $0x154] sm:$0xf] %vm2908_vm1, %v3464_v49  ;;  %v2424_v35 = vmax.f32 %v2195_v53, 0.0  ;;  %v3469_v23 = vpack.c.bf16 %v2442_v14, %v2442_v14  ;;  %v1718_v4 = vadd.f32 %v5152_v58, %v1717_v7  ;;  %v2270_v0 = vadd.f32 %v3643_v41, %v1790_v62 }
 0x227   :  { %v2440_v20 = vmax.f32 %v2259_v19, 0.0  ;;  %v1719_v59 = vpop.f32.mrf.mxu0  ;;  %v2261_v1 = vpop.f32.mrf.mxu1  ;;  %v1811_v41 = vadd.f32 %v5152_v58, %v4504_v9 }
 0x228   :  { %v3451_v56 = vpack.c.bf16 %v2424_v35, %v2424_v35  ;;  %2999 = vst.msk [vmem:[%s5431_s3 + $0x168] sm:$0xf] %vm2908_vm1, %v3469_v23  ;;  %v2198_v6 = vadd.f32 %v5132_v24, %v1718_v4  ;;  %v2443_v2 = vmax.f32 %v2270_v0, 0.0  ;;  %v2262_v34 = vadd.f32 %v2261_v1, %v1782_v50 }
 0x229   :  { %v3467_v5 = vpack.c.bf16 %v2440_v20, %v2440_v20  ;;  %v1722_v63 = vpop.f32.mrf.mxu0  ;;  %v3646_v28 = vpop.f32.mrf.mxu1 }
 0x22a   :  { %2981 = vst.msk [vmem:[%s5431_s3 + $0x120] sm:$0xf] %vm2908_vm1, %v3451_v56  ;;  %v2425_v37 = vmax.f32 %v2198_v6, 0.0  ;;  %v3470_v11 = vpack.c.bf16 %v2443_v2, %v2443_v2  ;;  %v2441_v18 = vmax.f32 %v2262_v34, 0.0  ;;  %v1723_v24 = vadd.f32 %v5152_v58, %v1722_v63 }
 0x22b   :  { %2997 = vst.msk [vmem:[%s5431_s3 + $0x160] sm:$0xf] %vm2908_vm1, %v3467_v5  ;;  %v2283_v43 = vadd.f32 %v3646_v28, %v1803_v57  ;;  %v1724_v55 = vpop.f32.mrf.mxu0  ;;  %v2274_v39 = vpop.f32.mrf.mxu1  ;;  %v1814_v34 = vadd.f32 %v5152_v58, %v4510_v15 }
 0x22c   :  { %v3452_v48 = vpack.c.bf16 %v2425_v37, %v2425_v37  ;;  %3000 = vst.msk [vmem:[%s5431_s3 + $0x16c] sm:$0xf] %vm2908_vm1, %v3470_v11  ;;  %v3468_v8 = vpack.c.bf16 %v2441_v18, %v2441_v18  ;;  %v2203_v31 = vadd.f32 %v5116_v42, %v1723_v24  ;;  %v2275_v40 = vadd.f32 %v2274_v39, %v1795_v52 }
 0x22d   :  { %v2446_v60 = vmax.f32 %v2283_v43, 0.0  ;;  %v1725_v61 = vpop.f32.mrf.mxu0  ;;  %v3647_v30 = vpop.f32.mrf.mxu1  ;;  %v1798_v42 = vadd.f32 %v5152_v58, %v4466_v47  ;;  %v1822_v52 = vadd.f32 %v5152_v58, %v4532_v33  ;;  %v1835_v18 = vadd.f32 %v5152_v58, %v4570_v3 }
 0x22e   :  { %2982 = vst.msk [vmem:[%s5431_s3 + $0x124] sm:$0xf] %vm2908_vm1, %v3452_v48  ;;  %2998 = vst.msk [vmem:[%s5431_s3 + $0x164] sm:$0xf] %vm2908_vm1, %v3468_v8  ;;  %v2426_v26 = vmax.f32 %v2203_v31, 0.0  ;;  %v2444_v62 = vmax.f32 %v2275_v40, 0.0  ;;  %v1726_v16 = vadd.f32 %v5152_v58, %v1725_v61  ;;  %v2286_v32 = vadd.f32 %v3647_v30, %v1806_v25 }
 0x22f   :  { %v3473_v12 = vpack.c.bf16 %v2446_v60, %v2446_v60  ;;  %v1727_v49 = vpop.f32.mrf.mxu0  ;;  %v2277_v53 = vpop.f32.mrf.mxu1  ;;  %v1838_v30 = vadd.f32 %v5152_v58, %v4576_v13 }
 0x230   :  { %v3453_v14 = vpack.c.bf16 %v2426_v26, %v2426_v26  ;;  %v3471_v50 = vpack.c.bf16 %v2444_v62, %v2444_v62  ;;  %v2206_v19 = vadd.f32 %v5125_v21, %v1726_v16  ;;  %v2447_v7 = vmax.f32 %v2286_v32, 0.0 }
 0x231   :  { %3003 = vst.msk [vmem:[%s5431_s3 + $0x178] sm:$0xf] %vm2908_vm1, %v3473_v12  ;;  %v2278_v47 = vadd.f32 %v2277_v53, %v1798_v42  ;;  %v1730_v35 = vpop.f32.mrf.mxu0  ;;  %v3650_v23 = vpop.f32.mrf.mxu1  ;;  %v1830_v49 = vadd.f32 %v5152_v58, %v4554_v51 }
 0x232   :  { %2983 = vst.msk [vmem:[%s5431_s3 + $0x128] sm:$0xf] %vm2908_vm1, %v3453_v14  ;;  %3001 = vst.msk [vmem:[%s5431_s3 + $0x170] sm:$0xf] %vm2908_vm1, %v3471_v50  ;;  %v2427_v27 = vmax.f32 %v2206_v19, 0.0  ;;  %v3474_v9 = vpack.c.bf16 %v2447_v7, %v2447_v7  ;;  %v1731_v21 = vadd.f32 %v5152_v58, %v1730_v35  ;;  %v2299_v4 = vadd.f32 %v3650_v23, %v1819_v38 }
 0x233   :  { %v2445_v0 = vmax.f32 %v2278_v47, 0.0  ;;  %v1732_v20 = vpop.f32.mrf.mxu0  ;;  %v2290_v59 = vpop.f32.mrf.mxu1 }
 0x234   :  { %v3454_v1 = vpack.c.bf16 %v2427_v27, %v2427_v27  ;;  %3004 = vst.msk [vmem:[%s5431_s3 + $0x17c] sm:$0xf] %vm2908_vm1, %v3474_v9  ;;  %v2211_v56 = vadd.f32 %v5141_v17, %v1731_v21  ;;  %v2450_v6 = vmax.f32 %v2299_v4, 0.0  ;;  %v2291_v2 = vadd.f32 %v2290_v59, %v1811_v41  ;;  %v5439_v9 = vld [vmem:[#allocation2_spill] sm:$0xff]  ;;  %v5440_v4 = vld [vmem:[#allocation4_spill] sm:$0xff] }
 0x235   :  { %v3472_v57 = vpack.c.bf16 %v2445_v0, %v2445_v0  ;;  %v1733_v5 = vpop.f32.mrf.mxu0  ;;  %v3651_v63 = vpop.f32.mrf.mxu1  ;;  %v1843_v21 = vadd.f32 %v5152_v58, %v5439_v9  ;;  %v1851_v0 = vadd.f32 %v5152_v58, %v5440_v4 }
 0x236   :  { %2984 = vst.msk [vmem:[%s5431_s3 + $0x12c] sm:$0xf] %vm2908_vm1, %v3454_v1  ;;  %v2428_v28 = vmax.f32 %v2211_v56, 0.0  ;;  %v3477_v37 = vpack.c.bf16 %v2450_v6, %v2450_v6  ;;  %v2448_v11 = vmax.f32 %v2291_v2, 0.0  ;;  %v1734_v17 = vadd.f32 %v5152_v58, %v1733_v5 }
 0x237   :  { %3002 = vst.msk [vmem:[%s5431_s3 + $0x174] sm:$0xf] %vm2908_vm1, %v3472_v57  ;;  %v2302_v15 = vadd.f32 %v3651_v63, %v1822_v52  ;;  %v1735_v33 = vpop.f32.mrf.mxu0  ;;  %v2293_v24 = vpop.f32.mrf.mxu1 }
 0x238   :  { %v3455_v25 = vpack.c.bf16 %v2428_v28, %v2428_v28  ;;  %3007 = vst.msk [vmem:[%s5431_s3 + $0x188] sm:$0xf] %vm2908_vm1, %v3477_v37  ;;  %v3475_v43 = vpack.c.bf16 %v2448_v11, %v2448_v11  ;;  %v2214_v55 = vadd.f32 %v5155_v36, %v1734_v17  ;;  %v2294_v39 = vadd.f32 %v2293_v24, %v1814_v34  ;;  %v5441_v34 = vld [vmem:[#allocation5_spill] sm:$0xff] }
 0x239   :  { %v2451_v48 = vmax.f32 %v2302_v15, 0.0  ;;  %v1738_v3 = vpop.f32.mrf.mxu0  ;;  %v3654_v8 = vpop.f32.mrf.mxu1  ;;  %v1827_v36 = vadd.f32 %v5152_v58, %v4548_v45  ;;  %v1854_v52 = vadd.f32 %v5152_v58, %v5441_v34 }
 0x23a   :  { %2985 = vst.msk [vmem:[%s5431_s3 + $0x130] sm:$0xf] %vm2908_vm1, %v3455_v25  ;;  %3005 = vst.msk [vmem:[%s5431_s3 + $0x180] sm:$0xf] %vm2908_vm1, %v3475_v43  ;;  %v2429_v31 = vmax.f32 %v2214_v55, 0.0  ;;  %v2449_v40 = vmax.f32 %v2294_v39, 0.0  ;;  %v1739_v60 = vadd.f32 %v5152_v58, %v1738_v3  ;;  %v2315_v61 = vadd.f32 %v3654_v8, %v1835_v18 }
 0x23b   :  { %v3478_v26 = vpack.c.bf16 %v2451_v48, %v2451_v48  ;;  %v1740_v62 = vpop.f32.mrf.mxu0  ;;  %v2306_v16 = vpop.f32.mrf.mxu1  ;;  %v5443_v48 = vld [vmem:[#allocation8_spill] sm:$0xff] }
 0x23c   :  { %v3456_v32 = vpack.c.bf16 %v2429_v31, %v2429_v31  ;;  %v3476_v42 = vpack.c.bf16 %v2449_v40, %v2449_v40  ;;  %v2219_v38 = vadd.f32 %v5134_v22, %v1739_v60  ;;  %v2454_v12 = vmax.f32 %v2315_v61, 0.0 }
 0x23d   :  { %3008 = vst.msk [vmem:[%s5431_s3 + $0x18c] sm:$0xf] %vm2908_vm1, %v3478_v26  ;;  %v2307_v45 = vadd.f32 %v2306_v16, %v1827_v36  ;;  %v1741_v53 = vpop.f32.mrf.mxu0  ;;  %v3655_v14 = vpop.f32.mrf.mxu1  ;;  %v1867_v3 = vadd.f32 %v5152_v58, %v5443_v48  ;;  %v5444_v26 = vld [vmem:[#allocation6_spill] sm:$0xff] }
 0x23e   :  { %2986 = vst.msk [vmem:[%s5431_s3 + $0x134] sm:$0xf] %vm2908_vm1, %v3456_v32  ;;  %3006 = vst.msk [vmem:[%s5431_s3 + $0x184] sm:$0xf] %vm2908_vm1, %v3476_v42  ;;  %v2430_v13 = vmax.f32 %v2219_v38, 0.0  ;;  %v3481_v51 = vpack.c.bf16 %v2454_v12, %v2454_v12  ;;  %v1742_v22 = vadd.f32 %v5152_v58, %v1741_v53  ;;  %v2318_v50 = vadd.f32 %v3655_v14, %v1838_v30 }
 0x23f   :  { %v2452_v19 = vmax.f32 %v2307_v45, 0.0  ;;  %v1743_v7 = vpop.f32.mrf.mxu0  ;;  %v2309_v41 = vpop.f32.mrf.mxu1  ;;  %v1859_v62 = vadd.f32 %v5152_v58, %v5444_v26 }
 0x240   :  { %v3457_v47 = vpack.c.bf16 %v2430_v13, %v2430_v13  ;;  %3011 = vst.msk [vmem:[%s5431_s3 + $0x198] sm:$0xf] %vm2908_vm1, %v3481_v51  ;;  %v2222_v35 = vadd.f32 %v5143_v46, %v1742_v22  ;;  %v2455_v23 = vmax.f32 %v2318_v50, 0.0  ;;  %v2310_v27 = vadd.f32 %v2309_v41, %v1830_v49 }
 0x241   :  { %v3479_v20 = vpack.c.bf16 %v2452_v19, %v2452_v19  ;;  %v1746_v59 = vpop.f32.mrf.mxu0  ;;  %v3658_v1 = vpop.f32.mrf.mxu1  ;;  %v5445_v19 = vld [vmem:[#allocation7_spill] sm:$0xff] }
 0x242   :  { %2987 = vst.msk [vmem:[%s5431_s3 + $0x138] sm:$0xf] %vm2908_vm1, %v3457_v47  ;;  %v2431_v56 = vmax.f32 %v2222_v35, 0.0  ;;  %v3482_v6 = vpack.c.bf16 %v2455_v23, %v2455_v23  ;;  %v2453_v2 = vmax.f32 %v2310_v27, 0.0  ;;  %v1747_v46 = vadd.f32 %v5152_v58, %v1746_v59 }
 0x243   :  { %3009 = vst.msk [vmem:[%s5431_s3 + $0x190] sm:$0xf] %vm2908_vm1, %v3479_v20  ;;  %v2331_v57 = vadd.f32 %v3658_v1, %v1851_v0  ;;  %v1748_v5 = vpop.f32.mrf.mxu0  ;;  %v2322_v63 = vpop.f32.mrf.mxu1  ;;  %v1862_v7 = vadd.f32 %v5152_v58, %v5445_v19 }
 0x244   :  { %v3458_v28 = vpack.c.bf16 %v2431_v56, %v2431_v56  ;;  %3012 = vst.msk [vmem:[%s5431_s3 + $0x19c] sm:$0xf] %vm2908_vm1, %v3482_v6  ;;  %v3480_v37 = vpack.c.bf16 %v2453_v2, %v2453_v2  ;;  %v2227_v11 = vadd.f32 %v5164_v10, %v1747_v46  ;;  %v2323_v17 = vadd.f32 %v2322_v63, %v1843_v21  ;;  %v5442_v10 = vld [vmem:[#allocation3_spill] sm:$0xff] }
 0x245   :  { %v2458_v18 = vmax.f32 %v2331_v57, 0.0  ;;  %v1749_v15 = vpop.f32.mrf.mxu0  ;;  %v3659_v33 = vpop.f32.mrf.mxu1  ;;  %v1846_v39 = vadd.f32 %v5152_v58, %v5442_v10 }
 0x246   :  { %2988 = vst.msk [vmem:[%s5431_s3 + $0x13c] sm:$0xf] %vm2908_vm1, %v3458_v28  ;;  %3010 = vst.msk [vmem:[%s5431_s3 + $0x194] sm:$0xf] %vm2908_vm1, %v3480_v37  ;;  %v2432_v24 = vmax.f32 %v2227_v11, 0.0  ;;  %v2456_v25 = vmax.f32 %v2323_v17, 0.0  ;;  %v1750_v43 = vadd.f32 %v5152_v58, %v1749_v15  ;;  %v2334_v55 = vadd.f32 %v3659_v33, %v1854_v52 }
 0x247   :  { %v3485_v8 = vpack.c.bf16 %v2458_v18, %v2458_v18  ;;  %v1751_v31 = vpop.f32.mrf.mxu0  ;;  %v2325_v40 = vpop.f32.mrf.mxu1 }
 0x248   :  { %v3459_v60 = vpack.c.bf16 %v2432_v24, %v2432_v24  ;;  %v3483_v61 = vpack.c.bf16 %v2456_v25, %v2456_v25  ;;  %v2230_v36 = vadd.f32 %v5173_v29, %v1750_v43  ;;  %v2459_v30 = vmax.f32 %v2334_v55, 0.0 }
 0x249   :  { %3015 = vst.msk [vmem:[%s5431_s3 + $0x1a8] sm:$0xf] %vm2908_vm1, %v3485_v8  ;;  %v2326_v16 = vadd.f32 %v2325_v40, %v1846_v39  ;;  %v1754_v32 = vpop.f32.mrf.mxu0  ;;  %v3662_v42 = vpop.f32.mrf.mxu1 }
 0x24a   :  { %2989 = vst.msk [vmem:[%s5431_s3 + $0x140] sm:$0xf] %vm2908_vm1, %v3459_v60  ;;  %3013 = vst.msk [vmem:[%s5431_s3 + $0x1a0] sm:$0xf] %vm2908_vm1, %v3483_v61  ;;  %v2433_v29 = vmax.f32 %v2230_v36, 0.0  ;;  %v3486_v38 = vpack.c.bf16 %v2459_v30, %v2459_v30  ;;  %v1755_v12 = vadd.f32 %v5152_v58, %v1754_v32  ;;  %v2347_v49 = vadd.f32 %v3662_v42, %v1867_v3 }
 0x24b   :  { %v2457_v45 = vmax.f32 %v2326_v16, 0.0  ;;  %v1756_v53 = vpop.f32.mrf.mxu0  ;;  %v2338_v14 = vpop.f32.mrf.mxu1 }
 0x24c   :  { %v3460_v13 = vpack.c.bf16 %v2433_v29, %v2433_v29  ;;  %3016 = vst.msk [vmem:[%s5431_s3 + $0x1ac] sm:$0xf] %vm2908_vm1, %v3486_v38  ;;  %v2235_v51 = vadd.f32 %v5157_v54, %v1755_v12  ;;  %v2462_v22 = vmax.f32 %v2347_v49, 0.0  ;;  %v2339_v50 = vadd.f32 %v2338_v14, %v1859_v62 }
 0x24d   :  { %v3484_v41 = vpack.c.bf16 %v2457_v45, %v2457_v45  ;;  %v1757_v47 = vpop.f32.mrf.mxu0  ;;  %v3663_v35 = vpop.f32.mrf.mxu1 }
 0x24e   :  { %2990 = vst.msk [vmem:[%s5431_s3 + $0x144] sm:$0xf] %vm2908_vm1, %v3460_v13  ;;  %v2434_v23 = vmax.f32 %v2235_v51, 0.0  ;;  %v3489_v27 = vpack.c.bf16 %v2462_v22, %v2462_v22  ;;  %v2460_v9 = vmax.f32 %v2339_v50, 0.0  ;;  %v1758_v21 = vadd.f32 %v5152_v58, %v1757_v47 }
 0x24f   :  { %3014 = vst.msk [vmem:[%s5431_s3 + $0x1a4] sm:$0xf] %vm2908_vm1, %v3484_v41  ;;  %v1759_v54 = vpop.f32.mrf.mxu0  ;;  %v2341_v4 = vpop.f32.mrf.mxu1 }
 0x250   :  { %v3461_v0 = vpack.c.bf16 %v2434_v23, %v2434_v23  ;;  %3020 = vst.msk [vmem:[%s5431_s3 + $0x1b8] sm:$0x1] %vm3019_vm2, %v3489_v27  ;;  %v3487_v20 = vpack.c.bf16 %v2460_v9, %v2460_v9  ;;  %v2238_v59 = vadd.f32 %v5166_v44, %v1758_v21  ;;  %v2342_v1 = vadd.f32 %v2341_v4, %v1862_v7 }
 0x252   :  { %2991 = vst.msk [vmem:[%s5431_s3 + $0x148] sm:$0xf] %vm2908_vm1, %v3461_v0  ;;  %3017 = vst.msk [vmem:[%s5431_s3 + $0x1b0] sm:$0xf] %vm2908_vm1, %v3487_v20  ;;  %v2435_v58 = vmax.f32 %v2238_v59, 0.0  ;;  %v2461_v56 = vmax.f32 %v2342_v1, 0.0 }
 0x254   :  { %v3462_v6 = vpack.c.bf16 %v2435_v58, %v2435_v58  ;;  %v3488_v2 = vpack.c.bf16 %v2461_v56, %v2461_v56 }
 0x256   :  { %2992 = vst.msk [vmem:[%s5431_s3 + $0x14c] sm:$0xf] %vm2908_vm1, %v3462_v6  ;;  %3018 = vst.msk [vmem:[%s5431_s3 + $0x1b4] sm:$0xf] %vm2908_vm1, %v3488_v2 }

// kernel: _forward_impl.7
= control target key start
LH: loop header
LB: loop body
LE: loop exit
PB: predicated region body
PF: predicated region fallthrough
CT: control target
= control target key end

     0   :  { %vm463_vm0 = vcmask 261120   ;;  %vm988_vm1 = vcmask 257024   ;;  %vm1019_vm2 = vcmask 253952   ;;  %s1853_s1 = inlined_call_operand.vmem [shape: bf16[288,32], index: 1, kind: input, shape index: {}]   ;;  %s1854_s0 = inlined_call_operand.vmem [shape: bf16[242,288], index: 0, kind: input, shape index: {}]   ;;  %s1855_s2 = inlined_call_operand.vmem [shape: f32[1,32], index: 2, kind: input, shape index: {}]   ;;  %s1856_s3 = inlined_call_operand.vmem [shape: bf16[242,32], index: 3, kind: output, shape index: {}]  }
   0x1   :  { %v1352_v0 = vld [vmem:[%s1853_s1 + $0x78] sm:$0xff]   ;;  %v1354_v2 = vld [vmem:[%s1853_s1 + $0x70] sm:$0xff]   ;;  %v1356_v4 = vld [vmem:[%s1853_s1 + $0x68] sm:$0xff]  }
   0x2   :  { %v1353_v1 = vld [vmem:[%s1853_s1 + $0x38] sm:$0xff]   ;;  %1170 = vmatprep.subr.bf16.mxu0 %v1352_v0  ;;  %1336 = vmatprep.subr.bf16.mxu1 %v1352_v0  ;;  %v1355_v3 = vld [vmem:[%s1853_s1 + $0x30] sm:$0xff]   ;;  %v1357_v5 = vld [vmem:[%s1853_s1 + $0x28] sm:$0xff]  }
   0x3   :  { %1171 = vmatpush3.bf16.msra.mxu0 %v1353_v1  ;;  %1344 = vmatpush3.bf16.msra.mxu1 %v1353_v1  ;;  %v1358_v6 = vld [vmem:[%s1853_s1 + $0x60] sm:$0xff]   ;;  %v1360_v8 = vld [vmem:[%s1853_s1 + $0x58] sm:$0xff]   ;;  %v1362_v10 = vld [vmem:[%s1853_s1 + $0x50] sm:$0xff]  }
   0x4   :  { %1172 = vmatprep.subr.bf16.mxu0 %v1354_v2  ;;  %1337 = vmatprep.subr.bf16.mxu1 %v1354_v2  ;;  %v1359_v7 = vld [vmem:[%s1853_s1 + $0x20] sm:$0xff]   ;;  %v1361_v9 = vld [vmem:[%s1853_s1 + $0x18] sm:$0xff]   ;;  %v1363_v13 = vld [vmem:[%s1853_s1 + $0x10] sm:$0xff]  }
   0x5   :  { %v1370_v11 = vld [vmem:[%s1854_s0 + $0x4] ss:$12 sps:$4 sm:$0xff]   ;;  %v1364_v14 = vld [vmem:[%s1853_s1 + $0x48] sm:$0xff]   ;;  %v1381_v26 = vld [vmem:[%s1854_s0 + $0x34] ss:$12 sps:$4 sm:$0xff]  }
   0x6   :  { %v1373_v12 = vld [vmem:[%s1854_s0 + $0x124] ss:$12 sps:$4 sm:$0xff]   ;;  %544 = vmatprep.mubr.bf16.mxu0 %v1370_v11  ;;  %v1365_v15 = vld [vmem:[%s1853_s1 + $0x8] sm:$0xff]   ;;  %v1383_v27 = vld [vmem:[%s1854_s0 + $0x154] ss:$12 sps:$4 sm:$0xff]  }
   0x7   :  { %1173 = vmatpush3.bf16.msra.mxu0 %v1355_v3  ;;  %1345 = vmatpush3.bf16.msra.mxu1 %v1355_v3  ;;  %v1366_v16 = vld [vmem:[%s1853_s1 + $0x40] sm:$0xff]   ;;  %v1374_v18 = vld [vmem:[%s1853_s1 + $0x88] sm:$0xff]   ;;  %v1385_v29 = vld [vmem:[%s1854_s0 + $0x30] ss:$12 sps:$4 sm:$0xff]  }
   0x8   :  { %1174 = vmatprep.subr.bf16.mxu0 %v1356_v4  ;;  %1338 = vmatprep.subr.bf16.mxu1 %v1356_v4  ;;  %v1367_v17 = vld [vmem:[%s1853_s1] sm:$0xff]   ;;  %v1375_v21 = vld [vmem:[%s1854_s0 + $0x1c] ss:$12 sps:$4 sm:$0xff]   ;;  %v1388_v31 = vld [vmem:[%s1854_s0 + $0x4c] ss:$12 sps:$4 sm:$0xff]  }
   0x9   :  { %640 = vmatprep.mubr.bf16.mxu1 %v1373_v12  ;;  %v1368_v19 = vld [vmem:[%s1854_s0] ss:$12 sps:$4 sm:$0xff]   ;;  %v1377_v22 = vld [vmem:[%s1854_s0 + $0x13c] ss:$12 sps:$4 sm:$0xff]   ;;  %v1379_v24 = vld [vmem:[%s1854_s0 + $0x18] ss:$12 sps:$4 sm:$0xff]  }
   0xa   :  { %v1371_v20 = vld [vmem:[%s1854_s0 + $0x120] ss:$12 sps:$4 sm:$0xff]   ;;  %v1380_v25 = vld [vmem:[%s1854_s0 + $0x138] ss:$12 sps:$4 sm:$0xff]   ;;  %v1386_v30 = vld [vmem:[%s1854_s0 + $0x150] ss:$12 sps:$4 sm:$0xff]  }
   0xb   :  { %1175 = vmatpush3.bf16.msra.mxu0 %v1357_v5  ;;  %1346 = vmatpush3.bf16.msra.mxu1 %v1357_v5  ;;  %v1387_v23 = vld [vmem:[%s1853_s1 + $0x80] sm:$0xff]   ;;  %v75_v28 = vld [vmem:[%s1854_s0 + $0x168] sm:$0x11]  ;;  %v1402_v42 = vld [vmem:[%s1854_s0 + $0x50] ss:$12 sps:$4 sm:$0xff]  }
   0xc   :  { %1176 = vmatprep.subr.bf16.mxu0 %v1358_v6  ;;  %1339 = vmatprep.subr.bf16.mxu1 %v1358_v6  ;;  %v1072_v32 = vcombine.high %v75_v28, %v75_v28  ;;  %v1391_v33 = vld [vmem:[%s1854_s0 + $0x48] ss:$12 sps:$4 sm:$0xff]   ;;  %v1071_v34 = vcombine.low %v75_v28, %v75_v28  ;;  %v1393_v35 = vld [vmem:[%s1854_s0 + $0x64] ss:$12 sps:$4 sm:$0xff]   ;;  %v1396_v37 = vld [vmem:[%s1854_s0 + $0x60] ss:$12 sps:$4 sm:$0xff]  }
   0xd   :  { %v1395_v36 = vld [vmem:[%s1854_s0 + $0x8] ss:$12 sps:$4 sm:$0xff]   ;;  %v1397_v38 = vld [vmem:[%s1854_s0 + $0x20] ss:$12 sps:$4 sm:$0xff]   ;;  %v1400_v40 = vld [vmem:[%s1854_s0 + $0x38] ss:$12 sps:$4 sm:$0xff]  }
   0xe   :  { %v1398_v39 = vld [vmem:[%s1854_s0 + $0x7c] ss:$12 sps:$4 sm:$0xff]   ;;  %v1401_v41 = vld [vmem:[%s1854_s0 + $0x78] ss:$12 sps:$4 sm:$0xff]   ;;  %v1403_v43 = vld [vmem:[%s1854_s0 + $0x94] ss:$12 sps:$4 sm:$0xff]  }
   0xf   :  { %1177 = vmatpush3.bf16.msra.mxu0 %v1359_v7  ;;  %1347 = vmatpush3.bf16.msra.mxu1 %v1359_v7  ;;  %v1405_v44 = vld [vmem:[%s1854_s0 + $0x68] ss:$12 sps:$4 sm:$0xff]   ;;  %v1406_v45 = vld [vmem:[%s1854_s0 + $0x90] ss:$12 sps:$4 sm:$0xff]   ;;  %v1407_v46 = vld [vmem:[%s1854_s0 + $0x80] ss:$12 sps:$4 sm:$0xff]  }
  0x10   :  { %1178 = vmatprep.subr.bf16.mxu0 %v1360_v8  ;;  %1340 = vmatprep.subr.bf16.mxu1 %v1360_v8  ;;  %v1408_v47 = vld [vmem:[%s1854_s0 + $0xac] ss:$12 sps:$4 sm:$0xff]   ;;  %v1411_v49 = vld [vmem:[%s1854_s0 + $0xa8] ss:$12 sps:$4 sm:$0xff]   ;;  %v1412_v50 = vld [vmem:[%s1854_s0 + $0xb0] ss:$12 sps:$4 sm:$0xff]  }
  0x11   :  { %v1410_v48 = vld [vmem:[%s1854_s0 + $0x98] ss:$12 sps:$4 sm:$0xff]   ;;  %v1415_v52 = vld [vmem:[%s1854_s0 + $0xc8] ss:$12 sps:$4 sm:$0xff]   ;;  %v1416_v53 = vld [vmem:[%s1854_s0 + $0xc0] ss:$12 sps:$4 sm:$0xff]  }
  0x12   :  { %v1413_v51 = vld [vmem:[%s1854_s0 + $0xc4] ss:$12 sps:$4 sm:$0xff]   ;;  %v1417_v54 = vld [vmem:[%s1854_s0 + $0xe0] ss:$12 sps:$4 sm:$0xff]   ;;  %v1418_v55 = vld [vmem:[%s1854_s0 + $0xdc] ss:$12 sps:$4 sm:$0xff]  }
  0x13   :  { %1179 = vmatpush3.bf16.msra.mxu0 %v1361_v9  ;;  %1348 = vmatpush3.bf16.msra.mxu1 %v1361_v9  ;;  %v1420_v56 = vld [vmem:[%s1854_s0 + $0xf8] ss:$12 sps:$4 sm:$0xff]   ;;  %v1422_v58 = vld [vmem:[%s1854_s0 + $0x110] ss:$12 sps:$4 sm:$0xff]   ;;  %v1423_v59 = vld [vmem:[%s1854_s0 + $0xf4] ss:$12 sps:$4 sm:$0xff]  }
  0x14   :  { %1180 = vmatprep.subr.bf16.mxu0 %v1362_v10  ;;  %1341 = vmatprep.subr.bf16.mxu1 %v1362_v10  ;;  %v1421_v57 = vld [vmem:[%s1854_s0 + $0xd8] ss:$12 sps:$4 sm:$0xff]   ;;  %v1425_v60 = vld [vmem:[%s1854_s0 + $0x128] ss:$12 sps:$4 sm:$0xff]   ;;  %v1426_v61 = vld [vmem:[%s1854_s0 + $0xf0] ss:$12 sps:$4 sm:$0xff]  }
  0x15   :  { %v1427_v62 = vld [vmem:[%s1854_s0 + $0x140] ss:$12 sps:$4 sm:$0xff]   ;;  %v1430_v0 = vld [vmem:[%s1854_s0 + $0x158] ss:$12 sps:$4 sm:$0xff]   ;;  %v1431_v1 = vld [vmem:[%s1854_s0 + $0x108] ss:$12 sps:$4 sm:$0xff]  }
  0x16   :  { %v1428_v63 = vld [vmem:[%s1854_s0 + $0x10c] ss:$12 sps:$4 sm:$0xff]   ;;  %v1432_v2 = vld [vmem:[%s1854_s0 + $0x170] ss:$0 sps:$4 sm:$0x11]  }
  0x17   :  { %1181 = vmatpush3.bf16.msra.mxu0 %v1363_v13  ;;  %1349 = vmatpush3.bf16.msra.mxu1 %v1363_v13 }
  0x18   :  { %1182 = vmatprep.subr.bf16.mxu0 %v1364_v14  ;;  %1342 = vmatprep.subr.bf16.mxu1 %v1364_v14 }
  0x1b   :  { %1183 = vmatpush3.bf16.msra.mxu0 %v1365_v15  ;;  %1350 = vmatpush3.bf16.msra.mxu1 %v1365_v15 }
  0x1c   :  { %1184 = vmatprep.subr.bf16.mxu0 %v1366_v16  ;;  %1343 = vmatprep.subr.bf16.mxu1 %v1366_v16 }
  0x1f   :  { %1185 = vmatpush3.bf16.msra.mxu0 %v1367_v17  ;;  %1351 = vmatpush3.bf16.msra.mxu1 %v1367_v17 }
  0x20   :  { %1300 = vmatprep.subr.bf16.mxu1 %v1374_v18 }
  0x22   :  { %545 = vmatmul.mubr.bf16.vlgmr.msra.gmra.mxu0 %v1368_v19  ;;  %641 = vmatmul.mubr.bf16.vlgmr.msra.gmra.mxu1 %v1371_v20 }
  0x23   :  { %1301 = vmatpush3.bf16.msra.mxu1 %v1374_v18  ;;  %552 = vmatprep.mubr.bf16.mxu0 %v1375_v21 }
  0x24   :  { %648 = vmatprep.mubr.bf16.mxu1 %v1377_v22  ;;  %1302 = vmatprep.subr.bf16.mxu1 %v1387_v23 }
  0x27   :  { %1303 = vmatpush3.bf16.msra.mxu1 %v1387_v23 }
  0x2a   :  { %553 = vmatmul.mubr.bf16.gmra.mxu0 %v1379_v24  ;;  %649 = vmatmul.mubr.bf16.gmra.mxu1 %v1380_v25 }
  0x2b   :  { %560 = vmatprep.mubr.bf16.mxu0 %v1381_v26  ;;  %656 = vmatprep.mubr.bf16.mxu1 %v1383_v27 }
  0x32   :  { %561 = vmatmul.mubr.bf16.gmra.mxu0 %v1385_v29  ;;  %657 = vmatmul.mubr.bf16.gmra.mxu1 %v1386_v30 }
  0x33   :  { %568 = vmatprep.mubr.bf16.mxu0 %v1388_v31  ;;  %664 = vmatprep.mubr.bf16.mxu1 %v1072_v32 }
  0x3a   :  { %569 = vmatmul.mubr.bf16.gmra.mxu0 %v1391_v33  ;;  %665 = vmatmul.mubr.bf16.gmra.mxu1 %v1071_v34 }
  0x3b   :  { %576 = vmatprep.mubr.bf16.mxu0 %v1393_v35  ;;  %1304 = vmatprep.mubr.msk.bf16.mxu1 %vm463_vm0, %v1395_v36 }
  0x42   :  { %577 = vmatmul.mubr.bf16.gmra.mxu0 %v1396_v37  ;;  %1305 = vmatmul.mubr.msk.bf16.vlgmr.msra.gmra.mxu1 %vm463_vm0, %v1397_v38 }
  0x43   :  { %584 = vmatprep.mubr.bf16.mxu0 %v1398_v39  ;;  %1308 = vmatprep.mubr.msk.bf16.mxu1 %vm463_vm0, %v1400_v40 }
  0x4a   :  { %585 = vmatmul.mubr.bf16.gmra.mxu0 %v1401_v41  ;;  %1309 = vmatmul.mubr.msk.bf16.gmra.mxu1 %vm463_vm0, %v1402_v42 }
  0x4b   :  { %592 = vmatprep.mubr.bf16.mxu0 %v1403_v43  ;;  %1312 = vmatprep.mubr.msk.bf16.mxu1 %vm463_vm0, %v1405_v44  ;;  %v1683_v43 = vld [vmem:[%s1855_s2] ss:$0 sm:$0xff] }
  0x52   :  { %593 = vmatmul.mubr.bf16.gmra.mxu0 %v1406_v45  ;;  %1313 = vmatmul.mubr.msk.bf16.gmra.mxu1 %vm463_vm0, %v1407_v46 }
  0x53   :  { %600 = vmatprep.mubr.bf16.mxu0 %v1408_v47  ;;  %1316 = vmatprep.mubr.msk.bf16.mxu1 %vm463_vm0, %v1410_v48 }
  0x5a   :  { %601 = vmatmul.mubr.bf16.gmra.mxu0 %v1411_v49  ;;  %1317 = vmatmul.mubr.msk.bf16.gmra.mxu1 %vm463_vm0, %v1412_v50 }
  0x5b   :  { %608 = vmatprep.mubr.bf16.mxu0 %v1413_v51  ;;  %1320 = vmatprep.mubr.msk.bf16.mxu1 %vm463_vm0, %v1415_v52 }
  0x62   :  { %609 = vmatmul.mubr.bf16.gmra.mxu0 %v1416_v53  ;;  %1321 = vmatmul.mubr.msk.bf16.gmra.mxu1 %vm463_vm0, %v1417_v54 }
  0x63   :  { %616 = vmatprep.mubr.bf16.mxu0 %v1418_v55  ;;  %1324 = vmatprep.mubr.msk.bf16.mxu1 %vm463_vm0, %v1420_v56 }
  0x6a   :  { %617 = vmatmul.mubr.bf16.gmra.mxu0 %v1421_v57  ;;  %1325 = vmatmul.mubr.msk.bf16.gmra.mxu1 %vm463_vm0, %v1422_v58 }
  0x6b   :  { %624 = vmatprep.mubr.bf16.mxu0 %v1423_v59  ;;  %1328 = vmatprep.mubr.msk.bf16.mxu1 %vm463_vm0, %v1425_v60 }
  0x72   :  { %625 = vmatmul.mubr.bf16.gmra.mxu0 %v1426_v61  ;;  %1329 = vmatmul.mubr.msk.bf16.gmra.mxu1 %vm463_vm0, %v1427_v62 }
  0x73   :  { %632 = vmatprep.mubr.bf16.mxu0 %v1428_v63  ;;  %1332 = vmatprep.mubr.msk.bf16.mxu1 %vm463_vm0, %v1430_v0 }
  0x7a   :  { %633 = vmatmul.mubr.bf16.gmra.mxu0 %v1431_v1  ;;  %1333 = vmatmul.mubr.msk.bf16.gmra.mxu1 %vm463_vm0, %v1432_v2 }
  0xe2   :  { %v1186_v3 = vpop.f32.mrf.mxu0  ;;  %v1258_v4 = vpop.f32.mrf.mxu1 }
  0xe4   :  { %v1187_v5 = vpop.f32.mrf.mxu0  ;;  %v1259_v6 = vpop.f32.mrf.mxu1 }
  0xe5   :  { %v1664_v7 = vadd.f32 %v1259_v6, %v1258_v4  ;;  %v1188_v40 = vadd.f32 %v1187_v5, %v1186_v3 }
  0xe6   :  { %v1189_v8 = vpop.f32.mrf.mxu0  ;;  %v1261_v9 = vpop.f32.mrf.mxu1 }
  0xe7   :  { %v547_v50 = vadd.f32 %v1188_v40, %v1683_v43 }
  0xe8   :  { %v1190_v10 = vpop.f32.mrf.mxu0  ;;  %v1262_v11 = vpop.f32.mrf.mxu1 }
  0xe9   :  { %v1666_v12 = vadd.f32 %v1262_v11, %v1261_v9  ;;  %v1191_v46 = vadd.f32 %v1190_v10, %v1189_v8 }
  0xea   :  { %v1192_v13 = vpop.f32.mrf.mxu0  ;;  %v1264_v14 = vpop.f32.mrf.mxu1 }
  0xeb   :  { %v550_v59 = vadd.f32 %v1191_v46, %v1683_v43 }
  0xec   :  { %v1193_v15 = vpop.f32.mrf.mxu0  ;;  %v1265_v16 = vpop.f32.mrf.mxu1 }
  0xed   :  { %v1668_v17 = vadd.f32 %v1265_v16, %v1264_v14  ;;  %v1194_v37 = vadd.f32 %v1193_v15, %v1192_v13 }
  0xee   :  { %v1195_v18 = vpop.f32.mrf.mxu0  ;;  %v1267_v19 = vpop.f32.mrf.mxu1 }
  0xef   :  { %v555_v45 = vadd.f32 %v1194_v37, %v1683_v43 }
  0xf0   :  { %v1196_v20 = vpop.f32.mrf.mxu0  ;;  %v1268_v21 = vpop.f32.mrf.mxu1 }
  0xf1   :  { %v1670_v22 = vadd.f32 %v1268_v21, %v1267_v19  ;;  %v1197_v44 = vadd.f32 %v1196_v20, %v1195_v18 }
  0xf2   :  { %v1198_v23 = vpop.f32.mrf.mxu0  ;;  %v1270_v24 = vpop.f32.mrf.mxu1 }
  0xf3   :  { %v558_v56 = vadd.f32 %v1197_v44, %v1683_v43 }
  0xf4   :  { %v1199_v25 = vpop.f32.mrf.mxu0  ;;  %v1271_v26 = vpop.f32.mrf.mxu1 }
  0xf5   :  { %v1672_v27 = vadd.f32 %v1271_v26, %v1270_v24  ;;  %v1200_v60 = vadd.f32 %v1199_v25, %v1198_v23 }
  0xf6   :  { %v1201_v28 = vpop.f32.mrf.mxu0  ;;  %v1273_v29 = vpop.f32.mrf.mxu1 }
  0xf7   :  { %v563_v15 = vadd.f32 %v1200_v60, %v1683_v43 }
  0xf8   :  { %v1202_v30 = vpop.f32.mrf.mxu0  ;;  %v1274_v31 = vpop.f32.mrf.mxu1 }
  0xf9   :  { %v1674_v32 = vadd.f32 %v1274_v31, %v1273_v29  ;;  %v1203_v8 = vadd.f32 %v1202_v30, %v1201_v28 }
  0xfa   :  { %v1204_v33 = vpop.f32.mrf.mxu0  ;;  %v1676_v34 = vpop.f32.mrf.mxu1 }
  0xfb   :  { %v566_v28 = vadd.f32 %v1203_v8, %v1683_v43 }
  0xfc   :  { %v1205_v35 = vpop.f32.mrf.mxu0  ;;  %v1678_v36 = vpop.f32.mrf.mxu1 }
  0xfd   :  { %v1206_v53 = vadd.f32 %v1205_v35, %v1204_v33 }
  0xfe   :  { %v1207_v38 = vpop.f32.mrf.mxu0  ;;  %v1279_v39 = vpop.f32.mrf.mxu1 }
  0xff   :  { %v571_v6 = vadd.f32 %v1206_v53, %v1683_v43 }
 0x100   :  { %v1208_v41 = vpop.f32.mrf.mxu0  ;;  %v1280_v42 = vpop.f32.mrf.mxu1 }
 0x101   :  { %v1209_v0 = vadd.f32 %v1208_v41, %v1207_v38 }
 0x102   :  { %v1210_v47 = vpop.f32.mrf.mxu0  ;;  %v1306_v48 = vpop.f32.mrf.mxu1 }
 0x103   :  { %v715_v49 = vadd.f32 %v1306_v48, %v555_v45  ;;  %v574_v19 = vadd.f32 %v1209_v0, %v1683_v43 }
 0x104   :  { %v1211_v51 = vpop.f32.mrf.mxu0  ;;  %v706_v52 = vpop.f32.mrf.mxu1 }
 0x105   :  { %v834_v54 = vmax.f32 %v715_v49, 0.0  ;;  %v707_v55 = vadd.f32 %v706_v52, %v547_v50  ;;  %v1212_v29 = vadd.f32 %v1211_v51, %v1210_v47 }
 0x106   :  { %v1213_v57 = vpop.f32.mrf.mxu0  ;;  %v1307_v58 = vpop.f32.mrf.mxu1 }
 0x107   :  { %v1141_v61 = vpack.c.bf16 %v834_v54, %v834_v54  ;;  %v832_v62 = vmax.f32 %v707_v55, 0.0  ;;  %v718_v63 = vadd.f32 %v1307_v58, %v558_v56  ;;  %v579_v50 = vadd.f32 %v1212_v29, %v1683_v43 }
 0x108   :  { %v1214_v1 = vpop.f32.mrf.mxu0  ;;  %v709_v2 = vpop.f32.mrf.mxu1 }
 0x109   :  { %991 = vst.msk [vmem:[%s1856_s3 + $0x8] sm:$0xf] %vm988_vm1, %v1141_v61  ;;  %v1139_v3 = vpack.c.bf16 %v832_v62, %v832_v62  ;;  %v835_v4 = vmax.f32 %v718_v63, 0.0  ;;  %v710_v5 = vadd.f32 %v709_v2, %v550_v59  ;;  %v1215_v44 = vadd.f32 %v1214_v1, %v1213_v57 }
 0x10a   :  { %v1216_v9 = vpop.f32.mrf.mxu0  ;;  %v1310_v10 = vpop.f32.mrf.mxu1 }
 0x10b   :  { %989 = vst.msk [vmem:[%s1856_s3] sm:$0xf] %vm988_vm1, %v1139_v3  ;;  %v1142_v11 = vpack.c.bf16 %v835_v4, %v835_v4  ;;  %v833_v13 = vmax.f32 %v710_v5, 0.0  ;;  %v731_v14 = vadd.f32 %v1310_v10, %v571_v6  ;;  %v582_v59 = vadd.f32 %v1215_v44, %v1683_v43 }
 0x10c   :  { %v1217_v16 = vpop.f32.mrf.mxu0  ;;  %v722_v18 = vpop.f32.mrf.mxu1 }
 0x10d   :  { %992 = vst.msk [vmem:[%s1856_s3 + $0xc] sm:$0xf] %vm988_vm1, %v1142_v11  ;;  %v1140_v20 = vpack.c.bf16 %v833_v13, %v833_v13  ;;  %v838_v21 = vmax.f32 %v731_v14, 0.0  ;;  %v1218_v23 = vadd.f32 %v1217_v16, %v1216_v9  ;;  %v723_v24 = vadd.f32 %v722_v18, %v563_v15 }
 0x10e   :  { %v1219_v25 = vpop.f32.mrf.mxu0  ;;  %v1311_v26 = vpop.f32.mrf.mxu1 }
 0x10f   :  { %990 = vst.msk [vmem:[%s1856_s3 + $0x4] sm:$0xf] %vm988_vm1, %v1140_v20  ;;  %v1145_v30 = vpack.c.bf16 %v838_v21, %v838_v21  ;;  %v836_v31 = vmax.f32 %v723_v24, 0.0  ;;  %v734_v33 = vadd.f32 %v1311_v26, %v574_v19  ;;  %v587_v38 = vadd.f32 %v1218_v23, %v1683_v43 }
 0x110   :  { %v1220_v35 = vpop.f32.mrf.mxu0  ;;  %v725_v37 = vpop.f32.mrf.mxu1 }
 0x111   :  { %995 = vst.msk [vmem:[%s1856_s3 + $0x18] sm:$0xf] %vm988_vm1, %v1145_v30  ;;  %v1143_v39 = vpack.c.bf16 %v836_v31, %v836_v31  ;;  %v839_v40 = vmax.f32 %v734_v33, 0.0  ;;  %v1221_v41 = vadd.f32 %v1220_v35, %v1219_v25  ;;  %v726_v42 = vadd.f32 %v725_v37, %v566_v28 }
 0x112   :  { %v1222_v45 = vpop.f32.mrf.mxu0  ;;  %v1314_v46 = vpop.f32.mrf.mxu1 }
 0x113   :  { %993 = vst.msk [vmem:[%s1856_s3 + $0x10] sm:$0xf] %vm988_vm1, %v1143_v39  ;;  %v1146_v47 = vpack.c.bf16 %v839_v40, %v839_v40  ;;  %v837_v48 = vmax.f32 %v726_v42, 0.0  ;;  %v747_v49 = vadd.f32 %v1314_v46, %v587_v38  ;;  %v590_v56 = vadd.f32 %v1221_v41, %v1683_v43 }
 0x114   :  { %v1223_v51 = vpop.f32.mrf.mxu0  ;;  %v738_v52 = vpop.f32.mrf.mxu1 }
 0x115   :  { %996 = vst.msk [vmem:[%s1856_s3 + $0x1c] sm:$0xf] %vm988_vm1, %v1146_v47  ;;  %v1144_v53 = vpack.c.bf16 %v837_v48, %v837_v48  ;;  %v842_v54 = vmax.f32 %v747_v49, 0.0  ;;  %v739_v55 = vadd.f32 %v738_v52, %v579_v50  ;;  %v1224_v61 = vadd.f32 %v1223_v51, %v1222_v45 }
 0x116   :  { %v1225_v57 = vpop.f32.mrf.mxu0  ;;  %v1315_v58 = vpop.f32.mrf.mxu1 }
 0x117   :  { %994 = vst.msk [vmem:[%s1856_s3 + $0x14] sm:$0xf] %vm988_vm1, %v1144_v53  ;;  %v1149_v60 = vpack.c.bf16 %v842_v54, %v842_v54  ;;  %v840_v62 = vmax.f32 %v739_v55, 0.0  ;;  %v750_v63 = vadd.f32 %v1315_v58, %v590_v56  ;;  %v595_v11 = vadd.f32 %v1224_v61, %v1683_v43 }
 0x118   :  { %v1226_v0 = vpop.f32.mrf.mxu0  ;;  %v741_v1 = vpop.f32.mrf.mxu1 }
 0x119   :  { %999 = vst.msk [vmem:[%s1856_s3 + $0x28] sm:$0xf] %vm988_vm1, %v1149_v60  ;;  %v1147_v2 = vpack.c.bf16 %v840_v62, %v840_v62  ;;  %v843_v3 = vmax.f32 %v750_v63, 0.0  ;;  %v742_v4 = vadd.f32 %v741_v1, %v582_v59  ;;  %v1227_v9 = vadd.f32 %v1226_v0, %v1225_v57 }
 0x11a   :  { %v1228_v5 = vpop.f32.mrf.mxu0  ;;  %v1318_v6 = vpop.f32.mrf.mxu1 }
 0x11b   :  { %997 = vst.msk [vmem:[%s1856_s3 + $0x20] sm:$0xf] %vm988_vm1, %v1147_v2  ;;  %v1150_v8 = vpack.c.bf16 %v843_v3, %v843_v3  ;;  %v841_v10 = vmax.f32 %v742_v4, 0.0  ;;  %v598_v24 = vadd.f32 %v1227_v9, %v1683_v43 }
 0x11c   :  { %v1229_v13 = vpop.f32.mrf.mxu0  ;;  %v754_v14 = vpop.f32.mrf.mxu1 }
 0x11d   :  { %1000 = vst.msk [vmem:[%s1856_s3 + $0x2c] sm:$0xf] %vm988_vm1, %v1150_v8  ;;  %v1148_v15 = vpack.c.bf16 %v841_v10, %v841_v10  ;;  %v1230_v16 = vadd.f32 %v1229_v13, %v1228_v5  ;;  %v755_v18 = vadd.f32 %v754_v14, %v595_v11  ;;  %v651_v11 = vadd.f32 %v1668_v17, %v1683_v43 }
 0x11e   :  { %v1231_v19 = vpop.f32.mrf.mxu0  ;;  %v1319_v20 = vpop.f32.mrf.mxu1  ;;  %v654_v17 = vadd.f32 %v1670_v22, %v1683_v43  ;;  %v646_v22 = vadd.f32 %v1666_v12, %v1683_v43 }
 0x11f   :  { %998 = vst.msk [vmem:[%s1856_s3 + $0x24] sm:$0xf] %vm988_vm1, %v1148_v15  ;;  %v603_v21 = vadd.f32 %v1230_v16, %v1683_v43  ;;  %v844_v23 = vmax.f32 %v755_v18, 0.0 }
 0x120   :  { %v1232_v25 = vpop.f32.mrf.mxu0  ;;  %v757_v26 = vpop.f32.mrf.mxu1 }
 0x121   :  { %v763_v28 = vadd.f32 %v1318_v6, %v603_v21  ;;  %v1151_v29 = vpack.c.bf16 %v844_v23, %v844_v23  ;;  %v1233_v30 = vadd.f32 %v1232_v25, %v1231_v19  ;;  %v758_v31 = vadd.f32 %v757_v26, %v598_v24 }
 0x122   :  { %v1234_v33 = vpop.f32.mrf.mxu0  ;;  %v1322_v35 = vpop.f32.mrf.mxu1  ;;  %v1278_v19 = vadd.f32 %v1678_v36, %v1676_v34  ;;  %v643_v21 = vadd.f32 %v1664_v7, %v1683_v43 }
 0x123   :  { %v846_v37 = vmax.f32 %v763_v28, 0.0  ;;  %1001 = vst.msk [vmem:[%s1856_s3 + $0x30] sm:$0xf] %vm988_vm1, %v1151_v29  ;;  %v606_v38 = vadd.f32 %v1233_v30, %v1683_v43  ;;  %v845_v39 = vmax.f32 %v758_v31, 0.0 }
 0x124   :  { %v1235_v40 = vpop.f32.mrf.mxu0  ;;  %v770_v41 = vpop.f32.mrf.mxu1 }
 0x125   :  { %v1153_v42 = vpack.c.bf16 %v846_v37, %v846_v37  ;;  %v766_v44 = vadd.f32 %v1319_v20, %v606_v38  ;;  %v1152_v45 = vpack.c.bf16 %v845_v39, %v845_v39  ;;  %v1236_v46 = vadd.f32 %v1235_v40, %v1234_v33 }
 0x126   :  { %v1237_v47 = vpop.f32.mrf.mxu0  ;;  %v1323_v48 = vpop.f32.mrf.mxu1  ;;  %v667_v39 = vadd.f32 %v1278_v19, %v1683_v43 }
 0x127   :  { %1003 = vst.msk [vmem:[%s1856_s3 + $0x38] sm:$0xf] %vm988_vm1, %v1153_v42  ;;  %v847_v49 = vmax.f32 %v766_v44, 0.0  ;;  %1002 = vst.msk [vmem:[%s1856_s3 + $0x34] sm:$0xf] %vm988_vm1, %v1152_v45  ;;  %v611_v50 = vadd.f32 %v1236_v46, %v1683_v43 }
 0x128   :  { %v1238_v51 = vpop.f32.mrf.mxu0  ;;  %v773_v52 = vpop.f32.mrf.mxu1 }
 0x129   :  { %v1154_v53 = vpack.c.bf16 %v847_v49, %v847_v49  ;;  %v771_v54 = vadd.f32 %v770_v41, %v611_v50  ;;  %v1239_v55 = vadd.f32 %v1238_v51, %v1237_v47 }
 0x12a   :  { %v1240_v56 = vpop.f32.mrf.mxu0  ;;  %v1762_v57 = vpop.f32.mrf.mxu1 }
 0x12b   :  { %1004 = vst.msk [vmem:[%s1856_s3 + $0x3c] sm:$0xf] %vm988_vm1, %v1154_v53  ;;  %v848_v58 = vmax.f32 %v771_v54, 0.0  ;;  %v614_v59 = vadd.f32 %v1239_v55, %v1683_v43  ;;  %v659_v54 = vadd.f32 %v1672_v27, %v1683_v43 }
 0x12c   :  { %v1241_v60 = vpop.f32.mrf.mxu0  ;;  %v786_v61 = vpop.f32.mrf.mxu1 }
 0x12d   :  { %v1155_v62 = vpack.c.bf16 %v848_v58, %v848_v58  ;;  %v774_v63 = vadd.f32 %v773_v52, %v614_v59  ;;  %v1242_v0 = vadd.f32 %v1241_v60, %v1240_v56 }
 0x12e   :  { %v1243_v1 = vpop.f32.mrf.mxu0  ;;  %v1769_v2 = vpop.f32.mrf.mxu1 }
 0x12f   :  { %1005 = vst.msk [vmem:[%s1856_s3 + $0x40] sm:$0xf] %vm988_vm1, %v1155_v62  ;;  %v849_v3 = vmax.f32 %v774_v63, 0.0  ;;  %v619_v4 = vadd.f32 %v1242_v0, %v1683_v43 }
 0x130   :  { %v1244_v5 = vpop.f32.mrf.mxu0  ;;  %v789_v6 = vpop.f32.mrf.mxu1 }
 0x131   :  { %v1156_v8 = vpack.c.bf16 %v849_v3, %v849_v3  ;;  %v779_v9 = vadd.f32 %v1322_v35, %v619_v4  ;;  %v1245_v10 = vadd.f32 %v1244_v5, %v1243_v1  ;;  %v662_v4 = vadd.f32 %v1674_v32, %v1683_v43 }
 0x132   :  { %v1246_v13 = vpop.f32.mrf.mxu0  ;;  %v1330_v14 = vpop.f32.mrf.mxu1 }
 0x133   :  { %1006 = vst.msk [vmem:[%s1856_s3 + $0x44] sm:$0xf] %vm988_vm1, %v1156_v8  ;;  %v850_v15 = vmax.f32 %v779_v9, 0.0  ;;  %v622_v16 = vadd.f32 %v1245_v10, %v1683_v43  ;;  %v811_v18 = vadd.f32 %v1330_v14, %v651_v11 }
 0x134   :  { %v1247_v20 = vpop.f32.mrf.mxu0  ;;  %v802_v23 = vpop.f32.mrf.mxu1 }
 0x135   :  { %v1157_v24 = vpack.c.bf16 %v850_v15, %v850_v15  ;;  %v782_v25 = vadd.f32 %v1323_v48, %v622_v16  ;;  %v858_v26 = vmax.f32 %v811_v18, 0.0  ;;  %v1248_v28 = vadd.f32 %v1247_v20, %v1246_v13 }
 0x136   :  { %v803_v29 = vadd.f32 %v802_v23, %v643_v21  ;;  %v1249_v30 = vpop.f32.mrf.mxu0  ;;  %v1331_v31 = vpop.f32.mrf.mxu1 }
 0x137   :  { %1007 = vst.msk [vmem:[%s1856_s3 + $0x48] sm:$0xf] %vm988_vm1, %v1157_v24  ;;  %v851_v34 = vmax.f32 %v782_v25, 0.0  ;;  %v1165_v36 = vpack.c.bf16 %v858_v26, %v858_v26  ;;  %v627_v7 = vadd.f32 %v1248_v28, %v1683_v43  ;;  %v814_v33 = vadd.f32 %v1331_v31, %v654_v17 }
 0x138   :  { %v856_v35 = vmax.f32 %v803_v29, 0.0  ;;  %v1250_v37 = vpop.f32.mrf.mxu0  ;;  %v805_v38 = vpop.f32.mrf.mxu1 }
 0x139   :  { %v1158_v40 = vpack.c.bf16 %v851_v34, %v851_v34  ;;  %1015 = vst.msk [vmem:[%s1856_s3 + $0x68] sm:$0xf] %vm988_vm1, %v1165_v36  ;;  %v787_v41 = vadd.f32 %v786_v61, %v627_v7  ;;  %v859_v42 = vmax.f32 %v814_v33, 0.0  ;;  %v1251_v44 = vadd.f32 %v1250_v37, %v1249_v30 }
 0x13a   :  { %v1163_v45 = vpack.c.bf16 %v856_v35, %v856_v35  ;;  %v806_v46 = vadd.f32 %v805_v38, %v646_v22  ;;  %v1252_v47 = vpop.f32.mrf.mxu0  ;;  %v1334_v48 = vpop.f32.mrf.mxu1 }
 0x13b   :  { %1008 = vst.msk [vmem:[%s1856_s3 + $0x4c] sm:$0xf] %vm988_vm1, %v1158_v40  ;;  %v852_v12 = vmax.f32 %v787_v41, 0.0  ;;  %v1166_v49 = vpack.c.bf16 %v859_v42, %v859_v42  ;;  %v630_v50 = vadd.f32 %v1251_v44, %v1683_v43  ;;  %v827_v51 = vadd.f32 %v1334_v48, %v667_v39 }
 0x13c   :  { %1013 = vst.msk [vmem:[%s1856_s3 + $0x60] sm:$0xf] %vm988_vm1, %v1163_v45  ;;  %v857_v52 = vmax.f32 %v806_v46, 0.0  ;;  %v1253_v53 = vpop.f32.mrf.mxu0  ;;  %v818_v55 = vpop.f32.mrf.mxu1 }
 0x13d   :  { %v1159_v56 = vpack.c.bf16 %v852_v12, %v852_v12  ;;  %1016 = vst.msk [vmem:[%s1856_s3 + $0x6c] sm:$0xf] %vm988_vm1, %v1166_v49  ;;  %v790_v58 = vadd.f32 %v789_v6, %v630_v50  ;;  %v862_v59 = vmax.f32 %v827_v51, 0.0  ;;  %v1254_v60 = vadd.f32 %v1253_v53, %v1252_v47 }
 0x13e   :  { %v1164_v61 = vpack.c.bf16 %v857_v52, %v857_v52  ;;  %v819_v62 = vadd.f32 %v818_v55, %v659_v54  ;;  %v1255_v63 = vpop.f32.mrf.mxu0  ;;  %v1335_v0 = vpop.f32.mrf.mxu1 }
 0x13f   :  { %1009 = vst.msk [vmem:[%s1856_s3 + $0x50] sm:$0xf] %vm988_vm1, %v1159_v56  ;;  %v853_v27 = vmax.f32 %v790_v58, 0.0  ;;  %v1169_v1 = vpack.c.bf16 %v862_v59, %v862_v59  ;;  %v635_v3 = vadd.f32 %v1254_v60, %v1683_v43 }
 0x140   :  { %1014 = vst.msk [vmem:[%s1856_s3 + $0x64] sm:$0xf] %vm988_vm1, %v1164_v61  ;;  %v860_v5 = vmax.f32 %v819_v62, 0.0  ;;  %v1256_v6 = vpop.f32.mrf.mxu0  ;;  %v821_v8 = vpop.f32.mrf.mxu1 }
 0x141   :  { %v1160_v9 = vpack.c.bf16 %v853_v27, %v853_v27  ;;  %1020 = vst.msk [vmem:[%s1856_s3 + $0x78] sm:$0x1] %vm1019_vm2, %v1169_v1  ;;  %v795_v10 = vadd.f32 %v1762_v57, %v635_v3  ;;  %v1257_v11 = vadd.f32 %v1256_v6, %v1255_v63  ;;  %v822_v13 = vadd.f32 %v821_v8, %v662_v4 }
 0x142   :  { %v1167_v14 = vpack.c.bf16 %v860_v5, %v860_v5 }
 0x143   :  { %1010 = vst.msk [vmem:[%s1856_s3 + $0x54] sm:$0xf] %vm988_vm1, %v1160_v9  ;;  %v854_v32 = vmax.f32 %v795_v10, 0.0  ;;  %v638_v15 = vadd.f32 %v1257_v11, %v1683_v43  ;;  %v861_v16 = vmax.f32 %v822_v13, 0.0 }
 0x144   :  { %1017 = vst.msk [vmem:[%s1856_s3 + $0x70] sm:$0xf] %vm988_vm1, %v1167_v14 }
 0x145   :  { %v1161_v18 = vpack.c.bf16 %v854_v32, %v854_v32  ;;  %v798_v57 = vadd.f32 %v1769_v2, %v638_v15  ;;  %v1168_v19 = vpack.c.bf16 %v861_v16, %v861_v16 }
 0x147   :  { %1011 = vst.msk [vmem:[%s1856_s3 + $0x58] sm:$0xf] %vm988_vm1, %v1161_v18  ;;  %v855_v20 = vmax.f32 %v798_v57, 0.0  ;;  %1018 = vst.msk [vmem:[%s1856_s3 + $0x74] sm:$0xf] %vm988_vm1, %v1168_v19 }
 0x149   :  { %v1162_v43 = vpack.c.bf16 %v855_v20, %v855_v20 }
 0x14b   :  { %1012 = vst.msk [vmem:[%s1856_s3 + $0x5c] sm:$0xf] %vm988_vm1, %v1162_v43 }

// kernel: _forward_impl.8
= control target key start
LH: loop header
LB: loop body
LE: loop exit
PB: predicated region body
PF: predicated region fallthrough
CT: control target
= control target key end

     0   :  { %v647_v1 = vmov 0.0   ;;  %vm648_vm0 = vmmov 0   ;;  %vm254_vm1 = vcmask 261120   ;;  %vm460_vm2 = vcmask 257024   ;;  %s832_s1 = inlined_call_operand.vmem [shape: bf16[288,32], index: 1, kind: input, shape index: {}]   ;;  %s833_s0 = inlined_call_operand.vmem [shape: bf16[72,288], index: 0, kind: input, shape index: {}]   ;;  %s834_s2 = inlined_call_operand.vmem [shape: f32[1,32], index: 2, kind: input, shape index: {}]   ;;  %s835_s3 = inlined_call_operand.vmem [shape: bf16[72,32], index: 3, kind: output, shape index: {}]  }
   0x1   :  { %v610_v0 = vld [vmem:[%s832_s1 + $0x78] sm:$0xff]   ;;  %584 = vmatprep.subr.bf16.mxu1 %v647_v1  ;;  %588 = vmatprep.mubr.msk.bf16.mxu1 %vm648_vm0, %v647_v1  ;;  %v612_v3 = vld [vmem:[%s832_s1 + $0x70] sm:$0xff]   ;;  %v614_v5 = vld [vmem:[%s832_s1 + $0x68] sm:$0xff]  }
   0x2   :  { %v611_v2 = vld [vmem:[%s832_s1 + $0x38] sm:$0xff]   ;;  %531 = vmatprep.subr.bf16.mxu0 %v610_v0  ;;  %v613_v4 = vld [vmem:[%s832_s1 + $0x30] sm:$0xff]   ;;  %v615_v6 = vld [vmem:[%s832_s1 + $0x28] sm:$0xff]  }
   0x3   :  { %532 = vmatpush3.bf16.msra.mxu0 %v611_v2  ;;  %v616_v7 = vld [vmem:[%s832_s1 + $0x60] sm:$0xff]   ;;  %v618_v9 = vld [vmem:[%s832_s1 + $0x58] sm:$0xff]   ;;  %v624_v10 = vld [vmem:[%s832_s1 + $0x88] sm:$0xff]  }
   0x4   :  { %533 = vmatprep.subr.bf16.mxu0 %v612_v3  ;;  %v617_v8 = vld [vmem:[%s832_s1 + $0x20] sm:$0xff]   ;;  %v619_v11 = vld [vmem:[%s832_s1 + $0x18] sm:$0xff]   ;;  %v620_v12 = vld [vmem:[%s832_s1 + $0x50] sm:$0xff]   ;;  %585 = vmatpush3.bf16.msra.mxu1 %v624_v10 }
   0x5   :  { %v621_v13 = vld [vmem:[%s832_s1 + $0x10] sm:$0xff]   ;;  %586 = vmatprep.subr.bf16.mxu1 %v647_v1  ;;  %v627_v14 = vld [vmem:[%s832_s1 + $0x80] sm:$0xff]   ;;  %v622_v15 = vld [vmem:[%s832_s1 + $0x48] sm:$0xff]  }
   0x6   :  { %v630_v16 = vld [vmem:[%s833_s0 + $0x4] ss:$12 sps:$4 sm:$0xff]   ;;  %v631_v17 = vld [vmem:[%s833_s0 + $0x8] ss:$12 sps:$4 sm:$0xff]   ;;  %v635_v21 = vld [vmem:[%s833_s0 + $0x20] ss:$12 sps:$4 sm:$0xff]  }
   0x7   :  { %534 = vmatpush3.bf16.msra.mxu0 %v613_v4  ;;  %302 = vmatprep.mubr.bf16.mxu0 %v630_v16  ;;  %v623_v18 = vld [vmem:[%s832_s1 + $0x8] sm:$0xff]   ;;  %v625_v19 = vld [vmem:[%s832_s1 + $0x40] sm:$0xff]   ;;  %v643_v27 = vld [vmem:[%s833_s0 + $0x50] ss:$12 sps:$4 sm:$0xff]  }
   0x8   :  { %535 = vmatprep.subr.bf16.mxu0 %v614_v5  ;;  %587 = vmatpush3.bf16.msra.mxu1 %v627_v14  ;;  %v626_v20 = vld [vmem:[%s832_s1] sm:$0xff]   ;;  %v632_v23 = vld [vmem:[%s833_s0 + $0x1c] ss:$12 sps:$4 sm:$0xff]   ;;  %v640_v29 = vld [vmem:[%s833_s0 + $0x4c] ss:$12 sps:$4 sm:$0xff]  }
   0x9   :  { %v628_v22 = vld [vmem:[%s833_s0] ss:$12 sps:$4 sm:$0xff]   ;;  %v639_v24 = vld [vmem:[%s833_s0 + $0x38] ss:$12 sps:$4 sm:$0xff]   ;;  %v638_v28 = vld [vmem:[%s833_s0 + $0x30] ss:$12 sps:$4 sm:$0xff]  }
   0xa   :  { %v634_v25 = vld [vmem:[%s833_s0 + $0x18] ss:$12 sps:$4 sm:$0xff]   ;;  %v636_v26 = vld [vmem:[%s833_s0 + $0x34] ss:$12 sps:$4 sm:$0xff]   ;;  %v646_v30 = vld [vmem:[%s833_s0 + $0x68] ss:$0 sps:$4 sm:$0xff]  }
   0xb   :  { %536 = vmatpush3.bf16.msra.mxu0 %v615_v6  ;;  %589 = vmatmul.mubr.msk.bf16.vlgmr.msra.gmra.mxu1 %vm254_vm1, %v631_v17  ;;  %v31_v31 = vld [vmem:[%s833_s0 + $0x60] sm:$0xff]  ;;  %v642_v32 = vld [vmem:[%s833_s0 + $0x48] ss:$12 sps:$4 sm:$0xff]  }
   0xc   :  { %537 = vmatprep.subr.bf16.mxu0 %v616_v7  ;;  %592 = vmatprep.mubr.msk.bf16.mxu1 %vm648_vm0, %v647_v1  ;;  %v488_v33 = vcombine.high %v31_v31, %v31_v31  ;;  %v487_v34 = vcombine.low %v31_v31, %v31_v31  ;;  %v785_v43 = vld [vmem:[%s834_s2] ss:$0 sm:$0xff] }
   0xf   :  { %538 = vmatpush3.bf16.msra.mxu0 %v617_v8 }
  0x10   :  { %539 = vmatprep.subr.bf16.mxu0 %v618_v9 }
  0x13   :  { %540 = vmatpush3.bf16.msra.mxu0 %v619_v11  ;;  %593 = vmatmul.mubr.msk.bf16.gmra.mxu1 %vm254_vm1, %v635_v21 }
  0x14   :  { %541 = vmatprep.subr.bf16.mxu0 %v620_v12  ;;  %596 = vmatprep.mubr.msk.bf16.mxu1 %vm648_vm0, %v647_v1 }
  0x17   :  { %542 = vmatpush3.bf16.msra.mxu0 %v621_v13 }
  0x18   :  { %543 = vmatprep.subr.bf16.mxu0 %v622_v15 }
  0x1b   :  { %544 = vmatpush3.bf16.msra.mxu0 %v623_v18  ;;  %597 = vmatmul.mubr.msk.bf16.gmra.mxu1 %vm254_vm1, %v639_v24 }
  0x1c   :  { %545 = vmatprep.subr.bf16.mxu0 %v625_v19  ;;  %600 = vmatprep.mubr.msk.bf16.mxu1 %vm648_vm0, %v647_v1 }
  0x1f   :  { %546 = vmatpush3.bf16.msra.mxu0 %v626_v20 }
  0x22   :  { %303 = vmatmul.mubr.bf16.vlgmr.msra.gmra.mxu0 %v628_v22 }
  0x23   :  { %310 = vmatprep.mubr.bf16.mxu0 %v632_v23  ;;  %601 = vmatmul.mubr.msk.bf16.gmra.mxu1 %vm254_vm1, %v643_v27 }
  0x24   :  { %604 = vmatprep.mubr.msk.bf16.mxu1 %vm648_vm0, %v647_v1 }
  0x2a   :  { %311 = vmatmul.mubr.bf16.gmra.mxu0 %v634_v25 }
  0x2b   :  { %318 = vmatprep.mubr.bf16.mxu0 %v636_v26  ;;  %605 = vmatmul.mubr.msk.bf16.gmra.mxu1 %vm254_vm1, %v646_v30 }
  0x32   :  { %319 = vmatmul.mubr.bf16.gmra.mxu0 %v638_v28 }
  0x33   :  { %326 = vmatprep.mubr.bf16.mxu0 %v640_v29 }
  0x3a   :  { %327 = vmatmul.mubr.bf16.gmra.mxu0 %v642_v32 }
  0x3b   :  { %334 = vmatprep.mubr.bf16.mxu0 %v488_v33 }
  0x42   :  { %335 = vmatmul.mubr.bf16.gmra.mxu0 %v487_v34 }
  0xcb   :  { %v376_v35 = vpop.f32.mrf.mxu1 }
  0xcd   :  { %v590_v36 = vpop.f32.mrf.mxu1 }
  0xcf   :  { %v379_v37 = vpop.f32.mrf.mxu1 }
  0xd1   :  { %v591_v38 = vpop.f32.mrf.mxu1 }
  0xd3   :  { %v384_v39 = vpop.f32.mrf.mxu1 }
  0xd5   :  { %v594_v40 = vpop.f32.mrf.mxu1 }
  0xd7   :  { %v387_v42 = vpop.f32.mrf.mxu1 }
  0xd9   :  { %v595_v46 = vpop.f32.mrf.mxu1 }
  0xdb   :  { %v392_v49 = vpop.f32.mrf.mxu1 }
  0xdd   :  { %v598_v53 = vpop.f32.mrf.mxu1 }
  0xdf   :  { %v395_v57 = vpop.f32.mrf.mxu1 }
  0xe1   :  { %v599_v62 = vpop.f32.mrf.mxu1 }
  0xe2   :  { %v547_v41 = vpop.f32.mrf.mxu0 }
  0xe3   :  { %v400_v2 = vpop.f32.mrf.mxu1 }
  0xe4   :  { %v548_v44 = vpop.f32.mrf.mxu0 }
  0xe5   :  { %v549_v45 = vadd.f32 %v548_v44, %v547_v41  ;;  %v602_v7 = vpop.f32.mrf.mxu1 }
  0xe6   :  { %v550_v47 = vpop.f32.mrf.mxu0 }
  0xe7   :  { %v305_v48 = vadd.f32 %v549_v45, %v785_v43  ;;  %v403_v11 = vpop.f32.mrf.mxu1 }
  0xe8   :  { %v551_v50 = vpop.f32.mrf.mxu0 }
  0xe9   :  { %v377_v51 = vadd.f32 %v376_v35, %v305_v48  ;;  %v552_v52 = vadd.f32 %v551_v50, %v550_v47  ;;  %v603_v16 = vpop.f32.mrf.mxu1 }
  0xea   :  { %v553_v54 = vpop.f32.mrf.mxu0 }
  0xeb   :  { %v414_v55 = vmax.f32 %v377_v51, 0.0  ;;  %v308_v56 = vadd.f32 %v552_v52, %v785_v43  ;;  %v408_v20 = vpop.f32.mrf.mxu1 }
  0xec   :  { %v554_v58 = vpop.f32.mrf.mxu0 }
  0xed   :  { %v522_v59 = vpack.c.bf16 %v414_v55, %v414_v55  ;;  %v380_v60 = vadd.f32 %v379_v37, %v308_v56  ;;  %v555_v61 = vadd.f32 %v554_v58, %v553_v54  ;;  %v606_v25 = vpop.f32.mrf.mxu1 }
  0xee   :  { %v556_v63 = vpop.f32.mrf.mxu0 }
  0xef   :  { %461 = vst.msk [vmem:[%s835_s3] sm:$0xf] %vm460_vm2, %v522_v59  ;;  %v415_v0 = vmax.f32 %v380_v60, 0.0  ;;  %v313_v1 = vadd.f32 %v555_v61, %v785_v43  ;;  %v411_v29 = vpop.f32.mrf.mxu1 }
  0xf0   :  { %v557_v3 = vpop.f32.mrf.mxu0 }
  0xf1   :  { %v523_v4 = vpack.c.bf16 %v415_v0, %v415_v0  ;;  %v385_v5 = vadd.f32 %v384_v39, %v313_v1  ;;  %v558_v6 = vadd.f32 %v557_v3, %v556_v63  ;;  %v607_v34 = vpop.f32.mrf.mxu1 }
  0xf2   :  { %v559_v8 = vpop.f32.mrf.mxu0 }
  0xf3   :  { %462 = vst.msk [vmem:[%s835_s3 + $0x4] sm:$0xf] %vm460_vm2, %v523_v4  ;;  %v416_v9 = vmax.f32 %v385_v5, 0.0  ;;  %v316_v10 = vadd.f32 %v558_v6, %v785_v43 }
  0xf4   :  { %v560_v12 = vpop.f32.mrf.mxu0 }
  0xf5   :  { %v524_v13 = vpack.c.bf16 %v416_v9, %v416_v9  ;;  %v388_v14 = vadd.f32 %v387_v42, %v316_v10  ;;  %v561_v15 = vadd.f32 %v560_v12, %v559_v8 }
  0xf6   :  { %v562_v17 = vpop.f32.mrf.mxu0 }
  0xf7   :  { %463 = vst.msk [vmem:[%s835_s3 + $0x8] sm:$0xf] %vm460_vm2, %v524_v13  ;;  %v417_v18 = vmax.f32 %v388_v14, 0.0  ;;  %v321_v19 = vadd.f32 %v561_v15, %v785_v43 }
  0xf8   :  { %v563_v21 = vpop.f32.mrf.mxu0 }
  0xf9   :  { %v525_v22 = vpack.c.bf16 %v417_v18, %v417_v18  ;;  %v393_v23 = vadd.f32 %v392_v49, %v321_v19  ;;  %v564_v24 = vadd.f32 %v563_v21, %v562_v17 }
  0xfa   :  { %v565_v26 = vpop.f32.mrf.mxu0 }
  0xfb   :  { %464 = vst.msk [vmem:[%s835_s3 + $0xc] sm:$0xf] %vm460_vm2, %v525_v22  ;;  %v418_v27 = vmax.f32 %v393_v23, 0.0  ;;  %v324_v28 = vadd.f32 %v564_v24, %v785_v43 }
  0xfc   :  { %v566_v30 = vpop.f32.mrf.mxu0 }
  0xfd   :  { %v526_v31 = vpack.c.bf16 %v418_v27, %v418_v27  ;;  %v396_v32 = vadd.f32 %v395_v57, %v324_v28  ;;  %v567_v33 = vadd.f32 %v566_v30, %v565_v26 }
  0xfe   :  { %v568_v35 = vpop.f32.mrf.mxu0 }
  0xff   :  { %465 = vst.msk [vmem:[%s835_s3 + $0x10] sm:$0xf] %vm460_vm2, %v526_v31  ;;  %v419_v36 = vmax.f32 %v396_v32, 0.0  ;;  %v329_v37 = vadd.f32 %v567_v33, %v785_v43 }
 0x100   :  { %v569_v38 = vpop.f32.mrf.mxu0 }
 0x101   :  { %v527_v39 = vpack.c.bf16 %v419_v36, %v419_v36  ;;  %v401_v40 = vadd.f32 %v400_v2, %v329_v37  ;;  %v570_v41 = vadd.f32 %v569_v38, %v568_v35 }
 0x102   :  { %v571_v42 = vpop.f32.mrf.mxu0 }
 0x103   :  { %466 = vst.msk [vmem:[%s835_s3 + $0x14] sm:$0xf] %vm460_vm2, %v527_v39  ;;  %v420_v44 = vmax.f32 %v401_v40, 0.0  ;;  %v332_v45 = vadd.f32 %v570_v41, %v785_v43 }
 0x104   :  { %v572_v46 = vpop.f32.mrf.mxu0 }
 0x105   :  { %v528_v47 = vpack.c.bf16 %v420_v44, %v420_v44  ;;  %v404_v48 = vadd.f32 %v403_v11, %v332_v45  ;;  %v573_v49 = vadd.f32 %v572_v46, %v571_v42 }
 0x106   :  { %v574_v50 = vpop.f32.mrf.mxu0 }
 0x107   :  { %467 = vst.msk [vmem:[%s835_s3 + $0x18] sm:$0xf] %vm460_vm2, %v528_v47  ;;  %v421_v51 = vmax.f32 %v404_v48, 0.0  ;;  %v337_v52 = vadd.f32 %v573_v49, %v785_v43 }
 0x108   :  { %v575_v53 = vpop.f32.mrf.mxu0 }
 0x109   :  { %v529_v54 = vpack.c.bf16 %v421_v51, %v421_v51  ;;  %v409_v55 = vadd.f32 %v408_v20, %v337_v52 }
 0x10b   :  { %468 = vst.msk [vmem:[%s835_s3 + $0x1c] sm:$0xf] %vm460_vm2, %v529_v54  ;;  %v422_v56 = vmax.f32 %v409_v55, 0.0 }
 0x10d   :  { %v530_v57 = vpack.c.bf16 %v422_v56, %v422_v56 }
 0x10f   :  { %469 = vst.msk [vmem:[%s835_s3 + $0x20] sm:$0xf] %vm460_vm2, %v530_v57 }

// kernel: _forward_impl.9
= control target key start
LH: loop header
LB: loop body
LE: loop exit
PB: predicated region body
PF: predicated region fallthrough
CT: control target
= control target key end

     0   :  { %vm2614_vm0 = vcmask 48128   ;;  %s4553_s1 = inlined_call_operand.vmem [shape: bf16[1152,512], index: 1, kind: input, shape index: {}]   ;;  %s4554_s0 = inlined_call_operand.vmem [shape: bf16[16,1152], index: 0, kind: input, shape index: {}]   ;;  %s4555_s3 = inlined_call_operand.vmem [shape: bf16[512,6], index: 3, kind: input, shape index: {}]   ;;  %s4556_s2 = inlined_call_operand.vmem [shape: f32[1,512], index: 2, kind: input, shape index: {}]   ;;  %s4557_s4 = inlined_call_operand.vmem [shape: f32[1,6], index: 4, kind: input, shape index: {}]   ;;  %s4558_s5 = inlined_call_operand.vmem [shape: f32[16,6], index: 5, kind: output, shape index: {}]  }
   0x1   :  { %v2996_v0 = vld [vmem:[%s4553_s1 + $0xe4] ss:$16 sps:$4 sm:$0xff]   ;;  %v3000_v2 = vld [vmem:[%s4553_s1 + $0xe0] ss:$16 sps:$4 sm:$0xff]  }
   0x2   :  { %v2998_v1 = vld [vmem:[%s4553_s1 + $0x2e4] ss:$16 sps:$4 sm:$0xff]   ;;  %1827 = vmatprep.subr.bf16.mxu0 %v2996_v0  ;;  %v3001_v3 = vld [vmem:[%s4553_s1 + $0x2e0] ss:$16 sps:$4 sm:$0xff]  }
   0x3   :  { %1870 = vmatprep.subr.bf16.mxu1 %v2998_v1  ;;  %v3002_v4 = vld [vmem:[%s4553_s1 + $0xc4] ss:$16 sps:$4 sm:$0xff]   ;;  %1828 = vmatpush1.bf16.msra.mxu0 %v3000_v2  ;;  %v3006_v6 = vld [vmem:[%s4553_s1 + $0xc0] ss:$16 sps:$4 sm:$0xff]  }
   0x4   :  { %1871 = vmatpush1.bf16.msra.mxu1 %v3001_v3  ;;  %v3004_v5 = vld [vmem:[%s4553_s1 + $0x2c4] ss:$16 sps:$4 sm:$0xff]   ;;  %1829 = vmatprep.subr.bf16.mxu0 %v3002_v4  ;;  %v3007_v7 = vld [vmem:[%s4553_s1 + $0x2c0] ss:$16 sps:$4 sm:$0xff]  }
   0x5   :  { %1872 = vmatprep.subr.bf16.mxu1 %v3004_v5  ;;  %v3008_v8 = vld [vmem:[%s4553_s1 + $0xa4] ss:$16 sps:$4 sm:$0xff]   ;;  %v3012_v10 = vld [vmem:[%s4553_s1 + $0xa0] ss:$16 sps:$4 sm:$0xff]   ;;  %v3095_v5 = vld [vmem:[%s4554_s0 + $0x8] ss:$36 sps:$4 sm:$0xff]  }
   0x6   :  { %v3010_v9 = vld [vmem:[%s4553_s1 + $0x2a4] ss:$16 sps:$4 sm:$0xff]   ;;  %v3013_v11 = vld [vmem:[%s4553_s1 + $0x2a0] ss:$16 sps:$4 sm:$0xff]  }
   0x7   :  { %1830 = vmatpush1.bf16.msra.mxu0 %v3006_v6  ;;  %v3014_v12 = vld [vmem:[%s4553_s1 + $0x84] ss:$16 sps:$4 sm:$0xff]   ;;  %v3018_v14 = vld [vmem:[%s4553_s1 + $0x80] ss:$16 sps:$4 sm:$0xff]  }
   0x8   :  { %1873 = vmatpush1.bf16.msra.mxu1 %v3007_v7  ;;  %1831 = vmatprep.subr.bf16.mxu0 %v3008_v8  ;;  %v3016_v13 = vld [vmem:[%s4553_s1 + $0x284] ss:$16 sps:$4 sm:$0xff]   ;;  %v3019_v15 = vld [vmem:[%s4553_s1 + $0x280] ss:$16 sps:$4 sm:$0xff]  }
   0x9   :  { %1874 = vmatprep.subr.bf16.mxu1 %v3010_v9  ;;  %v3020_v16 = vld [vmem:[%s4553_s1 + $0x64] ss:$16 sps:$4 sm:$0xff]   ;;  %v3024_v18 = vld [vmem:[%s4553_s1 + $0x60] ss:$16 sps:$4 sm:$0xff]  }
   0xa   :  { %v3022_v17 = vld [vmem:[%s4553_s1 + $0x264] ss:$16 sps:$4 sm:$0xff]   ;;  %v3025_v19 = vld [vmem:[%s4553_s1 + $0x260] ss:$16 sps:$4 sm:$0xff]  }
   0xb   :  { %1832 = vmatpush1.bf16.msra.mxu0 %v3012_v10  ;;  %v3026_v20 = vld [vmem:[%s4553_s1 + $0x44] ss:$16 sps:$4 sm:$0xff]   ;;  %v3030_v22 = vld [vmem:[%s4553_s1 + $0x40] ss:$16 sps:$4 sm:$0xff]  }
   0xc   :  { %1875 = vmatpush1.bf16.msra.mxu1 %v3013_v11  ;;  %1833 = vmatprep.subr.bf16.mxu0 %v3014_v12  ;;  %v3028_v21 = vld [vmem:[%s4553_s1 + $0x244] ss:$16 sps:$4 sm:$0xff]   ;;  %v3031_v23 = vld [vmem:[%s4553_s1 + $0x240] ss:$16 sps:$4 sm:$0xff]  }
   0xd   :  { %1876 = vmatprep.subr.bf16.mxu1 %v3016_v13  ;;  %v3032_v24 = vld [vmem:[%s4553_s1 + $0x24] ss:$16 sps:$4 sm:$0xff]   ;;  %v3036_v26 = vld [vmem:[%s4553_s1 + $0x20] ss:$16 sps:$4 sm:$0xff]  }
   0xe   :  { %v3034_v25 = vld [vmem:[%s4553_s1 + $0x224] ss:$16 sps:$4 sm:$0xff]   ;;  %v3037_v27 = vld [vmem:[%s4553_s1 + $0x220] ss:$16 sps:$4 sm:$0xff]  }
   0xf   :  { %1834 = vmatpush1.bf16.msra.mxu0 %v3018_v14  ;;  %v3038_v28 = vld [vmem:[%s4553_s1 + $0x4] ss:$16 sps:$4 sm:$0xff]   ;;  %v3042_v30 = vld [vmem:[%s4553_s1] ss:$16 sps:$4 sm:$0xff]  }
  0x10   :  { %1877 = vmatpush1.bf16.msra.mxu1 %v3019_v15  ;;  %1835 = vmatprep.subr.bf16.mxu0 %v3020_v16  ;;  %v3040_v29 = vld [vmem:[%s4553_s1 + $0x204] ss:$16 sps:$4 sm:$0xff]   ;;  %v3043_v31 = vld [vmem:[%s4553_s1 + $0x200] ss:$16 sps:$4 sm:$0xff]  }
  0x11   :  { %1878 = vmatprep.subr.bf16.mxu1 %v3022_v17  ;;  %v3044_v32 = vld [vmem:[%s4553_s1 + $0x1e4] ss:$16 sps:$4 sm:$0xff]   ;;  %v3048_v34 = vld [vmem:[%s4553_s1 + $0x1e0] ss:$16 sps:$4 sm:$0xff]  }
  0x12   :  { %v3046_v33 = vld [vmem:[%s4553_s1 + $0x3e4] ss:$16 sps:$4 sm:$0xff]   ;;  %v3049_v35 = vld [vmem:[%s4553_s1 + $0x3e0] ss:$16 sps:$4 sm:$0xff]  }
  0x13   :  { %1836 = vmatpush1.bf16.msra.mxu0 %v3024_v18  ;;  %v3050_v36 = vld [vmem:[%s4553_s1 + $0x1c4] ss:$16 sps:$4 sm:$0xff]   ;;  %v3054_v38 = vld [vmem:[%s4553_s1 + $0x1c0] ss:$16 sps:$4 sm:$0xff]  }
  0x14   :  { %1879 = vmatpush1.bf16.msra.mxu1 %v3025_v19  ;;  %1837 = vmatprep.subr.bf16.mxu0 %v3026_v20  ;;  %v3052_v37 = vld [vmem:[%s4553_s1 + $0x3c4] ss:$16 sps:$4 sm:$0xff]   ;;  %v3055_v39 = vld [vmem:[%s4553_s1 + $0x3c0] ss:$16 sps:$4 sm:$0xff]  }
  0x15   :  { %1880 = vmatprep.subr.bf16.mxu1 %v3028_v21  ;;  %v3056_v40 = vld [vmem:[%s4553_s1 + $0x1a4] ss:$16 sps:$4 sm:$0xff]   ;;  %v3060_v42 = vld [vmem:[%s4553_s1 + $0x1a0] ss:$16 sps:$4 sm:$0xff]  }
  0x16   :  { %v3058_v41 = vld [vmem:[%s4553_s1 + $0x3a4] ss:$16 sps:$4 sm:$0xff]   ;;  %v3061_v43 = vld [vmem:[%s4553_s1 + $0x3a0] ss:$16 sps:$4 sm:$0xff]  }
  0x17   :  { %1838 = vmatpush1.bf16.msra.mxu0 %v3030_v22  ;;  %v3062_v44 = vld [vmem:[%s4553_s1 + $0x184] ss:$16 sps:$4 sm:$0xff]   ;;  %v3066_v46 = vld [vmem:[%s4553_s1 + $0x180] ss:$16 sps:$4 sm:$0xff]  }
  0x18   :  { %1881 = vmatpush1.bf16.msra.mxu1 %v3031_v23  ;;  %1839 = vmatprep.subr.bf16.mxu0 %v3032_v24  ;;  %v3064_v45 = vld [vmem:[%s4553_s1 + $0x384] ss:$16 sps:$4 sm:$0xff]   ;;  %v3067_v47 = vld [vmem:[%s4553_s1 + $0x380] ss:$16 sps:$4 sm:$0xff]  }
  0x19   :  { %1882 = vmatprep.subr.bf16.mxu1 %v3034_v25  ;;  %v3068_v48 = vld [vmem:[%s4553_s1 + $0x164] ss:$16 sps:$4 sm:$0xff]   ;;  %v3664_v51 = vld [vmem:[%s4554_s0 + $0xc] ss:$36 sps:$4 sm:$0xff]  }
  0x1a   :  { %v3656_v49 = vld [vmem:[%s4554_s0 + $0x4] ss:$36 sps:$4 sm:$0xff]   ;;  %v3072_v52 = vld [vmem:[%s4553_s1 + $0x160] ss:$16 sps:$4 sm:$0xff]   ;;  %1902 = vmatprep.mubr.bf16.mxu1 %v3664_v51 }
  0x1b   :  { %1840 = vmatpush1.bf16.msra.mxu0 %v3036_v26  ;;  %v3070_v50 = vld [vmem:[%s4553_s1 + $0x364] ss:$16 sps:$4 sm:$0xff]   ;;  %1859 = vmatprep.mubr.bf16.mxu0 %v3656_v49  ;;  %v3073_v53 = vld [vmem:[%s4553_s1 + $0x360] ss:$16 sps:$4 sm:$0xff]  }
  0x1c   :  { %1883 = vmatpush1.bf16.msra.mxu1 %v3037_v27  ;;  %1841 = vmatprep.subr.bf16.mxu0 %v3038_v28  ;;  %v3074_v54 = vld [vmem:[%s4553_s1 + $0x144] ss:$16 sps:$4 sm:$0xff]   ;;  %v3078_v56 = vld [vmem:[%s4553_s1 + $0x140] ss:$16 sps:$4 sm:$0xff]  }
  0x1d   :  { %1884 = vmatprep.subr.bf16.mxu1 %v3040_v29  ;;  %v3076_v55 = vld [vmem:[%s4553_s1 + $0x344] ss:$16 sps:$4 sm:$0xff]   ;;  %v3079_v57 = vld [vmem:[%s4553_s1 + $0x340] ss:$16 sps:$4 sm:$0xff]  }
  0x1e   :  { %v3080_v58 = vld [vmem:[%s4553_s1 + $0x124] ss:$16 sps:$4 sm:$0xff]   ;;  %v3084_v60 = vld [vmem:[%s4553_s1 + $0x120] ss:$16 sps:$4 sm:$0xff]  }
  0x1f   :  { %1842 = vmatpush1.bf16.msra.mxu0 %v3042_v30  ;;  %v3082_v59 = vld [vmem:[%s4553_s1 + $0x324] ss:$16 sps:$4 sm:$0xff]   ;;  %v3085_v61 = vld [vmem:[%s4553_s1 + $0x320] ss:$16 sps:$4 sm:$0xff]  }
  0x20   :  { %1885 = vmatpush1.bf16.msra.mxu1 %v3043_v31  ;;  %1843 = vmatprep.subr.bf16.mxu0 %v3044_v32  ;;  %v3086_v62 = vld [vmem:[%s4553_s1 + $0x104] ss:$16 sps:$4 sm:$0xff]   ;;  %v3090_v0 = vld [vmem:[%s4553_s1 + $0x100] ss:$16 sps:$4 sm:$0xff]  }
  0x21   :  { %1886 = vmatprep.subr.bf16.mxu1 %v3046_v33  ;;  %v3088_v63 = vld [vmem:[%s4553_s1 + $0x304] ss:$16 sps:$4 sm:$0xff]   ;;  %v3091_v1 = vld [vmem:[%s4553_s1 + $0x300] ss:$16 sps:$4 sm:$0xff]  }
  0x22   :  { %v3100_v2 = vld [vmem:[%s4553_s1 + $0x4e4] ss:$16 sps:$4 sm:$0xff]   ;;  %v3098_v6 = vld [vmem:[%s4553_s1 + $0x4e0] ss:$16 sps:$4 sm:$0xff]  }
  0x23   :  { %1844 = vmatpush2.bf16.msra.mxu0 %v3048_v34  ;;  %v3103_v3 = vld [vmem:[%s4553_s1 + $0x6e4] ss:$16 sps:$4 sm:$0xff]   ;;  %v3101_v7 = vld [vmem:[%s4553_s1 + $0x6e0] ss:$16 sps:$4 sm:$0xff]  }
  0x24   :  { %1887 = vmatpush2.bf16.msra.mxu1 %v3049_v35  ;;  %1845 = vmatprep.subr.bf16.mxu0 %v3050_v36  ;;  %v3719_v4 = vld [vmem:[%s4554_s0] ss:$36 sps:$4 sm:$0xff]   ;;  %v3812_v34 = vld [vmem:[%s4554_s0 + $0x14] ss:$36 sps:$4 sm:$0xff]  }
  0x25   :  { %1888 = vmatprep.subr.bf16.mxu1 %v3052_v37  ;;  %v3106_v8 = vld [vmem:[%s4553_s1 + $0x4c4] ss:$16 sps:$4 sm:$0xff]   ;;  %v3104_v10 = vld [vmem:[%s4553_s1 + $0x4c0] ss:$16 sps:$4 sm:$0xff]  }
  0x26   :  { %v3109_v9 = vld [vmem:[%s4553_s1 + $0x6c4] ss:$16 sps:$4 sm:$0xff]   ;;  %v3107_v11 = vld [vmem:[%s4553_s1 + $0x6c0] ss:$16 sps:$4 sm:$0xff]  }
  0x27   :  { %1846 = vmatpush2.bf16.msra.mxu0 %v3054_v38  ;;  %v3112_v12 = vld [vmem:[%s4553_s1 + $0x4a4] ss:$16 sps:$4 sm:$0xff]   ;;  %v3110_v14 = vld [vmem:[%s4553_s1 + $0x4a0] ss:$16 sps:$4 sm:$0xff]  }
  0x28   :  { %1889 = vmatpush2.bf16.msra.mxu1 %v3055_v39  ;;  %1847 = vmatprep.subr.bf16.mxu0 %v3056_v40  ;;  %v3115_v13 = vld [vmem:[%s4553_s1 + $0x6a4] ss:$16 sps:$4 sm:$0xff]   ;;  %v3113_v15 = vld [vmem:[%s4553_s1 + $0x6a0] ss:$16 sps:$4 sm:$0xff]  }
  0x29   :  { %1890 = vmatprep.subr.bf16.mxu1 %v3058_v41  ;;  %v3118_v16 = vld [vmem:[%s4553_s1 + $0x484] ss:$16 sps:$4 sm:$0xff]   ;;  %v3116_v18 = vld [vmem:[%s4553_s1 + $0x480] ss:$16 sps:$4 sm:$0xff]  }
  0x2a   :  { %v3121_v17 = vld [vmem:[%s4553_s1 + $0x684] ss:$16 sps:$4 sm:$0xff]   ;;  %v3119_v19 = vld [vmem:[%s4553_s1 + $0x680] ss:$16 sps:$4 sm:$0xff]  }
  0x2b   :  { %1848 = vmatpush2.bf16.msra.mxu0 %v3060_v42  ;;  %v3124_v20 = vld [vmem:[%s4553_s1 + $0x464] ss:$16 sps:$4 sm:$0xff]   ;;  %v3122_v22 = vld [vmem:[%s4553_s1 + $0x460] ss:$16 sps:$4 sm:$0xff]  }
  0x2c   :  { %1891 = vmatpush2.bf16.msra.mxu1 %v3061_v43  ;;  %1849 = vmatprep.subr.bf16.mxu0 %v3062_v44  ;;  %v3127_v21 = vld [vmem:[%s4553_s1 + $0x664] ss:$16 sps:$4 sm:$0xff]   ;;  %v3125_v23 = vld [vmem:[%s4553_s1 + $0x660] ss:$16 sps:$4 sm:$0xff]  }
  0x2d   :  { %1892 = vmatprep.subr.bf16.mxu1 %v3064_v45  ;;  %v3130_v24 = vld [vmem:[%s4553_s1 + $0x444] ss:$16 sps:$4 sm:$0xff]   ;;  %v3128_v26 = vld [vmem:[%s4553_s1 + $0x440] ss:$16 sps:$4 sm:$0xff]  }
  0x2e   :  { %v3133_v25 = vld [vmem:[%s4553_s1 + $0x644] ss:$16 sps:$4 sm:$0xff]   ;;  %v3131_v27 = vld [vmem:[%s4553_s1 + $0x640] ss:$16 sps:$4 sm:$0xff]  }
  0x2f   :  { %1850 = vmatpush2.bf16.msra.mxu0 %v3066_v46  ;;  %v3136_v28 = vld [vmem:[%s4553_s1 + $0x424] ss:$16 sps:$4 sm:$0xff]   ;;  %v3134_v30 = vld [vmem:[%s4553_s1 + $0x420] ss:$16 sps:$4 sm:$0xff]  }
  0x30   :  { %1893 = vmatpush2.bf16.msra.mxu1 %v3067_v47  ;;  %1851 = vmatprep.subr.bf16.mxu0 %v3068_v48  ;;  %v3139_v29 = vld [vmem:[%s4553_s1 + $0x624] ss:$16 sps:$4 sm:$0xff]   ;;  %v3137_v31 = vld [vmem:[%s4553_s1 + $0x620] ss:$16 sps:$4 sm:$0xff]  }
  0x31   :  { %1894 = vmatprep.subr.bf16.mxu1 %v3070_v50  ;;  %v3142_v32 = vld [vmem:[%s4553_s1 + $0x404] ss:$16 sps:$4 sm:$0xff]   ;;  %v3199_v35 = vld [vmem:[%s4554_s0 + $0x1c] ss:$36 sps:$4 sm:$0xff]  }
  0x32   :  { %v3145_v33 = vld [vmem:[%s4553_s1 + $0x604] ss:$16 sps:$4 sm:$0xff]   ;;  %v3140_v36 = vld [vmem:[%s4553_s1 + $0x400] ss:$16 sps:$4 sm:$0xff]  }
  0x33   :  { %1852 = vmatpush2.bf16.msra.mxu0 %v3072_v52  ;;  %v3143_v37 = vld [vmem:[%s4553_s1 + $0x600] ss:$16 sps:$4 sm:$0xff]   ;;  %v3148_v38 = vld [vmem:[%s4553_s1 + $0x5e4] ss:$16 sps:$4 sm:$0xff]  }
  0x34   :  { %1895 = vmatpush2.bf16.msra.mxu1 %v3073_v53  ;;  %1853 = vmatprep.subr.bf16.mxu0 %v3074_v54  ;;  %v3151_v39 = vld [vmem:[%s4553_s1 + $0x7e4] ss:$16 sps:$4 sm:$0xff]   ;;  %v3146_v40 = vld [vmem:[%s4553_s1 + $0x5e0] ss:$16 sps:$4 sm:$0xff]  }
  0x35   :  { %1896 = vmatprep.subr.bf16.mxu1 %v3076_v55  ;;  %v3149_v41 = vld [vmem:[%s4553_s1 + $0x7e0] ss:$16 sps:$4 sm:$0xff]   ;;  %v3154_v42 = vld [vmem:[%s4553_s1 + $0x5c4] ss:$16 sps:$4 sm:$0xff]  }
  0x36   :  { %v3157_v43 = vld [vmem:[%s4553_s1 + $0x7c4] ss:$16 sps:$4 sm:$0xff]   ;;  %v3152_v44 = vld [vmem:[%s4553_s1 + $0x5c0] ss:$16 sps:$4 sm:$0xff]  }
  0x37   :  { %1854 = vmatpush2.bf16.msra.mxu0 %v3078_v56  ;;  %v3155_v45 = vld [vmem:[%s4553_s1 + $0x7c0] ss:$16 sps:$4 sm:$0xff]   ;;  %v3160_v46 = vld [vmem:[%s4553_s1 + $0x5a4] ss:$16 sps:$4 sm:$0xff]  }
  0x38   :  { %1897 = vmatpush2.bf16.msra.mxu1 %v3079_v57  ;;  %1855 = vmatprep.subr.bf16.mxu0 %v3080_v58  ;;  %v3163_v47 = vld [vmem:[%s4553_s1 + $0x7a4] ss:$16 sps:$4 sm:$0xff]   ;;  %v3158_v48 = vld [vmem:[%s4553_s1 + $0x5a0] ss:$16 sps:$4 sm:$0xff]  }
  0x39   :  { %1898 = vmatprep.subr.bf16.mxu1 %v3082_v59  ;;  %v3161_v50 = vld [vmem:[%s4553_s1 + $0x7a0] ss:$16 sps:$4 sm:$0xff]   ;;  %v3166_v52 = vld [vmem:[%s4553_s1 + $0x584] ss:$16 sps:$4 sm:$0xff]  }
  0x3a   :  { %v3169_v53 = vld [vmem:[%s4553_s1 + $0x784] ss:$16 sps:$4 sm:$0xff]   ;;  %v3164_v54 = vld [vmem:[%s4553_s1 + $0x580] ss:$16 sps:$4 sm:$0xff]  }
  0x3b   :  { %1856 = vmatpush2.bf16.msra.mxu0 %v3084_v60  ;;  %v3167_v55 = vld [vmem:[%s4553_s1 + $0x780] ss:$16 sps:$4 sm:$0xff]   ;;  %v3172_v56 = vld [vmem:[%s4553_s1 + $0x564] ss:$16 sps:$4 sm:$0xff]  }
  0x3c   :  { %1899 = vmatpush2.bf16.msra.mxu1 %v3085_v61  ;;  %1857 = vmatprep.subr.bf16.mxu0 %v3086_v62  ;;  %v3175_v57 = vld [vmem:[%s4553_s1 + $0x764] ss:$16 sps:$4 sm:$0xff]   ;;  %v3170_v58 = vld [vmem:[%s4553_s1 + $0x560] ss:$16 sps:$4 sm:$0xff]  }
  0x3d   :  { %1900 = vmatprep.subr.bf16.mxu1 %v3088_v63  ;;  %v3173_v59 = vld [vmem:[%s4553_s1 + $0x760] ss:$16 sps:$4 sm:$0xff]   ;;  %v3178_v60 = vld [vmem:[%s4553_s1 + $0x544] ss:$16 sps:$4 sm:$0xff]  }
  0x3e   :  { %v3181_v61 = vld [vmem:[%s4553_s1 + $0x744] ss:$16 sps:$4 sm:$0xff]   ;;  %v3176_v62 = vld [vmem:[%s4553_s1 + $0x540] ss:$16 sps:$4 sm:$0xff]  }
  0x3f   :  { %1858 = vmatpush2.bf16.msra.mxu0 %v3090_v0  ;;  %v3179_v63 = vld [vmem:[%s4553_s1 + $0x740] ss:$16 sps:$4 sm:$0xff]   ;;  %v3184_v0 = vld [vmem:[%s4553_s1 + $0x524] ss:$16 sps:$4 sm:$0xff]  }
  0x40   :  { %1901 = vmatpush2.bf16.msra.mxu1 %v3091_v1  ;;  %1913 = vmatprep.subr.bf16.mxu0 %v3100_v2  ;;  %v3187_v1 = vld [vmem:[%s4553_s1 + $0x724] ss:$16 sps:$4 sm:$0xff]   ;;  %v3182_v2 = vld [vmem:[%s4553_s1 + $0x520] ss:$16 sps:$4 sm:$0xff]  }
  0x41   :  { %1956 = vmatprep.subr.bf16.mxu1 %v3103_v3  ;;  %v3185_v3 = vld [vmem:[%s4553_s1 + $0x720] ss:$16 sps:$4 sm:$0xff]  }
  0x42   :  { %1860 = vmatmul.mubr.bf16.vlgmr.msra.gmra.mxu0 %v3719_v4 }
  0x43   :  { %1903 = vmatmul.mubr.bf16.vlgmr.msra.gmra.mxu1 %v3095_v5  ;;  %1914 = vmatpush1.bf16.msra.mxu0 %v3098_v6  ;;  %v3190_v5 = vld [vmem:[%s4553_s1 + $0x504] ss:$16 sps:$4 sm:$0xff]  }
  0x44   :  { %1957 = vmatpush1.bf16.msra.mxu1 %v3101_v7  ;;  %1915 = vmatprep.subr.bf16.mxu0 %v3106_v8  ;;  %v3193_v6 = vld [vmem:[%s4553_s1 + $0x704] ss:$16 sps:$4 sm:$0xff]   ;;  %v3188_v7 = vld [vmem:[%s4553_s1 + $0x500] ss:$16 sps:$4 sm:$0xff]  }
  0x45   :  { %1958 = vmatprep.subr.bf16.mxu1 %v3109_v9  ;;  %1945 = vmatprep.mubr.bf16.mxu0 %v3812_v34  ;;  %v3191_v8 = vld [vmem:[%s4553_s1 + $0x700] ss:$16 sps:$4 sm:$0xff]   ;;  %v3202_v9 = vld [vmem:[%s4553_s1 + $0x8e4] ss:$16 sps:$4 sm:$0xff]  }
  0x46   :  { %1988 = vmatprep.mubr.bf16.mxu1 %v3199_v35  ;;  %v3233_v35 = vld [vmem:[%s4553_s1 + $0x48] ss:$16 sps:$4 sm:$0xff]  }
  0x47   :  { %1916 = vmatpush1.bf16.msra.mxu0 %v3104_v10  ;;  %v3205_v10 = vld [vmem:[%s4553_s1 + $0xec] ss:$16 sps:$4 sm:$0xff]  }
  0x48   :  { %1959 = vmatpush1.bf16.msra.mxu1 %v3107_v11  ;;  %1917 = vmatprep.subr.bf16.mxu0 %v3112_v12  ;;  %v3929_v11 = vld [vmem:[%s4554_s0 + $0x10] ss:$36 sps:$4 sm:$0xff]   ;;  %v3934_v12 = vld [vmem:[%s4554_s0 + $0x18] ss:$36 sps:$4 sm:$0xff]  }
  0x49   :  { %1960 = vmatprep.subr.bf16.mxu1 %v3115_v13  ;;  %v3200_v13 = vld [vmem:[%s4553_s1 + $0x8e0] ss:$16 sps:$4 sm:$0xff]  }
  0x4b   :  { %1918 = vmatpush1.bf16.msra.mxu0 %v3110_v14  ;;  %v3203_v14 = vld [vmem:[%s4553_s1 + $0xe8] ss:$16 sps:$4 sm:$0xff]  }
  0x4c   :  { %1961 = vmatpush1.bf16.msra.mxu1 %v3113_v15  ;;  %1919 = vmatprep.subr.bf16.mxu0 %v3118_v16  ;;  %v3208_v15 = vld [vmem:[%s4553_s1 + $0x8c4] ss:$16 sps:$4 sm:$0xff]   ;;  %v3211_v16 = vld [vmem:[%s4553_s1 + $0xcc] ss:$16 sps:$4 sm:$0xff]  }
  0x4d   :  { %1962 = vmatprep.subr.bf16.mxu1 %v3121_v17  ;;  %v3206_v17 = vld [vmem:[%s4553_s1 + $0x8c0] ss:$16 sps:$4 sm:$0xff]  }
  0x4f   :  { %1920 = vmatpush1.bf16.msra.mxu0 %v3116_v18  ;;  %v3209_v18 = vld [vmem:[%s4553_s1 + $0xc8] ss:$16 sps:$4 sm:$0xff]  }
  0x50   :  { %1963 = vmatpush1.bf16.msra.mxu1 %v3119_v19  ;;  %1921 = vmatprep.subr.bf16.mxu0 %v3124_v20  ;;  %v3214_v19 = vld [vmem:[%s4553_s1 + $0x8a4] ss:$16 sps:$4 sm:$0xff]   ;;  %v3217_v20 = vld [vmem:[%s4553_s1 + $0xac] ss:$16 sps:$4 sm:$0xff]  }
  0x51   :  { %1964 = vmatprep.subr.bf16.mxu1 %v3127_v21  ;;  %v3475_v21 = vmov 0  }
  0x53   :  { %1922 = vmatpush1.bf16.msra.mxu0 %v3122_v22  ;;  %v3212_v22 = vld [vmem:[%s4553_s1 + $0x8a0] ss:$16 sps:$4 sm:$0xff]  }
  0x54   :  { %1965 = vmatpush1.bf16.msra.mxu1 %v3125_v23  ;;  %1923 = vmatprep.subr.bf16.mxu0 %v3130_v24  ;;  %v3215_v23 = vld [vmem:[%s4553_s1 + $0xa8] ss:$16 sps:$4 sm:$0xff]   ;;  %v3220_v24 = vld [vmem:[%s4553_s1 + $0x884] ss:$16 sps:$4 sm:$0xff]  }
  0x55   :  { %1966 = vmatprep.subr.bf16.mxu1 %v3133_v25  ;;  %v3218_v25 = vld [vmem:[%s4553_s1 + $0x880] ss:$16 sps:$4 sm:$0xff]  }
  0x57   :  { %1924 = vmatpush1.bf16.msra.mxu0 %v3128_v26  ;;  %v3221_v26 = vld [vmem:[%s4553_s1 + $0x88] ss:$16 sps:$4 sm:$0xff]  }
  0x58   :  { %1967 = vmatpush1.bf16.msra.mxu1 %v3131_v27  ;;  %1925 = vmatprep.subr.bf16.mxu0 %v3136_v28  ;;  %v3226_v27 = vld [vmem:[%s4553_s1 + $0x864] ss:$16 sps:$4 sm:$0xff]   ;;  %v3229_v28 = vld [vmem:[%s4553_s1 + $0x6c] ss:$16 sps:$4 sm:$0xff]  }
  0x59   :  { %1968 = vmatprep.subr.bf16.mxu1 %v3139_v29  ;;  %v3224_v29 = vld [vmem:[%s4553_s1 + $0x860] ss:$16 sps:$4 sm:$0xff]  }
  0x5b   :  { %1926 = vmatpush1.bf16.msra.mxu0 %v3134_v30  ;;  %v3227_v30 = vld [vmem:[%s4553_s1 + $0x68] ss:$16 sps:$4 sm:$0xff]  }
  0x5c   :  { %1969 = vmatpush1.bf16.msra.mxu1 %v3137_v31  ;;  %1927 = vmatprep.subr.bf16.mxu0 %v3142_v32  ;;  %v3232_v31 = vld [vmem:[%s4553_s1 + $0x844] ss:$16 sps:$4 sm:$0xff]   ;;  %v3235_v32 = vld [vmem:[%s4553_s1 + $0x4c] ss:$16 sps:$4 sm:$0xff]  }
  0x5d   :  { %1970 = vmatprep.subr.bf16.mxu1 %v3145_v33  ;;  %v3230_v33 = vld [vmem:[%s4553_s1 + $0x840] ss:$16 sps:$4 sm:$0xff]  }
  0x5f   :  { %1928 = vmatpush1.bf16.msra.mxu0 %v3140_v36  ;;  %v3238_v36 = vld [vmem:[%s4553_s1 + $0x824] ss:$16 sps:$4 sm:$0xff]  }
  0x60   :  { %1971 = vmatpush1.bf16.msra.mxu1 %v3143_v37  ;;  %1929 = vmatprep.subr.bf16.mxu0 %v3148_v38  ;;  %v3241_v37 = vld [vmem:[%s4553_s1 + $0x2c] ss:$16 sps:$4 sm:$0xff]   ;;  %v3236_v38 = vld [vmem:[%s4553_s1 + $0x820] ss:$16 sps:$4 sm:$0xff]  }
  0x61   :  { %1972 = vmatprep.subr.bf16.mxu1 %v3151_v39  ;;  %v3239_v39 = vld [vmem:[%s4553_s1 + $0x28] ss:$16 sps:$4 sm:$0xff]  }
  0x63   :  { %1930 = vmatpush2.bf16.msra.mxu0 %v3146_v40  ;;  %v3244_v40 = vld [vmem:[%s4553_s1 + $0x804] ss:$16 sps:$4 sm:$0xff]  }
  0x64   :  { %1973 = vmatpush2.bf16.msra.mxu1 %v3149_v41  ;;  %1931 = vmatprep.subr.bf16.mxu0 %v3154_v42  ;;  %v3247_v41 = vld [vmem:[%s4553_s1 + $0xc] ss:$16 sps:$4 sm:$0xff]   ;;  %v3242_v42 = vld [vmem:[%s4553_s1 + $0x800] ss:$16 sps:$4 sm:$0xff]  }
  0x65   :  { %1974 = vmatprep.subr.bf16.mxu1 %v3157_v43  ;;  %v3245_v43 = vld [vmem:[%s4553_s1 + $0x8] ss:$16 sps:$4 sm:$0xff]  }
  0x67   :  { %1932 = vmatpush2.bf16.msra.mxu0 %v3152_v44  ;;  %v3251_v44 = vld [vmem:[%s4553_s1 + $0x1ec] ss:$16 sps:$4 sm:$0xff]  }
  0x68   :  { %1975 = vmatpush2.bf16.msra.mxu1 %v3155_v45  ;;  %1933 = vmatprep.subr.bf16.mxu0 %v3160_v46  ;;  %v3254_v45 = vld [vmem:[%s4553_s1 + $0x2ec] ss:$16 sps:$4 sm:$0xff]   ;;  %v4039_v46 = vld [vmem:[%s4554_s0 + $0x20] ss:$36 sps:$4 sm:$0xff]  }
  0x69   :  { %1976 = vmatprep.subr.bf16.mxu1 %v3163_v47  ;;  %v3249_v47 = vld [vmem:[%s4553_s1 + $0x1e8] ss:$16 sps:$4 sm:$0xff]  }
  0x6b   :  { %1934 = vmatpush2.bf16.msra.mxu0 %v3158_v48  ;;  %v3252_v48 = vld [vmem:[%s4553_s1 + $0x2e8] ss:$16 sps:$4 sm:$0xff]  }
  0x6c   :  { %1977 = vmatpush2.bf16.msra.mxu1 %v3161_v50  ;;  %1935 = vmatprep.subr.bf16.mxu0 %v3166_v52  ;;  %v3257_v50 = vld [vmem:[%s4553_s1 + $0x1cc] ss:$16 sps:$4 sm:$0xff]  }
  0x6d   :  { %1978 = vmatprep.subr.bf16.mxu1 %v3169_v53  ;;  %v3260_v52 = vld [vmem:[%s4553_s1 + $0x2cc] ss:$16 sps:$4 sm:$0xff]   ;;  %v3255_v53 = vld [vmem:[%s4553_s1 + $0x1c8] ss:$16 sps:$4 sm:$0xff]  }
  0x6f   :  { %1936 = vmatpush2.bf16.msra.mxu0 %v3164_v54  ;;  %v3258_v54 = vld [vmem:[%s4553_s1 + $0x2c8] ss:$16 sps:$4 sm:$0xff]  }
  0x70   :  { %1979 = vmatpush2.bf16.msra.mxu1 %v3167_v55  ;;  %1937 = vmatprep.subr.bf16.mxu0 %v3172_v56  ;;  %v3263_v55 = vld [vmem:[%s4553_s1 + $0x1ac] ss:$16 sps:$4 sm:$0xff]  }
  0x71   :  { %1980 = vmatprep.subr.bf16.mxu1 %v3175_v57  ;;  %v3266_v56 = vld [vmem:[%s4553_s1 + $0x2ac] ss:$16 sps:$4 sm:$0xff]   ;;  %v3261_v57 = vld [vmem:[%s4553_s1 + $0x1a8] ss:$16 sps:$4 sm:$0xff]  }
  0x73   :  { %1938 = vmatpush2.bf16.msra.mxu0 %v3170_v58  ;;  %v3264_v58 = vld [vmem:[%s4553_s1 + $0x2a8] ss:$16 sps:$4 sm:$0xff]  }
  0x74   :  { %1981 = vmatpush2.bf16.msra.mxu1 %v3173_v59  ;;  %1939 = vmatprep.subr.bf16.mxu0 %v3178_v60  ;;  %v3269_v59 = vld [vmem:[%s4553_s1 + $0x18c] ss:$16 sps:$4 sm:$0xff]   ;;  %v3267_v60 = vld [vmem:[%s4553_s1 + $0x188] ss:$16 sps:$4 sm:$0xff]  }
  0x75   :  { %1982 = vmatprep.subr.bf16.mxu1 %v3181_v61  ;;  %v3270_v61 = vld [vmem:[%s4553_s1 + $0x288] ss:$16 sps:$4 sm:$0xff]  }
  0x77   :  { %1940 = vmatpush2.bf16.msra.mxu0 %v3176_v62  ;;  %v3275_v62 = vld [vmem:[%s4553_s1 + $0x16c] ss:$16 sps:$4 sm:$0xff]  }
  0x78   :  { %1983 = vmatpush2.bf16.msra.mxu1 %v3179_v63  ;;  %1941 = vmatprep.subr.bf16.mxu0 %v3184_v0  ;;  %v3278_v63 = vld [vmem:[%s4553_s1 + $0x26c] ss:$16 sps:$4 sm:$0xff]   ;;  %v3273_v0 = vld [vmem:[%s4553_s1 + $0x168] ss:$16 sps:$4 sm:$0xff]  }
  0x79   :  { %1984 = vmatprep.subr.bf16.mxu1 %v3187_v1  ;;  %v3276_v1 = vld [vmem:[%s4553_s1 + $0x268] ss:$16 sps:$4 sm:$0xff]  }
  0x7b   :  { %1942 = vmatpush2.bf16.msra.mxu0 %v3182_v2  ;;  %v3281_v2 = vld [vmem:[%s4553_s1 + $0x14c] ss:$16 sps:$4 sm:$0xff]  }
  0x7c   :  { %1985 = vmatpush2.bf16.msra.mxu1 %v3185_v3  ;;  %1943 = vmatprep.subr.bf16.mxu0 %v3190_v5  ;;  %v3284_v3 = vld [vmem:[%s4553_s1 + $0x24c] ss:$16 sps:$4 sm:$0xff]   ;;  %v3279_v5 = vld [vmem:[%s4553_s1 + $0x148] ss:$16 sps:$4 sm:$0xff]  }
  0x7d   :  { %1986 = vmatprep.subr.bf16.mxu1 %v3193_v6  ;;  %v3282_v6 = vld [vmem:[%s4553_s1 + $0x248] ss:$16 sps:$4 sm:$0xff]  }
  0x7f   :  { %1944 = vmatpush2.bf16.msra.mxu0 %v3188_v7  ;;  %v3287_v7 = vld [vmem:[%s4553_s1 + $0x12c] ss:$16 sps:$4 sm:$0xff]  }
  0x80   :  { %1987 = vmatpush2.bf16.msra.mxu1 %v3191_v8  ;;  %1999 = vmatprep.subr.bf16.mxu0 %v3202_v9  ;;  %v3290_v8 = vld [vmem:[%s4553_s1 + $0x22c] ss:$16 sps:$4 sm:$0xff]   ;;  %v3285_v9 = vld [vmem:[%s4553_s1 + $0x128] ss:$16 sps:$4 sm:$0xff]  }
  0x81   :  { %2042 = vmatprep.subr.bf16.mxu1 %v3205_v10  ;;  %v3288_v10 = vld [vmem:[%s4553_s1 + $0x228] ss:$16 sps:$4 sm:$0xff]  }
  0x82   :  { %1946 = vmatmul.mubr.bf16.vlgmr.msra.gmra.mxu0 %v3929_v11 }
  0x83   :  { %1989 = vmatmul.mubr.bf16.vlgmr.msra.gmra.mxu1 %v3934_v12  ;;  %2000 = vmatpush1.bf16.msra.mxu0 %v3200_v13  ;;  %v3293_v13 = vld [vmem:[%s4553_s1 + $0x10c] ss:$16 sps:$4 sm:$0xff]  }
  0x84   :  { %2043 = vmatpush1.bf16.msra.mxu1 %v3203_v14  ;;  %2001 = vmatprep.subr.bf16.mxu0 %v3208_v15  ;;  %v3296_v14 = vld [vmem:[%s4553_s1 + $0x20c] ss:$16 sps:$4 sm:$0xff]   ;;  %v3291_v15 = vld [vmem:[%s4553_s1 + $0x108] ss:$16 sps:$4 sm:$0xff]  }
  0x85   :  { %2044 = vmatprep.subr.bf16.mxu1 %v3211_v16  ;;  %2031 = vmatprep.mubr.bf16.mxu0 %v3475_v21  ;;  %v3294_v16 = vld [vmem:[%s4553_s1 + $0x208] ss:$16 sps:$4 sm:$0xff]  }
  0x86   :  { %2074 = vmatprep.mubr.bf16.mxu1 %v3656_v49  ;;  %v3223_v49 = vld [vmem:[%s4553_s1 + $0x8c] ss:$16 sps:$4 sm:$0xff]  }
  0x87   :  { %2002 = vmatpush1.bf16.msra.mxu0 %v3206_v17  ;;  %v3299_v17 = vld [vmem:[%s4553_s1 + $0x3ec] ss:$16 sps:$4 sm:$0xff]  }
  0x88   :  { %2045 = vmatpush1.bf16.msra.mxu1 %v3209_v18  ;;  %2003 = vmatprep.subr.bf16.mxu0 %v3214_v19  ;;  %v3302_v18 = vld [vmem:[%s4553_s1 + $0x4ec] ss:$16 sps:$4 sm:$0xff]   ;;  %v3297_v19 = vld [vmem:[%s4553_s1 + $0x3e8] ss:$16 sps:$4 sm:$0xff]  }
  0x89   :  { %2046 = vmatprep.subr.bf16.mxu1 %v3217_v20  ;;  %v3300_v20 = vld [vmem:[%s4553_s1 + $0x4e8] ss:$16 sps:$4 sm:$0xff]  }
  0x8b   :  { %2004 = vmatpush1.bf16.msra.mxu0 %v3212_v22  ;;  %v3305_v22 = vld [vmem:[%s4553_s1 + $0x3cc] ss:$16 sps:$4 sm:$0xff]  }
  0x8c   :  { %2047 = vmatpush1.bf16.msra.mxu1 %v3215_v23  ;;  %2005 = vmatprep.subr.bf16.mxu0 %v3220_v24  ;;  %v3308_v23 = vld [vmem:[%s4553_s1 + $0x4cc] ss:$16 sps:$4 sm:$0xff]   ;;  %v3303_v24 = vld [vmem:[%s4553_s1 + $0x3c8] ss:$16 sps:$4 sm:$0xff]  }
  0x8d   :  { %2048 = vmatprep.subr.bf16.mxu1 %v3223_v49  ;;  %v3306_v49 = vld [vmem:[%s4553_s1 + $0x4c8] ss:$16 sps:$4 sm:$0xff]  }
  0x8f   :  { %2006 = vmatpush1.bf16.msra.mxu0 %v3218_v25  ;;  %v3311_v25 = vld [vmem:[%s4553_s1 + $0x3ac] ss:$16 sps:$4 sm:$0xff]  }
  0x90   :  { %2049 = vmatpush1.bf16.msra.mxu1 %v3221_v26  ;;  %2007 = vmatprep.subr.bf16.mxu0 %v3226_v27  ;;  %v3309_v26 = vld [vmem:[%s4553_s1 + $0x3a8] ss:$16 sps:$4 sm:$0xff]  }
  0x91   :  { %2050 = vmatprep.subr.bf16.mxu1 %v3229_v28  ;;  %v3312_v27 = vld [vmem:[%s4553_s1 + $0x4a8] ss:$16 sps:$4 sm:$0xff]   ;;  %v3317_v28 = vld [vmem:[%s4553_s1 + $0x38c] ss:$16 sps:$4 sm:$0xff]  }
  0x93   :  { %2008 = vmatpush1.bf16.msra.mxu0 %v3224_v29  ;;  %v3315_v29 = vld [vmem:[%s4553_s1 + $0x388] ss:$16 sps:$4 sm:$0xff]  }
  0x94   :  { %2051 = vmatpush1.bf16.msra.mxu1 %v3227_v30  ;;  %2009 = vmatprep.subr.bf16.mxu0 %v3232_v31  ;;  %v3318_v30 = vld [vmem:[%s4553_s1 + $0x488] ss:$16 sps:$4 sm:$0xff]   ;;  %v3323_v31 = vld [vmem:[%s4553_s1 + $0x36c] ss:$16 sps:$4 sm:$0xff]  }
  0x95   :  { %2052 = vmatprep.subr.bf16.mxu1 %v3235_v32  ;;  %v3326_v32 = vld [vmem:[%s4553_s1 + $0x46c] ss:$16 sps:$4 sm:$0xff]  }
  0x97   :  { %2010 = vmatpush1.bf16.msra.mxu0 %v3230_v33  ;;  %v3321_v33 = vld [vmem:[%s4553_s1 + $0x368] ss:$16 sps:$4 sm:$0xff]  }
  0x98   :  { %2053 = vmatpush1.bf16.msra.mxu1 %v3233_v35  ;;  %2011 = vmatprep.subr.bf16.mxu0 %v3238_v36  ;;  %v3324_v35 = vld [vmem:[%s4553_s1 + $0x468] ss:$16 sps:$4 sm:$0xff]   ;;  %v3329_v36 = vld [vmem:[%s4553_s1 + $0x34c] ss:$16 sps:$4 sm:$0xff]  }
  0x99   :  { %2054 = vmatprep.subr.bf16.mxu1 %v3241_v37  ;;  %v3332_v37 = vld [vmem:[%s4553_s1 + $0x44c] ss:$16 sps:$4 sm:$0xff]  }
  0x9b   :  { %2012 = vmatpush1.bf16.msra.mxu0 %v3236_v38  ;;  %v3327_v38 = vld [vmem:[%s4553_s1 + $0x348] ss:$16 sps:$4 sm:$0xff]  }
  0x9c   :  { %2055 = vmatpush1.bf16.msra.mxu1 %v3239_v39  ;;  %2013 = vmatprep.subr.bf16.mxu0 %v3244_v40  ;;  %v3330_v39 = vld [vmem:[%s4553_s1 + $0x448] ss:$16 sps:$4 sm:$0xff]   ;;  %v3335_v40 = vld [vmem:[%s4553_s1 + $0x32c] ss:$16 sps:$4 sm:$0xff]  }
  0x9d   :  { %2056 = vmatprep.subr.bf16.mxu1 %v3247_v41  ;;  %v3338_v41 = vld [vmem:[%s4553_s1 + $0x42c] ss:$16 sps:$4 sm:$0xff]  }
  0x9f   :  { %2014 = vmatpush1.bf16.msra.mxu0 %v3242_v42  ;;  %v3333_v42 = vld [vmem:[%s4553_s1 + $0x328] ss:$16 sps:$4 sm:$0xff]  }
  0xa0   :  { %2057 = vmatpush1.bf16.msra.mxu1 %v3245_v43  ;;  %2085 = vmatprep.subr.bf16.mxu0 %v3254_v45  ;;  %v3336_v43 = vld [vmem:[%s4553_s1 + $0x428] ss:$16 sps:$4 sm:$0xff]   ;;  %v3344_v45 = vld [vmem:[%s4553_s1 + $0x40c] ss:$16 sps:$4 sm:$0xff]  }
  0xa1   :  { %2058 = vmatprep.subr.bf16.mxu1 %v3251_v44  ;;  %v3341_v44 = vld [vmem:[%s4553_s1 + $0x30c] ss:$16 sps:$4 sm:$0xff]  }
  0xa2   :  { %2032 = vmatmul.mubr.bf16.vlgmr.msra.gmra.mxu0 %v4039_v46 }
  0xa3   :  { %2086 = vmatpush1.bf16.msra.mxu0 %v3252_v48  ;;  %2117 = vmatprep.mubr.bf16.mxu0 %v3664_v51  ;;  %v3272_v51 = vld [vmem:[%s4553_s1 + $0x28c] ss:$16 sps:$4 sm:$0xff]   ;;  %v3342_v48 = vld [vmem:[%s4553_s1 + $0x408] ss:$16 sps:$4 sm:$0xff]  }
  0xa4   :  { %2059 = vmatpush2.bf16.msra.mxu1 %v3249_v47  ;;  %2087 = vmatprep.subr.bf16.mxu0 %v3260_v52  ;;  %v3339_v47 = vld [vmem:[%s4553_s1 + $0x308] ss:$16 sps:$4 sm:$0xff]   ;;  %v3350_v52 = vld [vmem:[%s4553_s1 + $0x6ec] ss:$16 sps:$4 sm:$0xff]  }
  0xa5   :  { %2060 = vmatprep.subr.bf16.mxu1 %v3257_v50  ;;  %v3347_v50 = vld [vmem:[%s4553_s1 + $0x5ec] ss:$16 sps:$4 sm:$0xff]  }
  0xa7   :  { %2088 = vmatpush1.bf16.msra.mxu0 %v3258_v54  ;;  %v3348_v54 = vld [vmem:[%s4553_s1 + $0x6e8] ss:$16 sps:$4 sm:$0xff]  }
  0xa8   :  { %2061 = vmatpush2.bf16.msra.mxu1 %v3255_v53  ;;  %2089 = vmatprep.subr.bf16.mxu0 %v3266_v56  ;;  %v3345_v53 = vld [vmem:[%s4553_s1 + $0x5e8] ss:$16 sps:$4 sm:$0xff]   ;;  %v3356_v56 = vld [vmem:[%s4553_s1 + $0x6cc] ss:$16 sps:$4 sm:$0xff]  }
  0xa9   :  { %2062 = vmatprep.subr.bf16.mxu1 %v3263_v55  ;;  %v3353_v55 = vld [vmem:[%s4553_s1 + $0x5cc] ss:$16 sps:$4 sm:$0xff]  }
  0xab   :  { %2090 = vmatpush1.bf16.msra.mxu0 %v3264_v58  ;;  %v3354_v58 = vld [vmem:[%s4553_s1 + $0x6c8] ss:$16 sps:$4 sm:$0xff]  }
  0xac   :  { %2063 = vmatpush2.bf16.msra.mxu1 %v3261_v57  ;;  %2091 = vmatprep.subr.bf16.mxu0 %v3272_v51  ;;  %v3351_v57 = vld [vmem:[%s4553_s1 + $0x5c8] ss:$16 sps:$4 sm:$0xff]   ;;  %v3359_v51 = vld [vmem:[%s4553_s1 + $0x5ac] ss:$16 sps:$4 sm:$0xff]  }
  0xad   :  { %2064 = vmatprep.subr.bf16.mxu1 %v3269_v59  ;;  %v3473_v59 = vld [vmem:[%s4554_s0 + $0x8] ss:$36 sps:$4 sm:$0xff]  }
  0xaf   :  { %2092 = vmatpush1.bf16.msra.mxu0 %v3270_v61  ;;  %v3474_v61 = vld [vmem:[%s4554_s0 + $0x1c] ss:$36 sps:$4 sm:$0xff]  }
  0xb0   :  { %2065 = vmatpush2.bf16.msra.mxu1 %v3267_v60  ;;  %2093 = vmatprep.subr.bf16.mxu0 %v3278_v63  ;;  %v3362_v60 = vld [vmem:[%s4553_s1 + $0x6ac] ss:$16 sps:$4 sm:$0xff]   ;;  %v3360_v63 = vld [vmem:[%s4553_s1 + $0x6a8] ss:$16 sps:$4 sm:$0xff]  }
  0xb1   :  { %2066 = vmatprep.subr.bf16.mxu1 %v3275_v62  ;;  %v3357_v62 = vld [vmem:[%s4553_s1 + $0x5a8] ss:$16 sps:$4 sm:$0xff]  }
  0xb3   :  { %2094 = vmatpush1.bf16.msra.mxu0 %v3276_v1  ;;  %v3368_v1 = vld [vmem:[%s4553_s1 + $0x68c] ss:$16 sps:$4 sm:$0xff]  }
  0xb4   :  { %2067 = vmatpush2.bf16.msra.mxu1 %v3273_v0  ;;  %2095 = vmatprep.subr.bf16.mxu0 %v3284_v3  ;;  %v3365_v0 = vld [vmem:[%s4553_s1 + $0x58c] ss:$16 sps:$4 sm:$0xff]   ;;  %v3366_v3 = vld [vmem:[%s4553_s1 + $0x688] ss:$16 sps:$4 sm:$0xff]  }
  0xb5   :  { %2068 = vmatprep.subr.bf16.mxu1 %v3281_v2  ;;  %v3363_v2 = vld [vmem:[%s4553_s1 + $0x588] ss:$16 sps:$4 sm:$0xff]  }
  0xb7   :  { %2096 = vmatpush1.bf16.msra.mxu0 %v3282_v6  ;;  %v3374_v6 = vld [vmem:[%s4553_s1 + $0x66c] ss:$16 sps:$4 sm:$0xff]  }
  0xb8   :  { %2069 = vmatpush2.bf16.msra.mxu1 %v3279_v5  ;;  %2097 = vmatprep.subr.bf16.mxu0 %v3290_v8  ;;  %v3371_v5 = vld [vmem:[%s4553_s1 + $0x56c] ss:$16 sps:$4 sm:$0xff]   ;;  %v3372_v8 = vld [vmem:[%s4553_s1 + $0x668] ss:$16 sps:$4 sm:$0xff]  }
  0xb9   :  { %2070 = vmatprep.subr.bf16.mxu1 %v3287_v7  ;;  %v3369_v7 = vld [vmem:[%s4553_s1 + $0x568] ss:$16 sps:$4 sm:$0xff]  }
  0xbb   :  { %2098 = vmatpush1.bf16.msra.mxu0 %v3288_v10  ;;  %v3380_v10 = vld [vmem:[%s4553_s1 + $0x64c] ss:$16 sps:$4 sm:$0xff]  }
  0xbc   :  { %2071 = vmatpush2.bf16.msra.mxu1 %v3285_v9  ;;  %2099 = vmatprep.subr.bf16.mxu0 %v3296_v14  ;;  %v3377_v9 = vld [vmem:[%s4553_s1 + $0x54c] ss:$16 sps:$4 sm:$0xff]   ;;  %v3378_v14 = vld [vmem:[%s4553_s1 + $0x648] ss:$16 sps:$4 sm:$0xff]  }
  0xbd   :  { %2072 = vmatprep.subr.bf16.mxu1 %v3293_v13  ;;  %v3375_v13 = vld [vmem:[%s4553_s1 + $0x548] ss:$16 sps:$4 sm:$0xff]  }
  0xbf   :  { %2100 = vmatpush1.bf16.msra.mxu0 %v3294_v16  ;;  %v3386_v16 = vld [vmem:[%s4553_s1 + $0x62c] ss:$16 sps:$4 sm:$0xff]  }
  0xc0   :  { %2073 = vmatpush2.bf16.msra.mxu1 %v3291_v15  ;;  %2101 = vmatprep.subr.bf16.mxu0 %v3299_v17  ;;  %v3383_v15 = vld [vmem:[%s4553_s1 + $0x52c] ss:$16 sps:$4 sm:$0xff]   ;;  %v3381_v17 = vld [vmem:[%s4553_s1 + $0x528] ss:$16 sps:$4 sm:$0xff]  }
  0xc1   :  { %2128 = vmatprep.subr.bf16.mxu1 %v3302_v18  ;;  %v3384_v18 = vld [vmem:[%s4553_s1 + $0x628] ss:$16 sps:$4 sm:$0xff]  }
  0xc3   :  { %2075 = vmatmul.mubr.bf16.vlgmr.msra.gmra.mxu1 %v3719_v4  ;;  %2102 = vmatpush2.bf16.msra.mxu0 %v3297_v19  ;;  %v3314_v4 = vld [vmem:[%s4553_s1 + $0x4ac] ss:$16 sps:$4 sm:$0xff]  }
  0xc4   :  { %2129 = vmatpush1.bf16.msra.mxu1 %v3300_v20  ;;  %2103 = vmatprep.subr.bf16.mxu0 %v3305_v22  ;;  %v3389_v19 = vld [vmem:[%s4553_s1 + $0x50c] ss:$16 sps:$4 sm:$0xff]   ;;  %v3387_v22 = vld [vmem:[%s4553_s1 + $0x508] ss:$16 sps:$4 sm:$0xff]  }
  0xc5   :  { %2130 = vmatprep.subr.bf16.mxu1 %v3308_v23  ;;  %2160 = vmatprep.mubr.bf16.mxu1 %v3812_v34  ;;  %v3320_v34 = vld [vmem:[%s4553_s1 + $0x48c] ss:$16 sps:$4 sm:$0xff]   ;;  %v3390_v23 = vld [vmem:[%s4553_s1 + $0x608] ss:$16 sps:$4 sm:$0xff]  }
  0xc6   :  { %v3392_v20 = vld [vmem:[%s4553_s1 + $0x60c] ss:$16 sps:$4 sm:$0xff]  }
  0xc7   :  { %2104 = vmatpush2.bf16.msra.mxu0 %v3303_v24  ;;  %v3395_v24 = vld [vmem:[%s4553_s1 + $0x7ec] ss:$16 sps:$4 sm:$0xff]  }
  0xc8   :  { %2131 = vmatpush1.bf16.msra.mxu1 %v3306_v49  ;;  %2105 = vmatprep.subr.bf16.mxu0 %v3311_v25  ;;  %v3398_v49 = vld [vmem:[%s4553_s1 + $0x8ec] ss:$16 sps:$4 sm:$0xff]   ;;  %v3393_v25 = vld [vmem:[%s4553_s1 + $0x7e8] ss:$16 sps:$4 sm:$0xff]  }
  0xc9   :  { %2132 = vmatprep.subr.bf16.mxu1 %v3314_v4  ;;  %v3396_v4 = vld [vmem:[%s4553_s1 + $0x8e8] ss:$16 sps:$4 sm:$0xff]  }
  0xcb   :  { %2106 = vmatpush2.bf16.msra.mxu0 %v3309_v26  ;;  %v3401_v26 = vld [vmem:[%s4553_s1 + $0x7cc] ss:$16 sps:$4 sm:$0xff]  }
  0xcc   :  { %2133 = vmatpush1.bf16.msra.mxu1 %v3312_v27  ;;  %2107 = vmatprep.subr.bf16.mxu0 %v3317_v28  ;;  %v3404_v27 = vld [vmem:[%s4553_s1 + $0x8cc] ss:$16 sps:$4 sm:$0xff]   ;;  %v3399_v28 = vld [vmem:[%s4553_s1 + $0x7c8] ss:$16 sps:$4 sm:$0xff]  }
  0xcd   :  { %2134 = vmatprep.subr.bf16.mxu1 %v3320_v34  ;;  %v3402_v34 = vld [vmem:[%s4553_s1 + $0x8c8] ss:$16 sps:$4 sm:$0xff]  }
  0xcf   :  { %2108 = vmatpush2.bf16.msra.mxu0 %v3315_v29  ;;  %v3407_v29 = vld [vmem:[%s4553_s1 + $0x7ac] ss:$16 sps:$4 sm:$0xff]  }
  0xd0   :  { %2135 = vmatpush1.bf16.msra.mxu1 %v3318_v30  ;;  %2109 = vmatprep.subr.bf16.mxu0 %v3323_v31  ;;  %v3405_v30 = vld [vmem:[%s4553_s1 + $0x7a8] ss:$16 sps:$4 sm:$0xff]  }
  0xd1   :  { %2136 = vmatprep.subr.bf16.mxu1 %v3326_v32  ;;  %v3408_v31 = vld [vmem:[%s4553_s1 + $0x8a8] ss:$16 sps:$4 sm:$0xff]   ;;  %v3413_v32 = vld [vmem:[%s4553_s1 + $0x78c] ss:$16 sps:$4 sm:$0xff]  }
  0xd3   :  { %2110 = vmatpush2.bf16.msra.mxu0 %v3321_v33  ;;  %v3411_v33 = vld [vmem:[%s4553_s1 + $0x788] ss:$16 sps:$4 sm:$0xff]  }
  0xd4   :  { %2137 = vmatpush1.bf16.msra.mxu1 %v3324_v35  ;;  %2111 = vmatprep.subr.bf16.mxu0 %v3329_v36  ;;  %v3414_v35 = vld [vmem:[%s4553_s1 + $0x888] ss:$16 sps:$4 sm:$0xff]   ;;  %v3419_v36 = vld [vmem:[%s4553_s1 + $0x76c] ss:$16 sps:$4 sm:$0xff]  }
  0xd5   :  { %2138 = vmatprep.subr.bf16.mxu1 %v3332_v37  ;;  %v3422_v37 = vld [vmem:[%s4553_s1 + $0x86c] ss:$16 sps:$4 sm:$0xff]  }
  0xd7   :  { %2112 = vmatpush2.bf16.msra.mxu0 %v3327_v38  ;;  %v3417_v38 = vld [vmem:[%s4553_s1 + $0x768] ss:$16 sps:$4 sm:$0xff]  }
  0xd8   :  { %2139 = vmatpush1.bf16.msra.mxu1 %v3330_v39  ;;  %2113 = vmatprep.subr.bf16.mxu0 %v3335_v40  ;;  %v3420_v39 = vld [vmem:[%s4553_s1 + $0x868] ss:$16 sps:$4 sm:$0xff]   ;;  %v3425_v40 = vld [vmem:[%s4553_s1 + $0x74c] ss:$16 sps:$4 sm:$0xff]  }
  0xd9   :  { %2140 = vmatprep.subr.bf16.mxu1 %v3338_v41  ;;  %v3428_v41 = vld [vmem:[%s4553_s1 + $0x84c] ss:$16 sps:$4 sm:$0xff]  }
  0xdb   :  { %2114 = vmatpush2.bf16.msra.mxu0 %v3333_v42  ;;  %v3423_v42 = vld [vmem:[%s4553_s1 + $0x748] ss:$16 sps:$4 sm:$0xff]  }
  0xdc   :  { %2141 = vmatpush1.bf16.msra.mxu1 %v3336_v43  ;;  %2115 = vmatprep.subr.bf16.mxu0 %v3341_v44  ;;  %v3426_v43 = vld [vmem:[%s4553_s1 + $0x848] ss:$16 sps:$4 sm:$0xff]   ;;  %v3431_v44 = vld [vmem:[%s4553_s1 + $0x72c] ss:$16 sps:$4 sm:$0xff]  }
  0xdd   :  { %2142 = vmatprep.subr.bf16.mxu1 %v3344_v45  ;;  %v3434_v45 = vld [vmem:[%s4553_s1 + $0x82c] ss:$16 sps:$4 sm:$0xff]  }
  0xdf   :  { %2116 = vmatpush2.bf16.msra.mxu0 %v3339_v47  ;;  %v3429_v47 = vld [vmem:[%s4553_s1 + $0x728] ss:$16 sps:$4 sm:$0xff]  }
  0xe0   :  { %2143 = vmatpush1.bf16.msra.mxu1 %v3342_v48  ;;  %2171 = vmatprep.subr.bf16.mxu0 %v3350_v52  ;;  %v3432_v48 = vld [vmem:[%s4553_s1 + $0x828] ss:$16 sps:$4 sm:$0xff]   ;;  %v3440_v52 = vld [vmem:[%s4553_s1 + $0x80c] ss:$16 sps:$4 sm:$0xff]  }
  0xe1   :  { %2144 = vmatprep.subr.bf16.mxu1 %v3347_v50  ;;  %v3437_v50 = vld [vmem:[%s4553_s1 + $0x70c] ss:$16 sps:$4 sm:$0xff]  }
  0xe2   :  { %2118 = vmatmul.mubr.bf16.vlgmr.msra.gmra.mxu0 %v3473_v59  ;;  %v3445_v59 = vld [vmem:[%s4555_s3 + $0x68] sm:$0xff]  }
  0xe3   :  { %2172 = vmatpush1.bf16.msra.mxu0 %v3348_v54  ;;  %2203 = vmatprep.mubr.bf16.mxu0 %v3474_v61  ;;  %v3438_v54 = vld [vmem:[%s4553_s1 + $0x808] ss:$16 sps:$4 sm:$0xff]  }
  0xe4   :  { %2145 = vmatpush2.bf16.msra.mxu1 %v3345_v53  ;;  %2173 = vmatprep.subr.bf16.mxu0 %v3356_v56  ;;  %v3435_v53 = vld [vmem:[%s4553_s1 + $0x708] ss:$16 sps:$4 sm:$0xff]  }
  0xe5   :  { %2146 = vmatprep.subr.bf16.mxu1 %v3353_v55  ;;  %v3441_v55 = vld [vmem:[%s4555_s3 + $0x78] sm:$0xff]  }
  0xe6   :  { %v3442_v56 = vld [vmem:[%s4555_s3 + $0x38] sm:$0xff]  }
  0xe7   :  { %2174 = vmatpush1.bf16.msra.mxu0 %v3354_v58  ;;  %v3444_v58 = vld [vmem:[%s4555_s3 + $0x30] sm:$0xff]   ;;  %v3450_v61 = vld [vmem:[%s4555_s3 + $0x18] sm:$0xff]  }
  0xe8   :  { %2147 = vmatpush2.bf16.msra.mxu1 %v3351_v57  ;;  %2175 = vmatprep.subr.bf16.mxu0 %v3362_v60  ;;  %v3443_v57 = vld [vmem:[%s4555_s3 + $0x70] sm:$0xff]   ;;  %v3449_v60 = vld [vmem:[%s4555_s3 + $0x58] sm:$0xff]  }
  0xe9   :  { %2148 = vmatprep.subr.bf16.mxu1 %v3359_v51  ;;  %v3446_v51 = vld [vmem:[%s4555_s3 + $0x28] sm:$0xff]  }
  0xeb   :  { %2176 = vmatpush1.bf16.msra.mxu0 %v3360_v63  ;;  %v3452_v63 = vld [vmem:[%s4555_s3 + $0x10] sm:$0xff]  }
  0xec   :  { %2149 = vmatpush2.bf16.msra.mxu1 %v3357_v62  ;;  %2177 = vmatprep.subr.bf16.mxu0 %v3368_v1  ;;  %v3451_v62 = vld [vmem:[%s4555_s3 + $0x50] sm:$0xff]   ;;  %v3454_v1 = vld [vmem:[%s4555_s3 + $0x8] sm:$0xff]  }
  0xed   :  { %2150 = vmatprep.subr.bf16.mxu1 %v3365_v0  ;;  %v3453_v0 = vld [vmem:[%s4555_s3 + $0x48] sm:$0xff]  }
  0xef   :  { %2178 = vmatpush1.bf16.msra.mxu0 %v3366_v3  ;;  %v3456_v3 = vld [vmem:[%s4555_s3] sm:$0xff]  }
  0xf0   :  { %2151 = vmatpush2.bf16.msra.mxu1 %v3363_v2  ;;  %2179 = vmatprep.subr.bf16.mxu0 %v3374_v6  ;;  %v3455_v2 = vld [vmem:[%s4555_s3 + $0x40] sm:$0xff]   ;;  %v3457_v6 = vld [vmem:[%s4555_s3 + $0xf8] sm:$0xff]  }
  0xf1   :  { %2152 = vmatprep.subr.bf16.mxu1 %v3371_v5 }
  0xf3   :  { %2180 = vmatpush1.bf16.msra.mxu0 %v3372_v8  ;;  %v3459_v8 = vld [vmem:[%s4555_s3 + $0xf0] sm:$0xff]  }
  0xf4   :  { %2153 = vmatpush2.bf16.msra.mxu1 %v3369_v7  ;;  %2181 = vmatprep.subr.bf16.mxu0 %v3380_v10  ;;  %v3458_v7 = vld [vmem:[%s4555_s3 + $0xb8] sm:$0xff]   ;;  %v321_v10 = vlaneseq }
  0xf5   :  { %2154 = vmatprep.subr.bf16.mxu1 %v3377_v9 }
  0xf7   :  { %2182 = vmatpush1.bf16.msra.mxu0 %v3378_v14  ;;  %v3460_v14 = vld [vmem:[%s4555_s3 + $0xb0] sm:$0xff]  }
  0xf8   :  { %2155 = vmatpush2.bf16.msra.mxu1 %v3375_v13  ;;  %2183 = vmatprep.subr.bf16.mxu0 %v3386_v16 }
  0xf9   :  { %2156 = vmatprep.subr.bf16.mxu1 %v3383_v15  ;;  %v3461_v15 = vld [vmem:[%s4555_s3 + $0xe8] sm:$0xff]  }
  0xfb   :  { %2184 = vmatpush1.bf16.msra.mxu0 %v3384_v18 }
  0xfc   :  { %2157 = vmatpush2.bf16.msra.mxu1 %v3381_v17  ;;  %2185 = vmatprep.subr.bf16.mxu0 %v3392_v20  ;;  %v4496_v17 = vshrl.u32 %v321_v10, 7  ;;  %v3463_v20 = vld [vmem:[%s4555_s3 + $0xe0] sm:$0xff]  }
  0xfd   :  { %2158 = vmatprep.subr.bf16.mxu1 %v3389_v19  ;;  %v3462_v19 = vld [vmem:[%s4555_s3 + $0xa8] sm:$0xff]  }
  0xff   :  { %2186 = vmatpush1.bf16.msra.mxu0 %v3390_v23  ;;  %v327_v23 = vsub.s32 1, %v4496_v17 }
 0x100   :  { %2159 = vmatpush2.bf16.msra.mxu1 %v3387_v22  ;;  %2187 = vmatprep.subr.bf16.mxu0 %v3395_v24  ;;  %v4508_v24 = vld [vmem:[%s4556_s2] sm:$0xf] }
 0x101   :  { %2214 = vmatprep.subr.bf16.mxu1 %v3398_v49  ;;  %v323_v49 = vsub.s32 0, %v4496_v17 }
 0x102   :  { %v1861_v5 = vpop.f32.mrf.mxu0 }
 0x103   :  { %2161 = vmatmul.mubr.bf16.vlgmr.msra.gmra.mxu1 %v3929_v11  ;;  %2188 = vmatpush2.bf16.msra.mxu0 %v3393_v25  ;;  %v3410_v11 = vld [vmem:[%s4553_s1 + $0x8ac] ss:$16 sps:$4 sm:$0xff]   ;;  %v1904_v13 = vpop.f32.mrf.mxu1 }
 0x104   :  { %2215 = vmatpush1.bf16.msra.mxu1 %v3396_v4  ;;  %2189 = vmatprep.subr.bf16.mxu0 %v3401_v26  ;;  %v1863_v9 = vpop.f32.mrf.mxu0  ;;  %v3464_v26 = vld [vmem:[%s4555_s3 + $0xa0] sm:$0xff]  }
 0x105   :  { %2216 = vmatprep.subr.bf16.mxu1 %v3404_v27  ;;  %2246 = vmatprep.mubr.bf16.mxu1 %v3475_v21  ;;  %v3416_v21 = vld [vmem:[%s4553_s1 + $0x88c] ss:$16 sps:$4 sm:$0xff]   ;;  %v1906_v18 = vpop.f32.mrf.mxu1  ;;  %v328_v27 = vrot.slane %v4508_v24, %v327_v23 }
 0x106   :  { %v1865_v16 = vpop.f32.mrf.mxu0 }
 0x107   :  { %2190 = vmatpush2.bf16.msra.mxu0 %v3399_v28  ;;  %v1908_v25 = vpop.f32.mrf.mxu1  ;;  %v324_v28 = vrot.slane %v4508_v24, %v323_v49 }
 0x108   :  { %2217 = vmatpush1.bf16.msra.mxu1 %v3402_v34  ;;  %2191 = vmatprep.subr.bf16.mxu0 %v3407_v29  ;;  %v1867_v22 = vpop.f32.mrf.mxu0 }
 0x109   :  { %2218 = vmatprep.subr.bf16.mxu1 %v3410_v11  ;;  %v1910_v34 = vpop.f32.mrf.mxu1 }
 0x10b   :  { %2192 = vmatpush2.bf16.msra.mxu0 %v3405_v30  ;;  %v1864_v30 = vadd.f32 %v1863_v9, %v328_v27 }
 0x10c   :  { %2219 = vmatpush1.bf16.msra.mxu1 %v3408_v31  ;;  %2193 = vmatprep.subr.bf16.mxu0 %v3413_v32  ;;  %v1866_v31 = vadd.f32 %v1865_v16, %v324_v28  ;;  %v1862_v32 = vadd.f32 %v1861_v5, %v324_v28 }
 0x10d   :  { %2220 = vmatprep.subr.bf16.mxu1 %v3416_v21 }
 0x10f   :  { %2194 = vmatpush2.bf16.msra.mxu0 %v3411_v33  ;;  %v1868_v33 = vadd.f32 %v1867_v22, %v328_v27 }
 0x110   :  { %2221 = vmatpush1.bf16.msra.mxu1 %v3414_v35  ;;  %2195 = vmatprep.subr.bf16.mxu0 %v3419_v36  ;;  %v1907_v36 = vadd.f32 %v1906_v18, %v1864_v30 }
 0x111   :  { %2222 = vmatprep.subr.bf16.mxu1 %v3422_v37  ;;  %v1909_v37 = vadd.f32 %v1908_v25, %v1866_v31 }
 0x113   :  { %2196 = vmatpush2.bf16.msra.mxu0 %v3417_v38  ;;  %v1905_v38 = vadd.f32 %v1904_v13, %v1862_v32 }
 0x114   :  { %2223 = vmatpush1.bf16.msra.mxu1 %v3420_v39  ;;  %2197 = vmatprep.subr.bf16.mxu0 %v3425_v40  ;;  %v3465_v40 = vld [vmem:[%s4555_s3 + $0xd8] sm:$0xff]  }
 0x115   :  { %2224 = vmatprep.subr.bf16.mxu1 %v3428_v41  ;;  %v1911_v41 = vadd.f32 %v1910_v34, %v1868_v33 }
 0x117   :  { %2198 = vmatpush2.bf16.msra.mxu0 %v3423_v42 }
 0x118   :  { %2225 = vmatpush1.bf16.msra.mxu1 %v3426_v43  ;;  %2199 = vmatprep.subr.bf16.mxu0 %v3431_v44  ;;  %v3466_v44 = vld [vmem:[%s4555_s3 + $0x98] sm:$0xff]  }
 0x119   :  { %2226 = vmatprep.subr.bf16.mxu1 %v3434_v45 }
 0x11b   :  { %2200 = vmatpush2.bf16.msra.mxu0 %v3429_v47 }
 0x11c   :  { %2227 = vmatpush1.bf16.msra.mxu1 %v3432_v48  ;;  %2201 = vmatprep.subr.bf16.mxu0 %v3437_v50 }
 0x11d   :  { %2228 = vmatprep.subr.bf16.mxu1 %v3440_v52 }
 0x11f   :  { %2202 = vmatpush2.bf16.msra.mxu0 %v3435_v53  ;;  %v3467_v53 = vld [vmem:[%s4555_s3 + $0xd0] sm:$0xff]  }
 0x120   :  { %2229 = vmatpush1.bf16.msra.mxu1 %v3438_v54  ;;  %2951 = vmatprep.subr.bf16.mxu0 %v3441_v55 }
 0x121   :  { %2973 = vmatprep.subr.bf16.mxu1 %v3457_v6  ;;  %v3471_v6 = vld [vmem:[%s4555_s3 + $0xc0] sm:$0xff]  }
 0x122   :  { %2204 = vmatmul.mubr.bf16.vlgmr.msra.gmra.mxu0 %v3934_v12  ;;  %v3447_v12 = vld [vmem:[%s4555_s3 + $0x60] sm:$0xff]  }
 0x123   :  { %2247 = vmatmul.mubr.bf16.vlgmr.msra.gmra.mxu1 %v4039_v46  ;;  %2952 = vmatpush3.bf16.msra.mxu0 %v3442_v56  ;;  %v3448_v46 = vld [vmem:[%s4555_s3 + $0x20] sm:$0xff]   ;;  %v3468_v56 = vld [vmem:[%s4555_s3 + $0x90] sm:$0xff]  }
 0x124   :  { %2953 = vmatprep.subr.bf16.mxu0 %v3443_v57  ;;  %2974 = vmatpush3.bf16.msra.mxu1 %v3458_v7 }
 0x125   :  { %2975 = vmatprep.subr.bf16.mxu1 %v3459_v8  ;;  %v3472_v8 = vld [vmem:[%s4555_s3 + $0x80] sm:$0xff]  }
 0x127   :  { %2954 = vmatpush3.bf16.msra.mxu0 %v3444_v58 }
 0x128   :  { %2955 = vmatprep.subr.bf16.mxu0 %v3445_v59  ;;  %2976 = vmatpush3.bf16.msra.mxu1 %v3460_v14 }
 0x129   :  { %2977 = vmatprep.subr.bf16.mxu1 %v3461_v15 }
 0x12b   :  { %2956 = vmatpush3.bf16.msra.mxu0 %v3446_v51 }
 0x12c   :  { %2957 = vmatprep.subr.bf16.mxu0 %v3447_v12  ;;  %2978 = vmatpush3.bf16.msra.mxu1 %v3462_v19  ;;  %v335_v19 = vsub.s32 3, %v4496_v17 }
 0x12d   :  { %2979 = vmatprep.subr.bf16.mxu1 %v3463_v20  ;;  %v331_v20 = vsub.s32 2, %v4496_v17 }
 0x12e   :  { %v336_v49 = vrot.slane %v4508_v24, %v335_v19 }
 0x12f   :  { %2958 = vmatpush3.bf16.msra.mxu0 %v3448_v46  ;;  %v332_v25 = vrot.slane %v4508_v24, %v331_v20 }
 0x130   :  { %2959 = vmatprep.subr.bf16.mxu0 %v3449_v60  ;;  %2980 = vmatpush3.bf16.msra.mxu1 %v3464_v26 }
 0x131   :  { %2981 = vmatprep.subr.bf16.mxu1 %v3465_v40 }
 0x133   :  { %2960 = vmatpush3.bf16.msra.mxu0 %v3450_v61 }
 0x134   :  { %2961 = vmatprep.subr.bf16.mxu0 %v3451_v62  ;;  %2982 = vmatpush3.bf16.msra.mxu1 %v3466_v44  ;;  %v3469_v62 = vld [vmem:[%s4555_s3 + $0xc8] sm:$0xff]  }
 0x135   :  { %2983 = vmatprep.subr.bf16.mxu1 %v3467_v53 }
 0x137   :  { %2962 = vmatpush3.bf16.msra.mxu0 %v3452_v63 }
 0x138   :  { %2963 = vmatprep.subr.bf16.mxu0 %v3453_v0  ;;  %2984 = vmatpush3.bf16.msra.mxu1 %v3468_v56  ;;  %v3470_v0 = vld [vmem:[%s4555_s3 + $0x88] sm:$0xff]  }
 0x139   :  { %2985 = vmatprep.subr.bf16.mxu1 %v3469_v62 }
 0x13b   :  { %2964 = vmatpush3.bf16.msra.mxu0 %v3454_v1 }
 0x13c   :  { %2965 = vmatprep.subr.bf16.mxu0 %v3455_v2  ;;  %2986 = vmatpush3.bf16.msra.mxu1 %v3470_v0 }
 0x13d   :  { %2987 = vmatprep.subr.bf16.mxu1 %v3471_v6 }
 0x13f   :  { %2966 = vmatpush3.bf16.msra.mxu0 %v3456_v3 }
 0x140   :  { %2988 = vmatpush3.bf16.msra.mxu1 %v3472_v8 }
 0x142   :  { %v1947_v4 = vpop.f32.mrf.mxu0 }
 0x143   :  { %v1990_v11 = vpop.f32.mrf.mxu1  ;;  %v1948_v45 = vadd.f32 %v1947_v4, %v1905_v38 }
 0x144   :  { %v1949_v29 = vpop.f32.mrf.mxu0 }
 0x145   :  { %v1992_v35 = vpop.f32.mrf.mxu1  ;;  %v1950_v42 = vadd.f32 %v1949_v29, %v1907_v36  ;;  %v1991_v57 = vadd.f32 %v1990_v11, %v1948_v45 }
 0x146   :  { %v1951_v21 = vpop.f32.mrf.mxu0 }
 0x147   :  { %v1952_v43 = vadd.f32 %v1951_v21, %v1909_v37  ;;  %v1994_v47 = vpop.f32.mrf.mxu1  ;;  %v1993_v54 = vadd.f32 %v1992_v35, %v1950_v42 }
 0x148   :  { %v1953_v39 = vpop.f32.mrf.mxu0 }
 0x149   :  { %v1954_v50 = vadd.f32 %v1953_v39, %v1911_v41  ;;  %v1995_v55 = vadd.f32 %v1994_v47, %v1952_v43  ;;  %v1996_v58 = vpop.f32.mrf.mxu1 }
 0x14b   :  { %v1997_v51 = vadd.f32 %v1996_v58, %v1954_v50 }
 0x162   :  { %v2033_v48 = vpop.f32.mrf.mxu0 }
 0x163   :  { %v2034_v60 = vadd.f32 %v2033_v48, %v1991_v57 }
 0x164   :  { %v2035_v52 = vpop.f32.mrf.mxu0 }
 0x165   :  { %v2036_v12 = vadd.f32 %v2035_v52, %v1993_v54  ;;  %v2257_v5 = vmax.f32 %v2034_v60, 0.0 }
 0x166   :  { %v2037_v59 = vpop.f32.mrf.mxu0 }
 0x167   :  { %v2038_v46 = vadd.f32 %v2037_v59, %v1995_v55  ;;  %v2258_v2 = vmax.f32 %v2036_v12, 0.0 }
 0x168   :  { %v2039_v61 = vpop.f32.mrf.mxu0 }
 0x169   :  { %v2040_v63 = vadd.f32 %v2039_v61, %v1997_v51  ;;  %v2261_v1 = vmax.f32 %v2038_v46, 0.0 }
 0x16b   :  { %v2262_v3 = vmax.f32 %v2040_v63, 0.0  ;;  %v2265_v9 = vpack.c.bf16 %v2261_v1, %v2257_v5  ;;  %v2918_v63 = vld [vmem:[%s4557_s4] ss:$0 sm:$0xff] }
 0x16d   :  { %v2266_v7 = vpack.c.bf16 %v2262_v3, %v2258_v2 }
 0x16f   :  { %2564 = vmatprep.mubr.bf16.mxu0 %v2266_v7 }
 0x170   :  { %2565 = vmatmul.mubr.bf16.vlgmr.msra.gmra.mxu0 %v2265_v9 }
 0x183   :  { %v2076_v10 = vpop.f32.mrf.mxu1 }
 0x184   :  { %v2077_v28 = vadd.f32 %v2076_v10, %v332_v25 }
 0x185   :  { %v2078_v13 = vpop.f32.mrf.mxu1 }
 0x186   :  { %v2079_v27 = vadd.f32 %v2078_v13, %v336_v49 }
 0x187   :  { %v2080_v14 = vpop.f32.mrf.mxu1 }
 0x188   :  { %v2081_v11 = vadd.f32 %v2080_v14, %v332_v25 }
 0x189   :  { %v2082_v15 = vpop.f32.mrf.mxu1 }
 0x18a   :  { %v2083_v33 = vadd.f32 %v2082_v15, %v336_v49 }
 0x1a2   :  { %v2119_v16 = vpop.f32.mrf.mxu0 }
 0x1a3   :  { %v2120_v31 = vadd.f32 %v2119_v16, %v2077_v28 }
 0x1a4   :  { %v2121_v22 = vpop.f32.mrf.mxu0 }
 0x1a5   :  { %v2122_v30 = vadd.f32 %v2121_v22, %v2079_v27 }
 0x1a6   :  { %v2123_v4 = vpop.f32.mrf.mxu0 }
 0x1a7   :  { %v2124_v35 = vadd.f32 %v2123_v4, %v2081_v11 }
 0x1a8   :  { %v2125_v34 = vpop.f32.mrf.mxu0 }
 0x1a9   :  { %v2126_v39 = vadd.f32 %v2125_v34, %v2083_v33 }
 0x1c3   :  { %v2162_v18 = vpop.f32.mrf.mxu1 }
 0x1c4   :  { %v2163_v36 = vadd.f32 %v2162_v18, %v2120_v31 }
 0x1c5   :  { %v2164_v23 = vpop.f32.mrf.mxu1 }
 0x1c6   :  { %v2165_v17 = vadd.f32 %v2164_v23, %v2122_v30 }
 0x1c7   :  { %v2166_v26 = vpop.f32.mrf.mxu1 }
 0x1c8   :  { %v2167_v40 = vadd.f32 %v2166_v26, %v2124_v35 }
 0x1c9   :  { %v2168_v29 = vpop.f32.mrf.mxu1 }
 0x1ca   :  { %v2169_v44 = vadd.f32 %v2168_v29, %v2126_v39 }
 0x1e2   :  { %v2205_v32 = vpop.f32.mrf.mxu0 }
 0x1e3   :  { %v2248_v21 = vpop.f32.mrf.mxu1  ;;  %v2206_v41 = vadd.f32 %v2205_v32, %v2163_v36 }
 0x1e4   :  { %v2207_v37 = vpop.f32.mrf.mxu0 }
 0x1e5   :  { %v2250_v38 = vpop.f32.mrf.mxu1  ;;  %v2208_v24 = vadd.f32 %v2207_v37, %v2165_v17  ;;  %v2249_v53 = vadd.f32 %v2248_v21, %v2206_v41 }
 0x1e6   :  { %v2209_v42 = vpop.f32.mrf.mxu0 }
 0x1e7   :  { %v2252_v43 = vpop.f32.mrf.mxu1  ;;  %v2210_v45 = vadd.f32 %v2209_v42, %v2167_v40  ;;  %v2251_v48 = vadd.f32 %v2250_v38, %v2208_v24  ;;  %v2259_v59 = vmax.f32 %v2249_v53, 0.0 }
 0x1e8   :  { %v2211_v47 = vpop.f32.mrf.mxu0 }
 0x1e9   :  { %v2253_v50 = vadd.f32 %v2252_v43, %v2210_v45  ;;  %v2212_v52 = vadd.f32 %v2211_v47, %v2169_v44  ;;  %v2254_v54 = vpop.f32.mrf.mxu1  ;;  %v2260_v57 = vmax.f32 %v2251_v48, 0.0 }
 0x1eb   :  { %v2255_v55 = vadd.f32 %v2254_v54, %v2212_v52  ;;  %v2263_v56 = vmax.f32 %v2253_v50, 0.0 }
 0x1ed   :  { %v2264_v58 = vmax.f32 %v2255_v55, 0.0  ;;  %v2267_v12 = vpack.c.bf16 %v2263_v56, %v2259_v59 }
 0x1ef   :  { %v2268_v51 = vpack.c.bf16 %v2264_v58, %v2260_v57 }
 0x1f1   :  { %2605 = vmatprep.mubr.bf16.mxu1 %v2268_v51 }
 0x1f2   :  { %2606 = vmatmul.mubr.bf16.vlgmr.msra.gmra.mxu1 %v2267_v12 }
 0x230   :  { %v2967_v46 = vpop.f32.mrf.mxu0 }
 0x232   :  { %v2968_v60 = vpop.f32.mrf.mxu0 }
 0x233   :  { %v2969_v62 = vadd.f32 %v2968_v60, %v2967_v46 }
 0x234   :  { %v2970_v61 = vpop.f32.mrf.mxu0 }
 0x235   :  { %v2567_v3 = vadd.f32 %v2969_v62, %v2918_v63 }
 0x236   :  { %v2971_v0 = vpop.f32.mrf.mxu0 }
 0x237   :  { %v2972_v5 = vadd.f32 %v2971_v0, %v2970_v61 }
 0x239   :  { %v2570_v10 = vadd.f32 %v2972_v5, %v2918_v63 }
 0x2b2   :  { %v2989_v1 = vpop.f32.mrf.mxu1 }
 0x2b4   :  { %v2990_v2 = vpop.f32.mrf.mxu1 }
 0x2b5   :  { %v2991_v6 = vadd.f32 %v2990_v2, %v2989_v1 }
 0x2b6   :  { %v2992_v7 = vpop.f32.mrf.mxu1 }
 0x2b7   :  { %v2608_v8 = vadd.f32 %v2991_v6, %v2567_v3 }
 0x2b8   :  { %v2993_v9 = vpop.f32.mrf.mxu1 }
 0x2b9   :  { %2615 = vst.msk [vmem:[%s4558_s5] sm:$0xff] %vm2614_vm0, %v2608_v8  ;;  %v2994_v13 = vadd.f32 %v2993_v9, %v2992_v7 }
 0x2bb   :  { %v2611_v14 = vadd.f32 %v2994_v13, %v2570_v10 }
 0x2bd   :  { %2616 = vst.msk [vmem:[%s4558_s5 + $0x8] sm:$0xff] %vm2614_vm0, %v2611_v14 }

</bundles_post_ra>
